<compile_context>
chip_gen: v7x
topology: tpu7x:2x2x1
jax: 0.10.0
libtpu: 0.0.40
codegen_flags: <defaults>
</compile_context>

<pallas_src>
import functools

import jax
import jax.numpy as jnp
from jax import lax
from jax.experimental import pallas as pl
from jax.experimental.pallas import tpu as pltpu

NEG_SLOPE = 0.01          # default negative_slope of nn.LeakyReLU / F.leaky_relu
ROW = 32                  # padded flat row width (26 valid cols padded to 32)
IMG_ROWS = 26 * ROW       # 832 flat rows per image inside the conv kernel
H1_PAD = 72               # zero rows so shifted reads (+kh*32+kw <= 66) stay in-bounds
H2_PAD = 8                # zero rows for the +1 shifted read in the pool


# ---------------------------------------------------------------------------
# Kernel 1: fused conv1 + lrelu + im2col + conv2 + lrelu + 2x2 maxpool
# ---------------------------------------------------------------------------
def _conv_pool_kernel(cols_ref, w1_ref, b1_ref, w2_ref, b2_ref, o_ref,
                      h1_s, im2col_s, h2_s, tmp_s, *, bt):
    R = bt * IMG_ROWS

    # conv1: [R, 9] @ [9, 32] on the MXU, bias + leaky_relu in f32.
    a1 = jnp.dot(cols_ref[...], w1_ref[...], preferred_element_type=jnp.float32)
    a1 = a1 + b1_ref[...]
    h1_s[pl.ds(0, R), :] = jnp.where(a1 >= 0, a1, NEG_SLOPE * a1)
    # Zero pad rows so the shifted im2col reads below stay deterministic.
    h1_s[pl.ds(R, H1_PAD), :] = jnp.zeros((H1_PAD, ROW), jnp.float32)

    # conv2 im2col: 9 shifted-row copies (cast to bf16) into a (R, 288)
    # scratch.  Tap (kh, kw) is just a constant row offset kh*32+kw.
    # NOTE: for per-image rows h=24,25 the shift reads into the next image's
    # h1 rows / the zero tail; those conv2 outputs are never pooled (hp<=11
    # -> h<=23), same for the lrelu(b1) values living in pad columns w>=26.
    for kh in range(3):
        for kw in range(3):
            t = kh * 3 + kw
            im2col_s[:, t * 32:(t + 1) * 32] = (
                h1_s[pl.ds(kh * ROW + kw, R), :].astype(jnp.bfloat16))

    # conv2: ONE [R, 288] @ [288, 64] bf16 matmul (accumulation stays in the
    # MXU instead of a VMEM f32 accumulator), bias + leaky_relu in f32.
    a2 = jnp.dot(im2col_s[...], w2_ref[...], preferred_element_type=jnp.float32)
    a2 = a2 + b2_ref[...]
    h2_s[pl.ds(0, R), :] = jnp.where(a2 >= 0, a2, NEG_SLOPE * a2)
    h2_s[pl.ds(R, H2_PAD), :] = jnp.zeros((H2_PAD, 64), jnp.float32)

    # 2x2 max-pool.
    # Stage A (vectorized over the whole tile): w-direction pair max.
    tmp_s[...] = jnp.maximum(h2_s[pl.ds(0, R), :], h2_s[pl.ds(1, R), :])
    # Stage B: per (image, pooled row) one stride-2 gather from each of the
    # two h-neighbour rows, one VPU max, one store into the flat NHWC output.
    for b in range(bt):
        for hp in range(12):
            base = b * IMG_ROWS + 2 * hp * ROW
            top = tmp_s[pl.ds(base, 12, 2), :]
            bot = tmp_s[pl.ds(base + ROW, 12, 2), :]
            o_ref[b, pl.ds(hp * 12, 12), :] = (
                jnp.maximum(top, bot).astype(jnp.bfloat16))


def _pick_bt(batch):
    # Prefer an even number of grid steps: v7x has 2 TensorCores and the
    # "parallel" batch axis is sharded across them.
    for t in (8, 4, 2, 1):
        if batch % t == 0 and batch // t >= 2 and (batch // t) % 2 == 0:
            return t
    for t in (8, 4, 2, 1):
        if batch % t == 0 and batch // t >= 2:
            return t
    return batch


def conv_pool(cols, w1, b1, w2, b2, batch):
    bt = _pick_bt(batch)
    R = bt * IMG_ROWS
    return pl.pallas_call(
        functools.partial(_conv_pool_kernel, bt=bt),
        out_shape=jax.ShapeDtypeStruct((batch, 144, 64), jnp.bfloat16),
        grid=(batch // bt,),
        in_specs=[
            pl.BlockSpec((R, 9), lambda i: (i, 0)),
            pl.BlockSpec((9, ROW), lambda i: (0, 0)),
            pl.BlockSpec((1, ROW), lambda i: (0, 0)),
            pl.BlockSpec((288, 64), lambda i: (0, 0)),
            pl.BlockSpec((1, 64), lambda i: (0, 0)),
        ],
        out_specs=pl.BlockSpec((bt, 144, 64), lambda i: (i, 0, 0)),
        scratch_shapes=[
            pltpu.VMEM((R + H1_PAD, ROW), jnp.float32),   # conv1 activations
            pltpu.VMEM((R, 288), jnp.bfloat16),           # conv2 im2col
            pltpu.VMEM((R + H2_PAD, 64), jnp.float32),    # conv2 activations
            pltpu.VMEM((R, 64), jnp.float32),             # w-direction pool max
        ],
        compiler_params=pltpu.CompilerParams(
            dimension_semantics=("parallel",),
            vmem_limit_bytes=28 * 1024 * 1024),   # ~20 MB real footprint @ bt=8
    )(cols, w1, b1, w2, b2)


# ---------------------------------------------------------------------------
# Kernel 2: linear (9216 -> 10, padded to 128 lanes) + log_softmax
# ---------------------------------------------------------------------------
def _linear_logsoftmax_kernel(x_ref, w_ref, b_ref, o_ref):
    logits = jnp.dot(x_ref[...], w_ref[...], preferred_element_type=jnp.float32)
    logits = logits + b_ref[...]
    valid = lax.broadcasted_iota(jnp.int32, logits.shape, 1) < 10
    logits = jnp.where(valid, logits, -1e30)
    m = jnp.max(logits, axis=-1, keepdims=True)
    s = logits - m
    lse = jnp.log(jnp.sum(jnp.exp(s), axis=-1, keepdims=True))
    o_ref[...] = s - lse


def _pick_tm(batch):
    for t in (512, 256, 128, 64, 32, 16, 8):
        if batch % t == 0:
            return t
    return batch   # small / odd batch: one full block


def linear_logsoftmax(acts, w3, b3):
    batch = acts.shape[0]
    tm = _pick_tm(batch)
    return pl.pallas_call(
        _linear_logsoftmax_kernel,
        out_shape=jax.ShapeDtypeStruct((batch, 128), jnp.float32),
        grid=(batch // tm,),
        in_specs=[
            pl.BlockSpec((tm, 9216), lambda i: (i, 0)),
            pl.BlockSpec((9216, 128), lambda i: (0, 0)),
            pl.BlockSpec((1, 128), lambda i: (0, 0)),
        ],
        out_specs=pl.BlockSpec((tm, 128), lambda i: (i, 0)),
        compiler_params=pltpu.CompilerParams(
            dimension_semantics=("parallel",),
            vmem_limit_bytes=30 * 1024 * 1024),
    )(acts, w3, b3)


# ---------------------------------------------------------------------------
# Parameters (PyTorch layouts) and one-time preparation for the kernels
# ---------------------------------------------------------------------------
def init_params(key):
    """Deterministic synthetic parameters, stored in PyTorch layouts."""
    k = jax.random.split(key, 6)
    return dict(
        w1=jax.random.normal(k[0], (32, 1, 3, 3), jnp.float32) * 0.2,    # OIHW
        b1=jax.random.normal(k[1], (32,), jnp.float32) * 0.05,
        w2=jax.random.normal(k[2], (64, 32, 3, 3), jnp.float32) * 0.05,  # OIHW
        b2=jax.random.normal(k[3], (64,), jnp.float32) * 0.05,
        w3=jax.random.normal(k[4], (10, 64 * 12 * 12), jnp.float32) * 0.01,  # (out,in)
        b3=jax.random.normal(k[5], (10,), jnp.float32) * 0.05,
    )


def prepare_params(p):
    """One-time weight permutes/casts (hoisted out of forward)."""
    # conv1: OIHW -> (kh*3+kw, cout) = (9, 32)
    w1 = jnp.transpose(p["w1"], (2, 3, 1, 0)).reshape(9, 32).astype(jnp.bfloat16)
    b1 = p["b1"].reshape(1, 32).astype(jnp.float32)
    # conv2: OIHW -> ((kh*3+kw)*32 + cin, cout) = (288, 64) to match the
    # in-kernel im2col column order (one K=288 matmul).
    w2 = (jnp.transpose(p["w2"], (2, 3, 1, 0)).reshape(288, 64)
          .astype(jnp.bfloat16))
    b2 = p["b2"].reshape(1, 64).astype(jnp.float32)
    # Permute w3 rows from NCHW (c,h,w) flatten order to the kernel's NHWC
    # (h,w,c) order, transpose to [F, 10] and pad the 10 outputs to 128 lanes.
    w3 = p["w3"].reshape(10, 64, 12, 12).transpose(2, 3, 1, 0).reshape(9216, 10)
    w3 = jnp.pad(w3, ((0, 0), (0, 118))).astype(jnp.bfloat16)            # [9216, 128]
    b3 = jnp.pad(p["b3"], (0, 118)).reshape(1, 128).astype(jnp.float32)  # [1, 128]
    return dict(w1=w1, b1=b1, w2=w2, b2=b2, w3=w3, b3=b3)


# ---------------------------------------------------------------------------
# Forward pass
# ---------------------------------------------------------------------------
def forward(x_nchw, pp):
    """Pallas forward pass, semantics match MyNeuralNet.forward."""
    batch = x_nchw.shape[0]
    x = x_nchw.reshape(batch, 28, 28)

    # conv1 im2col (Cin=1, 9 taps -> tiny), width padded 26 -> 32 so each image
    # occupies IMG_ROWS=832 flat rows inside the fused kernel.
    cols = jnp.stack([x[:, kh:kh + 26, kw:kw + 26]
                      for kh in range(3) for kw in range(3)], axis=-1)   # [B,26,26,9]
    cols = jnp.pad(cols, ((0, 0), (0, 0), (0, 6), (0, 0)))               # [B,26,32,9]
    cols = cols.reshape(batch * IMG_ROWS, 9).astype(jnp.bfloat16)

    pooled = conv_pool(cols, pp["w1"], pp["b1"], pp["w2"], pp["b2"], batch)
    acts = pooled.reshape(batch, 12 * 12 * 64)          # NHWC flatten (free bitcast)

    out = linear_logsoftmax(acts, pp["w3"], pp["b3"])   # [B, 128] f32
    return out[:, :10]


def forward_ref(x_nchw, p):
    """Pure-JAX f32 reference mirroring the PyTorch module, for validation."""
    dn = ("NCHW", "OIHW", "NCHW")
    y = lax.conv_general_dilated(x_nchw, p["w1"], (1, 1), "VALID",
                                 dimension_numbers=dn) + p["b1"][None, :, None, None]
    y = jnp.where(y >= 0, y, NEG_SLOPE * y)
    y = lax.conv_general_dilated(y, p["w2"], (1, 1), "VALID",
                                 dimension_numbers=dn) + p["b2"][None, :, None, None]
    y = jnp.where(y >= 0, y, NEG_SLOPE * y)
    y = lax.reduce_window(y, -jnp.inf, lax.max, (1, 1, 2, 2), (1, 1, 2, 2), "VALID")
    y = y.reshape(y.shape[0], -1)
    y = y @ p["w3"].T + p["b3"]
    return jax.nn.log_softmax(y, axis=1)


if __name__ == "__main__":
    key = jax.random.PRNGKey(0)
    pkey, xkey = jax.random.split(key)
    params = init_params(pkey)
    prepped = prepare_params(params)
    x = jax.random.normal(xkey, (2, 1, 28, 28), jnp.float32)  # [B, 1, 28, 28]

    fwd = jax.jit(forward)
    out = jax.block_until_ready(fwd(x, prepped))
    assert out.shape == (2, 10) and out.dtype == jnp.float32

    ref = jax.block_until_ready(forward_ref(x, params))
    max_err = float(jnp.max(jnp.abs(out - ref)))
    # bf16 matmul operands (inputs + activations) -> looser tolerance than f32.
    assert jnp.allclose(out, ref, atol=5e-2, rtol=5e-2), max_err

    print("KERNEL_OK")
</pallas_src>

<mosaic_0001>
module attributes {stable_mosaic.version = 11 : i64} {
  func.func @_conv_pool_kernel(%arg0: i32, %arg1: memref<832x9xbf16, #tpu.memory_space<vmem>>, %arg2: memref<9x32xbf16, #tpu.memory_space<vmem>>, %arg3: memref<1x32xf32, #tpu.memory_space<vmem>>, %arg4: memref<288x64xbf16, #tpu.memory_space<vmem>>, %arg5: memref<1x64xf32, #tpu.memory_space<vmem>>, %arg6: memref<1x144x64xbf16, #tpu.memory_space<vmem>>, %arg7: memref<904x32xf32, #tpu.memory_space<vmem>>, %arg8: memref<832x288xbf16, #tpu.memory_space<vmem>>, %arg9: memref<840x64xf32, #tpu.memory_space<vmem>>, %arg10: memref<832x64xf32, #tpu.memory_space<vmem>>) attributes {dimension_semantics = [#tpu.dimension_semantics<parallel>], iteration_bounds = array<i64: 2>, scalar_prefetch = 0 : i64, scratch_operands = 4 : i64, tpu.core_type = #tpu.core_type<tc>, window_params = [{transform_indices = @transform_0, window_bounds = array<i64: 832, 9>}, {pipeline_mode = #tpu.pipeline_mode<synchronous>, transform_indices = @transform_1, window_bounds = array<i64: 9, 32>}, {pipeline_mode = #tpu.pipeline_mode<synchronous>, transform_indices = @transform_2, window_bounds = array<i64: 1, 32>}, {pipeline_mode = #tpu.pipeline_mode<synchronous>, transform_indices = @transform_3, window_bounds = array<i64: 288, 64>}, {pipeline_mode = #tpu.pipeline_mode<synchronous>, transform_indices = @transform_4, window_bounds = array<i64: 1, 64>}, {transform_indices = @transform_5, window_bounds = array<i64: 1, 144, 64>}]} {
    %c0 = arith.constant 0 : index
    %c0_0 = arith.constant 0 : index
    %0 = vector.load %arg1[%c0, %c0_0] : memref<832x9xbf16, #tpu.memory_space<vmem>>, vector<832x9xbf16>
    %c0_1 = arith.constant 0 : index
    %c0_2 = arith.constant 0 : index
    %1 = vector.load %arg2[%c0_1, %c0_2] : memref<9x32xbf16, #tpu.memory_space<vmem>>, vector<9x32xbf16>
    %cst = arith.constant dense<0.000000e+00> : vector<832x32xf32>
    %2 = tpu.matmul %0, %1, %cst {dimension_numbers = #tpu.dot_dimension_numbers<[1], [0], [0], [1], [0, 0, 1, 1], [], []>} : vector<832x9xbf16>, vector<9x32xbf16>, vector<832x32xf32> -> vector<832x32xf32>
    %c0_3 = arith.constant 0 : index
    %c0_4 = arith.constant 0 : index
    %3 = vector.load %arg3[%c0_3, %c0_4] : memref<1x32xf32, #tpu.memory_space<vmem>>, vector<1x32xf32>
    %4 = vector.broadcast %3 : vector<1x32xf32> to vector<832x32xf32>
    %5 = arith.addf %2, %4 : vector<832x32xf32>
    %cst_5 = arith.constant 0.000000e+00 : f32
    %6 = vector.broadcast %cst_5 : f32 to vector<832x32xf32>
    %7 = arith.cmpf oge, %5, %6 : vector<832x32xf32>
    %cst_6 = arith.constant 0.00999999977 : f32
    %8 = vector.broadcast %cst_6 : f32 to vector<832x32xf32>
    %9 = arith.mulf %8, %5 : vector<832x32xf32>
    %10 = arith.select %7, %5, %9 : vector<832x32xi1>, vector<832x32xf32>
    %c0_7 = arith.constant 0 : index
    %c0_8 = arith.constant 0 : index
    %11 = vector.load %arg7[%c0_7, %c0_8] : memref<904x32xf32, #tpu.memory_space<vmem>>, vector<832x32xf32>
    tpu.vector_store %arg7[%c0_7, %c0_8], %10 {strides = array<i32>} : memref<904x32xf32, #tpu.memory_space<vmem>>, vector<832x32xf32>,
    %cst_9 = arith.constant 0.000000e+00 : f32
    %12 = vector.broadcast %cst_9 : f32 to vector<72x32xf32>
    %c832 = arith.constant 832 : index
    %c0_10 = arith.constant 0 : index
    %13 = vector.load %arg7[%c832, %c0_10] : memref<904x32xf32, #tpu.memory_space<vmem>>, vector<72x32xf32>
    tpu.vector_store %arg7[%c832, %c0_10], %12 {strides = array<i32>} : memref<904x32xf32, #tpu.memory_space<vmem>>, vector<72x32xf32>,
    %c0_11 = arith.constant 0 : index
    %c0_12 = arith.constant 0 : index
    %14 = vector.load %arg7[%c0_11, %c0_12] : memref<904x32xf32, #tpu.memory_space<vmem>>, vector<832x32xf32>
    %15 = arith.truncf %14 : vector<832x32xf32> to vector<832x32xbf16>
    %c0_13 = arith.constant 0 : index
    %c0_14 = arith.constant 0 : index
    %16 = vector.load %arg8[%c0_13, %c0_14] : memref<832x288xbf16, #tpu.memory_space<vmem>>, vector<832x32xbf16>
    tpu.vector_store %arg8[%c0_13, %c0_14], %15 {strides = array<i32>} : memref<832x288xbf16, #tpu.memory_space<vmem>>, vector<832x32xbf16>,
    %c1 = arith.constant 1 : index
    %c0_15 = arith.constant 0 : index
    %17 = vector.load %arg7[%c1, %c0_15] : memref<904x32xf32, #tpu.memory_space<vmem>>, vector<832x32xf32>
    %18 = arith.truncf %17 : vector<832x32xf32> to vector<832x32xbf16>
    %c0_16 = arith.constant 0 : index
    %c32 = arith.constant 32 : index
    %19 = vector.load %arg8[%c0_16, %c32] : memref<832x288xbf16, #tpu.memory_space<vmem>>, vector<832x32xbf16>
    tpu.vector_store %arg8[%c0_16, %c32], %18 {strides = array<i32>} : memref<832x288xbf16, #tpu.memory_space<vmem>>, vector<832x32xbf16>,
    %c2 = arith.constant 2 : index
    %c0_17 = arith.constant 0 : index
    %20 = vector.load %arg7[%c2, %c0_17] : memref<904x32xf32, #tpu.memory_space<vmem>>, vector<832x32xf32>
    %21 = arith.truncf %20 : vector<832x32xf32> to vector<832x32xbf16>
    %c0_18 = arith.constant 0 : index
    %c64 = arith.constant 64 : index
    %22 = vector.load %arg8[%c0_18, %c64] : memref<832x288xbf16, #tpu.memory_space<vmem>>, vector<832x32xbf16>
    tpu.vector_store %arg8[%c0_18, %c64], %21 {strides = array<i32>} : memref<832x288xbf16, #tpu.memory_space<vmem>>, vector<832x32xbf16>,
    %c32_19 = arith.constant 32 : index
    %c0_20 = arith.constant 0 : index
    %23 = vector.load %arg7[%c32_19, %c0_20] : memref<904x32xf32, #tpu.memory_space<vmem>>, vector<832x32xf32>
    %24 = arith.truncf %23 : vector<832x32xf32> to vector<832x32xbf16>
    %c0_21 = arith.constant 0 : index
    %c96 = arith.constant 96 : index
    %25 = vector.load %arg8[%c0_21, %c96] : memref<832x288xbf16, #tpu.memory_space<vmem>>, vector<832x32xbf16>
    tpu.vector_store %arg8[%c0_21, %c96], %24 {strides = array<i32>} : memref<832x288xbf16, #tpu.memory_space<vmem>>, vector<832x32xbf16>,
    %c33 = arith.constant 33 : index
    %c0_22 = arith.constant 0 : index
    %26 = vector.load %arg7[%c33, %c0_22] : memref<904x32xf32, #tpu.memory_space<vmem>>, vector<832x32xf32>
    %27 = arith.truncf %26 : vector<832x32xf32> to vector<832x32xbf16>
    %c0_23 = arith.constant 0 : index
    %c128 = arith.constant 128 : index
    %28 = vector.load %arg8[%c0_23, %c128] : memref<832x288xbf16, #tpu.memory_space<vmem>>, vector<832x32xbf16>
    tpu.vector_store %arg8[%c0_23, %c128], %27 {strides = array<i32>} : memref<832x288xbf16, #tpu.memory_space<vmem>>, vector<832x32xbf16>,
    %c34 = arith.constant 34 : index
    %c0_24 = arith.constant 0 : index
    %29 = vector.load %arg7[%c34, %c0_24] : memref<904x32xf32, #tpu.memory_space<vmem>>, vector<832x32xf32>
    %30 = arith.truncf %29 : vector<832x32xf32> to vector<832x32xbf16>
    %c0_25 = arith.constant 0 : index
    %c160 = arith.constant 160 : index
    %31 = vector.load %arg8[%c0_25, %c160] : memref<832x288xbf16, #tpu.memory_space<vmem>>, vector<832x32xbf16>
    tpu.vector_store %arg8[%c0_25, %c160], %30 {strides = array<i32>} : memref<832x288xbf16, #tpu.memory_space<vmem>>, vector<832x32xbf16>,
    %c64_26 = arith.constant 64 : index
    %c0_27 = arith.constant 0 : index
    %32 = vector.load %arg7[%c64_26, %c0_27] : memref<904x32xf32, #tpu.memory_space<vmem>>, vector<832x32xf32>
    %33 = arith.truncf %32 : vector<832x32xf32> to vector<832x32xbf16>
    %c0_28 = arith.constant 0 : index
    %c192 = arith.constant 192 : index
    %34 = vector.load %arg8[%c0_28, %c192] : memref<832x288xbf16, #tpu.memory_space<vmem>>, vector<832x32xbf16>
    tpu.vector_store %arg8[%c0_28, %c192], %33 {strides = array<i32>} : memref<832x288xbf16, #tpu.memory_space<vmem>>, vector<832x32xbf16>,
    %c65 = arith.constant 65 : index
    %c0_29 = arith.constant 0 : index
    %35 = vector.load %arg7[%c65, %c0_29] : memref<904x32xf32, #tpu.memory_space<vmem>>, vector<832x32xf32>
    %36 = arith.truncf %35 : vector<832x32xf32> to vector<832x32xbf16>
    %c0_30 = arith.constant 0 : index
    %c224 = arith.constant 224 : index
    %37 = vector.load %arg8[%c0_30, %c224] : memref<832x288xbf16, #tpu.memory_space<vmem>>, vector<832x32xbf16>
    tpu.vector_store %arg8[%c0_30, %c224], %36 {strides = array<i32>} : memref<832x288xbf16, #tpu.memory_space<vmem>>, vector<832x32xbf16>,
    %c66 = arith.constant 66 : index
    %c0_31 = arith.constant 0 : index
    %38 = vector.load %arg7[%c66, %c0_31] : memref<904x32xf32, #tpu.memory_space<vmem>>, vector<832x32xf32>
    %39 = arith.truncf %38 : vector<832x32xf32> to vector<832x32xbf16>
    %c0_32 = arith.constant 0 : index
    %c256 = arith.constant 256 : index
    %40 = vector.load %arg8[%c0_32, %c256] : memref<832x288xbf16, #tpu.memory_space<vmem>>, vector<832x32xbf16>
    tpu.vector_store %arg8[%c0_32, %c256], %39 {strides = array<i32>} : memref<832x288xbf16, #tpu.memory_space<vmem>>, vector<832x32xbf16>,
    %c0_33 = arith.constant 0 : index
    %c0_34 = arith.constant 0 : index
    %41 = vector.load %arg8[%c0_33, %c0_34] : memref<832x288xbf16, #tpu.memory_space<vmem>>, vector<832x288xbf16>
    %c0_35 = arith.constant 0 : index
    %c0_36 = arith.constant 0 : index
    %42 = vector.load %arg4[%c0_35, %c0_36] : memref<288x64xbf16, #tpu.memory_space<vmem>>, vector<288x64xbf16>
    %cst_37 = arith.constant dense<0.000000e+00> : vector<832x64xf32>
    %43 = tpu.matmul %41, %42, %cst_37 {dimension_numbers = #tpu.dot_dimension_numbers<[1], [0], [0], [1], [0, 0, 1, 1], [], []>} : vector<832x288xbf16>, vector<288x64xbf16>, vector<832x64xf32> -> vector<832x64xf32>
    %c0_38 = arith.constant 0 : index
    %c0_39 = arith.constant 0 : index
    %44 = vector.load %arg5[%c0_38, %c0_39] : memref<1x64xf32, #tpu.memory_space<vmem>>, vector<1x64xf32>
    %45 = vector.broadcast %44 : vector<1x64xf32> to vector<832x64xf32>
    %46 = arith.addf %43, %45 : vector<832x64xf32>
    %cst_40 = arith.constant 0.000000e+00 : f32
    %47 = vector.broadcast %cst_40 : f32 to vector<832x64xf32>
    %48 = arith.cmpf oge, %46, %47 : vector<832x64xf32>
    %cst_41 = arith.constant 0.00999999977 : f32
    %49 = vector.broadcast %cst_41 : f32 to vector<832x64xf32>
    %50 = arith.mulf %49, %46 : vector<832x64xf32>
    %51 = arith.select %48, %46, %50 : vector<832x64xi1>, vector<832x64xf32>
    %c0_42 = arith.constant 0 : index
    %c0_43 = arith.constant 0 : index
    %52 = vector.load %arg9[%c0_42, %c0_43] : memref<840x64xf32, #tpu.memory_space<vmem>>, vector<832x64xf32>
    tpu.vector_store %arg9[%c0_42, %c0_43], %51 {strides = array<i32>} : memref<840x64xf32, #tpu.memory_space<vmem>>, vector<832x64xf32>,
    %cst_44 = arith.constant 0.000000e+00 : f32
    %53 = vector.broadcast %cst_44 : f32 to vector<8x64xf32>
    %c832_45 = arith.constant 832 : index
    %c0_46 = arith.constant 0 : index
    %54 = vector.load %arg9[%c832_45, %c0_46] : memref<840x64xf32, #tpu.memory_space<vmem>>, vector<8x64xf32>
    tpu.vector_store %arg9[%c832_45, %c0_46], %53 {strides = array<i32>} : memref<840x64xf32, #tpu.memory_space<vmem>>, vector<8x64xf32>,
    %c0_47 = arith.constant 0 : index
    %c0_48 = arith.constant 0 : index
    %55 = vector.load %arg9[%c0_47, %c0_48] : memref<840x64xf32, #tpu.memory_space<vmem>>, vector<832x64xf32>
    %c1_49 = arith.constant 1 : index
    %c0_50 = arith.constant 0 : index
    %56 = vector.load %arg9[%c1_49, %c0_50] : memref<840x64xf32, #tpu.memory_space<vmem>>, vector<832x64xf32>
    %57 = arith.maximumf %55, %56 : vector<832x64xf32>
    %c0_51 = arith.constant 0 : index
    %c0_52 = arith.constant 0 : index
    %58 = vector.load %arg10[%c0_51, %c0_52] : memref<832x64xf32, #tpu.memory_space<vmem>>, vector<832x64xf32>
    tpu.vector_store %arg10[%c0_51, %c0_52], %57 {strides = array<i32>} : memref<832x64xf32, #tpu.memory_space<vmem>>, vector<832x64xf32>,
    %c0_53 = arith.constant 0 : index
    %c0_54 = arith.constant 0 : index
    %59 = tpu.strided_load %arg10[%c0_53, %c0_54] {strides = array<i32: 2, 1>} : memref<832x64xf32, #tpu.memory_space<vmem>>, vector<12x64xf32>
    %c32_55 = arith.constant 32 : index
    %c0_56 = arith.constant 0 : index
    %60 = tpu.strided_load %arg10[%c32_55, %c0_56] {strides = array<i32: 2, 1>} : memref<832x64xf32, #tpu.memory_space<vmem>>, vector<12x64xf32>
    %61 = arith.maximumf %59, %60 : vector<12x64xf32>
    %62 = arith.truncf %61 : vector<12x64xf32> to vector<12x64xbf16>
    %c0_57 = arith.constant 0 : index
    %c0_58 = arith.constant 0 : index
    %c0_59 = arith.constant 0 : index
    %63 = vector.load %arg6[%c0_57, %c0_58, %c0_59] : memref<1x144x64xbf16, #tpu.memory_space<vmem>>, vector<1x12x64xbf16>
    %64 = vector.shape_cast %63 : vector<1x12x64xbf16> to vector<12x64xbf16>
    %65 = vector.shape_cast %62 : vector<12x64xbf16> to vector<1x12x64xbf16>
    tpu.vector_store %arg6[%c0_57, %c0_58, %c0_59], %65 {strides = array<i32>} : memref<1x144x64xbf16, #tpu.memory_space<vmem>>, vector<1x12x64xbf16>,
    %c64_60 = arith.constant 64 : index
    %c0_61 = arith.constant 0 : index
    %66 = tpu.strided_load %arg10[%c64_60, %c0_61] {strides = array<i32: 2, 1>} : memref<832x64xf32, #tpu.memory_space<vmem>>, vector<12x64xf32>
    %c96_62 = arith.constant 96 : index
    %c0_63 = arith.constant 0 : index
    %67 = tpu.strided_load %arg10[%c96_62, %c0_63] {strides = array<i32: 2, 1>} : memref<832x64xf32, #tpu.memory_space<vmem>>, vector<12x64xf32>
    %68 = arith.maximumf %66, %67 : vector<12x64xf32>
    %69 = arith.truncf %68 : vector<12x64xf32> to vector<12x64xbf16>
    %c0_64 = arith.constant 0 : index
    %c12 = arith.constant 12 : index
    %c0_65 = arith.constant 0 : index
    %70 = vector.load %arg6[%c0_64, %c12, %c0_65] : memref<1x144x64xbf16, #tpu.memory_space<vmem>>, vector<1x12x64xbf16>
    %71 = vector.shape_cast %70 : vector<1x12x64xbf16> to vector<12x64xbf16>
    %72 = vector.shape_cast %69 : vector<12x64xbf16> to vector<1x12x64xbf16>
    tpu.vector_store %arg6[%c0_64, %c12, %c0_65], %72 {strides = array<i32>} : memref<1x144x64xbf16, #tpu.memory_space<vmem>>, vector<1x12x64xbf16>,
    %c128_66 = arith.constant 128 : index
    %c0_67 = arith.constant 0 : index
    %73 = tpu.strided_load %arg10[%c128_66, %c0_67] {strides = array<i32: 2, 1>} : memref<832x64xf32, #tpu.memory_space<vmem>>, vector<12x64xf32>
    %c160_68 = arith.constant 160 : index
    %c0_69 = arith.constant 0 : index
    %74 = tpu.strided_load %arg10[%c160_68, %c0_69] {strides = array<i32: 2, 1>} : memref<832x64xf32, #tpu.memory_space<vmem>>, vector<12x64xf32>
    %75 = arith.maximumf %73, %74 : vector<12x64xf32>
    %76 = arith.truncf %75 : vector<12x64xf32> to vector<12x64xbf16>
    %c0_70 = arith.constant 0 : index
    %c24 = arith.constant 24 : index
    %c0_71 = arith.constant 0 : index
    %77 = vector.load %arg6[%c0_70, %c24, %c0_71] : memref<1x144x64xbf16, #tpu.memory_space<vmem>>, vector<1x12x64xbf16>
    %78 = vector.shape_cast %77 : vector<1x12x64xbf16> to vector<12x64xbf16>
    %79 = vector.shape_cast %76 : vector<12x64xbf16> to vector<1x12x64xbf16>
    tpu.vector_store %arg6[%c0_70, %c24, %c0_71], %79 {strides = array<i32>} : memref<1x144x64xbf16, #tpu.memory_space<vmem>>, vector<1x12x64xbf16>,
    %c192_72 = arith.constant 192 : index
    %c0_73 = arith.constant 0 : index
    %80 = tpu.strided_load %arg10[%c192_72, %c0_73] {strides = array<i32: 2, 1>} : memref<832x64xf32, #tpu.memory_space<vmem>>, vector<12x64xf32>
    %c224_74 = arith.constant 224 : index
    %c0_75 = arith.constant 0 : index
    %81 = tpu.strided_load %arg10[%c224_74, %c0_75] {strides = array<i32: 2, 1>} : memref<832x64xf32, #tpu.memory_space<vmem>>, vector<12x64xf32>
    %82 = arith.maximumf %80, %81 : vector<12x64xf32>
    %83 = arith.truncf %82 : vector<12x64xf32> to vector<12x64xbf16>
    %c0_76 = arith.constant 0 : index
    %c36 = arith.constant 36 : index
    %c0_77 = arith.constant 0 : index
    %84 = vector.load %arg6[%c0_76, %c36, %c0_77] : memref<1x144x64xbf16, #tpu.memory_space<vmem>>, vector<1x12x64xbf16>
    %85 = vector.shape_cast %84 : vector<1x12x64xbf16> to vector<12x64xbf16>
    %86 = vector.shape_cast %83 : vector<12x64xbf16> to vector<1x12x64xbf16>
    tpu.vector_store %arg6[%c0_76, %c36, %c0_77], %86 {strides = array<i32>} : memref<1x144x64xbf16, #tpu.memory_space<vmem>>, vector<1x12x64xbf16>,
    %c256_78 = arith.constant 256 : index
    %c0_79 = arith.constant 0 : index
    %87 = tpu.strided_load %arg10[%c256_78, %c0_79] {strides = array<i32: 2, 1>} : memref<832x64xf32, #tpu.memory_space<vmem>>, vector<12x64xf32>
    %c288 = arith.constant 288 : index
    %c0_80 = arith.constant 0 : index
    %88 = tpu.strided_load %arg10[%c288, %c0_80] {strides = array<i32: 2, 1>} : memref<832x64xf32, #tpu.memory_space<vmem>>, vector<12x64xf32>
    %89 = arith.maximumf %87, %88 : vector<12x64xf32>
    %90 = arith.truncf %89 : vector<12x64xf32> to vector<12x64xbf16>
    %c0_81 = arith.constant 0 : index
    %c48 = arith.constant 48 : index
    %c0_82 = arith.constant 0 : index
    %91 = vector.load %arg6[%c0_81, %c48, %c0_82] : memref<1x144x64xbf16, #tpu.memory_space<vmem>>, vector<1x12x64xbf16>
    %92 = vector.shape_cast %91 : vector<1x12x64xbf16> to vector<12x64xbf16>
    %93 = vector.shape_cast %90 : vector<12x64xbf16> to vector<1x12x64xbf16>
    tpu.vector_store %arg6[%c0_81, %c48, %c0_82], %93 {strides = array<i32>} : memref<1x144x64xbf16, #tpu.memory_space<vmem>>, vector<1x12x64xbf16>,
    %c320 = arith.constant 320 : index
    %c0_83 = arith.constant 0 : index
    %94 = tpu.strided_load %arg10[%c320, %c0_83] {strides = array<i32: 2, 1>} : memref<832x64xf32, #tpu.memory_space<vmem>>, vector<12x64xf32>
    %c352 = arith.constant 352 : index
    %c0_84 = arith.constant 0 : index
    %95 = tpu.strided_load %arg10[%c352, %c0_84] {strides = array<i32: 2, 1>} : memref<832x64xf32, #tpu.memory_space<vmem>>, vector<12x64xf32>
    %96 = arith.maximumf %94, %95 : vector<12x64xf32>
    %97 = arith.truncf %96 : vector<12x64xf32> to vector<12x64xbf16>
    %c0_85 = arith.constant 0 : index
    %c60 = arith.constant 60 : index
    %c0_86 = arith.constant 0 : index
    %98 = vector.load %arg6[%c0_85, %c60, %c0_86] : memref<1x144x64xbf16, #tpu.memory_space<vmem>>, vector<1x12x64xbf16>
    %99 = vector.shape_cast %98 : vector<1x12x64xbf16> to vector<12x64xbf16>
    %100 = vector.shape_cast %97 : vector<12x64xbf16> to vector<1x12x64xbf16>
    tpu.vector_store %arg6[%c0_85, %c60, %c0_86], %100 {strides = array<i32>} : memref<1x144x64xbf16, #tpu.memory_space<vmem>>, vector<1x12x64xbf16>,
    %c384 = arith.constant 384 : index
    %c0_87 = arith.constant 0 : index
    %101 = tpu.strided_load %arg10[%c384, %c0_87] {strides = array<i32: 2, 1>} : memref<832x64xf32, #tpu.memory_space<vmem>>, vector<12x64xf32>
    %c416 = arith.constant 416 : index
    %c0_88 = arith.constant 0 : index
    %102 = tpu.strided_load %arg10[%c416, %c0_88] {strides = array<i32: 2, 1>} : memref<832x64xf32, #tpu.memory_space<vmem>>, vector<12x64xf32>
    %103 = arith.maximumf %101, %102 : vector<12x64xf32>
    %104 = arith.truncf %103 : vector<12x64xf32> to vector<12x64xbf16>
    %c0_89 = arith.constant 0 : index
    %c72 = arith.constant 72 : index
    %c0_90 = arith.constant 0 : index
    %105 = vector.load %arg6[%c0_89, %c72, %c0_90] : memref<1x144x64xbf16, #tpu.memory_space<vmem>>, vector<1x12x64xbf16>
    %106 = vector.shape_cast %105 : vector<1x12x64xbf16> to vector<12x64xbf16>
    %107 = vector.shape_cast %104 : vector<12x64xbf16> to vector<1x12x64xbf16>
    tpu.vector_store %arg6[%c0_89, %c72, %c0_90], %107 {strides = array<i32>} : memref<1x144x64xbf16, #tpu.memory_space<vmem>>, vector<1x12x64xbf16>,
    %c448 = arith.constant 448 : index
    %c0_91 = arith.constant 0 : index
    %108 = tpu.strided_load %arg10[%c448, %c0_91] {strides = array<i32: 2, 1>} : memref<832x64xf32, #tpu.memory_space<vmem>>, vector<12x64xf32>
    %c480 = arith.constant 480 : index
    %c0_92 = arith.constant 0 : index
    %109 = tpu.strided_load %arg10[%c480, %c0_92] {strides = array<i32: 2, 1>} : memref<832x64xf32, #tpu.memory_space<vmem>>, vector<12x64xf32>
    %110 = arith.maximumf %108, %109 : vector<12x64xf32>
    %111 = arith.truncf %110 : vector<12x64xf32> to vector<12x64xbf16>
    %c0_93 = arith.constant 0 : index
    %c84 = arith.constant 84 : index
    %c0_94 = arith.constant 0 : index
    %112 = vector.load %arg6[%c0_93, %c84, %c0_94] : memref<1x144x64xbf16, #tpu.memory_space<vmem>>, vector<1x12x64xbf16>
    %113 = vector.shape_cast %112 : vector<1x12x64xbf16> to vector<12x64xbf16>
    %114 = vector.shape_cast %111 : vector<12x64xbf16> to vector<1x12x64xbf16>
    tpu.vector_store %arg6[%c0_93, %c84, %c0_94], %114 {strides = array<i32>} : memref<1x144x64xbf16, #tpu.memory_space<vmem>>, vector<1x12x64xbf16>,
    %c512 = arith.constant 512 : index
    %c0_95 = arith.constant 0 : index
    %115 = tpu.strided_load %arg10[%c512, %c0_95] {strides = array<i32: 2, 1>} : memref<832x64xf32, #tpu.memory_space<vmem>>, vector<12x64xf32>
    %c544 = arith.constant 544 : index
    %c0_96 = arith.constant 0 : index
    %116 = tpu.strided_load %arg10[%c544, %c0_96] {strides = array<i32: 2, 1>} : memref<832x64xf32, #tpu.memory_space<vmem>>, vector<12x64xf32>
    %117 = arith.maximumf %115, %116 : vector<12x64xf32>
    %118 = arith.truncf %117 : vector<12x64xf32> to vector<12x64xbf16>
    %c0_97 = arith.constant 0 : index
    %c96_98 = arith.constant 96 : index
    %c0_99 = arith.constant 0 : index
    %119 = vector.load %arg6[%c0_97, %c96_98, %c0_99] : memref<1x144x64xbf16, #tpu.memory_space<vmem>>, vector<1x12x64xbf16>
    %120 = vector.shape_cast %119 : vector<1x12x64xbf16> to vector<12x64xbf16>
    %121 = vector.shape_cast %118 : vector<12x64xbf16> to vector<1x12x64xbf16>
    tpu.vector_store %arg6[%c0_97, %c96_98, %c0_99], %121 {strides = array<i32>} : memref<1x144x64xbf16, #tpu.memory_space<vmem>>, vector<1x12x64xbf16>,
    %c576 = arith.constant 576 : index
    %c0_100 = arith.constant 0 : index
    %122 = tpu.strided_load %arg10[%c576, %c0_100] {strides = array<i32: 2, 1>} : memref<832x64xf32, #tpu.memory_space<vmem>>, vector<12x64xf32>
    %c608 = arith.constant 608 : index
    %c0_101 = arith.constant 0 : index
    %123 = tpu.strided_load %arg10[%c608, %c0_101] {strides = array<i32: 2, 1>} : memref<832x64xf32, #tpu.memory_space<vmem>>, vector<12x64xf32>
    %124 = arith.maximumf %122, %123 : vector<12x64xf32>
    %125 = arith.truncf %124 : vector<12x64xf32> to vector<12x64xbf16>
    %c0_102 = arith.constant 0 : index
    %c108 = arith.constant 108 : index
    %c0_103 = arith.constant 0 : index
    %126 = vector.load %arg6[%c0_102, %c108, %c0_103] : memref<1x144x64xbf16, #tpu.memory_space<vmem>>, vector<1x12x64xbf16>
    %127 = vector.shape_cast %126 : vector<1x12x64xbf16> to vector<12x64xbf16>
    %128 = vector.shape_cast %125 : vector<12x64xbf16> to vector<1x12x64xbf16>
    tpu.vector_store %arg6[%c0_102, %c108, %c0_103], %128 {strides = array<i32>} : memref<1x144x64xbf16, #tpu.memory_space<vmem>>, vector<1x12x64xbf16>,
    %c640 = arith.constant 640 : index
    %c0_104 = arith.constant 0 : index
    %129 = tpu.strided_load %arg10[%c640, %c0_104] {strides = array<i32: 2, 1>} : memref<832x64xf32, #tpu.memory_space<vmem>>, vector<12x64xf32>
    %c672 = arith.constant 672 : index
    %c0_105 = arith.constant 0 : index
    %130 = tpu.strided_load %arg10[%c672, %c0_105] {strides = array<i32: 2, 1>} : memref<832x64xf32, #tpu.memory_space<vmem>>, vector<12x64xf32>
    %131 = arith.maximumf %129, %130 : vector<12x64xf32>
    %132 = arith.truncf %131 : vector<12x64xf32> to vector<12x64xbf16>
    %c0_106 = arith.constant 0 : index
    %c120 = arith.constant 120 : index
    %c0_107 = arith.constant 0 : index
    %133 = vector.load %arg6[%c0_106, %c120, %c0_107] : memref<1x144x64xbf16, #tpu.memory_space<vmem>>, vector<1x12x64xbf16>
    %134 = vector.shape_cast %133 : vector<1x12x64xbf16> to vector<12x64xbf16>
    %135 = vector.shape_cast %132 : vector<12x64xbf16> to vector<1x12x64xbf16>
    tpu.vector_store %arg6[%c0_106, %c120, %c0_107], %135 {strides = array<i32>} : memref<1x144x64xbf16, #tpu.memory_space<vmem>>, vector<1x12x64xbf16>,
    %c704 = arith.constant 704 : index
    %c0_108 = arith.constant 0 : index
    %136 = tpu.strided_load %arg10[%c704, %c0_108] {strides = array<i32: 2, 1>} : memref<832x64xf32, #tpu.memory_space<vmem>>, vector<12x64xf32>
    %c736 = arith.constant 736 : index
    %c0_109 = arith.constant 0 : index
    %137 = tpu.strided_load %arg10[%c736, %c0_109] {strides = array<i32: 2, 1>} : memref<832x64xf32, #tpu.memory_space<vmem>>, vector<12x64xf32>
    %138 = arith.maximumf %136, %137 : vector<12x64xf32>
    %139 = arith.truncf %138 : vector<12x64xf32> to vector<12x64xbf16>
    %c0_110 = arith.constant 0 : index
    %c132 = arith.constant 132 : index
    %c0_111 = arith.constant 0 : index
    %140 = vector.load %arg6[%c0_110, %c132, %c0_111] : memref<1x144x64xbf16, #tpu.memory_space<vmem>>, vector<1x12x64xbf16>
    %141 = vector.shape_cast %140 : vector<1x12x64xbf16> to vector<12x64xbf16>
    %142 = vector.shape_cast %139 : vector<12x64xbf16> to vector<1x12x64xbf16>
    tpu.vector_store %arg6[%c0_110, %c132, %c0_111], %142 {strides = array<i32>} : memref<1x144x64xbf16, #tpu.memory_space<vmem>>, vector<1x12x64xbf16>,
    return
  }
  func.func @transform_0(%arg0: i32) -> (i32, i32) {
    %c0_i32 = arith.constant 0 : i32
    %c0_i32_0 = arith.constant 0 : i32
    return %arg0, %c0_i32 : i32, i32
  }
  func.func @transform_1(%arg0: i32) -> (i32, i32) {
    %c0_i32 = arith.constant 0 : i32
    %c0_i32_0 = arith.constant 0 : i32
    %c0_i32_1 = arith.constant 0 : i32
    return %c0_i32, %c0_i32_0 : i32, i32
  }
  func.func @transform_2(%arg0: i32) -> (i32, i32) {
    %c0_i32 = arith.constant 0 : i32
    %c0_i32_0 = arith.constant 0 : i32
    %c0_i32_1 = arith.constant 0 : i32
    return %c0_i32, %c0_i32_0 : i32, i32
  }
  func.func @transform_3(%arg0: i32) -> (i32, i32) {
    %c0_i32 = arith.constant 0 : i32
    %c0_i32_0 = arith.constant 0 : i32
    %c0_i32_1 = arith.constant 0 : i32
    return %c0_i32, %c0_i32_0 : i32, i32
  }
  func.func @transform_4(%arg0: i32) -> (i32, i32) {
    %c0_i32 = arith.constant 0 : i32
    %c0_i32_0 = arith.constant 0 : i32
    %c0_i32_1 = arith.constant 0 : i32
    return %c0_i32, %c0_i32_0 : i32, i32
  }
  func.func @transform_5(%arg0: i32) -> (i32, i32, i32) {
    %c0_i32 = arith.constant 0 : i32
    %c0_i32_0 = arith.constant 0 : i32
    %c0_i32_1 = arith.constant 0 : i32
    return %arg0, %c0_i32, %c0_i32_0 : i32, i32, i32
  }
}

module attributes {stable_mosaic.version = 11 : i64} {
  func.func @_linear_logsoftmax_kernel(%arg0: i32, %arg1: memref<2x9216xbf16, #tpu.memory_space<vmem>>, %arg2: memref<9216x128xbf16, #tpu.memory_space<vmem>>, %arg3: memref<1x128xf32, #tpu.memory_space<vmem>>, %arg4: memref<2x128xf32, #tpu.memory_space<vmem>>) attributes {dimension_semantics = [#tpu.dimension_semantics<parallel>], iteration_bounds = array<i64: 1>, scalar_prefetch = 0 : i64, scratch_operands = 0 : i64, tpu.core_type = #tpu.core_type<tc>, window_params = [{transform_indices = @transform_0, window_bounds = array<i64: 2, 9216>}, {pipeline_mode = #tpu.pipeline_mode<synchronous>, transform_indices = @transform_1, window_bounds = array<i64: 9216, 128>}, {pipeline_mode = #tpu.pipeline_mode<synchronous>, transform_indices = @transform_2, window_bounds = array<i64: 1, 128>}, {transform_indices = @transform_3, window_bounds = array<i64: 2, 128>}]} {
    %c0 = arith.constant 0 : index
    %c0_0 = arith.constant 0 : index
    %0 = vector.load %arg1[%c0, %c0_0] : memref<2x9216xbf16, #tpu.memory_space<vmem>>, vector<2x9216xbf16>
    %c0_1 = arith.constant 0 : index
    %c0_2 = arith.constant 0 : index
    %1 = vector.load %arg2[%c0_1, %c0_2] : memref<9216x128xbf16, #tpu.memory_space<vmem>>, vector<9216x128xbf16>
    %cst = arith.constant dense<0.000000e+00> : vector<2x128xf32>
    %2 = tpu.matmul %0, %1, %cst {dimension_numbers = #tpu.dot_dimension_numbers<[1], [0], [0], [1], [0, 0, 1, 1], [], []>} : vector<2x9216xbf16>, vector<9216x128xbf16>, vector<2x128xf32> -> vector<2x128xf32>
    %c0_3 = arith.constant 0 : index
    %c0_4 = arith.constant 0 : index
    %3 = vector.load %arg3[%c0_3, %c0_4] : memref<1x128xf32, #tpu.memory_space<vmem>>, vector<1x128xf32>
    %4 = vector.broadcast %3 : vector<1x128xf32> to vector<2x128xf32>
    %5 = arith.addf %2, %4 : vector<2x128xf32>
    %6 = tpu.iota {dimensions = array<i32: 1>} : vector<2x128xi32>
    %c10_i32 = arith.constant 10 : i32
    %7 = vector.broadcast %c10_i32 : i32 to vector<2x128xi32>
    %8 = arith.cmpi slt, %6, %7 : vector<2x128xi32>
    %cst_5 = arith.constant -1.000000e+30 : f32
    %9 = vector.broadcast %cst_5 : f32 to vector<2x128xf32>
    %10 = arith.select %8, %5, %9 : vector<2x128xi1>, vector<2x128xf32>
    %cst_6 = arith.constant dense<0xFF800000> : vector<2xf32>
    %11 = vector.multi_reduction <maximumf>, %10, %cst_6 [1] : vector<2x128xf32> to vector<2xf32>
    %12 = vector.shape_cast %11 : vector<2xf32> to vector<2x1xf32>
    %13 = vector.broadcast %12 : vector<2x1xf32> to vector<2x128xf32>
    %14 = arith.subf %10, %13 : vector<2x128xf32>
    %15 = math.exp %14 : vector<2x128xf32>
    %cst_7 = arith.constant dense<0.000000e+00> : vector<2xf32>
    %16 = vector.multi_reduction <add>, %15, %cst_7 [1] : vector<2x128xf32> to vector<2xf32>
    %17 = vector.shape_cast %16 : vector<2xf32> to vector<2x1xf32>
    %18 = math.log %17 : vector<2x1xf32>
    %19 = vector.broadcast %18 : vector<2x1xf32> to vector<2x128xf32>
    %20 = arith.subf %14, %19 : vector<2x128xf32>
    %c0_8 = arith.constant 0 : index
    %c0_9 = arith.constant 0 : index
    %21 = vector.load %arg4[%c0_8, %c0_9] : memref<2x128xf32, #tpu.memory_space<vmem>>, vector<2x128xf32>
    tpu.vector_store %arg4[%c0_8, %c0_9], %20 {strides = array<i32>} : memref<2x128xf32, #tpu.memory_space<vmem>>, vector<2x128xf32>,
    return
  }
  func.func @transform_0(%arg0: i32) -> (i32, i32) {
    %c0_i32 = arith.constant 0 : i32
    %c0_i32_0 = arith.constant 0 : i32
    return %arg0, %c0_i32 : i32, i32
  }
  func.func @transform_1(%arg0: i32) -> (i32, i32) {
    %c0_i32 = arith.constant 0 : i32
    %c0_i32_0 = arith.constant 0 : i32
    %c0_i32_1 = arith.constant 0 : i32
    return %c0_i32, %c0_i32_0 : i32, i32
  }
  func.func @transform_2(%arg0: i32) -> (i32, i32) {
    %c0_i32 = arith.constant 0 : i32
    %c0_i32_0 = arith.constant 0 : i32
    %c0_i32_1 = arith.constant 0 : i32
    return %c0_i32, %c0_i32_0 : i32, i32
  }
  func.func @transform_3(%arg0: i32) -> (i32, i32) {
    %c0_i32 = arith.constant 0 : i32
    %c0_i32_0 = arith.constant 0 : i32
    return %arg0, %c0_i32 : i32, i32
  }
}

</mosaic_0001>

<bundles_post_ra>
// kernel: forward.3
= control target key start
LH: loop header
LB: loop body
LE: loop exit
PB: predicated region body
PF: predicated region fallthrough
CT: control target
= control target key end

     0   :  { %v1197_v28 = vlaneseq  ;;  %v8618_v36 = vmov 1966171168   ;;  %s10543_s0 = inlined_call_operand.vmem [shape: bf16[2,9216], index: 0, kind: input, shape index: {}]   ;;  %s10544_s1 = inlined_call_operand.vmem [shape: bf16[9216,128], index: 1, kind: input, shape index: {}]   ;;  %s10545_s2 = inlined_call_operand.vmem [shape: f32[1,128], index: 2, kind: input, shape index: {}]   ;;  %s10546_s3 = inlined_call_operand.hbm [shape: f32[2,128], index: 3, kind: output, shape index: {}]  }
   0x1   :  { %v8005_v0 = vld [vmem:[%s10544_s1 + $0x40] sm:$0xff]   ;;  %v8009_v4 = vld [vmem:[%s10544_s1 + $0x48] sm:$0xff]   ;;  %v8013_v8 = vld [vmem:[%s10544_s1 + $0x50] sm:$0xff]   ;;  %v1195_v37 = vunpack.c.l.s4 %v8618_v36 }
   0x2   :  { %v8006_v1 = vld [vmem:[%s10544_s1 + $0xc0] sm:$0xff]   ;;  %7211 = vmatprep.subr.bf16.mxu0 %v8005_v0  ;;  %v8010_v5 = vld [vmem:[%s10544_s1 + $0xc8] sm:$0xff]   ;;  %v8014_v9 = vld [vmem:[%s10544_s1 + $0xd0] sm:$0xff]   ;;  %v1198_v33 = vshrl.u32 %v1197_v28, 7 }
   0x3   :  { %v8007_v2 = vld [vmem:[%s10544_s1] sm:$0xff]   ;;  %7233 = vmatprep.subr.bf16.mxu1 %v8006_v1  ;;  %v8011_v6 = vld [vmem:[%s10544_s1 + $0x8] sm:$0xff]   ;;  %v8015_v10 = vld [vmem:[%s10544_s1 + $0x10] sm:$0xff]   ;;  %v1196_v40 = vunpack.c.0.s8 %v1195_v37 }
   0x4   :  { %v8008_v3 = vld [vmem:[%s10544_s1 + $0x80] sm:$0xff]   ;;  %7212 = vmatpush3.bf16.msra.mxu0 %v8007_v2  ;;  %v8012_v7 = vld [vmem:[%s10544_s1 + $0x88] sm:$0xff]   ;;  %v8016_v11 = vld [vmem:[%s10544_s1 + $0x90] sm:$0xff]  }
   0x5   :  { %7234 = vmatpush3.bf16.msra.mxu1 %v8008_v3  ;;  %7213 = vmatprep.subr.bf16.mxu0 %v8009_v4  ;;  %v8017_v12 = vld [vmem:[%s10544_s1 + $0x58] sm:$0xff]   ;;  %v8021_v16 = vld [vmem:[%s10544_s1 + $0x60] sm:$0xff]   ;;  %v8025_v20 = vld [vmem:[%s10544_s1 + $0x68] sm:$0xff]   ;;  %v8746_v41 = vsub.s32 %v1196_v40, %v1198_v33 }
   0x6   :  { %7235 = vmatprep.subr.bf16.mxu1 %v8010_v5  ;;  %v8018_v13 = vld [vmem:[%s10544_s1 + $0xd8] sm:$0xff]   ;;  %v8022_v17 = vld [vmem:[%s10544_s1 + $0xe0] sm:$0xff]   ;;  %v8026_v21 = vld [vmem:[%s10544_s1 + $0xe8] sm:$0xff]  }
   0x7   :  { %v8019_v14 = vld [vmem:[%s10544_s1 + $0x18] sm:$0xff]   ;;  %v8023_v18 = vld [vmem:[%s10544_s1 + $0x20] sm:$0xff]   ;;  %v8027_v22 = vld [vmem:[%s10544_s1 + $0x28] sm:$0xff]  }
   0x8   :  { %7214 = vmatpush3.bf16.msra.mxu0 %v8011_v6  ;;  %v8020_v15 = vld [vmem:[%s10544_s1 + $0x98] sm:$0xff]   ;;  %v8024_v19 = vld [vmem:[%s10544_s1 + $0xa0] sm:$0xff]   ;;  %v8028_v23 = vld [vmem:[%s10544_s1 + $0xa8] sm:$0xff]  }
   0x9   :  { %7236 = vmatpush3.bf16.msra.mxu1 %v8012_v7  ;;  %7215 = vmatprep.subr.bf16.mxu0 %v8013_v8  ;;  %v8029_v24 = vld [vmem:[%s10544_s1 + $0x70] sm:$0xff]   ;;  %v8033_v29 = vld [vmem:[%s10544_s1 + $0x78] sm:$0xff]   ;;  %v16_v34 = vld [vmem:[%s10543_s0] sm:$0xff] }
   0xa   :  { %7237 = vmatprep.subr.bf16.mxu1 %v8014_v9  ;;  %v8030_v25 = vld [vmem:[%s10544_s1 + $0xf0] sm:$0xff]   ;;  %v8034_v30 = vld [vmem:[%s10544_s1 + $0xf8] sm:$0xff]   ;;  %v8038_v35 = vld [vmem:[%s10544_s1 + $0x140] sm:$0xff]   ;;  %v1193_v39 = vcombine.high %v16_v34, %v16_v34  ;;  %v1200_v42 = vrot.slane %v16_v34, %v8746_v41 }
   0xb   :  { %v8031_v26 = vld [vmem:[%s10544_s1 + $0x30] sm:$0xff]   ;;  %v8035_v31 = vld [vmem:[%s10544_s1 + $0x38] sm:$0xff]   ;;  %v8039_v38 = vld [vmem:[%s10544_s1 + $0x1c0] sm:$0xff]  }
   0xc   :  { %7216 = vmatpush3.bf16.msra.mxu0 %v8015_v10  ;;  %v8032_v27 = vld [vmem:[%s10544_s1 + $0xb0] sm:$0xff]   ;;  %v8036_v32 = vld [vmem:[%s10544_s1 + $0xb8] sm:$0xff]   ;;  %v8750_v43 = vrot.slane %v1193_v39, %v8746_v41  ;;  %v1208_v44 = vcombine.high %v1200_v42, %v1200_v42  ;;  %v1216_v45 = vrot.slane %v1200_v42, %v8746_v41  ;;  %v8040_v47 = vld [vmem:[%s10544_s1 + $0x100] sm:$0xff]  }
   0xd   :  { %7238 = vmatpush3.bf16.msra.mxu1 %v8016_v11  ;;  %7217 = vmatprep.subr.bf16.mxu0 %v8017_v12  ;;  %v8041_v49 = vld [vmem:[%s10544_s1 + $0x180] sm:$0xff]   ;;  %v8042_v52 = vld [vmem:[%s10544_s1 + $0x148] sm:$0xff]   ;;  %v8046_v58 = vld [vmem:[%s10544_s1 + $0x150] sm:$0xff]  }
   0xe   :  { %7239 = vmatprep.subr.bf16.mxu1 %v8018_v13  ;;  %v1209_v46 = vcombine.high %v8750_v43, %v8750_v43  ;;  %v1230_v48 = vrot.slane %v1208_v44, %v8746_v41  ;;  %v1238_v51 = vcombine.high %v1216_v45, %v1216_v45  ;;  %v8043_v54 = vld [vmem:[%s10544_s1 + $0x1c8] sm:$0xff]   ;;  %v8047_v59 = vld [vmem:[%s10544_s1 + $0x1d0] sm:$0xff]   ;;  %v8050_v62 = vld [vmem:[%s10544_s1 + $0x158] sm:$0xff]  }
   0xf   :  { %v8044_v55 = vld [vmem:[%s10544_s1 + $0x108] sm:$0xff]   ;;  %v8048_v60 = vld [vmem:[%s10544_s1 + $0x110] sm:$0xff]   ;;  %v8051_v63 = vld [vmem:[%s10544_s1 + $0x1d8] sm:$0xff]  }
  0x10   :  { %7218 = vmatpush3.bf16.msra.mxu0 %v8019_v14  ;;  %v1237_v50 = vrot.slane %v1209_v46, %v8746_v41  ;;  %5194 = vmatprep.mubr.bf16.mxu0 %v1230_v48  ;;  %v1240_v53 = vcombine.high %v1230_v48, %v1230_v48  ;;  %v8045_v57 = vld [vmem:[%s10544_s1 + $0x188] sm:$0xff]   ;;  %v8049_v61 = vld [vmem:[%s10544_s1 + $0x190] sm:$0xff]   ;;  %v8052_v0 = vld [vmem:[%s10544_s1 + $0x118] sm:$0xff]  }
  0x11   :  { %7240 = vmatpush3.bf16.msra.mxu1 %v8020_v15  ;;  %7219 = vmatprep.subr.bf16.mxu0 %v8021_v16  ;;  %v8053_v1 = vld [vmem:[%s10544_s1 + $0x198] sm:$0xff]   ;;  %v8054_v2 = vld [vmem:[%s10544_s1 + $0x160] sm:$0xff]   ;;  %v8058_v6 = vld [vmem:[%s10544_s1 + $0x168] sm:$0xff]  }
  0x12   :  { %7241 = vmatprep.subr.bf16.mxu1 %v8022_v17  ;;  %v1241_v56 = vcombine.high %v1237_v50, %v1237_v50  ;;  %5234 = vmatprep.mubr.bf16.mxu1 %v1240_v53  ;;  %v8055_v3 = vld [vmem:[%s10544_s1 + $0x1e0] sm:$0xff]   ;;  %v8059_v7 = vld [vmem:[%s10544_s1 + $0x1e8] sm:$0xff]   ;;  %v8062_v10 = vld [vmem:[%s10544_s1 + $0x170] sm:$0xff]  }
  0x13   :  { %v8056_v4 = vld [vmem:[%s10544_s1 + $0x120] sm:$0xff]   ;;  %v8060_v8 = vld [vmem:[%s10544_s1 + $0x128] sm:$0xff]   ;;  %v8063_v11 = vld [vmem:[%s10544_s1 + $0x1f0] sm:$0xff]  }
  0x14   :  { %7220 = vmatpush3.bf16.msra.mxu0 %v8023_v18  ;;  %v8057_v5 = vld [vmem:[%s10544_s1 + $0x1a0] sm:$0xff]   ;;  %v8061_v9 = vld [vmem:[%s10544_s1 + $0x1a8] sm:$0xff]   ;;  %v8064_v12 = vld [vmem:[%s10544_s1 + $0x130] sm:$0xff]   ;;  %v1223_v18 = vrot.slane %v8750_v43, %v8746_v41 }
  0x15   :  { %7242 = vmatpush3.bf16.msra.mxu1 %v8024_v19  ;;  %7221 = vmatprep.subr.bf16.mxu0 %v8025_v20  ;;  %v8065_v13 = vld [vmem:[%s10544_s1 + $0x1b0] sm:$0xff]   ;;  %v8066_v14 = vld [vmem:[%s10544_s1 + $0x178] sm:$0xff]   ;;  %v8070_v19 = vld [vmem:[%s10544_s1 + $0x240] sm:$0xff]  }
  0x16   :  { %7243 = vmatprep.subr.bf16.mxu1 %v8026_v21  ;;  %v8067_v15 = vld [vmem:[%s10544_s1 + $0x1f8] sm:$0xff]   ;;  %v8071_v20 = vld [vmem:[%s10544_s1 + $0x2c0] sm:$0xff]   ;;  %v8090_v42 = vld [vmem:[%s10544_s1 + $0x268] sm:$0xff]  }
  0x17   :  { %v8068_v16 = vld [vmem:[%s10544_s1 + $0x138] sm:$0xff]   ;;  %v8072_v21 = vld [vmem:[%s10544_s1 + $0x200] sm:$0xff]   ;;  %v8091_v43 = vld [vmem:[%s10544_s1 + $0x2e8] sm:$0xff]  }
  0x18   :  { %7222 = vmatpush3.bf16.msra.mxu0 %v8027_v22  ;;  %v8069_v17 = vld [vmem:[%s10544_s1 + $0x1b8] sm:$0xff]   ;;  %v8073_v22 = vld [vmem:[%s10544_s1 + $0x280] sm:$0xff]   ;;  %v8092_v44 = vld [vmem:[%s10544_s1 + $0x228] sm:$0xff]  }
  0x19   :  { %7244 = vmatpush3.bf16.msra.mxu1 %v8028_v23  ;;  %7223 = vmatprep.subr.bf16.mxu0 %v8029_v24  ;;  %v1239_v23 = vcombine.high %v1223_v18, %v1223_v18  ;;  %v8074_v24 = vld [vmem:[%s10544_s1 + $0x248] sm:$0xff]   ;;  %v8082_v33 = vld [vmem:[%s10544_s1 + $0x258] sm:$0xff]   ;;  %v8086_v37 = vld [vmem:[%s10544_s1 + $0x260] sm:$0xff]  }
  0x1a   :  { %7245 = vmatprep.subr.bf16.mxu1 %v8030_v25  ;;  %v8075_v25 = vld [vmem:[%s10544_s1 + $0x2c8] sm:$0xff]   ;;  %v8083_v34 = vld [vmem:[%s10544_s1 + $0x2d8] sm:$0xff]   ;;  %v8088_v39 = vld [vmem:[%s10544_s1 + $0x220] sm:$0xff]  }
  0x1b   :  { %v8085_v36 = vld [vmem:[%s10544_s1 + $0x298] sm:$0xff]   ;;  %v8089_v40 = vld [vmem:[%s10544_s1 + $0x2a0] sm:$0xff]   ;;  %v8094_v46 = vld [vmem:[%s10544_s1 + $0x270] sm:$0xff]  }
  0x1c   :  { %7224 = vmatpush3.bf16.msra.mxu0 %v8031_v26  ;;  %v8076_v26 = vld [vmem:[%s10544_s1 + $0x208] sm:$0xff]   ;;  %v8095_v48 = vld [vmem:[%s10544_s1 + $0x2f0] sm:$0xff]  }
  0x1d   :  { %7246 = vmatpush3.bf16.msra.mxu1 %v8032_v27  ;;  %7225 = vmatprep.subr.bf16.mxu0 %v8033_v29  ;;  %v8077_v27 = vld [vmem:[%s10544_s1 + $0x288] sm:$0xff]   ;;  %v8078_v29 = vld [vmem:[%s10544_s1 + $0x250] sm:$0xff]  }
  0x1e   :  { %7247 = vmatprep.subr.bf16.mxu1 %v8034_v30  ;;  %v8079_v30 = vld [vmem:[%s10544_s1 + $0x2d0] sm:$0xff]  }
  0x20   :  { %7226 = vmatpush3.bf16.msra.mxu0 %v8035_v31  ;;  %v8080_v31 = vld [vmem:[%s10544_s1 + $0x210] sm:$0xff]  }
  0x21   :  { %7248 = vmatpush3.bf16.msra.mxu1 %v8036_v32  ;;  %7255 = vmatprep.subr.bf16.mxu0 %v8038_v35  ;;  %v8081_v32 = vld [vmem:[%s10544_s1 + $0x290] sm:$0xff]   ;;  %v8084_v35 = vld [vmem:[%s10544_s1 + $0x218] sm:$0xff]  }
  0x22   :  { %7277 = vmatprep.subr.bf16.mxu1 %v8039_v38  ;;  %v8087_v38 = vld [vmem:[%s10544_s1 + $0x2e0] sm:$0xff]  }
  0x23   :  { %5195 = vmatmul.mubr.bf16.vlgmr.msra.gmra.mrb[0].mxu0 %v1216_v45  ;;  %v8093_v45 = vld [vmem:[%s10544_s1 + $0x2a8] sm:$0xff]  }
  0x24   :  { %7256 = vmatpush3.bf16.msra.mxu0 %v8040_v47  ;;  %5235 = vmatmul.mubr.bf16.vlgmr.msra.gmra.mrb[0].mxu1 %v1238_v51  ;;  %v17_v47 = vld [vmem:[%s10543_s0 + $0x8] sm:$0xff]  ;;  %v8096_v51 = vld [vmem:[%s10544_s1 + $0x230] sm:$0xff]  }
  0x25   :  { %7257 = vmatprep.subr.bf16.mxu0 %v8042_v52  ;;  %7278 = vmatpush3.bf16.msra.mxu1 %v8041_v49  ;;  %v1249_v49 = vrot.slane %v17_v47, %v8746_v41  ;;  %v8097_v52 = vld [vmem:[%s10544_s1 + $0x2b0] sm:$0xff]  }
  0x26   :  { %5274 = vmatprep.mubr.bf16.mxu0 %v1237_v50  ;;  %7279 = vmatprep.subr.bf16.mxu1 %v8043_v54  ;;  %v1242_v50 = vcombine.high %v17_v47, %v17_v47  ;;  %v8144_v47 = vld [vmem:[%s10544_s1 + $0x4d0] sm:$0xff]  }
  0x27   :  { %5314 = vmatprep.mubr.bf16.mxu1 %v1241_v56  ;;  %v1257_v53 = vcombine.high %v1249_v49, %v1249_v49  ;;  %v8099_v56 = vld [vmem:[%s10544_s1 + $0x2f8] sm:$0xff]  }
  0x28   :  { %7258 = vmatpush3.bf16.msra.mxu0 %v8044_v55  ;;  %v8938_v54 = vrot.slane %v1242_v50, %v8746_v41  ;;  %v8098_v55 = vld [vmem:[%s10544_s1 + $0x278] sm:$0xff]  }
  0x29   :  { %7259 = vmatprep.subr.bf16.mxu0 %v8046_v58  ;;  %7280 = vmatpush3.bf16.msra.mxu1 %v8045_v57  ;;  %v1279_v57 = vrot.slane %v1257_v53, %v8746_v41  ;;  %v8147_v50 = vld [vmem:[%s10544_s1 + $0x458] sm:$0xff]  }
  0x2a   :  { %7281 = vmatprep.subr.bf16.mxu1 %v8047_v59  ;;  %v1258_v58 = vcombine.high %v8938_v54, %v8938_v54  ;;  %v8100_v59 = vld [vmem:[%s10544_s1 + $0x238] sm:$0xff]  }
  0x2b   :  { %v8150_v53 = vld [vmem:[%s10544_s1 + $0x498] sm:$0xff]  }
  0x2c   :  { %7260 = vmatpush3.bf16.msra.mxu0 %v8048_v60  ;;  %v8101_v60 = vld [vmem:[%s10544_s1 + $0x2b8] sm:$0xff]  }
  0x2d   :  { %7261 = vmatprep.subr.bf16.mxu0 %v8050_v62  ;;  %7282 = vmatpush3.bf16.msra.mxu1 %v8049_v61  ;;  %v1289_v61 = vcombine.high %v1279_v57, %v1279_v57  ;;  %v1265_v62 = vrot.slane %v1249_v49, %v8746_v41  ;;  %v8146_v49 = vld [vmem:[%s10544_s1 + $0x490] sm:$0xff]  }
  0x2e   :  { %7283 = vmatprep.subr.bf16.mxu1 %v8051_v63  ;;  %v8102_v63 = vld [vmem:[%s10544_s1 + $0x340] sm:$0xff]  }
  0x30   :  { %7262 = vmatpush3.bf16.msra.mxu0 %v8052_v0  ;;  %v8103_v0 = vld [vmem:[%s10544_s1 + $0x3c0] sm:$0xff]  }
  0x31   :  { %7263 = vmatprep.subr.bf16.mxu0 %v8054_v2  ;;  %7284 = vmatpush3.bf16.msra.mxu1 %v8053_v1  ;;  %v1286_v1 = vrot.slane %v1258_v58, %v8746_v41  ;;  %v8104_v2 = vld [vmem:[%s10544_s1 + $0x300] sm:$0xff]   ;;  %v8155_v58 = vld [vmem:[%s10544_s1 + $0x468] sm:$0xff]  }
  0x32   :  { %7285 = vmatprep.subr.bf16.mxu1 %v8055_v3  ;;  %v8105_v3 = vld [vmem:[%s10544_s1 + $0x380] sm:$0xff]  }
  0x34   :  { %7264 = vmatpush3.bf16.msra.mxu0 %v8056_v4  ;;  %v1287_v4 = vcombine.high %v1265_v62, %v1265_v62 }
  0x35   :  { %7265 = vmatprep.subr.bf16.mxu0 %v8058_v6  ;;  %7286 = vmatpush3.bf16.msra.mxu1 %v8057_v5  ;;  %v8106_v5 = vld [vmem:[%s10544_s1 + $0x348] sm:$0xff]  }
  0x36   :  { %7287 = vmatprep.subr.bf16.mxu1 %v8059_v7  ;;  %v8107_v6 = vld [vmem:[%s10544_s1 + $0x3c8] sm:$0xff]   ;;  %v1290_v7 = vcombine.high %v1286_v1, %v1286_v1 }
  0x38   :  { %7266 = vmatpush3.bf16.msra.mxu0 %v8060_v8  ;;  %v8108_v8 = vld [vmem:[%s10544_s1 + $0x308] sm:$0xff]  }
  0x39   :  { %7267 = vmatprep.subr.bf16.mxu0 %v8062_v10  ;;  %7288 = vmatpush3.bf16.msra.mxu1 %v8061_v9  ;;  %v8109_v9 = vld [vmem:[%s10544_s1 + $0x388] sm:$0xff]   ;;  %v8110_v10 = vld [vmem:[%s10544_s1 + $0x350] sm:$0xff]  }
  0x3a   :  { %7289 = vmatprep.subr.bf16.mxu1 %v8063_v11  ;;  %v8111_v11 = vld [vmem:[%s10544_s1 + $0x3d0] sm:$0xff]  }
  0x3c   :  { %7268 = vmatpush3.bf16.msra.mxu0 %v8064_v12  ;;  %v8112_v12 = vld [vmem:[%s10544_s1 + $0x310] sm:$0xff]  }
  0x3d   :  { %7269 = vmatprep.subr.bf16.mxu0 %v8066_v14  ;;  %7290 = vmatpush3.bf16.msra.mxu1 %v8065_v13  ;;  %v8113_v13 = vld [vmem:[%s10544_s1 + $0x390] sm:$0xff]   ;;  %v8114_v14 = vld [vmem:[%s10544_s1 + $0x358] sm:$0xff]  }
  0x3e   :  { %7291 = vmatprep.subr.bf16.mxu1 %v8067_v15  ;;  %v8115_v15 = vld [vmem:[%s10544_s1 + $0x3d8] sm:$0xff]  }
  0x40   :  { %7270 = vmatpush3.bf16.msra.mxu0 %v8068_v16  ;;  %v8116_v16 = vld [vmem:[%s10544_s1 + $0x318] sm:$0xff]  }
  0x41   :  { %7299 = vmatprep.subr.bf16.mxu0 %v8070_v19  ;;  %7292 = vmatpush3.bf16.msra.mxu1 %v8069_v17  ;;  %v8117_v17 = vld [vmem:[%s10544_s1 + $0x398] sm:$0xff]   ;;  %v8119_v19 = vld [vmem:[%s10544_s1 + $0x3e0] sm:$0xff]  }
  0x42   :  { %7321 = vmatprep.subr.bf16.mxu1 %v8071_v20  ;;  %v8120_v20 = vld [vmem:[%s10544_s1 + $0x320] sm:$0xff]  }
  0x43   :  { %5275 = vmatmul.mubr.bf16.vlgmr.msra.gmra.mrb[4].mxu0 %v1223_v18  ;;  %v8118_v18 = vld [vmem:[%s10544_s1 + $0x360] sm:$0xff]  }
  0x44   :  { %7300 = vmatpush3.bf16.msra.mxu0 %v8072_v21  ;;  %5315 = vmatmul.mubr.bf16.vlgmr.msra.gmra.mrb[4].mxu1 %v1239_v23  ;;  %v8121_v21 = vld [vmem:[%s10544_s1 + $0x3a0] sm:$0xff]   ;;  %v8123_v23 = vld [vmem:[%s10544_s1 + $0x3e8] sm:$0xff]  }
  0x45   :  { %7301 = vmatprep.subr.bf16.mxu0 %v8074_v24  ;;  %7322 = vmatpush3.bf16.msra.mxu1 %v8073_v22  ;;  %v8122_v22 = vld [vmem:[%s10544_s1 + $0x368] sm:$0xff]  }
  0x46   :  { %7323 = vmatprep.subr.bf16.mxu1 %v8075_v25  ;;  %5354 = vmatprep.mubr.bf16.mxu0 %v1279_v57  ;;  %v8124_v24 = vld [vmem:[%s10544_s1 + $0x328] sm:$0xff]   ;;  %v8154_v57 = vld [vmem:[%s10544_s1 + $0x4a0] sm:$0xff]  }
  0x47   :  { %5394 = vmatprep.mubr.bf16.mxu1 %v1289_v61  ;;  %v8125_v25 = vld [vmem:[%s10544_s1 + $0x3a8] sm:$0xff]  }
  0x48   :  { %7302 = vmatpush3.bf16.msra.mxu0 %v8076_v26  ;;  %v8126_v26 = vld [vmem:[%s10544_s1 + $0x370] sm:$0xff]   ;;  %v8158_v61 = vld [vmem:[%s10544_s1 + $0x4a8] sm:$0xff]  }
  0x49   :  { %7303 = vmatprep.subr.bf16.mxu0 %v8078_v29  ;;  %7324 = vmatpush3.bf16.msra.mxu1 %v8077_v27  ;;  %v8127_v27 = vld [vmem:[%s10544_s1 + $0x3f0] sm:$0xff]  }
  0x4a   :  { %7325 = vmatprep.subr.bf16.mxu1 %v8079_v30  ;;  %v8128_v29 = vld [vmem:[%s10544_s1 + $0x330] sm:$0xff]  }
  0x4b   :  { %v8129_v30 = vld [vmem:[%s10544_s1 + $0x3b0] sm:$0xff]  }
  0x4c   :  { %7304 = vmatpush3.bf16.msra.mxu0 %v8080_v31  ;;  %v8130_v31 = vld [vmem:[%s10544_s1 + $0x378] sm:$0xff]  }
  0x4d   :  { %7305 = vmatprep.subr.bf16.mxu0 %v8082_v33  ;;  %7326 = vmatpush3.bf16.msra.mxu1 %v8081_v32  ;;  %v8131_v32 = vld [vmem:[%s10544_s1 + $0x3f8] sm:$0xff]  }
  0x4e   :  { %7327 = vmatprep.subr.bf16.mxu1 %v8083_v34  ;;  %v8132_v33 = vld [vmem:[%s10544_s1 + $0x338] sm:$0xff]  }
  0x4f   :  { %v8133_v34 = vld [vmem:[%s10544_s1 + $0x3b8] sm:$0xff]  }
  0x50   :  { %7306 = vmatpush3.bf16.msra.mxu0 %v8084_v35  ;;  %v1272_v35 = vrot.slane %v8938_v54, %v8746_v41  ;;  %v8151_v54 = vld [vmem:[%s10544_s1 + $0x460] sm:$0xff]  }
  0x51   :  { %7307 = vmatprep.subr.bf16.mxu0 %v8086_v37  ;;  %7328 = vmatpush3.bf16.msra.mxu1 %v8085_v36  ;;  %v8135_v36 = vld [vmem:[%s10544_s1 + $0x440] sm:$0xff]  }
  0x52   :  { %7329 = vmatprep.subr.bf16.mxu1 %v8087_v38  ;;  %v8136_v37 = vld [vmem:[%s10544_s1 + $0x4c0] sm:$0xff]  }
  0x53   :  { %v8137_v38 = vld [vmem:[%s10544_s1 + $0x400] sm:$0xff]  }
  0x54   :  { %7308 = vmatpush3.bf16.msra.mxu0 %v8088_v39  ;;  %v8138_v39 = vld [vmem:[%s10544_s1 + $0x480] sm:$0xff]  }
  0x55   :  { %7309 = vmatprep.subr.bf16.mxu0 %v8090_v42  ;;  %7330 = vmatpush3.bf16.msra.mxu1 %v8089_v40  ;;  %v1288_v40 = vcombine.high %v1272_v35, %v1272_v35  ;;  %v8139_v42 = vld [vmem:[%s10544_s1 + $0x448] sm:$0xff]  }
  0x56   :  { %7331 = vmatprep.subr.bf16.mxu1 %v8091_v43  ;;  %v8140_v43 = vld [vmem:[%s10544_s1 + $0x4c8] sm:$0xff]  }
  0x58   :  { %7310 = vmatpush3.bf16.msra.mxu0 %v8092_v44  ;;  %v8141_v44 = vld [vmem:[%s10544_s1 + $0x408] sm:$0xff]  }
  0x59   :  { %7311 = vmatprep.subr.bf16.mxu0 %v8094_v46  ;;  %7332 = vmatpush3.bf16.msra.mxu1 %v8093_v45  ;;  %v8142_v45 = vld [vmem:[%s10544_s1 + $0x488] sm:$0xff]   ;;  %v8143_v46 = vld [vmem:[%s10544_s1 + $0x450] sm:$0xff]  }
  0x5a   :  { %7333 = vmatprep.subr.bf16.mxu1 %v8095_v48  ;;  %v8145_v48 = vld [vmem:[%s10544_s1 + $0x410] sm:$0xff]  }
  0x5c   :  { %7312 = vmatpush3.bf16.msra.mxu0 %v8096_v51  ;;  %v8148_v51 = vld [vmem:[%s10544_s1 + $0x4d8] sm:$0xff]  }
  0x5d   :  { %7313 = vmatprep.subr.bf16.mxu0 %v8098_v55  ;;  %7334 = vmatpush3.bf16.msra.mxu1 %v8097_v52  ;;  %v8149_v52 = vld [vmem:[%s10544_s1 + $0x418] sm:$0xff]   ;;  %v8152_v55 = vld [vmem:[%s10544_s1 + $0x4e0] sm:$0xff]  }
  0x5e   :  { %7335 = vmatprep.subr.bf16.mxu1 %v8099_v56  ;;  %v8153_v56 = vld [vmem:[%s10544_s1 + $0x420] sm:$0xff]  }
  0x60   :  { %7314 = vmatpush3.bf16.msra.mxu0 %v8100_v59  ;;  %v8156_v59 = vld [vmem:[%s10544_s1 + $0x4e8] sm:$0xff]  }
  0x61   :  { %7343 = vmatprep.subr.bf16.mxu0 %v8102_v63  ;;  %7336 = vmatpush3.bf16.msra.mxu1 %v8101_v60  ;;  %v8157_v60 = vld [vmem:[%s10544_s1 + $0x428] sm:$0xff]   ;;  %v18_v63 = vld [vmem:[%s10543_s0 + $0x10] sm:$0xff] }
  0x62   :  { %7365 = vmatprep.subr.bf16.mxu1 %v8103_v0  ;;  %v8160_v0 = vld [vmem:[%s10544_s1 + $0x4f0] sm:$0xff]  }
  0x63   :  { %5355 = vmatmul.mubr.bf16.vlgmr.msra.gmra.mrb[8].mxu0 %v1265_v62  ;;  %v8159_v62 = vld [vmem:[%s10544_s1 + $0x470] sm:$0xff]  }
  0x64   :  { %7344 = vmatpush3.bf16.msra.mxu0 %v8104_v2  ;;  %5434 = vmatprep.mubr.bf16.mxu0 %v1286_v1  ;;  %v1298_v1 = vrot.slane %v18_v63, %v8746_v41  ;;  %v1291_v2 = vcombine.high %v18_v63, %v18_v63  ;;  %v8209_v63 = vld [vmem:[%s10544_s1 + $0x6d0] sm:$0xff]  }
  0x65   :  { %5395 = vmatmul.mubr.bf16.vlgmr.msra.gmra.mrb[8].mxu1 %v1287_v4  ;;  %7345 = vmatprep.subr.bf16.mxu0 %v8106_v5  ;;  %v8162_v4 = vld [vmem:[%s10544_s1 + $0x4b0] sm:$0xff]  }
  0x66   :  { %7366 = vmatpush3.bf16.msra.mxu1 %v8105_v3  ;;  %5474 = vmatprep.mubr.bf16.mxu1 %v1290_v7  ;;  %v8161_v3 = vld [vmem:[%s10544_s1 + $0x430] sm:$0xff]   ;;  %v1306_v5 = vcombine.high %v1298_v1, %v1298_v1  ;;  %v8163_v7 = vld [vmem:[%s10544_s1 + $0x478] sm:$0xff]  }
  0x67   :  { %7367 = vmatprep.subr.bf16.mxu1 %v8107_v6  ;;  %v9144_v6 = vrot.slane %v1291_v2, %v8746_v41  ;;  %v8212_v2 = vld [vmem:[%s10544_s1 + $0x658] sm:$0xff]  }
  0x68   :  { %7346 = vmatpush3.bf16.msra.mxu0 %v8108_v8  ;;  %v8164_v8 = vld [vmem:[%s10544_s1 + $0x4f8] sm:$0xff]  }
  0x69   :  { %7347 = vmatprep.subr.bf16.mxu0 %v8110_v10  ;;  %v1307_v10 = vcombine.high %v9144_v6, %v9144_v6 }
  0x6a   :  { %7368 = vmatpush3.bf16.msra.mxu1 %v8109_v9  ;;  %v1328_v9 = vrot.slane %v1306_v5, %v8746_v41  ;;  %v8215_v5 = vld [vmem:[%s10544_s1 + $0x698] sm:$0xff]  }
  0x6b   :  { %7369 = vmatprep.subr.bf16.mxu1 %v8111_v11  ;;  %v8165_v11 = vld [vmem:[%s10544_s1 + $0x438] sm:$0xff]  }
  0x6c   :  { %7348 = vmatpush3.bf16.msra.mxu0 %v8112_v12  ;;  %v8166_v12 = vld [vmem:[%s10544_s1 + $0x4b8] sm:$0xff]  }
  0x6d   :  { %7349 = vmatprep.subr.bf16.mxu0 %v8114_v14  ;;  %v1314_v14 = vrot.slane %v1298_v1, %v8746_v41  ;;  %v8211_v1 = vld [vmem:[%s10544_s1 + $0x690] sm:$0xff]  }
  0x6e   :  { %7370 = vmatpush3.bf16.msra.mxu1 %v8113_v13  ;;  %v1338_v13 = vcombine.high %v1328_v9, %v1328_v9 }
  0x6f   :  { %7371 = vmatprep.subr.bf16.mxu1 %v8115_v15  ;;  %v8167_v15 = vld [vmem:[%s10544_s1 + $0x540] sm:$0xff]  }
  0x70   :  { %7350 = vmatpush3.bf16.msra.mxu0 %v8116_v16  ;;  %v8168_v16 = vld [vmem:[%s10544_s1 + $0x5c0] sm:$0xff]  }
  0x71   :  { %7351 = vmatprep.subr.bf16.mxu0 %v8118_v18  ;;  %v8169_v18 = vld [vmem:[%s10544_s1 + $0x500] sm:$0xff]  }
  0x72   :  { %7372 = vmatpush3.bf16.msra.mxu1 %v8117_v17  ;;  %v1335_v17 = vrot.slane %v1307_v10, %v8746_v41  ;;  %v8220_v10 = vld [vmem:[%s10544_s1 + $0x668] sm:$0xff]  }
  0x73   :  { %7373 = vmatprep.subr.bf16.mxu1 %v8119_v19  ;;  %v8170_v19 = vld [vmem:[%s10544_s1 + $0x580] sm:$0xff]  }
  0x74   :  { %7352 = vmatpush3.bf16.msra.mxu0 %v8120_v20  ;;  %v1336_v20 = vcombine.high %v1314_v14, %v1314_v14 }
  0x75   :  { %7353 = vmatprep.subr.bf16.mxu0 %v8122_v22  ;;  %v8172_v22 = vld [vmem:[%s10544_s1 + $0x5c8] sm:$0xff]  }
  0x76   :  { %7374 = vmatpush3.bf16.msra.mxu1 %v8121_v21  ;;  %v8171_v21 = vld [vmem:[%s10544_s1 + $0x548] sm:$0xff]  }
  0x77   :  { %7375 = vmatprep.subr.bf16.mxu1 %v8123_v23  ;;  %v1339_v23 = vcombine.high %v1335_v17, %v1335_v17 }
  0x78   :  { %7354 = vmatpush3.bf16.msra.mxu0 %v8124_v24  ;;  %v8173_v24 = vld [vmem:[%s10544_s1 + $0x508] sm:$0xff]  }
  0x79   :  { %7355 = vmatprep.subr.bf16.mxu0 %v8126_v26  ;;  %v8175_v26 = vld [vmem:[%s10544_s1 + $0x550] sm:$0xff]  }
  0x7a   :  { %7376 = vmatpush3.bf16.msra.mxu1 %v8125_v25  ;;  %v8174_v25 = vld [vmem:[%s10544_s1 + $0x588] sm:$0xff]  }
  0x7b   :  { %7377 = vmatprep.subr.bf16.mxu1 %v8127_v27  ;;  %v8176_v27 = vld [vmem:[%s10544_s1 + $0x5d0] sm:$0xff]  }
  0x7c   :  { %7356 = vmatpush3.bf16.msra.mxu0 %v8128_v29  ;;  %v8177_v29 = vld [vmem:[%s10544_s1 + $0x510] sm:$0xff]  }
  0x7d   :  { %7357 = vmatprep.subr.bf16.mxu0 %v8130_v31  ;;  %v8179_v31 = vld [vmem:[%s10544_s1 + $0x558] sm:$0xff]  }
  0x7e   :  { %7378 = vmatpush3.bf16.msra.mxu1 %v8129_v30  ;;  %v8178_v30 = vld [vmem:[%s10544_s1 + $0x590] sm:$0xff]  }
  0x7f   :  { %7379 = vmatprep.subr.bf16.mxu1 %v8131_v32  ;;  %v8180_v32 = vld [vmem:[%s10544_s1 + $0x5d8] sm:$0xff]  }
  0x80   :  { %7358 = vmatpush3.bf16.msra.mxu0 %v8132_v33  ;;  %v8181_v33 = vld [vmem:[%s10544_s1 + $0x518] sm:$0xff]  }
  0x81   :  { %7387 = vmatprep.subr.bf16.mxu0 %v8135_v36  ;;  %v8184_v36 = vld [vmem:[%s10544_s1 + $0x5e0] sm:$0xff]  }
  0x82   :  { %7380 = vmatpush3.bf16.msra.mxu1 %v8133_v34  ;;  %v8182_v34 = vld [vmem:[%s10544_s1 + $0x598] sm:$0xff]  }
  0x83   :  { %5435 = vmatmul.mubr.bf16.vlgmr.msra.gmra.mrb[12].mxu0 %v1272_v35  ;;  %7409 = vmatprep.subr.bf16.mxu1 %v8136_v37  ;;  %v8183_v35 = vld [vmem:[%s10544_s1 + $0x560] sm:$0xff]  }
  0x84   :  { %7388 = vmatpush3.bf16.msra.mxu0 %v8137_v38  ;;  %5514 = vmatprep.mubr.bf16.mxu0 %v1328_v9  ;;  %v8185_v37 = vld [vmem:[%s10544_s1 + $0x520] sm:$0xff]  }
  0x85   :  { %5475 = vmatmul.mubr.bf16.vlgmr.msra.gmra.mrb[12].mxu1 %v1288_v40  ;;  %7389 = vmatprep.subr.bf16.mxu0 %v8139_v42  ;;  %v8186_v38 = vld [vmem:[%s10544_s1 + $0x5a0] sm:$0xff]   ;;  %v8188_v40 = vld [vmem:[%s10544_s1 + $0x5e8] sm:$0xff]  }
  0x86   :  { %7410 = vmatpush3.bf16.msra.mxu1 %v8138_v39  ;;  %5554 = vmatprep.mubr.bf16.mxu1 %v1338_v13  ;;  %v8187_v39 = vld [vmem:[%s10544_s1 + $0x568] sm:$0xff]   ;;  %v8219_v9 = vld [vmem:[%s10544_s1 + $0x6a0] sm:$0xff]  }
  0x87   :  { %7411 = vmatprep.subr.bf16.mxu1 %v8140_v43  ;;  %v8189_v42 = vld [vmem:[%s10544_s1 + $0x528] sm:$0xff]  }
  0x88   :  { %7390 = vmatpush3.bf16.msra.mxu0 %v8141_v44  ;;  %v8190_v43 = vld [vmem:[%s10544_s1 + $0x5a8] sm:$0xff]   ;;  %v8191_v44 = vld [vmem:[%s10544_s1 + $0x570] sm:$0xff]  }
  0x89   :  { %7391 = vmatprep.subr.bf16.mxu0 %v8143_v46  ;;  %v8193_v46 = vld [vmem:[%s10544_s1 + $0x530] sm:$0xff]   ;;  %v8223_v13 = vld [vmem:[%s10544_s1 + $0x6a8] sm:$0xff]  }
  0x8a   :  { %7412 = vmatpush3.bf16.msra.mxu1 %v8142_v45  ;;  %v8192_v45 = vld [vmem:[%s10544_s1 + $0x5f0] sm:$0xff]  }
  0x8b   :  { %7413 = vmatprep.subr.bf16.mxu1 %v8144_v47  ;;  %v8194_v47 = vld [vmem:[%s10544_s1 + $0x5b0] sm:$0xff]  }
  0x8c   :  { %7392 = vmatpush3.bf16.msra.mxu0 %v8145_v48  ;;  %v8195_v48 = vld [vmem:[%s10544_s1 + $0x578] sm:$0xff]  }
  0x8d   :  { %7393 = vmatprep.subr.bf16.mxu0 %v8147_v50  ;;  %v8197_v50 = vld [vmem:[%s10544_s1 + $0x538] sm:$0xff]  }
  0x8e   :  { %7414 = vmatpush3.bf16.msra.mxu1 %v8146_v49  ;;  %v8196_v49 = vld [vmem:[%s10544_s1 + $0x5f8] sm:$0xff]  }
  0x8f   :  { %7415 = vmatprep.subr.bf16.mxu1 %v8148_v51  ;;  %v8198_v51 = vld [vmem:[%s10544_s1 + $0x5b8] sm:$0xff]  }
  0x90   :  { %7394 = vmatpush3.bf16.msra.mxu0 %v8149_v52  ;;  %v1321_v52 = vrot.slane %v9144_v6, %v8746_v41  ;;  %v8216_v6 = vld [vmem:[%s10544_s1 + $0x660] sm:$0xff]  }
  0x91   :  { %7395 = vmatprep.subr.bf16.mxu0 %v8151_v54  ;;  %v8201_v54 = vld [vmem:[%s10544_s1 + $0x6c0] sm:$0xff]  }
  0x92   :  { %7416 = vmatpush3.bf16.msra.mxu1 %v8150_v53  ;;  %v8200_v53 = vld [vmem:[%s10544_s1 + $0x640] sm:$0xff]  }
  0x93   :  { %7417 = vmatprep.subr.bf16.mxu1 %v8152_v55  ;;  %v8202_v55 = vld [vmem:[%s10544_s1 + $0x600] sm:$0xff]  }
  0x94   :  { %7396 = vmatpush3.bf16.msra.mxu0 %v8153_v56  ;;  %v8203_v56 = vld [vmem:[%s10544_s1 + $0x680] sm:$0xff]  }
  0x95   :  { %7397 = vmatprep.subr.bf16.mxu0 %v8155_v58  ;;  %v8204_v58 = vld [vmem:[%s10544_s1 + $0x648] sm:$0xff]  }
  0x96   :  { %7418 = vmatpush3.bf16.msra.mxu1 %v8154_v57  ;;  %v1337_v57 = vcombine.high %v1321_v52, %v1321_v52 }
  0x97   :  { %7419 = vmatprep.subr.bf16.mxu1 %v8156_v59  ;;  %v8205_v59 = vld [vmem:[%s10544_s1 + $0x6c8] sm:$0xff]  }
  0x98   :  { %7398 = vmatpush3.bf16.msra.mxu0 %v8157_v60  ;;  %v8206_v60 = vld [vmem:[%s10544_s1 + $0x608] sm:$0xff]  }
  0x99   :  { %7399 = vmatprep.subr.bf16.mxu0 %v8159_v62  ;;  %v8208_v62 = vld [vmem:[%s10544_s1 + $0x650] sm:$0xff]  }
  0x9a   :  { %7420 = vmatpush3.bf16.msra.mxu1 %v8158_v61  ;;  %v8207_v61 = vld [vmem:[%s10544_s1 + $0x688] sm:$0xff]  }
  0x9b   :  { %7421 = vmatprep.subr.bf16.mxu1 %v8160_v0  ;;  %v8210_v0 = vld [vmem:[%s10544_s1 + $0x610] sm:$0xff]  }
  0x9c   :  { %7400 = vmatpush3.bf16.msra.mxu0 %v8161_v3  ;;  %v8213_v3 = vld [vmem:[%s10544_s1 + $0x6d8] sm:$0xff]  }
  0x9d   :  { %7401 = vmatprep.subr.bf16.mxu0 %v8163_v7  ;;  %v8217_v7 = vld [vmem:[%s10544_s1 + $0x6e0] sm:$0xff]  }
  0x9e   :  { %7422 = vmatpush3.bf16.msra.mxu1 %v8162_v4  ;;  %v8214_v4 = vld [vmem:[%s10544_s1 + $0x618] sm:$0xff]  }
  0x9f   :  { %7423 = vmatprep.subr.bf16.mxu1 %v8164_v8  ;;  %v8218_v8 = vld [vmem:[%s10544_s1 + $0x620] sm:$0xff]  }
  0xa0   :  { %7402 = vmatpush3.bf16.msra.mxu0 %v8165_v11  ;;  %v8221_v11 = vld [vmem:[%s10544_s1 + $0x6e8] sm:$0xff]  }
  0xa1   :  { %7431 = vmatprep.subr.bf16.mxu0 %v8167_v15  ;;  %v19_v15 = vld [vmem:[%s10543_s0 + $0x18] sm:$0xff] }
  0xa2   :  { %7424 = vmatpush3.bf16.msra.mxu1 %v8166_v12  ;;  %v8222_v12 = vld [vmem:[%s10544_s1 + $0x628] sm:$0xff]  }
  0xa3   :  { %5515 = vmatmul.mubr.bf16.vlgmr.msra.gmra.mrb[16].mxu0 %v1314_v14  ;;  %7453 = vmatprep.subr.bf16.mxu1 %v8168_v16  ;;  %v8224_v14 = vld [vmem:[%s10544_s1 + $0x670] sm:$0xff]  }
  0xa4   :  { %7432 = vmatpush3.bf16.msra.mxu0 %v8169_v18  ;;  %5594 = vmatprep.mubr.bf16.mxu0 %v1335_v17  ;;  %v8225_v16 = vld [vmem:[%s10544_s1 + $0x6f0] sm:$0xff]   ;;  %v1347_v17 = vrot.slane %v19_v15, %v8746_v41  ;;  %v1340_v18 = vcombine.high %v19_v15, %v19_v15 }
  0xa5   :  { %5555 = vmatmul.mubr.bf16.vlgmr.msra.gmra.mrb[16].mxu1 %v1336_v20  ;;  %7433 = vmatprep.subr.bf16.mxu0 %v8171_v21  ;;  %v8228_v20 = vld [vmem:[%s10544_s1 + $0x678] sm:$0xff]  }
  0xa6   :  { %7454 = vmatpush3.bf16.msra.mxu1 %v8170_v19  ;;  %5634 = vmatprep.mubr.bf16.mxu1 %v1339_v23  ;;  %v8226_v19 = vld [vmem:[%s10544_s1 + $0x630] sm:$0xff]   ;;  %v1355_v21 = vcombine.high %v1347_v17, %v1347_v17 }
  0xa7   :  { %7455 = vmatprep.subr.bf16.mxu1 %v8172_v22  ;;  %v9350_v22 = vrot.slane %v1340_v18, %v8746_v41  ;;  %v8227_v23 = vld [vmem:[%s10544_s1 + $0x6b0] sm:$0xff]   ;;  %v8265_v18 = vld [vmem:[%s10544_s1 + $0x840] sm:$0xff]  }
  0xa8   :  { %7434 = vmatpush3.bf16.msra.mxu0 %v8173_v24  ;;  %v8229_v24 = vld [vmem:[%s10544_s1 + $0x6f8] sm:$0xff]  }
  0xa9   :  { %7435 = vmatprep.subr.bf16.mxu0 %v8175_v26  ;;  %v1356_v26 = vcombine.high %v9350_v22, %v9350_v22 }
  0xaa   :  { %7456 = vmatpush3.bf16.msra.mxu1 %v8174_v25  ;;  %v1377_v25 = vrot.slane %v1355_v21, %v8746_v41  ;;  %v8268_v21 = vld [vmem:[%s10544_s1 + $0x880] sm:$0xff]  }
  0xab   :  { %7457 = vmatprep.subr.bf16.mxu1 %v8176_v27  ;;  %v8230_v27 = vld [vmem:[%s10544_s1 + $0x638] sm:$0xff]  }
  0xac   :  { %7436 = vmatpush3.bf16.msra.mxu0 %v8177_v29  ;;  %v1387_v29 = vcombine.high %v1377_v25, %v1377_v25 }
  0xad   :  { %7437 = vmatprep.subr.bf16.mxu0 %v8179_v31  ;;  %v8232_v31 = vld [vmem:[%s10544_s1 + $0x740] sm:$0xff]  }
  0xae   :  { %7458 = vmatpush3.bf16.msra.mxu1 %v8178_v30  ;;  %v1363_v30 = vrot.slane %v1347_v17, %v8746_v41  ;;  %v1370_v17 = vrot.slane %v9350_v22, %v8746_v41 }
  0xaf   :  { %7459 = vmatprep.subr.bf16.mxu1 %v8180_v32  ;;  %v8231_v32 = vld [vmem:[%s10544_s1 + $0x6b8] sm:$0xff]  }
  0xb0   :  { %7438 = vmatpush3.bf16.msra.mxu0 %v8181_v33  ;;  %v1384_v33 = vrot.slane %v1356_v26, %v8746_v41  ;;  %v1386_v22 = vcombine.high %v1370_v17, %v1370_v17  ;;  %v8272_v26 = vld [vmem:[%s10544_s1 + $0x888] sm:$0xff]  }
  0xb1   :  { %7439 = vmatprep.subr.bf16.mxu0 %v8183_v35  ;;  %v8234_v35 = vld [vmem:[%s10544_s1 + $0x700] sm:$0xff]  }
  0xb2   :  { %7460 = vmatpush3.bf16.msra.mxu1 %v8182_v34  ;;  %v8233_v34 = vld [vmem:[%s10544_s1 + $0x7c0] sm:$0xff]  }
  0xb3   :  { %7461 = vmatprep.subr.bf16.mxu1 %v8184_v36  ;;  %v1385_v36 = vcombine.high %v1363_v30, %v1363_v30 }
  0xb4   :  { %7440 = vmatpush3.bf16.msra.mxu0 %v8185_v37  ;;  %v8236_v37 = vld [vmem:[%s10544_s1 + $0x748] sm:$0xff]  }
  0xb5   :  { %7441 = vmatprep.subr.bf16.mxu0 %v8187_v39  ;;  %v1388_v39 = vcombine.high %v1384_v33, %v1384_v33 }
  0xb6   :  { %7462 = vmatpush3.bf16.msra.mxu1 %v8186_v38  ;;  %v8235_v38 = vld [vmem:[%s10544_s1 + $0x780] sm:$0xff]  }
  0xb7   :  { %7463 = vmatprep.subr.bf16.mxu1 %v8188_v40  ;;  %v8237_v40 = vld [vmem:[%s10544_s1 + $0x7c8] sm:$0xff]  }
  0xb8   :  { %7442 = vmatpush3.bf16.msra.mxu0 %v8189_v42  ;;  %v8238_v42 = vld [vmem:[%s10544_s1 + $0x708] sm:$0xff]  }
  0xb9   :  { %7443 = vmatprep.subr.bf16.mxu0 %v8191_v44  ;;  %v8239_v44 = vld [vmem:[%s10544_s1 + $0x788] sm:$0xff]  }
  0xba   :  { %7464 = vmatpush3.bf16.msra.mxu1 %v8190_v43  ;;  %v8240_v43 = vld [vmem:[%s10544_s1 + $0x750] sm:$0xff]  }
  0xbb   :  { %7465 = vmatprep.subr.bf16.mxu1 %v8192_v45  ;;  %v8241_v45 = vld [vmem:[%s10544_s1 + $0x7d0] sm:$0xff]  }
  0xbc   :  { %7444 = vmatpush3.bf16.msra.mxu0 %v8193_v46  ;;  %v8242_v46 = vld [vmem:[%s10544_s1 + $0x710] sm:$0xff]  }
  0xbd   :  { %7445 = vmatprep.subr.bf16.mxu0 %v8195_v48  ;;  %v8243_v48 = vld [vmem:[%s10544_s1 + $0x790] sm:$0xff]  }
  0xbe   :  { %7466 = vmatpush3.bf16.msra.mxu1 %v8194_v47  ;;  %v8244_v47 = vld [vmem:[%s10544_s1 + $0x758] sm:$0xff]  }
  0xbf   :  { %7467 = vmatprep.subr.bf16.mxu1 %v8196_v49  ;;  %v8245_v49 = vld [vmem:[%s10544_s1 + $0x7d8] sm:$0xff]  }
  0xc0   :  { %7446 = vmatpush3.bf16.msra.mxu0 %v8197_v50  ;;  %v8246_v50 = vld [vmem:[%s10544_s1 + $0x718] sm:$0xff]  }
  0xc1   :  { %7475 = vmatprep.subr.bf16.mxu0 %v8200_v53  ;;  %v8249_v53 = vld [vmem:[%s10544_s1 + $0x7e0] sm:$0xff]  }
  0xc2   :  { %7468 = vmatpush3.bf16.msra.mxu1 %v8198_v51  ;;  %v8247_v51 = vld [vmem:[%s10544_s1 + $0x798] sm:$0xff]  }
  0xc3   :  { %5595 = vmatmul.mubr.bf16.vlgmr.msra.gmra.mrb[20].mxu0 %v1321_v52  ;;  %7497 = vmatprep.subr.bf16.mxu1 %v8201_v54  ;;  %v8248_v52 = vld [vmem:[%s10544_s1 + $0x760] sm:$0xff]  }
  0xc4   :  { %7476 = vmatpush3.bf16.msra.mxu0 %v8202_v55  ;;  %5674 = vmatprep.mubr.bf16.mxu0 %v1377_v25  ;;  %v8250_v54 = vld [vmem:[%s10544_s1 + $0x720] sm:$0xff]   ;;  %v8271_v25 = vld [vmem:[%s10544_s1 + $0x808] sm:$0xff]  }
  0xc5   :  { %5635 = vmatmul.mubr.bf16.vlgmr.msra.gmra.mrb[20].mxu1 %v1337_v57  ;;  %7477 = vmatprep.subr.bf16.mxu0 %v8204_v58  ;;  %v8251_v55 = vld [vmem:[%s10544_s1 + $0x7a0] sm:$0xff]   ;;  %v8253_v57 = vld [vmem:[%s10544_s1 + $0x7e8] sm:$0xff]  }
  0xc6   :  { %7498 = vmatpush3.bf16.msra.mxu1 %v8203_v56  ;;  %5714 = vmatprep.mubr.bf16.mxu1 %v1387_v29  ;;  %v8252_v56 = vld [vmem:[%s10544_s1 + $0x768] sm:$0xff]   ;;  %v8274_v29 = vld [vmem:[%s10544_s1 + $0x8d0] sm:$0xff]  }
  0xc7   :  { %7499 = vmatprep.subr.bf16.mxu1 %v8205_v59  ;;  %v8254_v58 = vld [vmem:[%s10544_s1 + $0x728] sm:$0xff]  }
  0xc8   :  { %7478 = vmatpush3.bf16.msra.mxu0 %v8206_v60  ;;  %v8255_v59 = vld [vmem:[%s10544_s1 + $0x7a8] sm:$0xff]   ;;  %v6634_v60 = vld [vmem:[%s10545_s2] ss:$0 sm:$0xff] }
  0xc9   :  { %7479 = vmatprep.subr.bf16.mxu0 %v8208_v62 }
  0xca   :  { %7500 = vmatpush3.bf16.msra.mxu1 %v8207_v61  ;;  %v8256_v61 = vld [vmem:[%s10544_s1 + $0x770] sm:$0xff]  }
  0xcb   :  { %7501 = vmatprep.subr.bf16.mxu1 %v8209_v63  ;;  %v8257_v63 = vld [vmem:[%s10544_s1 + $0x7f0] sm:$0xff]  }
  0xcc   :  { %7480 = vmatpush3.bf16.msra.mxu0 %v8210_v0 }
  0xcd   :  { %7481 = vmatprep.subr.bf16.mxu0 %v8212_v2 }
  0xce   :  { %7502 = vmatpush3.bf16.msra.mxu1 %v8211_v1  ;;  %v8258_v1 = vld [vmem:[%s10544_s1 + $0x730] sm:$0xff]  }
  0xcf   :  { %7503 = vmatprep.subr.bf16.mxu1 %v8213_v3 }
  0xd0   :  { %7482 = vmatpush3.bf16.msra.mxu0 %v8214_v4 }
  0xd1   :  { %7483 = vmatprep.subr.bf16.mxu0 %v8216_v6  ;;  %v8260_v6 = vld [vmem:[%s10544_s1 + $0x778] sm:$0xff]  }
  0xd2   :  { %7504 = vmatpush3.bf16.msra.mxu1 %v8215_v5  ;;  %v8259_v5 = vld [vmem:[%s10544_s1 + $0x7b0] sm:$0xff]  }
  0xd3   :  { %7505 = vmatprep.subr.bf16.mxu1 %v8217_v7 }
  0xd4   :  { %7484 = vmatpush3.bf16.msra.mxu0 %v8218_v8 }
  0xd5   :  { %7485 = vmatprep.subr.bf16.mxu0 %v8220_v10 }
  0xd6   :  { %7506 = vmatpush3.bf16.msra.mxu1 %v8219_v9 }
  0xd7   :  { %7507 = vmatprep.subr.bf16.mxu1 %v8221_v11 }
  0xd8   :  { %7486 = vmatpush3.bf16.msra.mxu0 %v8222_v12  ;;  %v8261_v12 = vld [vmem:[%s10544_s1 + $0x7f8] sm:$0xff]  }
  0xd9   :  { %7487 = vmatprep.subr.bf16.mxu0 %v8224_v14  ;;  %v8262_v14 = vld [vmem:[%s10544_s1 + $0x738] sm:$0xff]  }
  0xda   :  { %7508 = vmatpush3.bf16.msra.mxu1 %v8223_v13 }
  0xdb   :  { %7509 = vmatprep.subr.bf16.mxu1 %v8225_v16  ;;  %v8263_v16 = vld [vmem:[%s10544_s1 + $0x7b8] sm:$0xff]  }
  0xdc   :  { %7488 = vmatpush3.bf16.msra.mxu0 %v8226_v19  ;;  %v8266_v19 = vld [vmem:[%s10544_s1 + $0x8c0] sm:$0xff]  }
  0xdd   :  { %7489 = vmatprep.subr.bf16.mxu0 %v8228_v20  ;;  %v8267_v20 = vld [vmem:[%s10544_s1 + $0x800] sm:$0xff]  }
  0xde   :  { %7510 = vmatpush3.bf16.msra.mxu1 %v8227_v23  ;;  %v8269_v23 = vld [vmem:[%s10544_s1 + $0x848] sm:$0xff]  }
  0xdf   :  { %7511 = vmatprep.subr.bf16.mxu1 %v8229_v24  ;;  %v8270_v24 = vld [vmem:[%s10544_s1 + $0x8c8] sm:$0xff]  }
  0xe0   :  { %7490 = vmatpush3.bf16.msra.mxu0 %v8230_v27  ;;  %v8273_v27 = vld [vmem:[%s10544_s1 + $0x850] sm:$0xff]  }
  0xe1   :  { %7519 = vmatprep.subr.bf16.mxu0 %v8232_v31  ;;  %v8276_v31 = vld [vmem:[%s10544_s1 + $0x890] sm:$0xff]  }
  0xe2   :  { %7512 = vmatpush3.bf16.msra.mxu1 %v8231_v32  ;;  %v8277_v32 = vld [vmem:[%s10544_s1 + $0x858] sm:$0xff]  }
  0xe3   :  { %5675 = vmatmul.mubr.bf16.vlgmr.msra.gmra.mrb[24].mxu0 %v1363_v30  ;;  %7541 = vmatprep.subr.bf16.mxu1 %v8233_v34  ;;  %v8275_v30 = vld [vmem:[%s10544_s1 + $0x810] sm:$0xff]   ;;  %v8279_v34 = vld [vmem:[%s10544_s1 + $0x818] sm:$0xff]  }
  0xe4   :  { %7520 = vmatpush3.bf16.msra.mxu0 %v8234_v35  ;;  %5754 = vmatprep.mubr.bf16.mxu0 %v1384_v33  ;;  %v8278_v33 = vld [vmem:[%s10544_s1 + $0x8d8] sm:$0xff]  }
  0xe5   :  { %5715 = vmatmul.mubr.bf16.vlgmr.msra.gmra.mrb[24].mxu1 %v1385_v36  ;;  %7521 = vmatprep.subr.bf16.mxu0 %v8236_v37  ;;  %v8280_v35 = vld [vmem:[%s10544_s1 + $0x898] sm:$0xff]   ;;  %v8281_v36 = vld [vmem:[%s10544_s1 + $0x860] sm:$0xff]  }
  0xe6   :  { %7542 = vmatpush3.bf16.msra.mxu1 %v8235_v38  ;;  %5794 = vmatprep.mubr.bf16.mxu1 %v1388_v39  ;;  %v8282_v37 = vld [vmem:[%s10544_s1 + $0x8e0] sm:$0xff]  }
  0xe7   :  { %7543 = vmatprep.subr.bf16.mxu1 %v8237_v40  ;;  %v8283_v38 = vld [vmem:[%s10544_s1 + $0x820] sm:$0xff]   ;;  %v8285_v40 = vld [vmem:[%s10544_s1 + $0x868] sm:$0xff]  }
  0xe8   :  { %7522 = vmatpush3.bf16.msra.mxu0 %v8238_v42  ;;  %v8284_v39 = vld [vmem:[%s10544_s1 + $0x8a0] sm:$0xff]   ;;  %v8286_v42 = vld [vmem:[%s10544_s1 + $0x8e8] sm:$0xff]  }
  0xe9   :  { %7523 = vmatprep.subr.bf16.mxu0 %v8240_v43  ;;  %v8287_v43 = vld [vmem:[%s10544_s1 + $0x828] sm:$0xff]  }
  0xea   :  { %7544 = vmatpush3.bf16.msra.mxu1 %v8239_v44  ;;  %v8288_v44 = vld [vmem:[%s10544_s1 + $0x8a8] sm:$0xff]  }
  0xeb   :  { %7545 = vmatprep.subr.bf16.mxu1 %v8241_v45  ;;  %v8289_v45 = vld [vmem:[%s10544_s1 + $0x870] sm:$0xff]  }
  0xec   :  { %7524 = vmatpush3.bf16.msra.mxu0 %v8242_v46  ;;  %v8290_v46 = vld [vmem:[%s10544_s1 + $0x8f0] sm:$0xff]  }
  0xed   :  { %7525 = vmatprep.subr.bf16.mxu0 %v8244_v47 }
  0xee   :  { %7546 = vmatpush3.bf16.msra.mxu1 %v8243_v48  ;;  %v8291_v48 = vld [vmem:[%s10544_s1 + $0x830] sm:$0xff]  }
  0xef   :  { %7547 = vmatprep.subr.bf16.mxu1 %v8245_v49 }
  0xf0   :  { %7526 = vmatpush3.bf16.msra.mxu0 %v8246_v50  ;;  %v20_v50 = vld [vmem:[%s10543_s0 + $0x20] sm:$0xff] }
  0xf1   :  { %7527 = vmatprep.subr.bf16.mxu0 %v8248_v52 }
  0xf2   :  { %7548 = vmatpush3.bf16.msra.mxu1 %v8247_v51 }
  0xf3   :  { %7549 = vmatprep.subr.bf16.mxu1 %v8249_v53 }
  0xf4   :  { %7528 = vmatpush3.bf16.msra.mxu0 %v8250_v54  ;;  %v8292_v54 = vld [vmem:[%s10544_s1 + $0x8b0] sm:$0xff]  }
  0xf5   :  { %7529 = vmatprep.subr.bf16.mxu0 %v8252_v56  ;;  %v1396_v56 = vrot.slane %v20_v50, %v8746_v41 }
  0xf6   :  { %7550 = vmatpush3.bf16.msra.mxu1 %v8251_v55  ;;  %v7227_v62 = vpop.f32.mrb[0].mxu0  ;;  %v8293_v55 = vld [vmem:[%s10544_s1 + $0x878] sm:$0xff]  }
  0xf7   :  { %v7228_v0 = vpop.f32.mrb[1].mxu0  ;;  %7551 = vmatprep.subr.bf16.mxu1 %v8253_v57  ;;  %v7249_v2 = vpop.f32.mrb[0].mxu1  ;;  %v1389_v57 = vcombine.high %v20_v50, %v20_v50 }
  0xf8   :  { %v7229_v3 = vadd.f32 %v7228_v0, %v7227_v62  ;;  %v7230_v4 = vpop.f32.mrb[2].mxu0  ;;  %7530 = vmatpush3.bf16.msra.mxu0 %v8254_v58  ;;  %v7250_v7 = vpop.f32.mrb[1].mxu1  ;;  %v1404_v0 = vcombine.high %v1396_v56, %v1396_v56 }
  0xf9   :  { %v7231_v8 = vpop.f32.mrb[3].mxu0  ;;  %7531 = vmatprep.subr.bf16.mxu0 %v8256_v61  ;;  %v7251_v10 = vadd.f32 %v7250_v7, %v7249_v2  ;;  %v7252_v11 = vpop.f32.mrb[2].mxu1  ;;  %v8295_v2 = vld [vmem:[%s10544_s1 + $0x838] sm:$0xff]   ;;  %v1412_v7 = vrot.slane %v1396_v56, %v8746_v41 }
  0xfa   :  { %v5197_v9 = vadd.f32 %v7229_v3, %v6634_v60  ;;  %7552 = vmatpush3.bf16.msra.mxu1 %v8255_v59  ;;  %v7253_v13 = vpop.f32.mrb[3].mxu1  ;;  %v9571_v3 = vrot.slane %v1389_v57, %v8746_v41  ;;  %v8297_v8 = vld [vmem:[%s10544_s1 + $0x940] sm:$0xff]   ;;  %v8327_v56 = vld [vmem:[%s10544_s1 + $0x938] sm:$0xff]  }
  0xfb   :  { %7553 = vmatprep.subr.bf16.mxu1 %v8257_v63  ;;  %v8294_v63 = vld [vmem:[%s10544_s1 + $0x8f8] sm:$0xff]   ;;  %v8298_v11 = vld [vmem:[%s10544_s1 + $0x9c0] sm:$0xff]  }
  0xfc   :  { %v9465_v15 = vadd.f32 %v7251_v10, %v5197_v9  ;;  %7532 = vmatpush3.bf16.msra.mxu0 %v8258_v1  ;;  %v1405_v9 = vcombine.high %v9571_v3, %v9571_v3 }
  0xfd   :  { %7533 = vmatprep.subr.bf16.mxu0 %v8260_v6  ;;  %v1426_v6 = vrot.slane %v1404_v0, %v8746_v41 }
  0xfe   :  { %7554 = vmatpush3.bf16.msra.mxu1 %v8259_v5  ;;  %v8296_v5 = vld [vmem:[%s10544_s1 + $0x8b8] sm:$0xff]   ;;  %v1433_v13 = vrot.slane %v1405_v9, %v8746_v41 }
  0xff   :  { %7555 = vmatprep.subr.bf16.mxu1 %v8261_v12  ;;  %v1436_v10 = vcombine.high %v1426_v6, %v1426_v6  ;;  %v8299_v12 = vld [vmem:[%s10544_s1 + $0x900] sm:$0xff]   ;;  %v8342_v9 = vld [vmem:[%s10544_s1 + $0xa58] sm:$0xff]  }
 0x100   :  { %7534 = vmatpush3.bf16.msra.mxu0 %v8262_v14  ;;  %v8300_v14 = vld [vmem:[%s10544_s1 + $0x980] sm:$0xff]  }
 0x101   :  { %7563 = vmatprep.subr.bf16.mxu0 %v8265_v18  ;;  %v1437_v18 = vcombine.high %v1433_v13, %v1433_v13 }
 0x102   :  { %7556 = vmatpush3.bf16.msra.mxu1 %v8263_v16  ;;  %v8301_v16 = vld [vmem:[%s10544_s1 + $0x948] sm:$0xff]  }
 0x103   :  { %5755 = vmatmul.mubr.bf16.vlgmr.msra.gmra.mrb[28].mxu0 %v1370_v17  ;;  %7585 = vmatprep.subr.bf16.mxu1 %v8266_v19  ;;  %v8302_v17 = vld [vmem:[%s10544_s1 + $0x9c8] sm:$0xff]  }
 0x104   :  { %7564 = vmatpush3.bf16.msra.mxu0 %v8267_v20  ;;  %5834 = vmatprep.mubr.bf16.mxu0 %v1426_v6  ;;  %v8303_v19 = vld [vmem:[%s10544_s1 + $0x908] sm:$0xff]   ;;  %v8339_v6 = vld [vmem:[%s10544_s1 + $0xad0] sm:$0xff]  }
 0x105   :  { %5795 = vmatmul.mubr.bf16.vlgmr.msra.gmra.mrb[28].mxu1 %v1386_v22  ;;  %7565 = vmatprep.subr.bf16.mxu0 %v8269_v23  ;;  %v8304_v20 = vld [vmem:[%s10544_s1 + $0x988] sm:$0xff]   ;;  %v8306_v22 = vld [vmem:[%s10544_s1 + $0x9d0] sm:$0xff]  }
 0x106   :  { %7586 = vmatpush3.bf16.msra.mxu1 %v8268_v21  ;;  %5874 = vmatprep.mubr.bf16.mxu1 %v1436_v10  ;;  %v8305_v21 = vld [vmem:[%s10544_s1 + $0x950] sm:$0xff]   ;;  %v8343_v10 = vld [vmem:[%s10544_s1 + $0xad8] sm:$0xff]  }
 0x107   :  { %7587 = vmatprep.subr.bf16.mxu1 %v8270_v24  ;;  %v8307_v23 = vld [vmem:[%s10544_s1 + $0x910] sm:$0xff]  }
 0x108   :  { %7566 = vmatpush3.bf16.msra.mxu0 %v8271_v25  ;;  %v8308_v24 = vld [vmem:[%s10544_s1 + $0x990] sm:$0xff]   ;;  %v8309_v25 = vld [vmem:[%s10544_s1 + $0x958] sm:$0xff]  }
 0x109   :  { %7567 = vmatprep.subr.bf16.mxu0 %v8273_v27  ;;  %v8311_v27 = vld [vmem:[%s10544_s1 + $0x918] sm:$0xff]  }
 0x10a   :  { %7588 = vmatpush3.bf16.msra.mxu1 %v8272_v26  ;;  %v8310_v26 = vld [vmem:[%s10544_s1 + $0x9d8] sm:$0xff]  }
 0x10b   :  { %7589 = vmatprep.subr.bf16.mxu1 %v8274_v29  ;;  %v8312_v29 = vld [vmem:[%s10544_s1 + $0x998] sm:$0xff]  }
 0x10c   :  { %7568 = vmatpush3.bf16.msra.mxu0 %v8275_v30  ;;  %v8313_v30 = vld [vmem:[%s10544_s1 + $0x960] sm:$0xff]  }
 0x10d   :  { %7569 = vmatprep.subr.bf16.mxu0 %v8277_v32  ;;  %v8315_v32 = vld [vmem:[%s10544_s1 + $0x920] sm:$0xff]  }
 0x10e   :  { %7590 = vmatpush3.bf16.msra.mxu1 %v8276_v31  ;;  %v8314_v31 = vld [vmem:[%s10544_s1 + $0x9e0] sm:$0xff]  }
 0x10f   :  { %7591 = vmatprep.subr.bf16.mxu1 %v8278_v33  ;;  %v8316_v33 = vld [vmem:[%s10544_s1 + $0x9a0] sm:$0xff]  }
 0x110   :  { %7570 = vmatpush3.bf16.msra.mxu0 %v8279_v34  ;;  %v8317_v34 = vld [vmem:[%s10544_s1 + $0x968] sm:$0xff]  }
 0x111   :  { %7571 = vmatprep.subr.bf16.mxu0 %v8281_v36  ;;  %v8319_v36 = vld [vmem:[%s10544_s1 + $0x928] sm:$0xff]  }
 0x112   :  { %7592 = vmatpush3.bf16.msra.mxu1 %v8280_v35  ;;  %v8318_v35 = vld [vmem:[%s10544_s1 + $0x9e8] sm:$0xff]  }
 0x113   :  { %7593 = vmatprep.subr.bf16.mxu1 %v8282_v37  ;;  %v8320_v37 = vld [vmem:[%s10544_s1 + $0x9a8] sm:$0xff]  }
 0x114   :  { %7572 = vmatpush3.bf16.msra.mxu0 %v8283_v38  ;;  %v8321_v38 = vld [vmem:[%s10544_s1 + $0x970] sm:$0xff]  }
 0x115   :  { %7573 = vmatprep.subr.bf16.mxu0 %v8285_v40  ;;  %v8322_v40 = vld [vmem:[%s10544_s1 + $0x9f0] sm:$0xff]  }
 0x116   :  { %7594 = vmatpush3.bf16.msra.mxu1 %v8284_v39  ;;  %v7271_v47 = vpop.f32.mrb[4].mxu0 }
 0x117   :  { %v7272_v49 = vpop.f32.mrb[5].mxu0  ;;  %7595 = vmatprep.subr.bf16.mxu1 %v8286_v42  ;;  %v7293_v51 = vpop.f32.mrb[4].mxu1 }
 0x118   :  { %v7273_v52 = vadd.f32 %v7272_v49, %v7271_v47  ;;  %v7274_v53 = vpop.f32.mrb[6].mxu0  ;;  %7574 = vmatpush3.bf16.msra.mxu0 %v8287_v43  ;;  %v7294_v58 = vpop.f32.mrb[5].mxu1  ;;  %v8323_v43 = vld [vmem:[%s10544_s1 + $0x930] sm:$0xff]  }
 0x119   :  { %v7275_v59 = vpop.f32.mrb[7].mxu0  ;;  %7575 = vmatprep.subr.bf16.mxu0 %v8289_v45  ;;  %v7295_v61 = vadd.f32 %v7294_v58, %v7293_v51  ;;  %v7296_v62 = vpop.f32.mrb[6].mxu1  ;;  %v8324_v47 = vld [vmem:[%s10544_s1 + $0x9b0] sm:$0xff]   ;;  %v8328_v58 = vld [vmem:[%s10544_s1 + $0x9b8] sm:$0xff]  }
 0x11a   :  { %v5277_v60 = vadd.f32 %v7273_v52, %v9465_v15  ;;  %7596 = vmatpush3.bf16.msra.mxu1 %v8288_v44  ;;  %v7297_v1 = vpop.f32.mrb[7].mxu1  ;;  %v1434_v15 = vcombine.high %v1412_v7, %v1412_v7  ;;  %v1419_v59 = vrot.slane %v9571_v3, %v8746_v41  ;;  %v8332_v62 = vld [vmem:[%s10544_s1 + $0xa00] sm:$0xff]   ;;  %v8336_v3 = vld [vmem:[%s10544_s1 + $0xa08] sm:$0xff]  }
 0x11b   :  { %7597 = vmatprep.subr.bf16.mxu1 %v8290_v46  ;;  %v8334_v1 = vld [vmem:[%s10544_s1 + $0xa48] sm:$0xff]  }
 0x11c   :  { %v9573_v4 = vadd.f32 %v7295_v61, %v5277_v60  ;;  %7576 = vmatpush3.bf16.msra.mxu0 %v8291_v48  ;;  %v8325_v48 = vld [vmem:[%s10544_s1 + $0x978] sm:$0xff]   ;;  %v8330_v60 = vld [vmem:[%s10544_s1 + $0xa40] sm:$0xff]   ;;  %v1435_v0 = vcombine.high %v1419_v59, %v1419_v59 }
 0x11d   :  { %7577 = vmatprep.subr.bf16.mxu0 %v8293_v55  ;;  %v8331_v61 = vld [vmem:[%s10544_s1 + $0xac0] sm:$0xff]  }
 0x11e   :  { %7598 = vmatpush3.bf16.msra.mxu1 %v8292_v54  ;;  %v8326_v54 = vld [vmem:[%s10544_s1 + $0x9f8] sm:$0xff]  }
 0x11f   :  { %7599 = vmatprep.subr.bf16.mxu1 %v8294_v63  ;;  %v8333_v63 = vld [vmem:[%s10544_s1 + $0xa80] sm:$0xff]  }
 0x120   :  { %7578 = vmatpush3.bf16.msra.mxu0 %v8295_v2  ;;  %v8335_v2 = vld [vmem:[%s10544_s1 + $0xac8] sm:$0xff]  }
 0x121   :  { %7607 = vmatprep.subr.bf16.mxu0 %v8297_v8  ;;  %v8341_v8 = vld [vmem:[%s10544_s1 + $0xa90] sm:$0xff]  }
 0x122   :  { %7600 = vmatpush3.bf16.msra.mxu1 %v8296_v5  ;;  %v8338_v5 = vld [vmem:[%s10544_s1 + $0xa50] sm:$0xff]  }
 0x123   :  { %5835 = vmatmul.mubr.bf16.vlgmr.msra.gmra.mrb[32].mxu0 %v1412_v7  ;;  %7629 = vmatprep.subr.bf16.mxu1 %v8298_v11  ;;  %v8340_v7 = vld [vmem:[%s10544_s1 + $0xa10] sm:$0xff]   ;;  %v8344_v11 = vld [vmem:[%s10544_s1 + $0xa18] sm:$0xff]  }
 0x124   :  { %7608 = vmatpush3.bf16.msra.mxu0 %v8299_v12  ;;  %5914 = vmatprep.mubr.bf16.mxu0 %v1433_v13  ;;  %v8345_v12 = vld [vmem:[%s10544_s1 + $0xa98] sm:$0xff]   ;;  %v8346_v13 = vld [vmem:[%s10544_s1 + $0xa60] sm:$0xff]  }
 0x125   :  { %5875 = vmatmul.mubr.bf16.vlgmr.msra.gmra.mrb[32].mxu1 %v1434_v15  ;;  %7609 = vmatprep.subr.bf16.mxu0 %v8301_v16  ;;  %v8348_v15 = vld [vmem:[%s10544_s1 + $0xa20] sm:$0xff]  }
 0x126   :  { %7630 = vmatpush3.bf16.msra.mxu1 %v8300_v14  ;;  %5954 = vmatprep.mubr.bf16.mxu1 %v1437_v18  ;;  %v8347_v14 = vld [vmem:[%s10544_s1 + $0xae0] sm:$0xff]   ;;  %v8351_v18 = vld [vmem:[%s10544_s1 + $0xae8] sm:$0xff]  }
 0x127   :  { %7631 = vmatprep.subr.bf16.mxu1 %v8302_v17  ;;  %v8349_v16 = vld [vmem:[%s10544_s1 + $0xaa0] sm:$0xff]   ;;  %v8350_v17 = vld [vmem:[%s10544_s1 + $0xa68] sm:$0xff]  }
 0x128   :  { %7610 = vmatpush3.bf16.msra.mxu0 %v8303_v19  ;;  %v8352_v19 = vld [vmem:[%s10544_s1 + $0xa28] sm:$0xff]  }
 0x129   :  { %7611 = vmatprep.subr.bf16.mxu0 %v8305_v21  ;;  %v8354_v21 = vld [vmem:[%s10544_s1 + $0xa70] sm:$0xff]  }
 0x12a   :  { %7632 = vmatpush3.bf16.msra.mxu1 %v8304_v20  ;;  %v8353_v20 = vld [vmem:[%s10544_s1 + $0xaa8] sm:$0xff]  }
 0x12b   :  { %7633 = vmatprep.subr.bf16.mxu1 %v8306_v22 }
 0x12c   :  { %7612 = vmatpush3.bf16.msra.mxu0 %v8307_v23  ;;  %v8355_v23 = vld [vmem:[%s10544_s1 + $0xaf0] sm:$0xff]  }
 0x12d   :  { %7613 = vmatprep.subr.bf16.mxu0 %v8309_v25  ;;  %v8356_v25 = vld [vmem:[%s10544_s1 + $0xa30] sm:$0xff]  }
 0x12e   :  { %7634 = vmatpush3.bf16.msra.mxu1 %v8308_v24 }
 0x12f   :  { %7635 = vmatprep.subr.bf16.mxu1 %v8310_v26 }
 0x130   :  { %7614 = vmatpush3.bf16.msra.mxu0 %v8311_v27 }
 0x131   :  { %7615 = vmatprep.subr.bf16.mxu0 %v8313_v30  ;;  %v8357_v30 = vld [vmem:[%s10544_s1 + $0xab0] sm:$0xff]  }
 0x132   :  { %7636 = vmatpush3.bf16.msra.mxu1 %v8312_v29 }
 0x133   :  { %7637 = vmatprep.subr.bf16.mxu1 %v8314_v31  ;;  %v8358_v31 = vld [vmem:[%s10544_s1 + $0xa78] sm:$0xff]  }
 0x134   :  { %7616 = vmatpush3.bf16.msra.mxu0 %v8315_v32  ;;  %v21_v32 = vld [vmem:[%s10543_s0 + $0x28] sm:$0xff] }
 0x135   :  { %7617 = vmatprep.subr.bf16.mxu0 %v8317_v34 }
 0x136   :  { %7638 = vmatpush3.bf16.msra.mxu1 %v8316_v33  ;;  %v7315_v39 = vpop.f32.mrb[8].mxu0 }
 0x137   :  { %v7316_v42 = vpop.f32.mrb[9].mxu0  ;;  %7639 = vmatprep.subr.bf16.mxu1 %v8318_v35  ;;  %v1445_v35 = vrot.slane %v21_v32, %v8746_v41 }
 0x138   :  { %v7337_v44 = vpop.f32.mrb[8].mxu1  ;;  %v7317_v45 = vadd.f32 %v7316_v42, %v7315_v39  ;;  %v7318_v46 = vpop.f32.mrb[10].mxu0  ;;  %7618 = vmatpush3.bf16.msra.mxu0 %v8319_v36  ;;  %v1438_v36 = vcombine.high %v21_v32, %v21_v32 }
 0x139   :  { %v7338_v49 = vpop.f32.mrb[9].mxu1  ;;  %v7319_v50 = vpop.f32.mrb[11].mxu0  ;;  %7619 = vmatprep.subr.bf16.mxu0 %v8321_v38 }
 0x13a   :  { %v5357_v51 = vadd.f32 %v7317_v45, %v9573_v4  ;;  %v7339_v52 = vadd.f32 %v7338_v49, %v7337_v44  ;;  %v7340_v53 = vpop.f32.mrb[10].mxu1  ;;  %7640 = vmatpush3.bf16.msra.mxu1 %v8320_v37  ;;  %v8337_v4 = vld [vmem:[%s10544_s1 + $0xa88] sm:$0xff]   ;;  %v1453_v44 = vcombine.high %v1445_v35, %v1445_v35  ;;  %v9783_v45 = vrot.slane %v1438_v36, %v8746_v41  ;;  %v8362_v50 = vld [vmem:[%s10544_s1 + $0xb40] sm:$0xff]  }
 0x13b   :  { %v7341_v55 = vpop.f32.mrb[11].mxu1  ;;  %7641 = vmatprep.subr.bf16.mxu1 %v8322_v40  ;;  %v8359_v40 = vld [vmem:[%s10544_s1 + $0xaf8] sm:$0xff]   ;;  %v1461_v49 = vrot.slane %v1445_v35, %v8746_v41 }
 0x13c   :  { %v9677_v57 = vadd.f32 %v7339_v52, %v5357_v51  ;;  %7620 = vmatpush3.bf16.msra.mxu0 %v8323_v43  ;;  %v8360_v43 = vld [vmem:[%s10544_s1 + $0xa38] sm:$0xff]   ;;  %v1454_v51 = vcombine.high %v9783_v45, %v9783_v45  ;;  %v8363_v52 = vld [vmem:[%s10544_s1 + $0xbc0] sm:$0xff]   ;;  %v1468_v36 = vrot.slane %v9783_v45, %v8746_v41  ;;  %v8401_v45 = vld [vmem:[%s10544_s1 + $0xc08] sm:$0xff]  }
 0x13d   :  { %7621 = vmatprep.subr.bf16.mxu0 %v8325_v48  ;;  %v1475_v48 = vrot.slane %v1453_v44, %v8746_v41  ;;  %v8393_v35 = vld [vmem:[%s10544_s1 + $0xbb8] sm:$0xff]   ;;  %v8400_v44 = vld [vmem:[%s10544_s1 + $0xcc8] sm:$0xff]  }
 0x13e   :  { %7642 = vmatpush3.bf16.msra.mxu1 %v8324_v47  ;;  %v8361_v47 = vld [vmem:[%s10544_s1 + $0xab8] sm:$0xff]   ;;  %v1482_v55 = vrot.slane %v1454_v51, %v8746_v41 }
 0x13f   :  { %7643 = vmatprep.subr.bf16.mxu1 %v8326_v54  ;;  %v1485_v53 = vcombine.high %v1475_v48, %v1475_v48  ;;  %v8364_v54 = vld [vmem:[%s10544_s1 + $0xb00] sm:$0xff]   ;;  %v8407_v51 = vld [vmem:[%s10544_s1 + $0xc58] sm:$0xff]  }
 0x140   :  { %7622 = vmatpush3.bf16.msra.mxu0 %v8327_v56  ;;  %v8365_v56 = vld [vmem:[%s10544_s1 + $0xb80] sm:$0xff]  }
 0x141   :  { %7651 = vmatprep.subr.bf16.mxu0 %v8330_v60  ;;  %v1486_v60 = vcombine.high %v1482_v55, %v1482_v55 }
 0x142   :  { %7644 = vmatpush3.bf16.msra.mxu1 %v8328_v58  ;;  %v8366_v58 = vld [vmem:[%s10544_s1 + $0xb48] sm:$0xff]  }
 0x143   :  { %5915 = vmatmul.mubr.bf16.vlgmr.msra.gmra.mrb[36].mxu0 %v1419_v59  ;;  %7673 = vmatprep.subr.bf16.mxu1 %v8331_v61  ;;  %v8367_v59 = vld [vmem:[%s10544_s1 + $0xbc8] sm:$0xff]  }
 0x144   :  { %7652 = vmatpush3.bf16.msra.mxu0 %v8332_v62  ;;  %5994 = vmatprep.mubr.bf16.mxu0 %v1475_v48  ;;  %v8368_v61 = vld [vmem:[%s10544_s1 + $0xb08] sm:$0xff]   ;;  %v8404_v48 = vld [vmem:[%s10544_s1 + $0xcd0] sm:$0xff]  }
 0x145   :  { %5955 = vmatmul.mubr.bf16.vlgmr.msra.gmra.mrb[36].mxu1 %v1435_v0  ;;  %7653 = vmatprep.subr.bf16.mxu0 %v8334_v1  ;;  %v8369_v62 = vld [vmem:[%s10544_s1 + $0xb88] sm:$0xff]   ;;  %v8371_v0 = vld [vmem:[%s10544_s1 + $0xbd0] sm:$0xff]  }
 0x146   :  { %7674 = vmatpush3.bf16.msra.mxu1 %v8333_v63  ;;  %6034 = vmatprep.mubr.bf16.mxu1 %v1485_v53  ;;  %v8370_v63 = vld [vmem:[%s10544_s1 + $0xb50] sm:$0xff]   ;;  %v8409_v53 = vld [vmem:[%s10544_s1 + $0xc18] sm:$0xff]  }
 0x147   :  { %7675 = vmatprep.subr.bf16.mxu1 %v8335_v2  ;;  %v8372_v1 = vld [vmem:[%s10544_s1 + $0xb10] sm:$0xff]  }
 0x148   :  { %7654 = vmatpush3.bf16.msra.mxu0 %v8336_v3  ;;  %v8373_v2 = vld [vmem:[%s10544_s1 + $0xb90] sm:$0xff]   ;;  %v8374_v3 = vld [vmem:[%s10544_s1 + $0xb58] sm:$0xff]  }
 0x149   :  { %7655 = vmatprep.subr.bf16.mxu0 %v8338_v5  ;;  %v8376_v5 = vld [vmem:[%s10544_s1 + $0xb18] sm:$0xff]  }
 0x14a   :  { %7676 = vmatpush3.bf16.msra.mxu1 %v8337_v4  ;;  %v8375_v4 = vld [vmem:[%s10544_s1 + $0xbd8] sm:$0xff]  }
 0x14b   :  { %7677 = vmatprep.subr.bf16.mxu1 %v8339_v6  ;;  %v8377_v6 = vld [vmem:[%s10544_s1 + $0xb98] sm:$0xff]  }
 0x14c   :  { %7656 = vmatpush3.bf16.msra.mxu0 %v8340_v7  ;;  %v8378_v7 = vld [vmem:[%s10544_s1 + $0xb60] sm:$0xff]  }
 0x14d   :  { %7657 = vmatprep.subr.bf16.mxu0 %v8342_v9  ;;  %v8380_v9 = vld [vmem:[%s10544_s1 + $0xb20] sm:$0xff]  }
 0x14e   :  { %7678 = vmatpush3.bf16.msra.mxu1 %v8341_v8  ;;  %v8379_v8 = vld [vmem:[%s10544_s1 + $0xbe0] sm:$0xff]  }
 0x14f   :  { %7679 = vmatprep.subr.bf16.mxu1 %v8343_v10  ;;  %v8381_v10 = vld [vmem:[%s10544_s1 + $0xba0] sm:$0xff]  }
 0x150   :  { %7658 = vmatpush3.bf16.msra.mxu0 %v8344_v11  ;;  %v8382_v11 = vld [vmem:[%s10544_s1 + $0xb68] sm:$0xff]  }
 0x151   :  { %7659 = vmatprep.subr.bf16.mxu0 %v8346_v13  ;;  %v8384_v13 = vld [vmem:[%s10544_s1 + $0xb28] sm:$0xff]  }
 0x152   :  { %7680 = vmatpush3.bf16.msra.mxu1 %v8345_v12  ;;  %v8383_v12 = vld [vmem:[%s10544_s1 + $0xbe8] sm:$0xff]  }
 0x153   :  { %7681 = vmatprep.subr.bf16.mxu1 %v8347_v14  ;;  %v8385_v14 = vld [vmem:[%s10544_s1 + $0xba8] sm:$0xff]  }
 0x154   :  { %7660 = vmatpush3.bf16.msra.mxu0 %v8348_v15  ;;  %v8386_v15 = vld [vmem:[%s10544_s1 + $0xb70] sm:$0xff]  }
 0x155   :  { %7661 = vmatprep.subr.bf16.mxu0 %v8350_v17  ;;  %v8387_v17 = vld [vmem:[%s10544_s1 + $0xbf0] sm:$0xff]  }
 0x156   :  { %7682 = vmatpush3.bf16.msra.mxu1 %v8349_v16  ;;  %v7359_v22 = vpop.f32.mrb[12].mxu0 }
 0x157   :  { %v7360_v24 = vpop.f32.mrb[13].mxu0  ;;  %7683 = vmatprep.subr.bf16.mxu1 %v8351_v18 }
 0x158   :  { %v7381_v26 = vpop.f32.mrb[12].mxu1  ;;  %v7361_v27 = vadd.f32 %v7360_v24, %v7359_v22  ;;  %v7362_v29 = vpop.f32.mrb[14].mxu0  ;;  %7662 = vmatpush3.bf16.msra.mxu0 %v8352_v19  ;;  %v8388_v19 = vld [vmem:[%s10544_s1 + $0xb30] sm:$0xff]   ;;  %v8390_v24 = vld [vmem:[%s10544_s1 + $0xb78] sm:$0xff]  }
 0x159   :  { %v7382_v33 = vpop.f32.mrb[13].mxu1  ;;  %v7363_v34 = vpop.f32.mrb[15].mxu0  ;;  %7663 = vmatprep.subr.bf16.mxu0 %v8354_v21 }
 0x15a   :  { %v5437_v37 = vadd.f32 %v7361_v27, %v9677_v57  ;;  %v7383_v38 = vadd.f32 %v7382_v33, %v7381_v26  ;;  %v7384_v39 = vpop.f32.mrb[14].mxu1  ;;  %7684 = vmatpush3.bf16.msra.mxu1 %v8353_v20  ;;  %v1483_v57 = vcombine.high %v1461_v49, %v1461_v49  ;;  %v8392_v33 = vld [vmem:[%s10544_s1 + $0xb38] sm:$0xff]  }
 0x15b   :  { %v7385_v42 = vpop.f32.mrb[15].mxu1  ;;  %7685 = vmatprep.subr.bf16.mxu1 %v8355_v23  ;;  %v8389_v23 = vld [vmem:[%s10544_s1 + $0xbb0] sm:$0xff]   ;;  %v8397_v39 = vld [vmem:[%s10544_s1 + $0xc00] sm:$0xff]  }
 0x15c   :  { %v9785_v46 = vadd.f32 %v7383_v38, %v5437_v37  ;;  %7664 = vmatpush3.bf16.msra.mxu0 %v8356_v25  ;;  %v8395_v37 = vld [vmem:[%s10544_s1 + $0xc40] sm:$0xff]   ;;  %v1484_v42 = vcombine.high %v1468_v36, %v1468_v36 }
 0x15d   :  { %7665 = vmatprep.subr.bf16.mxu0 %v8358_v31  ;;  %v8391_v31 = vld [vmem:[%s10544_s1 + $0xbf8] sm:$0xff]   ;;  %v8396_v38 = vld [vmem:[%s10544_s1 + $0xcc0] sm:$0xff]  }
 0x15e   :  { %7686 = vmatpush3.bf16.msra.mxu1 %v8357_v30 }
 0x15f   :  { %7687 = vmatprep.subr.bf16.mxu1 %v8359_v40  ;;  %v8398_v40 = vld [vmem:[%s10544_s1 + $0xc80] sm:$0xff]  }
 0x160   :  { %7666 = vmatpush3.bf16.msra.mxu0 %v8360_v43  ;;  %v8399_v43 = vld [vmem:[%s10544_s1 + $0xc48] sm:$0xff]  }
 0x161   :  { %7695 = vmatprep.subr.bf16.mxu0 %v8362_v50  ;;  %v8406_v50 = vld [vmem:[%s10544_s1 + $0xc90] sm:$0xff]  }
 0x162   :  { %7688 = vmatpush3.bf16.msra.mxu1 %v8361_v47  ;;  %v8403_v47 = vld [vmem:[%s10544_s1 + $0xc50] sm:$0xff]  }
 0x163   :  { %5995 = vmatmul.mubr.bf16.vlgmr.msra.gmra.mrb[40].mxu0 %v1461_v49  ;;  %7717 = vmatprep.subr.bf16.mxu1 %v8363_v52  ;;  %v8405_v49 = vld [vmem:[%s10544_s1 + $0xc10] sm:$0xff]   ;;  %v8408_v52 = vld [vmem:[%s10544_s1 + $0xcd8] sm:$0xff]  }
 0x164   :  { %7696 = vmatpush3.bf16.msra.mxu0 %v8364_v54  ;;  %6074 = vmatprep.mubr.bf16.mxu0 %v1482_v55  ;;  %v8410_v54 = vld [vmem:[%s10544_s1 + $0xc98] sm:$0xff]   ;;  %v8411_v55 = vld [vmem:[%s10544_s1 + $0xc60] sm:$0xff]  }
 0x165   :  { %6035 = vmatmul.mubr.bf16.vlgmr.msra.gmra.mrb[40].mxu1 %v1483_v57  ;;  %7697 = vmatprep.subr.bf16.mxu0 %v8366_v58  ;;  %v8413_v57 = vld [vmem:[%s10544_s1 + $0xc20] sm:$0xff]  }
 0x166   :  { %7718 = vmatpush3.bf16.msra.mxu1 %v8365_v56  ;;  %6114 = vmatprep.mubr.bf16.mxu1 %v1486_v60  ;;  %v8412_v56 = vld [vmem:[%s10544_s1 + $0xce0] sm:$0xff]   ;;  %v8416_v60 = vld [vmem:[%s10544_s1 + $0xce8] sm:$0xff]  }
 0x167   :  { %7719 = vmatprep.subr.bf16.mxu1 %v8367_v59  ;;  %v8414_v58 = vld [vmem:[%s10544_s1 + $0xca0] sm:$0xff]   ;;  %v8415_v59 = vld [vmem:[%s10544_s1 + $0xc68] sm:$0xff]  }
 0x168   :  { %7698 = vmatpush3.bf16.msra.mxu0 %v8368_v61  ;;  %v8417_v61 = vld [vmem:[%s10544_s1 + $0xc28] sm:$0xff]  }
 0x169   :  { %7699 = vmatprep.subr.bf16.mxu0 %v8370_v63  ;;  %v8419_v63 = vld [vmem:[%s10544_s1 + $0xc70] sm:$0xff]  }
 0x16a   :  { %7720 = vmatpush3.bf16.msra.mxu1 %v8369_v62  ;;  %v8418_v62 = vld [vmem:[%s10544_s1 + $0xca8] sm:$0xff]  }
 0x16b   :  { %7721 = vmatprep.subr.bf16.mxu1 %v8371_v0 }
 0x16c   :  { %7700 = vmatpush3.bf16.msra.mxu0 %v8372_v1  ;;  %v8420_v1 = vld [vmem:[%s10544_s1 + $0xcf0] sm:$0xff]  }
 0x16d   :  { %7701 = vmatprep.subr.bf16.mxu0 %v8374_v3  ;;  %v8421_v3 = vld [vmem:[%s10544_s1 + $0xc30] sm:$0xff]  }
 0x16e   :  { %7722 = vmatpush3.bf16.msra.mxu1 %v8373_v2 }
 0x16f   :  { %7723 = vmatprep.subr.bf16.mxu1 %v8375_v4 }
 0x170   :  { %7702 = vmatpush3.bf16.msra.mxu0 %v8376_v5 }
 0x171   :  { %7703 = vmatprep.subr.bf16.mxu0 %v8378_v7  ;;  %v8422_v7 = vld [vmem:[%s10544_s1 + $0xcb0] sm:$0xff]  }
 0x172   :  { %7724 = vmatpush3.bf16.msra.mxu1 %v8377_v6 }
 0x173   :  { %7725 = vmatprep.subr.bf16.mxu1 %v8379_v8 }
 0x174   :  { %7704 = vmatpush3.bf16.msra.mxu0 %v8380_v9 }
 0x175   :  { %7705 = vmatprep.subr.bf16.mxu0 %v8382_v11  ;;  %v22_v11 = vld [vmem:[%s10543_s0 + $0x30] sm:$0xff] }
 0x176   :  { %7726 = vmatpush3.bf16.msra.mxu1 %v8381_v10  ;;  %v7403_v16 = vpop.f32.mrb[16].mxu0  ;;  %v8423_v10 = vld [vmem:[%s10544_s1 + $0xc78] sm:$0xff]  }
 0x177   :  { %v7404_v18 = vpop.f32.mrb[17].mxu0  ;;  %7727 = vmatprep.subr.bf16.mxu1 %v8383_v12 }
 0x178   :  { %v7425_v20 = vpop.f32.mrb[16].mxu1  ;;  %v7405_v21 = vadd.f32 %v7404_v18, %v7403_v16  ;;  %v7406_v22 = vpop.f32.mrb[18].mxu0  ;;  %7706 = vmatpush3.bf16.msra.mxu0 %v8384_v13  ;;  %v1494_v16 = vrot.slane %v22_v11, %v8746_v41 }
 0x179   :  { %v7426_v25 = vpop.f32.mrb[17].mxu1  ;;  %v7407_v26 = vpop.f32.mrb[19].mxu0  ;;  %7707 = vmatprep.subr.bf16.mxu0 %v8386_v15  ;;  %v8424_v15 = vld [vmem:[%s10544_s1 + $0xcf8] sm:$0xff]  }
 0x17a   :  { %v5517_v27 = vadd.f32 %v7405_v21, %v9785_v46  ;;  %v7427_v29 = vadd.f32 %v7426_v25, %v7425_v20  ;;  %v7428_v30 = vpop.f32.mrb[18].mxu1  ;;  %7728 = vmatpush3.bf16.msra.mxu1 %v8385_v14  ;;  %v8402_v46 = vld [vmem:[%s10544_s1 + $0xc88] sm:$0xff]   ;;  %v8426_v21 = vld [vmem:[%s10544_s1 + $0xcb8] sm:$0xff]   ;;  %v1502_v22 = vcombine.high %v1494_v16, %v1494_v16  ;;  %v8427_v25 = vld [vmem:[%s10544_s1 + $0xd40] sm:$0xff]  }
 0x17b   :  { %v7429_v32 = vpop.f32.mrb[19].mxu1  ;;  %7729 = vmatprep.subr.bf16.mxu1 %v8387_v17  ;;  %v1487_v17 = vcombine.high %v22_v11, %v22_v11  ;;  %v8429_v30 = vld [vmem:[%s10544_s1 + $0xd00] sm:$0xff]  }
 0x17c   :  { %v9889_v34 = vadd.f32 %v7427_v29, %v5517_v27  ;;  %7708 = vmatpush3.bf16.msra.mxu0 %v8388_v19  ;;  %v8425_v19 = vld [vmem:[%s10544_s1 + $0xc38] sm:$0xff]   ;;  %v1524_v26 = vrot.slane %v1502_v22, %v8746_v41  ;;  %v8428_v27 = vld [vmem:[%s10544_s1 + $0xdc0] sm:$0xff]   ;;  %v8467_v22 = vld [vmem:[%s10544_s1 + $0xe88] sm:$0xff]  }
 0x17d   :  { %7709 = vmatprep.subr.bf16.mxu0 %v8390_v24  ;;  %v1510_v24 = vrot.slane %v1494_v16, %v8746_v41  ;;  %v8430_v32 = vld [vmem:[%s10544_s1 + $0xd80] sm:$0xff]  }
 0x17e   :  { %7730 = vmatpush3.bf16.msra.mxu1 %v8389_v23  ;;  %v10000_v23 = vrot.slane %v1487_v17, %v8746_v41  ;;  %v8462_v16 = vld [vmem:[%s10544_s1 + $0xe00] sm:$0xff]  }
 0x17f   :  { %7731 = vmatprep.subr.bf16.mxu1 %v8391_v31  ;;  %v1534_v31 = vcombine.high %v1524_v26, %v1524_v26  ;;  %v8463_v17 = vld [vmem:[%s10544_s1 + $0xe80] sm:$0xff]  }
 0x180   :  { %7710 = vmatpush3.bf16.msra.mxu0 %v8392_v33  ;;  %v1503_v29 = vcombine.high %v10000_v23, %v10000_v23 }
 0x181   :  { %7739 = vmatprep.subr.bf16.mxu0 %v8395_v37 }
 0x182   :  { %7732 = vmatpush3.bf16.msra.mxu1 %v8393_v35  ;;  %v1531_v33 = vrot.slane %v1503_v29, %v8746_v41  ;;  %v8431_v35 = vld [vmem:[%s10544_s1 + $0xd48] sm:$0xff]   ;;  %v8473_v29 = vld [vmem:[%s10544_s1 + $0xed8] sm:$0xff]  }
 0x183   :  { %6075 = vmatmul.mubr.bf16.vlgmr.msra.gmra.mrb[44].mxu0 %v1468_v36  ;;  %7761 = vmatprep.subr.bf16.mxu1 %v8396_v38  ;;  %v8432_v36 = vld [vmem:[%s10544_s1 + $0xdc8] sm:$0xff]  }
 0x184   :  { %7740 = vmatpush3.bf16.msra.mxu0 %v8397_v39  ;;  %6154 = vmatprep.mubr.bf16.mxu0 %v1524_v26  ;;  %v1535_v37 = vcombine.high %v1531_v33, %v1531_v33  ;;  %v8433_v38 = vld [vmem:[%s10544_s1 + $0xd08] sm:$0xff]   ;;  %v8471_v26 = vld [vmem:[%s10544_s1 + $0xe90] sm:$0xff]  }
 0x185   :  { %6115 = vmatmul.mubr.bf16.vlgmr.msra.gmra.mrb[44].mxu1 %v1484_v42  ;;  %7741 = vmatprep.subr.bf16.mxu0 %v8399_v43  ;;  %v8434_v39 = vld [vmem:[%s10544_s1 + $0xd88] sm:$0xff]   ;;  %v8436_v42 = vld [vmem:[%s10544_s1 + $0xdd0] sm:$0xff]  }
 0x186   :  { %7762 = vmatpush3.bf16.msra.mxu1 %v8398_v40  ;;  %6194 = vmatprep.mubr.bf16.mxu1 %v1534_v31  ;;  %v8435_v40 = vld [vmem:[%s10544_s1 + $0xd50] sm:$0xff]   ;;  %v8475_v31 = vld [vmem:[%s10544_s1 + $0xe98] sm:$0xff]  }
 0x187   :  { %7763 = vmatprep.subr.bf16.mxu1 %v8400_v44  ;;  %v8437_v43 = vld [vmem:[%s10544_s1 + $0xd10] sm:$0xff]  }
 0x188   :  { %7742 = vmatpush3.bf16.msra.mxu0 %v8401_v45  ;;  %v8438_v44 = vld [vmem:[%s10544_s1 + $0xd90] sm:$0xff]   ;;  %v8439_v45 = vld [vmem:[%s10544_s1 + $0xd58] sm:$0xff]  }
 0x189   :  { %7743 = vmatprep.subr.bf16.mxu0 %v8403_v47  ;;  %v8441_v47 = vld [vmem:[%s10544_s1 + $0xd18] sm:$0xff]  }
 0x18a   :  { %7764 = vmatpush3.bf16.msra.mxu1 %v8402_v46  ;;  %v8440_v46 = vld [vmem:[%s10544_s1 + $0xdd8] sm:$0xff]  }
 0x18b   :  { %7765 = vmatprep.subr.bf16.mxu1 %v8404_v48  ;;  %v8442_v48 = vld [vmem:[%s10544_s1 + $0xd98] sm:$0xff]  }
 0x18c   :  { %7744 = vmatpush3.bf16.msra.mxu0 %v8405_v49  ;;  %v8443_v49 = vld [vmem:[%s10544_s1 + $0xd60] sm:$0xff]  }
 0x18d   :  { %7745 = vmatprep.subr.bf16.mxu0 %v8407_v51  ;;  %v8445_v51 = vld [vmem:[%s10544_s1 + $0xd20] sm:$0xff]  }
 0x18e   :  { %7766 = vmatpush3.bf16.msra.mxu1 %v8406_v50  ;;  %v8444_v50 = vld [vmem:[%s10544_s1 + $0xde0] sm:$0xff]  }
 0x18f   :  { %7767 = vmatprep.subr.bf16.mxu1 %v8408_v52  ;;  %v8446_v52 = vld [vmem:[%s10544_s1 + $0xda0] sm:$0xff]  }
 0x190   :  { %7746 = vmatpush3.bf16.msra.mxu0 %v8409_v53  ;;  %v8447_v53 = vld [vmem:[%s10544_s1 + $0xd68] sm:$0xff]  }
 0x191   :  { %7747 = vmatprep.subr.bf16.mxu0 %v8411_v55  ;;  %v8449_v55 = vld [vmem:[%s10544_s1 + $0xd28] sm:$0xff]  }
 0x192   :  { %7768 = vmatpush3.bf16.msra.mxu1 %v8410_v54  ;;  %v8448_v54 = vld [vmem:[%s10544_s1 + $0xde8] sm:$0xff]  }
 0x193   :  { %7769 = vmatprep.subr.bf16.mxu1 %v8412_v56  ;;  %v8450_v56 = vld [vmem:[%s10544_s1 + $0xda8] sm:$0xff]  }
 0x194   :  { %7748 = vmatpush3.bf16.msra.mxu0 %v8413_v57  ;;  %v8451_v57 = vld [vmem:[%s10544_s1 + $0xd70] sm:$0xff]  }
 0x195   :  { %7749 = vmatprep.subr.bf16.mxu0 %v8415_v59  ;;  %v8452_v59 = vld [vmem:[%s10544_s1 + $0xdf0] sm:$0xff]  }
 0x196   :  { %7770 = vmatpush3.bf16.msra.mxu1 %v8414_v58  ;;  %v7447_v0 = vpop.f32.mrb[20].mxu0 }
 0x197   :  { %v7448_v2 = vpop.f32.mrb[21].mxu0  ;;  %7771 = vmatprep.subr.bf16.mxu1 %v8416_v60 }
 0x198   :  { %v7469_v4 = vpop.f32.mrb[20].mxu1  ;;  %v7449_v5 = vadd.f32 %v7448_v2, %v7447_v0  ;;  %v7450_v6 = vpop.f32.mrb[22].mxu0  ;;  %7750 = vmatpush3.bf16.msra.mxu0 %v8417_v61  ;;  %v8453_v61 = vld [vmem:[%s10544_s1 + $0xd30] sm:$0xff]   ;;  %v8455_v2 = vld [vmem:[%s10544_s1 + $0xd78] sm:$0xff]  }
 0x199   :  { %v7470_v8 = vpop.f32.mrb[21].mxu1  ;;  %v7451_v9 = vpop.f32.mrb[23].mxu0  ;;  %7751 = vmatprep.subr.bf16.mxu0 %v8419_v63 }
 0x19a   :  { %v5597_v12 = vadd.f32 %v7449_v5, %v9889_v34  ;;  %v7471_v13 = vadd.f32 %v7470_v8, %v7469_v4  ;;  %v7472_v14 = vpop.f32.mrb[22].mxu1  ;;  %7772 = vmatpush3.bf16.msra.mxu1 %v8418_v62  ;;  %v1532_v34 = vcombine.high %v1510_v24, %v1510_v24  ;;  %v8456_v8 = vld [vmem:[%s10544_s1 + $0xdf8] sm:$0xff]  }
 0x19b   :  { %v7473_v18 = vpop.f32.mrb[23].mxu1  ;;  %7773 = vmatprep.subr.bf16.mxu1 %v8420_v1  ;;  %v8454_v1 = vld [vmem:[%s10544_s1 + $0xdb0] sm:$0xff]   ;;  %v8460_v14 = vld [vmem:[%s10544_s1 + $0xe40] sm:$0xff]  }
 0x19c   :  { %v9994_v20 = vadd.f32 %v7471_v13, %v5597_v12  ;;  %7752 = vmatpush3.bf16.msra.mxu0 %v8421_v3  ;;  %v8458_v12 = vld [vmem:[%s10544_s1 + $0xdb8] sm:$0xff]   ;;  %v1517_v13 = vrot.slane %v10000_v23, %v8746_v41  ;;  %v8468_v23 = vld [vmem:[%s10544_s1 + $0xe50] sm:$0xff]  }
 0x19d   :  { %7753 = vmatprep.subr.bf16.mxu0 %v8423_v10  ;;  %v8457_v10 = vld [vmem:[%s10544_s1 + $0xd38] sm:$0xff]  }
 0x19e   :  { %7774 = vmatpush3.bf16.msra.mxu1 %v8422_v7  ;;  %v1533_v18 = vcombine.high %v1517_v13, %v1517_v13 }
 0x19f   :  { %7775 = vmatprep.subr.bf16.mxu1 %v8424_v15  ;;  %v8461_v15 = vld [vmem:[%s10544_s1 + $0xec0] sm:$0xff]  }
 0x1a0   :  { %7754 = vmatpush3.bf16.msra.mxu0 %v8425_v19  ;;  %v8464_v19 = vld [vmem:[%s10544_s1 + $0xe48] sm:$0xff]  }
 0x1a1   :  { %7783 = vmatprep.subr.bf16.mxu0 %v8427_v25  ;;  %v8470_v25 = vld [vmem:[%s10544_s1 + $0xe10] sm:$0xff]  }
 0x1a2   :  { %7776 = vmatpush3.bf16.msra.mxu1 %v8426_v21  ;;  %v8466_v21 = vld [vmem:[%s10544_s1 + $0xe08] sm:$0xff]  }
 0x1a3   :  { %6155 = vmatmul.mubr.bf16.vlgmr.msra.gmra.mrb[48].mxu0 %v1510_v24  ;;  %7805 = vmatprep.subr.bf16.mxu1 %v8428_v27  ;;  %v8469_v24 = vld [vmem:[%s10544_s1 + $0xed0] sm:$0xff]   ;;  %v8472_v27 = vld [vmem:[%s10544_s1 + $0xe58] sm:$0xff]  }
 0x1a4   :  { %7784 = vmatpush3.bf16.msra.mxu0 %v8429_v30  ;;  %6234 = vmatprep.mubr.bf16.mxu0 %v1531_v33  ;;  %v8474_v30 = vld [vmem:[%s10544_s1 + $0xe18] sm:$0xff]   ;;  %v8477_v33 = vld [vmem:[%s10544_s1 + $0xee0] sm:$0xff]  }
 0x1a5   :  { %6195 = vmatmul.mubr.bf16.vlgmr.msra.gmra.mrb[48].mxu1 %v1532_v34  ;;  %7785 = vmatprep.subr.bf16.mxu0 %v8431_v35  ;;  %v8478_v34 = vld [vmem:[%s10544_s1 + $0xe20] sm:$0xff]  }
 0x1a6   :  { %7806 = vmatpush3.bf16.msra.mxu1 %v8430_v32  ;;  %6274 = vmatprep.mubr.bf16.mxu1 %v1535_v37  ;;  %v8476_v32 = vld [vmem:[%s10544_s1 + $0xe60] sm:$0xff]   ;;  %v8481_v37 = vld [vmem:[%s10544_s1 + $0xee8] sm:$0xff]  }
 0x1a7   :  { %7807 = vmatprep.subr.bf16.mxu1 %v8432_v36  ;;  %v8479_v35 = vld [vmem:[%s10544_s1 + $0xea0] sm:$0xff]   ;;  %v8480_v36 = vld [vmem:[%s10544_s1 + $0xe68] sm:$0xff]  }
 0x1a8   :  { %7786 = vmatpush3.bf16.msra.mxu0 %v8433_v38  ;;  %v8482_v38 = vld [vmem:[%s10544_s1 + $0xe28] sm:$0xff]  }
 0x1a9   :  { %7787 = vmatprep.subr.bf16.mxu0 %v8435_v40  ;;  %v8484_v40 = vld [vmem:[%s10544_s1 + $0xe70] sm:$0xff]  }
 0x1aa   :  { %7808 = vmatpush3.bf16.msra.mxu1 %v8434_v39  ;;  %v8483_v39 = vld [vmem:[%s10544_s1 + $0xea8] sm:$0xff]  }
 0x1ab   :  { %7809 = vmatprep.subr.bf16.mxu1 %v8436_v42 }
 0x1ac   :  { %7788 = vmatpush3.bf16.msra.mxu0 %v8437_v43  ;;  %v8485_v43 = vld [vmem:[%s10544_s1 + $0xef0] sm:$0xff]  }
 0x1ad   :  { %7789 = vmatprep.subr.bf16.mxu0 %v8439_v45  ;;  %v8486_v45 = vld [vmem:[%s10544_s1 + $0xe30] sm:$0xff]  }
 0x1ae   :  { %7810 = vmatpush3.bf16.msra.mxu1 %v8438_v44 }
 0x1af   :  { %7811 = vmatprep.subr.bf16.mxu1 %v8440_v46 }
 0x1b0   :  { %7790 = vmatpush3.bf16.msra.mxu0 %v8441_v47 }
 0x1b1   :  { %7791 = vmatprep.subr.bf16.mxu0 %v8443_v49  ;;  %v8487_v49 = vld [vmem:[%s10544_s1 + $0xeb0] sm:$0xff]  }
 0x1b2   :  { %7812 = vmatpush3.bf16.msra.mxu1 %v8442_v48 }
 0x1b3   :  { %7813 = vmatprep.subr.bf16.mxu1 %v8444_v50 }
 0x1b4   :  { %7792 = vmatpush3.bf16.msra.mxu0 %v8445_v51 }
 0x1b5   :  { %7793 = vmatprep.subr.bf16.mxu0 %v8447_v53  ;;  %v8489_v53 = vld [vmem:[%s10544_s1 + $0xef8] sm:$0xff]  }
 0x1b6   :  { %7814 = vmatpush3.bf16.msra.mxu1 %v8446_v52  ;;  %v7491_v58 = vpop.f32.mrb[24].mxu0  ;;  %v8488_v52 = vld [vmem:[%s10544_s1 + $0xe78] sm:$0xff]  }
 0x1b7   :  { %v7492_v60 = vpop.f32.mrb[25].mxu0  ;;  %7815 = vmatprep.subr.bf16.mxu1 %v8448_v54 }
 0x1b8   :  { %v7513_v62 = vpop.f32.mrb[24].mxu1  ;;  %v7493_v63 = vadd.f32 %v7492_v60, %v7491_v58  ;;  %v7494_v0 = vpop.f32.mrb[26].mxu0  ;;  %7794 = vmatpush3.bf16.msra.mxu0 %v8449_v55 }
 0x1b9   :  { %v7514_v3 = vpop.f32.mrb[25].mxu1  ;;  %v7495_v4 = vpop.f32.mrb[27].mxu0  ;;  %7795 = vmatprep.subr.bf16.mxu0 %v8451_v57  ;;  %v23_v57 = vld [vmem:[%s10543_s0 + $0x38] sm:$0xff] }
 0x1ba   :  { %v5677_v5 = vadd.f32 %v7493_v63, %v9994_v20  ;;  %v7515_v6 = vadd.f32 %v7514_v3, %v7513_v62  ;;  %v7516_v7 = vpop.f32.mrb[26].mxu1  ;;  %7816 = vmatpush3.bf16.msra.mxu1 %v8450_v56  ;;  %v8465_v20 = vld [vmem:[%s10544_s1 + $0xec8] sm:$0xff]   ;;  %v1543_v60 = vrot.slane %v23_v57, %v8746_v41  ;;  %v8491_v63 = vld [vmem:[%s10544_s1 + $0xeb8] sm:$0xff]   ;;  %v8493_v4 = vld [vmem:[%s10544_s1 + $0xfc0] sm:$0xff]  }
 0x1bb   :  { %v7517_v9 = vpop.f32.mrb[27].mxu1  ;;  %7817 = vmatprep.subr.bf16.mxu1 %v8452_v59  ;;  %v8490_v59 = vld [vmem:[%s10544_s1 + $0xe38] sm:$0xff]  }
 0x1bc   :  { %v10101_v11 = vadd.f32 %v7515_v6, %v5677_v5  ;;  %7796 = vmatpush3.bf16.msra.mxu0 %v8453_v61  ;;  %v1536_v61 = vcombine.high %v23_v57, %v23_v57  ;;  %v1551_v0 = vcombine.high %v1543_v60, %v1543_v60  ;;  %v8494_v6 = vld [vmem:[%s10544_s1 + $0xf00] sm:$0xff]  }
 0x1bd   :  { %7797 = vmatprep.subr.bf16.mxu0 %v8455_v2  ;;  %v8492_v2 = vld [vmem:[%s10544_s1 + $0xf40] sm:$0xff]  }
 0x1be   :  { %7818 = vmatpush3.bf16.msra.mxu1 %v8454_v1  ;;  %v1559_v1 = vrot.slane %v1543_v60, %v8746_v41  ;;  %v10216_v3 = vrot.slane %v1536_v61, %v8746_v41  ;;  %v1573_v5 = vrot.slane %v1551_v0, %v8746_v41  ;;  %v8526_v57 = vld [vmem:[%s10544_s1 + $0x10c0] sm:$0xff]   ;;  %v8529_v61 = vld [vmem:[%s10544_s1 + $0x1048] sm:$0xff]  }
 0x1bf   :  { %7819 = vmatprep.subr.bf16.mxu1 %v8456_v8  ;;  %v8495_v8 = vld [vmem:[%s10544_s1 + $0xf80] sm:$0xff]   ;;  %v8532_v0 = vld [vmem:[%s10544_s1 + $0x1088] sm:$0xff]  }
 0x1c0   :  { %7798 = vmatpush3.bf16.msra.mxu0 %v8457_v10  ;;  %v1552_v7 = vcombine.high %v10216_v3, %v10216_v3  ;;  %v1583_v9 = vcombine.high %v1573_v5, %v1573_v5  ;;  %v1581_v10 = vcombine.high %v1559_v1, %v1559_v1 }
 0x1c1   :  { %7827 = vmatprep.subr.bf16.mxu0 %v8460_v14  ;;  %v8498_v14 = vld [vmem:[%s10544_s1 + $0xf08] sm:$0xff]  }
 0x1c2   :  { %7820 = vmatpush3.bf16.msra.mxu1 %v8458_v12  ;;  %v1580_v12 = vrot.slane %v1552_v7, %v8746_v41  ;;  %v8539_v7 = vld [vmem:[%s10544_s1 + $0x1018] sm:$0xff]  }
 0x1c3   :  { %6235 = vmatmul.mubr.bf16.vlgmr.msra.gmra.mrb[52].mxu0 %v1517_v13  ;;  %7849 = vmatprep.subr.bf16.mxu1 %v8461_v15  ;;  %v8497_v13 = vld [vmem:[%s10544_s1 + $0xfc8] sm:$0xff]  }
 0x1c4   :  { %7828 = vmatpush3.bf16.msra.mxu0 %v8462_v16  ;;  %6314 = vmatprep.mubr.bf16.mxu0 %v1573_v5  ;;  %v1584_v15 = vcombine.high %v1580_v12, %v1580_v12  ;;  %v8499_v16 = vld [vmem:[%s10544_s1 + $0xf88] sm:$0xff]   ;;  %v8537_v5 = vld [vmem:[%s10544_s1 + $0x1058] sm:$0xff]  }
 0x1c5   :  { %6275 = vmatmul.mubr.bf16.vlgmr.msra.gmra.mrb[52].mxu1 %v1533_v18  ;;  %7829 = vmatprep.subr.bf16.mxu0 %v8464_v19  ;;  %v8501_v18 = vld [vmem:[%s10544_s1 + $0xfd0] sm:$0xff]  }
 0x1c6   :  { %7850 = vmatpush3.bf16.msra.mxu1 %v8463_v17  ;;  %6354 = vmatprep.mubr.bf16.mxu1 %v1583_v9  ;;  %v8500_v17 = vld [vmem:[%s10544_s1 + $0xf50] sm:$0xff]   ;;  %v8541_v9 = vld [vmem:[%s10544_s1 + $0x1060] sm:$0xff]  }
 0x1c7   :  { %7851 = vmatprep.subr.bf16.mxu1 %v8465_v20  ;;  %v8502_v19 = vld [vmem:[%s10544_s1 + $0xf10] sm:$0xff]  }
 0x1c8   :  { %7830 = vmatpush3.bf16.msra.mxu0 %v8466_v21  ;;  %v8503_v20 = vld [vmem:[%s10544_s1 + $0xf90] sm:$0xff]   ;;  %v8504_v21 = vld [vmem:[%s10544_s1 + $0xf58] sm:$0xff]  }
 0x1c9   :  { %7831 = vmatprep.subr.bf16.mxu0 %v8468_v23  ;;  %v8506_v23 = vld [vmem:[%s10544_s1 + $0xf18] sm:$0xff]  }
 0x1ca   :  { %7852 = vmatpush3.bf16.msra.mxu1 %v8467_v22  ;;  %v8505_v22 = vld [vmem:[%s10544_s1 + $0xfd8] sm:$0xff]  }
 0x1cb   :  { %7853 = vmatprep.subr.bf16.mxu1 %v8469_v24  ;;  %v8507_v24 = vld [vmem:[%s10544_s1 + $0xf98] sm:$0xff]  }
 0x1cc   :  { %7832 = vmatpush3.bf16.msra.mxu0 %v8470_v25  ;;  %v8508_v25 = vld [vmem:[%s10544_s1 + $0xf60] sm:$0xff]  }
 0x1cd   :  { %7833 = vmatprep.subr.bf16.mxu0 %v8472_v27  ;;  %v8510_v27 = vld [vmem:[%s10544_s1 + $0xf20] sm:$0xff]  }
 0x1ce   :  { %7854 = vmatpush3.bf16.msra.mxu1 %v8471_v26  ;;  %v8509_v26 = vld [vmem:[%s10544_s1 + $0xfe0] sm:$0xff]  }
 0x1cf   :  { %7855 = vmatprep.subr.bf16.mxu1 %v8473_v29  ;;  %v8511_v29 = vld [vmem:[%s10544_s1 + $0xfa0] sm:$0xff]  }
 0x1d0   :  { %7834 = vmatpush3.bf16.msra.mxu0 %v8474_v30  ;;  %v8512_v30 = vld [vmem:[%s10544_s1 + $0xf68] sm:$0xff]  }
 0x1d1   :  { %7835 = vmatprep.subr.bf16.mxu0 %v8476_v32  ;;  %v8514_v32 = vld [vmem:[%s10544_s1 + $0xf28] sm:$0xff]  }
 0x1d2   :  { %7856 = vmatpush3.bf16.msra.mxu1 %v8475_v31  ;;  %v8513_v31 = vld [vmem:[%s10544_s1 + $0xfe8] sm:$0xff]  }
 0x1d3   :  { %7857 = vmatprep.subr.bf16.mxu1 %v8477_v33  ;;  %v8515_v33 = vld [vmem:[%s10544_s1 + $0xfa8] sm:$0xff]  }
 0x1d4   :  { %7836 = vmatpush3.bf16.msra.mxu0 %v8478_v34  ;;  %v8516_v34 = vld [vmem:[%s10544_s1 + $0xf70] sm:$0xff]  }
 0x1d5   :  { %7837 = vmatprep.subr.bf16.mxu0 %v8480_v36  ;;  %v8517_v36 = vld [vmem:[%s10544_s1 + $0xff0] sm:$0xff]  }
 0x1d6   :  { %7858 = vmatpush3.bf16.msra.mxu1 %v8479_v35  ;;  %v7535_v42 = vpop.f32.mrb[28].mxu0 }
 0x1d7   :  { %v7536_v44 = vpop.f32.mrb[29].mxu0  ;;  %7859 = vmatprep.subr.bf16.mxu1 %v8481_v37 }
 0x1d8   :  { %v7557_v46 = vpop.f32.mrb[28].mxu1  ;;  %v7537_v47 = vadd.f32 %v7536_v44, %v7535_v42  ;;  %v7538_v48 = vpop.f32.mrb[30].mxu0  ;;  %7838 = vmatpush3.bf16.msra.mxu0 %v8482_v38  ;;  %v8518_v38 = vld [vmem:[%s10544_s1 + $0xf30] sm:$0xff]   ;;  %v8520_v44 = vld [vmem:[%s10544_s1 + $0xf78] sm:$0xff]  }
 0x1d9   :  { %v7558_v50 = vpop.f32.mrb[29].mxu1  ;;  %v7539_v51 = vpop.f32.mrb[31].mxu0  ;;  %7839 = vmatprep.subr.bf16.mxu0 %v8484_v40 }
 0x1da   :  { %v5757_v54 = vadd.f32 %v7537_v47, %v10101_v11  ;;  %v7559_v55 = vadd.f32 %v7558_v50, %v7557_v46  ;;  %v7560_v56 = vpop.f32.mrb[30].mxu1  ;;  %7860 = vmatpush3.bf16.msra.mxu1 %v8483_v39  ;;  %v8496_v11 = vld [vmem:[%s10544_s1 + $0xf48] sm:$0xff]   ;;  %v8521_v50 = vld [vmem:[%s10544_s1 + $0xff8] sm:$0xff]  }
 0x1db   :  { %v7561_v58 = vpop.f32.mrb[31].mxu1  ;;  %7861 = vmatprep.subr.bf16.mxu1 %v8485_v43  ;;  %v8519_v43 = vld [vmem:[%s10544_s1 + $0xfb0] sm:$0xff]   ;;  %v8525_v56 = vld [vmem:[%s10544_s1 + $0x1040] sm:$0xff]  }
 0x1dc   :  { %v10206_v62 = vadd.f32 %v7559_v55, %v5757_v54  ;;  %7840 = vmatpush3.bf16.msra.mxu0 %v8486_v45  ;;  %v8523_v54 = vld [vmem:[%s10544_s1 + $0xfb8] sm:$0xff]   ;;  %v1566_v55 = vrot.slane %v10216_v3, %v8746_v41  ;;  %v8527_v58 = vld [vmem:[%s10544_s1 + $0x1000] sm:$0xff]   ;;  %v8535_v3 = vld [vmem:[%s10544_s1 + $0x1010] sm:$0xff]  }
 0x1dd   :  { %7841 = vmatprep.subr.bf16.mxu0 %v8488_v52  ;;  %v8522_v52 = vld [vmem:[%s10544_s1 + $0xf38] sm:$0xff]  }
 0x1de   :  { %7862 = vmatpush3.bf16.msra.mxu1 %v8487_v49  ;;  %v1582_v60 = vcombine.high %v1566_v55, %v1566_v55 }
 0x1df   :  { %7863 = vmatprep.subr.bf16.mxu1 %v8489_v53 }
 0x1e0   :  { %7842 = vmatpush3.bf16.msra.mxu0 %v8490_v59  ;;  %v8528_v59 = vld [vmem:[%s10544_s1 + $0x1080] sm:$0xff]  }
 0x1e1   :  { %7871 = vmatprep.subr.bf16.mxu0 %v8492_v2  ;;  %v8534_v2 = vld [vmem:[%s10544_s1 + $0x10d0] sm:$0xff]  }
 0x1e2   :  { %7864 = vmatpush3.bf16.msra.mxu1 %v8491_v63  ;;  %v8531_v63 = vld [vmem:[%s10544_s1 + $0x1008] sm:$0xff]  }
 0x1e3   :  { %6315 = vmatmul.mubr.bf16.vlgmr.msra.gmra.mrb[56].mxu0 %v1559_v1  ;;  %7893 = vmatprep.subr.bf16.mxu1 %v8493_v4  ;;  %v8533_v1 = vld [vmem:[%s10544_s1 + $0x1050] sm:$0xff]  }
 0x1e4   :  { %7872 = vmatpush3.bf16.msra.mxu0 %v8494_v6  ;;  %6394 = vmatprep.mubr.bf16.mxu0 %v1580_v12  ;;  %v8536_v4 = vld [vmem:[%s10544_s1 + $0x1090] sm:$0xff]   ;;  %v8538_v6 = vld [vmem:[%s10544_s1 + $0x10d8] sm:$0xff]   ;;  %v8544_v12 = vld [vmem:[%s10544_s1 + $0x10a0] sm:$0xff]  }
 0x1e5   :  { %6355 = vmatmul.mubr.bf16.vlgmr.msra.gmra.mrb[56].mxu1 %v1581_v10  ;;  %7873 = vmatprep.subr.bf16.mxu0 %v8496_v11  ;;  %v8542_v10 = vld [vmem:[%s10544_s1 + $0x10e0] sm:$0xff]  }
 0x1e6   :  { %7894 = vmatpush3.bf16.msra.mxu1 %v8495_v8  ;;  %6434 = vmatprep.mubr.bf16.mxu1 %v1584_v15  ;;  %v8540_v8 = vld [vmem:[%s10544_s1 + $0x1098] sm:$0xff]   ;;  %v8543_v11 = vld [vmem:[%s10544_s1 + $0x1020] sm:$0xff]   ;;  %v8547_v15 = vld [vmem:[%s10544_s1 + $0x1028] sm:$0xff]  }
 0x1e7   :  { %7895 = vmatprep.subr.bf16.mxu1 %v8497_v13  ;;  %v8545_v13 = vld [vmem:[%s10544_s1 + $0x1068] sm:$0xff]  }
 0x1e8   :  { %7874 = vmatpush3.bf16.msra.mxu0 %v8498_v14  ;;  %v8546_v14 = vld [vmem:[%s10544_s1 + $0x10e8] sm:$0xff]  }
 0x1e9   :  { %7875 = vmatprep.subr.bf16.mxu0 %v8500_v17  ;;  %v8549_v17 = vld [vmem:[%s10544_s1 + $0x1070] sm:$0xff]  }
 0x1ea   :  { %7896 = vmatpush3.bf16.msra.mxu1 %v8499_v16  ;;  %v8548_v16 = vld [vmem:[%s10544_s1 + $0x10a8] sm:$0xff]  }
 0x1eb   :  { %7897 = vmatprep.subr.bf16.mxu1 %v8501_v18 }
 0x1ec   :  { %7876 = vmatpush3.bf16.msra.mxu0 %v8502_v19  ;;  %v8550_v19 = vld [vmem:[%s10544_s1 + $0x10f0] sm:$0xff]  }
 0x1ed   :  { %7877 = vmatprep.subr.bf16.mxu0 %v8504_v21  ;;  %v8551_v21 = vld [vmem:[%s10544_s1 + $0x1030] sm:$0xff]  }
 0x1ee   :  { %7898 = vmatpush3.bf16.msra.mxu1 %v8503_v20 }
 0x1ef   :  { %7899 = vmatprep.subr.bf16.mxu1 %v8505_v22 }
 0x1f0   :  { %7878 = vmatpush3.bf16.msra.mxu0 %v8506_v23 }
 0x1f1   :  { %7879 = vmatprep.subr.bf16.mxu0 %v8508_v25 }
 0x1f2   :  { %7900 = vmatpush3.bf16.msra.mxu1 %v8507_v24 }
 0x1f3   :  { %7901 = vmatprep.subr.bf16.mxu1 %v8509_v26 }
 0x1f4   :  { %7880 = vmatpush3.bf16.msra.mxu0 %v8510_v27  ;;  %v8552_v27 = vld [vmem:[%s10544_s1 + $0x10b0] sm:$0xff]  }
 0x1f5   :  { %7881 = vmatprep.subr.bf16.mxu0 %v8512_v30 }
 0x1f6   :  { %7902 = vmatpush3.bf16.msra.mxu1 %v8511_v29  ;;  %v7579_v35 = vpop.f32.mrb[32].mxu0  ;;  %v8553_v29 = vld [vmem:[%s10544_s1 + $0x1078] sm:$0xff]  }
 0x1f7   :  { %v7580_v37 = vpop.f32.mrb[33].mxu0  ;;  %7903 = vmatprep.subr.bf16.mxu1 %v8513_v31 }
 0x1f8   :  { %v7601_v39 = vpop.f32.mrb[32].mxu1  ;;  %v7581_v40 = vadd.f32 %v7580_v37, %v7579_v35  ;;  %v7582_v42 = vpop.f32.mrb[34].mxu0  ;;  %7882 = vmatpush3.bf16.msra.mxu0 %v8514_v32  ;;  %v24_v35 = vld [vmem:[%s10543_s0 + $0x40] sm:$0xff]  ;;  %v8555_v37 = vld [vmem:[%s10544_s1 + $0x1038] sm:$0xff]  }
 0x1f9   :  { %v7602_v45 = vpop.f32.mrb[33].mxu1  ;;  %v7583_v46 = vpop.f32.mrb[35].mxu0  ;;  %7883 = vmatprep.subr.bf16.mxu0 %v8516_v34  ;;  %v8556_v42 = vld [vmem:[%s10544_s1 + $0x10b8] sm:$0xff]  }
 0x1fa   :  { %v5837_v47 = vadd.f32 %v7581_v40, %v10206_v62  ;;  %v7603_v48 = vadd.f32 %v7602_v45, %v7601_v39  ;;  %v7604_v49 = vpop.f32.mrb[34].mxu1  ;;  %7904 = vmatpush3.bf16.msra.mxu1 %v8515_v33  ;;  %v8530_v62 = vld [vmem:[%s10544_s1 + $0x10c8] sm:$0xff]   ;;  %v8554_v33 = vld [vmem:[%s10544_s1 + $0x10f8] sm:$0xff]   ;;  %v1585_v39 = vcombine.high %v24_v35, %v24_v35  ;;  %v8557_v40 = vld [vmem:[%s10544_s1 + $0x1140] sm:$0xff]  }
 0x1fb   :  { %v7605_v51 = vpop.f32.mrb[35].mxu1  ;;  %7905 = vmatprep.subr.bf16.mxu1 %v8517_v36  ;;  %v8558_v46 = vld [vmem:[%s10544_s1 + $0x11c0] sm:$0xff]  }
 0x1fc   :  { %v10313_v53 = vadd.f32 %v7603_v48, %v5837_v47  ;;  %7884 = vmatpush3.bf16.msra.mxu0 %v8518_v38  ;;  %v1592_v38 = vrot.slane %v24_v35, %v8746_v41  ;;  %v10428_v45 = vrot.slane %v1585_v39, %v8746_v41  ;;  %v8559_v48 = vld [vmem:[%s10544_s1 + $0x1100] sm:$0xff]   ;;  %v8561_v51 = vld [vmem:[%s10544_s1 + $0x1148] sm:$0xff]  }
 0x1fd   :  { %7885 = vmatprep.subr.bf16.mxu0 %v8520_v44 }
 0x1fe   :  { %7906 = vmatpush3.bf16.msra.mxu1 %v8519_v43  ;;  %v1600_v43 = vcombine.high %v1592_v38, %v1592_v38  ;;  %v1608_v44 = vrot.slane %v1592_v38, %v8746_v41  ;;  %v1601_v49 = vcombine.high %v10428_v45, %v10428_v45 }
 0x1ff   :  { %7907 = vmatprep.subr.bf16.mxu1 %v8521_v50 }
 0x200   :  { %7886 = vmatpush3.bf16.msra.mxu0 %v8522_v52  ;;  %v1622_v47 = vrot.slane %v1600_v43, %v8746_v41  ;;  %v1630_v50 = vcombine.high %v1608_v44, %v1608_v44 }
 0x201   :  { %7915 = vmatprep.subr.bf16.mxu0 %v8525_v56  ;;  %v8563_v56 = vld [vmem:[%s10544_s1 + $0x1108] sm:$0xff]  }
 0x202   :  { %7908 = vmatpush3.bf16.msra.mxu1 %v8523_v54  ;;  %v1632_v52 = vcombine.high %v1622_v47, %v1622_v47  ;;  %v1629_v54 = vrot.slane %v1601_v49, %v8746_v41 }
 0x203   :  { %6395 = vmatmul.mubr.bf16.vlgmr.msra.gmra.mrb[60].mxu0 %v1566_v55  ;;  %7937 = vmatprep.subr.bf16.mxu1 %v8526_v57  ;;  %v8562_v55 = vld [vmem:[%s10544_s1 + $0x11c8] sm:$0xff]  }
 0x204   :  { %7916 = vmatpush3.bf16.msra.mxu0 %v8527_v58  ;;  %6474 = vmatprep.mubr.bf16.mxu0 %v1622_v47  ;;  %v1633_v57 = vcombine.high %v1629_v54, %v1629_v54  ;;  %v8565_v58 = vld [vmem:[%s10544_s1 + $0x1150] sm:$0xff]  }
 0x205   :  { %6435 = vmatmul.mubr.bf16.vlgmr.msra.gmra.mrb[60].mxu1 %v1582_v60  ;;  %7917 = vmatprep.subr.bf16.mxu0 %v8529_v61  ;;  %v8566_v60 = vld [vmem:[%s10544_s1 + $0x11d0] sm:$0xff]  }
 0x206   :  { %7938 = vmatpush3.bf16.msra.mxu1 %v8528_v59  ;;  %6514 = vmatprep.mubr.bf16.mxu1 %v1632_v52  ;;  %v8564_v59 = vld [vmem:[%s10544_s1 + $0x1188] sm:$0xff]   ;;  %v8567_v61 = vld [vmem:[%s10544_s1 + $0x1110] sm:$0xff]  }
 0x207   :  { %7939 = vmatprep.subr.bf16.mxu1 %v8530_v62  ;;  %v8569_v62 = vld [vmem:[%s10544_s1 + $0x1158] sm:$0xff]  }
 0x208   :  { %7918 = vmatpush3.bf16.msra.mxu0 %v8531_v63  ;;  %v8568_v63 = vld [vmem:[%s10544_s1 + $0x1190] sm:$0xff]  }
 0x209   :  { %7919 = vmatprep.subr.bf16.mxu0 %v8533_v1  ;;  %v8571_v1 = vld [vmem:[%s10544_s1 + $0x1118] sm:$0xff]  }
 0x20a   :  { %7940 = vmatpush3.bf16.msra.mxu1 %v8532_v0  ;;  %v8570_v0 = vld [vmem:[%s10544_s1 + $0x11d8] sm:$0xff]  }
 0x20b   :  { %7941 = vmatprep.subr.bf16.mxu1 %v8534_v2  ;;  %v8573_v2 = vld [vmem:[%s10544_s1 + $0x1160] sm:$0xff]  }
 0x20c   :  { %7920 = vmatpush3.bf16.msra.mxu0 %v8535_v3  ;;  %v8572_v3 = vld [vmem:[%s10544_s1 + $0x1198] sm:$0xff]  }
 0x20d   :  { %7921 = vmatprep.subr.bf16.mxu0 %v8537_v5  ;;  %v8575_v5 = vld [vmem:[%s10544_s1 + $0x1120] sm:$0xff]  }
 0x20e   :  { %7942 = vmatpush3.bf16.msra.mxu1 %v8536_v4  ;;  %v8574_v4 = vld [vmem:[%s10544_s1 + $0x11e0] sm:$0xff]  }
 0x20f   :  { %7943 = vmatprep.subr.bf16.mxu1 %v8538_v6  ;;  %v8577_v6 = vld [vmem:[%s10544_s1 + $0x1168] sm:$0xff]  }
 0x210   :  { %7922 = vmatpush3.bf16.msra.mxu0 %v8539_v7  ;;  %v8576_v7 = vld [vmem:[%s10544_s1 + $0x11a0] sm:$0xff]  }
 0x211   :  { %7923 = vmatprep.subr.bf16.mxu0 %v8541_v9  ;;  %v8579_v9 = vld [vmem:[%s10544_s1 + $0x1128] sm:$0xff]  }
 0x212   :  { %7944 = vmatpush3.bf16.msra.mxu1 %v8540_v8  ;;  %v8578_v8 = vld [vmem:[%s10544_s1 + $0x11e8] sm:$0xff]  }
 0x213   :  { %7945 = vmatprep.subr.bf16.mxu1 %v8542_v10  ;;  %v8581_v10 = vld [vmem:[%s10544_s1 + $0x1170] sm:$0xff]  }
 0x214   :  { %7924 = vmatpush3.bf16.msra.mxu0 %v8543_v11 }
 0x215   :  { %7925 = vmatprep.subr.bf16.mxu0 %v8545_v13 }
 0x216   :  { %7946 = vmatpush3.bf16.msra.mxu1 %v8544_v12  ;;  %v7623_v18 = vpop.f32.mrb[36].mxu0  ;;  %v8580_v12 = vld [vmem:[%s10544_s1 + $0x11a8] sm:$0xff]  }
 0x217   :  { %v7624_v20 = vpop.f32.mrb[37].mxu0  ;;  %7947 = vmatprep.subr.bf16.mxu1 %v8546_v14  ;;  %v8582_v14 = vld [vmem:[%s10544_s1 + $0x11f0] sm:$0xff]  }
 0x218   :  { %v7645_v22 = vpop.f32.mrb[36].mxu1  ;;  %v7625_v23 = vadd.f32 %v7624_v20, %v7623_v18  ;;  %v7626_v24 = vpop.f32.mrb[38].mxu0  ;;  %7926 = vmatpush3.bf16.msra.mxu0 %v8547_v15  ;;  %v8583_v18 = vld [vmem:[%s10544_s1 + $0x1130] sm:$0xff]  }
 0x219   :  { %v7646_v25 = vpop.f32.mrb[37].mxu1  ;;  %v7627_v26 = vpop.f32.mrb[39].mxu0  ;;  %7927 = vmatprep.subr.bf16.mxu0 %v8549_v17 }
 0x21a   :  { %v5917_v30 = vadd.f32 %v7625_v23, %v10313_v53  ;;  %v7647_v31 = vadd.f32 %v7646_v25, %v7645_v22  ;;  %v7648_v32 = vpop.f32.mrb[38].mxu1  ;;  %7948 = vmatpush3.bf16.msra.mxu1 %v8548_v16  ;;  %v8560_v53 = vld [vmem:[%s10544_s1 + $0x1180] sm:$0xff]   ;;  %v8584_v25 = vld [vmem:[%s10544_s1 + $0x11b0] sm:$0xff]  }
 0x21b   :  { %v7649_v34 = vpop.f32.mrb[39].mxu1  ;;  %7949 = vmatprep.subr.bf16.mxu1 %v8550_v19  ;;  %v8585_v19 = vld [vmem:[%s10544_s1 + $0x1178] sm:$0xff]  }
 0x21c   :  { %v10414_v36 = vadd.f32 %v7647_v31, %v5917_v30  ;;  %7928 = vmatpush3.bf16.msra.mxu0 %v8551_v21  ;;  %v8587_v30 = vld [vmem:[%s10544_s1 + $0x1138] sm:$0xff]  }
 0x21d   :  { %7929 = vmatprep.subr.bf16.mxu0 %v8553_v29 }
 0x21e   :  { %7950 = vmatpush3.bf16.msra.mxu1 %v8552_v27  ;;  %v8586_v27 = vld [vmem:[%s10544_s1 + $0x11f8] sm:$0xff]  }
 0x21f   :  { %7951 = vmatprep.subr.bf16.mxu1 %v8554_v33 }
 0x220   :  { %7930 = vmatpush3.bf16.msra.mxu0 %v8555_v37 }
 0x221   :  { %7959 = vmatprep.subr.bf16.mxu0 %v8557_v40 }
 0x222   :  { %7952 = vmatpush3.bf16.msra.mxu1 %v8556_v42 }
 0x223   :  { %6475 = vmatmul.mubr.bf16.vlgmr.msra.gmra.mrb[64].mxu0 %v1608_v44  ;;  %7981 = vmatprep.subr.bf16.mxu1 %v8558_v46 }
 0x224   :  { %7960 = vmatpush3.bf16.msra.mxu0 %v8559_v48  ;;  %6554 = vmatprep.mubr.bf16.mxu0 %v1629_v54 }
 0x225   :  { %6515 = vmatmul.mubr.bf16.vlgmr.msra.gmra.mrb[64].mxu1 %v1630_v50  ;;  %7961 = vmatprep.subr.bf16.mxu0 %v8561_v51 }
 0x226   :  { %7982 = vmatpush3.bf16.msra.mxu1 %v8560_v53  ;;  %6594 = vmatprep.mubr.bf16.mxu1 %v1633_v57 }
 0x227   :  { %7983 = vmatprep.subr.bf16.mxu1 %v8562_v55 }
 0x228   :  { %7962 = vmatpush3.bf16.msra.mxu0 %v8563_v56 }
 0x229   :  { %7963 = vmatprep.subr.bf16.mxu0 %v8565_v58 }
 0x22a   :  { %7984 = vmatpush3.bf16.msra.mxu1 %v8564_v59 }
 0x22b   :  { %7985 = vmatprep.subr.bf16.mxu1 %v8566_v60 }
 0x22c   :  { %7964 = vmatpush3.bf16.msra.mxu0 %v8567_v61 }
 0x22d   :  { %7965 = vmatprep.subr.bf16.mxu0 %v8569_v62 }
 0x22e   :  { %7986 = vmatpush3.bf16.msra.mxu1 %v8568_v63 }
 0x22f   :  { %7987 = vmatprep.subr.bf16.mxu1 %v8570_v0 }
 0x230   :  { %7966 = vmatpush3.bf16.msra.mxu0 %v8571_v1 }
 0x231   :  { %7967 = vmatprep.subr.bf16.mxu0 %v8573_v2 }
 0x232   :  { %7988 = vmatpush3.bf16.msra.mxu1 %v8572_v3 }
 0x233   :  { %7989 = vmatprep.subr.bf16.mxu1 %v8574_v4 }
 0x234   :  { %7968 = vmatpush3.bf16.msra.mxu0 %v8575_v5 }
 0x235   :  { %7969 = vmatprep.subr.bf16.mxu0 %v8577_v6 }
 0x236   :  { %7990 = vmatpush3.bf16.msra.mxu1 %v8576_v7  ;;  %v7667_v11 = vpop.f32.mrb[40].mxu0 }
 0x237   :  { %v7668_v13 = vpop.f32.mrb[41].mxu0  ;;  %7991 = vmatprep.subr.bf16.mxu1 %v8578_v8 }
 0x238   :  { %v7689_v15 = vpop.f32.mrb[40].mxu1  ;;  %v7669_v16 = vadd.f32 %v7668_v13, %v7667_v11  ;;  %v7670_v17 = vpop.f32.mrb[42].mxu0  ;;  %7970 = vmatpush3.bf16.msra.mxu0 %v8579_v9 }
 0x239   :  { %v7690_v20 = vpop.f32.mrb[41].mxu1  ;;  %v7671_v21 = vpop.f32.mrb[43].mxu0  ;;  %7971 = vmatprep.subr.bf16.mxu0 %v8581_v10 }
 0x23a   :  { %v5997_v22 = vadd.f32 %v7669_v16, %v10414_v36  ;;  %v7691_v23 = vadd.f32 %v7690_v20, %v7689_v15  ;;  %v7692_v24 = vpop.f32.mrb[42].mxu1  ;;  %7992 = vmatpush3.bf16.msra.mxu1 %v8580_v12 }
 0x23b   :  { %v7693_v26 = vpop.f32.mrb[43].mxu1  ;;  %7993 = vmatprep.subr.bf16.mxu1 %v8582_v14 }
 0x23c   :  { %v6037_v29 = vadd.f32 %v7691_v23, %v5997_v22  ;;  %7972 = vmatpush3.bf16.msra.mxu0 %v8583_v18 }
 0x23d   :  { %8 = vsyncpa [#allocation3], 0  ;;  %7973 = vmatprep.subr.bf16.mxu0 %v8585_v19  ;;  %v1615_v31 = vrot.slane %v10428_v45, %v8746_v41  ;;  %v8588_v32 = vld [vmem:[%s10544_s1 + $0x11b8] sm:$0xff]   ;;  %vm6606_vm1 = vcmask 1041408   ;;  %s8619_s1 = smov [#allocation2]  }
 0x23e   :  { %7994 = vmatpush3.bf16.msra.mxu1 %v8584_v25  ;;  %s6626_s23 = sshll.u32 %s8619_s1, 4  ;;  %s6627_s23 = int_to_ptr.vmem [resolvable:$true] %s6626_s23 }
 0x23f   :  { %7995 = vmatprep.subr.bf16.mxu1 %v8586_v27  ;;  %v1631_v33 = vcombine.high %v1615_v31, %v1615_v31  ;;  %s8594_s24 = scalar_lea.vmem %s6627_s23, 32  ;;  %p8599_p1 = scmp.lt.s32.totalorder %s6627_s23, %s6627_s23 }
 0x240   :  { %7974 = vmatpush3.bf16.msra.mxu0 %v8587_v30  ;;  %p8595_p0 = scmp.ne.s32.totalorder %s6627_s23, %s8594_s24  ;;  %p8600_p2 = scmp.lt.s32.totalorder %s8594_s24, %s8594_s24 }
 0x242   :  { %7996 = vmatpush3.bf16.msra.mxu1 %v8588_v32  ;;  %p8601_p3 = por %p8600_p2, %p8599_p1 }
 0x243   :  { %6555 = vmatmul.mubr.bf16.vlgmr.msra.gmra.mrb[68].mxu0 %v1615_v31 }
 0x244   :  { %p8602_p4 = pnand %p8601_p3, %p8595_p0 }
 0x245   :  { %6595 = vmatmul.mubr.bf16.vlgmr.msra.gmra.mrb[68].mxu1 %v1631_v33 }
 0x256   :  { %v7711_v34 = vpop.f32.mrb[44].mxu0 }
 0x257   :  { %v7712_v35 = vpop.f32.mrb[45].mxu0 }
 0x258   :  { %v7733_v36 = vpop.f32.mrb[44].mxu1  ;;  %v7713_v37 = vadd.f32 %v7712_v35, %v7711_v34  ;;  %v7714_v38 = vpop.f32.mrb[46].mxu0 }
 0x259   :  { %v7734_v39 = vpop.f32.mrb[45].mxu1  ;;  %v7715_v40 = vpop.f32.mrb[47].mxu0 }
 0x25a   :  { %v6077_v42 = vadd.f32 %v7713_v37, %v6037_v29  ;;  %v7735_v41 = vadd.f32 %v7734_v39, %v7733_v36  ;;  %v7736_v43 = vpop.f32.mrb[46].mxu1 }
 0x25b   :  { %v7737_v44 = vpop.f32.mrb[47].mxu1 }
 0x25c   :  { %v6117_v45 = vadd.f32 %v7735_v41, %v6077_v42 }
 0x276   :  { %v7755_v46 = vpop.f32.mrb[48].mxu0 }
 0x277   :  { %v7756_v47 = vpop.f32.mrb[49].mxu0 }
 0x278   :  { %v7777_v48 = vpop.f32.mrb[48].mxu1  ;;  %v7757_v49 = vadd.f32 %v7756_v47, %v7755_v46  ;;  %v7758_v50 = vpop.f32.mrb[50].mxu0 }
 0x279   :  { %v7778_v51 = vpop.f32.mrb[49].mxu1  ;;  %v7759_v52 = vpop.f32.mrb[51].mxu0 }
 0x27a   :  { %v6157_v53 = vadd.f32 %v7757_v49, %v6117_v45  ;;  %v7779_v54 = vadd.f32 %v7778_v51, %v7777_v48  ;;  %v7780_v55 = vpop.f32.mrb[50].mxu1  ;;  %v6603_v45 = vand.u32 127, %v1197_v28 }
 0x27b   :  { %v7781_v56 = vpop.f32.mrb[51].mxu1 }
 0x27c   :  { %v6197_v57 = vadd.f32 %v7779_v54, %v6157_v53  ;;  %vm6604_vm0 = vcmp.lt.s32.totalorder %v6603_v45, 10 }
 0x296   :  { %v7799_v58 = vpop.f32.mrb[52].mxu0 }
 0x297   :  { %v7800_v59 = vpop.f32.mrb[53].mxu0 }
 0x298   :  { %v7821_v60 = vpop.f32.mrb[52].mxu1  ;;  %v7801_v61 = vadd.f32 %v7800_v59, %v7799_v58  ;;  %v7802_v62 = vpop.f32.mrb[54].mxu0 }
 0x299   :  { %v7822_v63 = vpop.f32.mrb[53].mxu1  ;;  %v7803_v0 = vpop.f32.mrb[55].mxu0 }
 0x29a   :  { %v6237_v1 = vadd.f32 %v7801_v61, %v6197_v57  ;;  %v7823_v2 = vadd.f32 %v7822_v63, %v7821_v60  ;;  %v7824_v3 = vpop.f32.mrb[54].mxu1 }
 0x29b   :  { %v7825_v4 = vpop.f32.mrb[55].mxu1 }
 0x29c   :  { %v6277_v5 = vadd.f32 %v7823_v2, %v6237_v1 }
 0x2b6   :  { %v7843_v6 = vpop.f32.mrb[56].mxu0 }
 0x2b7   :  { %v7844_v7 = vpop.f32.mrb[57].mxu0 }
 0x2b8   :  { %v7865_v8 = vpop.f32.mrb[56].mxu1  ;;  %v7845_v9 = vadd.f32 %v7844_v7, %v7843_v6  ;;  %v7846_v10 = vpop.f32.mrb[58].mxu0 }
 0x2b9   :  { %v7866_v11 = vpop.f32.mrb[57].mxu1  ;;  %v7847_v12 = vpop.f32.mrb[59].mxu0 }
 0x2ba   :  { %v6317_v13 = vadd.f32 %v7845_v9, %v6277_v5  ;;  %v7867_v14 = vadd.f32 %v7866_v11, %v7865_v8  ;;  %v7868_v15 = vpop.f32.mrb[58].mxu1 }
 0x2bb   :  { %v7869_v16 = vpop.f32.mrb[59].mxu1 }
 0x2bc   :  { %v6357_v17 = vadd.f32 %v7867_v14, %v6317_v13 }
 0x2d6   :  { %v7887_v18 = vpop.f32.mrb[60].mxu0 }
 0x2d7   :  { %v7888_v19 = vpop.f32.mrb[61].mxu0 }
 0x2d8   :  { %v7909_v20 = vpop.f32.mrb[60].mxu1  ;;  %v7889_v21 = vadd.f32 %v7888_v19, %v7887_v18  ;;  %v7890_v22 = vpop.f32.mrb[62].mxu0 }
 0x2d9   :  { %v7910_v23 = vpop.f32.mrb[61].mxu1  ;;  %v7891_v24 = vpop.f32.mrb[63].mxu0 }
 0x2da   :  { %v6397_v25 = vadd.f32 %v7889_v21, %v6357_v17  ;;  %v7911_v26 = vadd.f32 %v7910_v23, %v7909_v20  ;;  %v7912_v27 = vpop.f32.mrb[62].mxu1 }
 0x2db   :  { %v7913_v29 = vpop.f32.mrb[63].mxu1 }
 0x2dc   :  { %v6437_v30 = vadd.f32 %v7911_v26, %v6397_v25 }
 0x2f6   :  { %v7931_v31 = vpop.f32.mrb[64].mxu0 }
 0x2f7   :  { %v7932_v32 = vpop.f32.mrb[65].mxu0 }
 0x2f8   :  { %v7953_v33 = vpop.f32.mrb[64].mxu1  ;;  %v7933_v34 = vadd.f32 %v7932_v32, %v7931_v31  ;;  %v7934_v35 = vpop.f32.mrb[66].mxu0 }
 0x2f9   :  { %v7954_v36 = vpop.f32.mrb[65].mxu1  ;;  %v7935_v37 = vpop.f32.mrb[67].mxu0 }
 0x2fa   :  { %v6477_v38 = vadd.f32 %v7933_v34, %v6437_v30  ;;  %v7955_v39 = vadd.f32 %v7954_v36, %v7953_v33  ;;  %v7956_v40 = vpop.f32.mrb[66].mxu1 }
 0x2fb   :  { %v7957_v42 = vpop.f32.mrb[67].mxu1 }
 0x2fc   :  { %v6517_v41 = vadd.f32 %v7955_v39, %v6477_v38 }
 0x316   :  { %v7975_v43 = vpop.f32.mrb[68].mxu0 }
 0x317   :  { %v7976_v44 = vpop.f32.mrb[69].mxu0 }
 0x318   :  { %v7997_v46 = vpop.f32.mrb[68].mxu1  ;;  %v7977_v47 = vadd.f32 %v7976_v44, %v7975_v43  ;;  %v7978_v48 = vpop.f32.mrb[70].mxu0 }
 0x319   :  { %v7998_v49 = vpop.f32.mrb[69].mxu1  ;;  %v7979_v50 = vpop.f32.mrb[71].mxu0 }
 0x31a   :  { %v6557_v51 = vadd.f32 %v7977_v47, %v6517_v41  ;;  %v7999_v52 = vadd.f32 %v7998_v49, %v7997_v46  ;;  %v8000_v53 = vpop.f32.mrb[70].mxu1 }
 0x31b   :  { %v8001_v54 = vpop.f32.mrb[71].mxu1 }
 0x31c   :  { %v6597_v55 = vadd.f32 %v7999_v52, %v6557_v51 }
 0x31e   :  { %v6605_v56 = vsel %vm6604_vm0, %v6597_v55, -1e+30 }
 0x31f   :  { %v6607_v57 = vsel %vm6606_vm1, %v6605_v56, -inf }
 0x320   :  { %6608 = vmax.xlane.f32.xlu0 %v6607_v57 }
 0x3ad   :  { %v6609_v58 = vpop.xlane.xlu0 %6608 }
 0x3ae   :  { %v6610_v59 = vsub.f32 %v6605_v56, %v6609_v58 }
 0x3b0   :  { %v6611_v60 = vmul.f32 1.442695, %v6610_v59 }
 0x3b2   :  { %8590 = vpow2.f32 %v6611_v60 }
 0x3bc   :  { %v8591_v28 = vpop.eup %8590 }
 0x3bd   :  { %v6613_v61 = vsel %vm6606_vm1, %v8591_v28, 0.0 }
 0x3be   :  { %6614 = vadd.xlane.f32.xlu0 %v6613_v61 }
 0x44b   :  { %v6615_v62 = vpop.xlane.xlu0 %6614 }
 0x44c   :  { %8592 = vlog2.f32 %v6615_v62 }
 0x456   :  { %v8593_v63 = vpop.eup %8592 }
 0x457   :  { %v6617_v0 = vmul.f32 0.6931472, %v8593_v63 }
 0x459   :  { %v6618_v1 = vsub.f32 %v6610_v59, %v6617_v0 }
 0x45b   :  { %6619 = vst [vmem:[#allocation2] sm:$0x3] %v6618_v1 }
 0x45c   :  { %8605 = shalt.err (!%p8602_p4)
}
 0x45d   :  { %s8606_s27 = scalar_lea.hbm %s10546_s3, 32 }
 0x45e   :  { %p8607_p5 = scmp.ne.s32.totalorder %s10546_s3, %s8606_s27  ;;  %p8610_p6 = scmp.lt.u32.totalorder %s8606_s27, %s10546_s3 }
 0x460   :  { %p8612_p7 = pnand %p8610_p6, %p8607_p5 }
 0x462   :  { %8615 = shalt.err (!%p8612_p7)
}
 0x463   :  { %6629 = dma.vmem_to_hbm [thread:$0]  %s6627_s23, 32, %s10546_s3, [#allocation3]  }
 0x464   :  { %8616 = dma.done.wait [#allocation3], 32  }
 0x465   :  { %8617 = vsyncadd [#allocation3], 4294967264 }
 0x466   :  { %6633 = vsyncpa [#allocation3], 1 }

// kernel: forward.2
= control target key start
LH: loop header
LB: loop body
LE: loop exit
PB: predicated region body
PF: predicated region fallthrough
CT: control target
= control target key end

     0   :  { %10 = vsyncpa [#allocation7], 0  ;;  %s10919_s0 = inlined_call_operand.vmem [shape: bf16[1664,9], index: 0, kind: input, shape index: {}]   ;;  %s10920_s1 = inlined_call_operand.hbm [shape: bf16[9,32], index: 1, kind: input, shape index: {}]   ;;  %s10921_s2 = inlined_call_operand.hbm [shape: f32[1,32], index: 2, kind: input, shape index: {}]   ;;  %s10922_s3 = inlined_call_operand.vmem [shape: bf16[288,64], index: 3, kind: input, shape index: {}]   ;;  %s10923_s4 = inlined_call_operand.hbm [shape: f32[1,64], index: 4, kind: input, shape index: {}]   ;;  %s10924_s5 = inlined_call_operand.vmem [shape: bf16[2,144,64], index: 5, kind: output, shape index: {}]  }
   0x1   :  { %11 = vsyncpa [#allocation9], 0  ;;  %s8220_s18 = smov 0  }
   0x2 LB: > { %s8179_s19 = smov [#allocation8]   ;;  %s8226_s21 = sadd.s32 4294967295, %s8177_s18   ;;  %s8177_s18 = sphi %s8220_s18, %s17_s18  }
   0x3   : > { %s184_s20 = sshll.u32 %s8179_s19, 4  ;;  %p7360_p0 = scmp.ge.s32.totalorder %s8177_s18, 1  ;;  %s185_s20 = int_to_ptr.vmem [resolvable:$true] %s184_s20 }
   0x4   : > { %p158_p1 = scmp.lt.s32.totalorder %s8177_s18, 3  ;;  %p10925_p2 = scmp.eq.s32.totalorder %s8226_s21, 0 }
   0x5   : > { %s8180_s23 = smov [#allocation6]   ;;  %s8181_s26 = smov [#allocation10]  }
   0x6   : > { %p8231_p3 = pnand %p7360_p0, %p158_p1  ;;  %s170_s24 = sshll.u32 %s8180_s23, 4  ;;  %s8243_s24 = int_to_ptr.vmem [resolvable:$true] %s170_s24 }
   0x7   : > { %s198_s27 = sshll.u32 %s8181_s26, 4  ;;  %s8079_s30 = scalar_lea.hbm %s10921_s2, 16  ;;  %s8245_s27 = int_to_ptr.vmem [resolvable:$true] %s198_s27 }
   0x8   : > { %s10927_s22 = scalar_select %p8231_p3, 1, 0 }
   0x9   : > { %p7964_p4 = pneg %p8231_p3  ;;  %p8080_p6 = scmp.ne.s32.totalorder %s10921_s2, %s8079_s30 }
   0xa   : > { %p8086_p10 = scmp.lt.u32.totalorder %s8079_s30, %s10921_s2 }
   0xb   : > { %p8239_p5 = pnand %p10925_p2, %p7964_p4 }
   0xd   : > { %p8255_p7 = pneg %p8239_p5 }
   0xf   : > { %p8082_p8 = pnand %p8255_p7, %p8080_p6 }
  0x11   : > { %p8083_p9 = pneg %p8082_p8 }
  0x13   : > { %p8088_p11 = pnand %p8086_p10, %p8083_p9 }
  0x15   : > { %8091 = shalt.err (!%p8088_p11)
}
  0x16   : > { %s8092_s11 = scalar_lea.vmem %s185_s20, 16  ;;  %s8099_s12 = scalar_lea.vmem %s185_s20, 32 }
  0x17   : > { %p8093_p12 = scmp.ne.s32.totalorder %s185_s20, %s8092_s11  ;;  %p8100_p1 = scmp.lt.s32.totalorder %s185_s20, %s185_s20 }
  0x18   : > { %p8101_p4 = scmp.lt.s32.totalorder %s8099_s12, %s8092_s11 }
  0x19   : > { %p8095_p13 = pnand %p8093_p12, %p8255_p7 }
  0x1a   : > { %p8102_p2 = por %p8101_p4, %p8100_p1 }
  0x1b   : > { %p8096_p0 = pneg %p8095_p13 }
  0x1d   : > { %p8103_p3 = pnand %p8102_p2, %p8096_p0 }
  0x1f   : > { %8106 = shalt.err (!%p8103_p3)
}
  0x20   : > { %7970 = dma.hbm_to_vmem [thread:$0]  (!%p8239_p5), %s10921_s2, 16, %s185_s20, [#allocation9]  }
  0x21   : > { %s8107_s17 = scalar_lea.hbm %s10920_s1, 128 }
  0x22   : > { %p8108_p6 = scmp.ne.s32.totalorder %s10920_s1, %s8107_s17  ;;  %p8114_p2 = scmp.lt.u32.totalorder %s8107_s17, %s10920_s1 }
  0x24   : > { %p8110_p8 = pnand %p8108_p6, %p8255_p7 }
  0x26   : > { %p8111_p9 = pneg %p8110_p8 }
  0x28   : > { %p8116_p3 = pnand %p8114_p2, %p8111_p9 }
  0x2a   : > { %8119 = shalt.err (!%p8116_p3)
}
  0x2b   : > { %s8120_s20 = scalar_lea.vmem %s8243_s24, 128  ;;  %p8128_p13 = scmp.lt.s32.totalorder %s8243_s24, %s8243_s24 }
  0x2c   : > { %p8121_p10 = scmp.ne.s32.totalorder %s8243_s24, %s8120_s20  ;;  %p8129_p0 = scmp.lt.s32.totalorder %s8120_s20, %s8120_s20 }
  0x2e   : > { %p8123_p11 = pnand %p8121_p10, %p8255_p7  ;;  %p8130_p1 = por %p8129_p0, %p8128_p13 }
  0x30   : > { %p8124_p12 = pneg %p8123_p11 }
  0x32   : > { %p8131_p4 = pnand %p8130_p1, %p8124_p12 }
  0x34   : > { %8134 = shalt.err (!%p8131_p4)
}
  0x35   : > { %s8182_s29 = smov 64   ;;  %s8183_s30 = smov 4  }
  0x36   : > { %7967 = dma.hbm_to_vmem [thread:$0]  (!%p8239_p5), %s10920_s1, 128, %s8243_s24, [#allocation7], %s8182_s29, %s8182_s29, %s8183_s30  }
  0x37   : > { %s8135_s11 = scalar_lea.hbm %s10923_s4, 16 }
  0x38   : > { %p8136_p6 = scmp.ne.s32.totalorder %s10923_s4, %s8135_s11  ;;  %p8142_p2 = scmp.lt.u32.totalorder %s8135_s11, %s10923_s4 }
  0x3a   : > { %p8138_p8 = pnand %p8136_p6, %p8255_p7 }
  0x3c   : > { %p8139_p9 = pneg %p8138_p8 }
  0x3e   : > { %p8144_p3 = pnand %p8142_p2, %p8139_p9 }
  0x40   : > { %8147 = shalt.err (!%p8144_p3)
}
  0x41   : > { %s8148_s24 = scalar_lea.vmem %s8245_s27, 16  ;;  %s8155_s16 = scalar_lea.vmem %s8245_s27, 32 }
  0x42   : > { %p8149_p10 = scmp.ne.s32.totalorder %s8245_s27, %s8148_s24  ;;  %p8156_p13 = scmp.lt.s32.totalorder %s8245_s27, %s8245_s27 }
  0x43   : > { %p8157_p0 = scmp.lt.s32.totalorder %s8155_s16, %s8148_s24 }
  0x44   : > { %p8151_p11 = pnand %p8149_p10, %p8255_p7 }
  0x45   : > { %p8158_p1 = por %p8157_p0, %p8156_p13 }
  0x46   : > { %p8152_p12 = pneg %p8151_p11 }
  0x48   : > { %p8159_p4 = pnand %p8158_p1, %p8152_p12 }
  0x4a   : > { %8162 = shalt.err (!%p8159_p4)
}
  0x4b   : > { %7973 = dma.hbm_to_vmem [thread:$0]  (!%p8239_p5), %s10923_s4, 16, %s8245_s27, [#allocation9]  }
  0x4c   : > { %p10930_p6 = scmp.ne.s32.totalorder %s10927_s22, 0 }
  0x4e   : > { %220 = sbr.rel (%p10930_p6) target bundleno = 1309 (0x51d), region = 40 }
  0x55   : > { %p10931_p7 = scmp.eq.s32.totalorder %s8226_s21, 0 }
  0x57   : > { %8168 = dma.done.wait (%p10931_p7), [#allocation7], 128   ;;  %p10932_p8 = pmov %p10931_p7 }
  0x58   : > { %p10933_p9 = pmov %p10931_p7 }
  0x59   : > { %8170 = vsyncadd (%p10932_p8), [#allocation7], 4294967168 }
  0x5a   : > { %8172 = dma.done.wait (%p10933_p9), [#allocation9], 32   ;;  %p10934_p2 = pmov %p10931_p7 }
  0x5b   : > { %vm803_vm0 = vcmask 1043456   ;;  %s256_s25 = smul.u32 104, %s8226_s21  ;;  %vm804_vm1 = vcmask 1044480   ;;  %v8184_v0 = vmov 65535   ;;  %vm646_vm2 = vcmask 72704   ;;  %v8038_v53 = vld [vmem:[%s10922_s3] sm:$0xff]  }
  0x5c   : > { %8174 = vsyncadd (%p10934_p2), [#allocation9], 4294967264  ;;  %v805_v1 = vsel %vm803_vm0, 4294967295, %v8184_v0  ;;  %v7999_v3 = vld [vmem:[#allocation6] sm:$0x1f]   ;;  %v8185_v49 = vmov 0  }
  0x5d   : > { %p257_p3 = scmp.lt.s32.totalorder %s256_s25, 207  ;;  %v806_v2 = vsel %vm804_vm1, %v805_v1, 0  ;;  %v8406_v41 = vld [vmem:[#allocation8] ss:$0 sm:$0xff]  ;;  %7919 = vmatprep.subr.bf16.mxu1 %v8185_v49  ;;  %vm1571_vm4 = vcmask 261120   ;;  %v8039_v61 = vld [vmem:[%s10922_s3 + $0x8] sm:$0xff]  }
  0x5e   : > { %v808_v5 = vand.u32 %v7999_v3, %v806_v2  ;;  %7935 = vmatpush1.bf16.msra.mxu1 %v8038_v53  ;;  %s8186_s10 = smov 32   ;;  %s8187_s13 = smov 64  }
  0x5f   : > { %s10974_s25 = smov (!%p257_p3, %s256_s25), 207  ;;  %7920 = vmatprep.subr.bf16.mxu1 %v8185_v49  ;;  %p262_p5 = scmp.lt.s32.totalorder %s8226_s21, 1 }
  0x60   : > { %s7369_s22 = sshll.u32 %s10974_s25, 2  ;;  %7705 = vmatprep.subr.bf16.mxu0 %v808_v5  ;;  %s8188_s25 = smov 96  }
  0x61   : > { %s8332_s23 = scalar_lea.vmem %s10919_s0, %s7369_s22  ;;  %7706 = vmatpush3.bf16.msra.mxu0 %v808_v5  ;;  %s10976_s21 = smov (!%p262_p5, %s8226_s21), 1 }
  0x62   : > { %v8000_v4 = vld [vmem:[%s8332_s23] sm:$0xff]   ;;  %v8001_v6 = vld [vmem:[%s8332_s23 + $0x8] sm:$0xff]   ;;  %v8002_v7 = vld [vmem:[%s8332_s23 + $0x10] sm:$0xff]   ;;  %5271 = vmatprep.subr.bf16.mxu0 %v8185_v49  ;;  %7936 = vmatpush1.bf16.msra.mxu1 %v8039_v61  ;;  %s7951_s22 = smul.u32 72, %s10976_s21 }
  0x63   : > { %7707 = vmatprep.mubr.msk.bf16.mxu0 %vm646_vm2, %v8000_v4  ;;  %v8003_v8 = vld [vmem:[%s8332_s23 + $0x18] sm:$0xff]   ;;  %v8004_v9 = vld [vmem:[%s8332_s23 + $0x20] sm:$0xff]   ;;  %v8005_v10 = vld [vmem:[%s8332_s23 + $0x28] sm:$0xff]   ;;  %7921 = vmatprep.subr.bf16.mxu1 %v8185_v49 }
  0x64   : > { %7708 = vmatmul.mubr.msk.bf16.vlgmr.msra.gmra.mrb[0].mxu0 %vm646_vm2, %v8001_v6  ;;  %v8006_v11 = vld [vmem:[%s8332_s23 + $0x30] sm:$0xff]   ;;  %v8007_v12 = vld [vmem:[%s8332_s23 + $0x38] sm:$0xff]   ;;  %v8008_v13 = vld [vmem:[%s8332_s23 + $0x40] sm:$0xff]   ;;  %s9943_s8 = scalar_lea.vmem %s10924_s5, %s7951_s22 }
  0x65   : > { %7711 = vmatprep.mubr.msk.bf16.mxu0 %vm646_vm2, %v8002_v7  ;;  %v8009_v14 = vld [vmem:[%s8332_s23 + $0x48] sm:$0xff]   ;;  %v8010_v15 = vld [vmem:[%s8332_s23 + $0x50] sm:$0xff]   ;;  %v8011_v16 = vld [vmem:[%s8332_s23 + $0x58] sm:$0xff]   ;;  %5272 = vmatpush1.bf16.msra.mxu0 %v8038_v53 }
  0x66   : > { %v8012_v17 = vld [vmem:[%s8332_s23 + $0x60] sm:$0xff]   ;;  %v8013_v18 = vld [vmem:[%s8332_s23 + $0x68] sm:$0xff]   ;;  %v8014_v19 = vld [vmem:[%s8332_s23 + $0x70] sm:$0xff]   ;;  %5273 = vmatprep.subr.bf16.mxu0 %v8185_v49 }
  0x67   : > { %v8015_v20 = vld [vmem:[%s8332_s23 + $0x78] sm:$0xff]   ;;  %v8016_v21 = vld [vmem:[%s8332_s23 + $0x80] sm:$0xff]   ;;  %v8017_v22 = vld [vmem:[%s8332_s23 + $0x88] sm:$0xff]  }
  0x68   : > { %v8018_v23 = vld [vmem:[%s8332_s23 + $0x90] sm:$0xff]   ;;  %v8019_v24 = vld [vmem:[%s8332_s23 + $0x98] sm:$0xff]   ;;  %v8020_v25 = vld [vmem:[%s8332_s23 + $0xa0] sm:$0xff]  }
  0x69   : > { %v8021_v26 = vld [vmem:[%s8332_s23 + $0xa8] sm:$0xff]   ;;  %v8022_v27 = vld [vmem:[%s8332_s23 + $0xb0] sm:$0xff]   ;;  %v8023_v28 = vld [vmem:[%s8332_s23 + $0xb8] sm:$0xff]   ;;  %5274 = vmatpush1.bf16.msra.mxu0 %v8039_v61 }
  0x6a   : > { %v8024_v29 = vld [vmem:[%s8332_s23 + $0xc0] sm:$0xff]   ;;  %v8025_v30 = vld [vmem:[%s8332_s23 + $0xc8] sm:$0xff]   ;;  %v8026_v31 = vld [vmem:[%s8332_s23 + $0xd0] sm:$0xff]   ;;  %5275 = vmatprep.subr.bf16.mxu0 %v8185_v49 }
  0x6b   : > { %v8027_v32 = vld [vmem:[%s8332_s23 + $0xd8] sm:$0xff]   ;;  %v8028_v33 = vld [vmem:[%s8332_s23 + $0xe0] sm:$0xff]   ;;  %v8029_v34 = vld [vmem:[%s8332_s23 + $0xe8] sm:$0xff]  }
  0x6c   : > { %7712 = vmatmul.mubr.msk.bf16.gmra.mrb[4].mxu0 %vm646_vm2, %v8003_v8  ;;  %v8030_v35 = vld [vmem:[%s8332_s23 + $0xf0] sm:$0xff]   ;;  %v8031_v36 = vld [vmem:[%s8332_s23 + $0xf8] sm:$0xff]   ;;  %v8032_v37 = vld [vmem:[%s8332_s23 + $0x100] sm:$0xff]  }
  0x6d   : > { %7715 = vmatprep.mubr.msk.bf16.mxu0 %vm646_vm2, %v8004_v9  ;;  %v8033_v38 = vld [vmem:[%s8332_s23 + $0x108] sm:$0xff]   ;;  %v8034_v39 = vld [vmem:[%s8332_s23 + $0x110] sm:$0xff]   ;;  %v8035_v40 = vld [vmem:[%s8332_s23 + $0x118] sm:$0xff]  }
  0x6e   : > { %v8036_v45 = vld [vmem:[%s8332_s23 + $0x120] sm:$0xff]   ;;  %v8037_v46 = vld [vmem:[%s8332_s23 + $0x128] sm:$0xff]   ;;  %v8040_v2 = vld [vmem:[%s8332_s23 + $0x130] sm:$0xff]  }
  0x6f   : > { %v8041_v5 = vld [vmem:[%s8332_s23 + $0x138] sm:$0xff]   ;;  %v8042_v9 = vld [vmem:[%s10922_s3 + $0x10] sm:$0xff]  }
  0x70   : > { %5276 = vmatpush1.bf16.msra.mxu0 %v8042_v9  ;;  %7937 = vmatpush1.bf16.msra.mxu1 %v8042_v9  ;;  %v8050_v9 = vld [vmem:[%s10922_s3 + $0x30] sm:$0xff]  }
  0x71   : > { %5277 = vmatprep.subr.bf16.mxu0 %v8185_v49  ;;  %7922 = vmatprep.subr.bf16.mxu1 %v8185_v49 }
  0x74   : > { %7716 = vmatmul.mubr.msk.bf16.gmra.mrb[8].mxu0 %vm646_vm2, %v8005_v10 }
  0x75   : > { %7719 = vmatprep.mubr.msk.bf16.mxu0 %vm646_vm2, %v8006_v11 }
  0x7c   : > { %7720 = vmatmul.mubr.msk.bf16.gmra.mrb[12].mxu0 %vm646_vm2, %v8007_v12 }
  0x7d   : > { %7723 = vmatprep.mubr.msk.bf16.mxu0 %vm646_vm2, %v8008_v13 }
  0x84   : > { %7724 = vmatmul.mubr.msk.bf16.gmra.mrb[16].mxu0 %vm646_vm2, %v8009_v14 }
  0x85   : > { %7727 = vmatprep.mubr.msk.bf16.mxu0 %vm646_vm2, %v8010_v15 }
  0x8c   : > { %7728 = vmatmul.mubr.msk.bf16.gmra.mrb[20].mxu0 %vm646_vm2, %v8011_v16 }
  0x8d   : > { %7731 = vmatprep.mubr.msk.bf16.mxu0 %vm646_vm2, %v8012_v17 }
  0x94   : > { %7732 = vmatmul.mubr.msk.bf16.gmra.mrb[24].mxu0 %vm646_vm2, %v8013_v18 }
  0x95   : > { %7735 = vmatprep.mubr.msk.bf16.mxu0 %vm646_vm2, %v8014_v19 }
  0x9c   : > { %7736 = vmatmul.mubr.msk.bf16.gmra.mrb[28].mxu0 %vm646_vm2, %v8015_v20 }
  0x9d   : > { %7739 = vmatprep.mubr.msk.bf16.mxu0 %vm646_vm2, %v8016_v21 }
  0xa4   : > { %7740 = vmatmul.mubr.msk.bf16.gmra.mrb[32].mxu0 %vm646_vm2, %v8017_v22 }
  0xa5   : > { %7743 = vmatprep.mubr.msk.bf16.mxu0 %vm646_vm2, %v8018_v23 }
  0xac   : > { %7744 = vmatmul.mubr.msk.bf16.gmra.mrb[36].mxu0 %vm646_vm2, %v8019_v24 }
  0xad   : > { %7747 = vmatprep.mubr.msk.bf16.mxu0 %vm646_vm2, %v8020_v25 }
  0xb4   : > { %7748 = vmatmul.mubr.msk.bf16.gmra.mrb[40].mxu0 %vm646_vm2, %v8021_v26 }
  0xb5   : > { %7751 = vmatprep.mubr.msk.bf16.mxu0 %vm646_vm2, %v8022_v27 }
  0xbc   : > { %7752 = vmatmul.mubr.msk.bf16.gmra.mrb[44].mxu0 %vm646_vm2, %v8023_v28 }
  0xbd   : > { %7755 = vmatprep.mubr.msk.bf16.mxu0 %vm646_vm2, %v8024_v29 }
  0xc4   : > { %7756 = vmatmul.mubr.msk.bf16.gmra.mrb[48].mxu0 %vm646_vm2, %v8025_v30  ;;  %v8043_v30 = vld [vmem:[%s10922_s3 + $0x18] sm:$0xff]  }
  0xc5   : > { %7759 = vmatprep.mubr.msk.bf16.mxu0 %vm646_vm2, %v8026_v31  ;;  %5278 = vmatpush1.bf16.msra.mxu0 %v8043_v30 }
  0xc6   : > { %5279 = vmatprep.subr.bf16.mxu0 %v8185_v49  ;;  %7938 = vmatpush1.bf16.msra.mxu1 %v8043_v30 }
  0xc7   : > { %7923 = vmatprep.subr.bf16.mxu1 %v8185_v49 }
  0xcc   : > { %7760 = vmatmul.mubr.msk.bf16.gmra.mrb[52].mxu0 %vm646_vm2, %v8027_v32 }
  0xcd   : > { %7763 = vmatprep.mubr.msk.bf16.mxu0 %vm646_vm2, %v8028_v33 }
  0xd4   : > { %7764 = vmatmul.mubr.msk.bf16.gmra.mrb[56].mxu0 %vm646_vm2, %v8029_v34 }
  0xd5   : > { %7767 = vmatprep.mubr.msk.bf16.mxu0 %vm646_vm2, %v8030_v35  ;;  %v8044_v35 = vld [vmem:[%s8332_s23 + $0x140] sm:$0xff]  }
  0xdc   : > { %7768 = vmatmul.mubr.msk.bf16.gmra.mrb[60].mxu0 %vm646_vm2, %v8031_v36  ;;  %v8045_v36 = vld [vmem:[%s8332_s23 + $0x148] sm:$0xff]  }
  0xdd   : > { %7771 = vmatprep.mubr.msk.bf16.mxu0 %vm646_vm2, %v8032_v37 }
  0xe4   : > { %7772 = vmatmul.mubr.msk.bf16.gmra.mrb[64].mxu0 %vm646_vm2, %v8033_v38 }
  0xe5   : > { %7775 = vmatprep.mubr.msk.bf16.mxu0 %vm646_vm2, %v8034_v39 }
  0xec   : > { %7776 = vmatmul.mubr.msk.bf16.gmra.mrb[68].mxu0 %vm646_vm2, %v8035_v40  ;;  %v8046_v40 = vld [vmem:[%s10922_s3 + $0x20] sm:$0xff]  }
  0xed   : > { %7779 = vmatprep.mubr.msk.bf16.mxu0 %vm646_vm2, %v8036_v45  ;;  %5280 = vmatpush1.bf16.msra.mxu0 %v8046_v40 }
  0xee   : > { %5281 = vmatprep.subr.bf16.mxu0 %v8185_v49  ;;  %7939 = vmatpush1.bf16.msra.mxu1 %v8046_v40 }
  0xef   : > { %7924 = vmatprep.subr.bf16.mxu1 %v8185_v49 }
  0xf4   : > { %7780 = vmatmul.mubr.msk.bf16.gmra.mrb[72].mxu0 %vm646_vm2, %v8037_v46 }
  0xf5   : > { %7783 = vmatprep.mubr.msk.bf16.mxu0 %vm646_vm2, %v8040_v2  ;;  %v8048_v2 = vld [vmem:[%s8332_s23 + $0x150] sm:$0xff]  }
  0xfc   : > { %7784 = vmatmul.mubr.msk.bf16.gmra.mrb[76].mxu0 %vm646_vm2, %v8041_v5 }
  0xfd   : > { %7787 = vmatprep.mubr.msk.bf16.mxu0 %vm646_vm2, %v8044_v35 }
 0x104   : > { %7788 = vmatmul.mubr.msk.bf16.gmra.mrb[80].mxu0 %vm646_vm2, %v8045_v36 }
 0x105   : > { %7791 = vmatprep.mubr.msk.bf16.mxu0 %vm646_vm2, %v8048_v2 }
 0x137   : > { %v7709_v42 = vpop.f32.mrb[0].mxu0 }
 0x138   : > { %v853_v43 = vadd.f32 %v7709_v42, %v8406_v41  ;;  %v844_v44 = vpop.f32.mrb[1].mxu0 }
 0x139   : > { %v845_v47 = vadd.f32 %v8406_v41, %v844_v44  ;;  %v7710_v48 = vpop.f32.mrb[2].mxu0 }
 0x13a   : > { %vm1261_vm3 = vcmp.ge.f32.partialorder %v853_v43, 0.0  ;;  %v1365_v50 = vmul.f32 0.01, %v853_v43  ;;  %v856_v51 = vadd.f32 %v7710_v48, %v8406_v41  ;;  %v847_v52 = vpop.f32.mrb[3].mxu0 }
 0x13b   : > { %vm1259_vm5 = vcmp.ge.f32.partialorder %v845_v47, 0.0  ;;  %v1363_v54 = vmul.f32 0.01, %v845_v47  ;;  %v848_v55 = vadd.f32 %v8406_v41, %v847_v52 }
 0x13c   : > { %v1469_v56 = vsel %vm1261_vm3, %v853_v43, %v1365_v50  ;;  %vm1262_vm6 = vcmp.ge.f32.partialorder %v856_v51, 0.0  ;;  %v1366_v57 = vmul.f32 0.01, %v856_v51 }
 0x13d   : > { %1574 = vst.msk [vmem:[#allocation2 + $0x10] sm:$0xff] %vm1571_vm4, %v1469_v56  ;;  %v1467_v58 = vsel %vm1259_vm5, %v845_v47, %v1363_v54  ;;  %vm1260_vm7 = vcmp.ge.f32.partialorder %v848_v55, 0.0  ;;  %v1364_v59 = vmul.f32 0.01, %v848_v55 }
 0x13e   : > { %1572 = vst.msk [vmem:[#allocation2] sm:$0xff] %vm1571_vm4, %v1467_v58  ;;  %v1470_v60 = vsel %vm1262_vm6, %v856_v51, %v1366_v57 }
 0x13f   : > { %1575 = vst.msk [vmem:[#allocation2 + $0x18] sm:$0xff] %vm1571_vm4, %v1470_v60  ;;  %v1468_v62 = vsel %vm1260_vm7, %v848_v55, %v1364_v59  ;;  %v7713_v63 = vpop.f32.mrb[4].mxu0 }
 0x140   : > { %1573 = vst.msk [vmem:[#allocation2 + $0x8] sm:$0xff] %vm1571_vm4, %v1468_v62  ;;  %v869_v0 = vadd.f32 %v7713_v63, %v8406_v41  ;;  %v860_v1 = vpop.f32.mrb[5].mxu0  ;;  %v8047_v62 = vld [vmem:[%s10922_s3 + $0x28] sm:$0xff]  }
 0x141   : > { %v861_v3 = vadd.f32 %v8406_v41, %v860_v1  ;;  %v7714_v4 = vpop.f32.mrb[6].mxu0  ;;  %5282 = vmatpush1.bf16.msra.mxu0 %v8047_v62  ;;  %7940 = vmatpush1.bf16.msra.mxu1 %v8047_v62 }
 0x142   : > { %vm1265_vm8 = vcmp.ge.f32.partialorder %v869_v0, 0.0  ;;  %v1369_v6 = vmul.f32 0.01, %v869_v0  ;;  %v872_v7 = vadd.f32 %v7714_v4, %v8406_v41  ;;  %v863_v8 = vpop.f32.mrb[7].mxu0  ;;  %5283 = vmatprep.subr.bf16.mxu0 %v8185_v49  ;;  %7925 = vmatprep.subr.bf16.mxu1 %v8185_v49 }
 0x143   : > { %vm1263_vm9 = vcmp.ge.f32.partialorder %v861_v3, 0.0  ;;  %v1367_v10 = vmul.f32 0.01, %v861_v3  ;;  %v864_v11 = vadd.f32 %v8406_v41, %v863_v8 }
 0x144   : > { %v1473_v12 = vsel %vm1265_vm8, %v869_v0, %v1369_v6  ;;  %vm1266_vm10 = vcmp.ge.f32.partialorder %v872_v7, 0.0  ;;  %v1370_v13 = vmul.f32 0.01, %v872_v7  ;;  %v1687_v17 = vld [vmem:[#allocation2 + $0x10] sm:$0xff] }
 0x145   : > { %1578 = vst.msk [vmem:[#allocation2 + $0x30] sm:$0xff] %vm1571_vm4, %v1473_v12  ;;  %v1471_v14 = vsel %vm1263_vm9, %v861_v3, %v1367_v10  ;;  %vm1264_vm11 = vcmp.ge.f32.partialorder %v864_v11, 0.0  ;;  %v1368_v15 = vmul.f32 0.01, %v864_v11  ;;  %v1685_v23 = vld [vmem:[#allocation2] sm:$0xff]  ;;  %v8049_v3 = vld [vmem:[%s8332_s23 + $0x158] sm:$0xff]   ;;  %5284 = vmatpush1.bf16.msra.mxu0 %v8050_v9  ;;  %7941 = vmatpush1.bf16.msra.mxu1 %v8050_v9 }
 0x146   : > { %1576 = vst.msk [vmem:[#allocation2 + $0x20] sm:$0xff] %vm1571_vm4, %v1471_v14  ;;  %v1474_v16 = vsel %vm1266_vm10, %v872_v7, %v1370_v13  ;;  %v1688_v18 = vld [vmem:[#allocation2 + $0x18] sm:$0xff]  ;;  %7792 = vmatmul.mubr.msk.bf16.gmra.mrb[84].mxu0 %vm646_vm2, %v8049_v3  ;;  %5285 = vmatprep.subr.bf16.mxu0 %v8185_v49 }
 0x147   : > { %1579 = vst.msk [vmem:[#allocation2 + $0x38] sm:$0xff] %vm1571_vm4, %v1474_v16  ;;  %v1472_v19 = vsel %vm1264_vm11, %v864_v11, %v1368_v15  ;;  %v7717_v20 = vpop.f32.mrb[8].mxu0  ;;  %v1893_v21 = vld [vmem:[#allocation2 + $0x1] sm:$0xff]  ;;  %v1894_v22 = vld [vmem:[#allocation2 + $0x9] sm:$0xff]  ;;  %v1790_v24 = vpack.c.bf16 %v1688_v18, %v1687_v17  ;;  %v1895_v54 = vld [vmem:[#allocation2 + $0x11] sm:$0xff]  ;;  %7926 = vmatprep.subr.bf16.mxu1 %v8185_v49 }
 0x148   : > { %1577 = vst.msk [vmem:[#allocation2 + $0x28] sm:$0xff] %vm1571_vm4, %v1472_v19  ;;  %v885_v25 = vadd.f32 %v7717_v20, %v8406_v41  ;;  %v876_v26 = vpop.f32.mrb[9].mxu0  ;;  %v1997_v27 = vpack.c.bf16 %v1894_v22, %v1893_v21  ;;  %v2310_v28 = vld [vmem:[#allocation2 + $0x2] sm:$0xff]  ;;  %v2311_v33 = vld [vmem:[#allocation2 + $0xa] sm:$0xff]  ;;  %v2312_v55 = vld [vmem:[#allocation2 + $0x12] sm:$0xff] }
 0x149   : > { %v1686_v29 = vld [vmem:[#allocation2 + $0x8] sm:$0xff]  ;;  %v877_v31 = vadd.f32 %v8406_v41, %v876_v26  ;;  %v7718_v32 = vpop.f32.mrb[10].mxu0  ;;  %1842 = vst.msk [vmem:[#allocation3 + $0x18] sm:$0xff] %vm1571_vm4, %v1790_v24  ;;  %v2414_v46 = vpack.c.bf16 %v2311_v33, %v2310_v28 }
 0x14a   : > { %v1789_v34 = vpack.c.bf16 %v1686_v29, %v1685_v23  ;;  %vm1269_vm12 = vcmp.ge.f32.partialorder %v885_v25, 0.0  ;;  %v1373_v37 = vmul.f32 0.01, %v885_v25  ;;  %v888_v38 = vadd.f32 %v7718_v32, %v8406_v41  ;;  %v879_v39 = vpop.f32.mrb[11].mxu0  ;;  %2101 = vrot.lane.b32.xlu0 %v1997_v27, %s8186_s10 }
 0x14b   : > { %vm1267_vm13 = vcmp.ge.f32.partialorder %v877_v31, 0.0  ;;  %v1371_v42 = vmul.f32 0.01, %v877_v31  ;;  %v880_v43 = vadd.f32 %v8406_v41, %v879_v39 }
 0x14c   : > { %1841 = vst.msk [vmem:[#allocation3] sm:$0xff] %vm1571_vm4, %v1789_v34  ;;  %v1477_v44 = vsel %vm1269_vm12, %v885_v25, %v1373_v37  ;;  %vm1270_vm14 = vcmp.ge.f32.partialorder %v888_v38, 0.0  ;;  %v1374_v45 = vmul.f32 0.01, %v888_v38  ;;  %v1691_v14 = vld [vmem:[#allocation2 + $0x30] sm:$0xff] }
 0x14d   : > { %1582 = vst.msk [vmem:[#allocation2 + $0x50] sm:$0xff] %vm1571_vm4, %v1477_v44  ;;  %v1475_v47 = vsel %vm1267_vm13, %v877_v31, %v1371_v42  ;;  %vm1268_vm15 = vcmp.ge.f32.partialorder %v880_v43, 0.0  ;;  %v1372_v48 = vmul.f32 0.01, %v880_v43  ;;  %v1896_v50 = vld [vmem:[#allocation2 + $0x19] sm:$0xff]  ;;  %v2729_v23 = vld [vmem:[#allocation2 + $0x30] sm:$0xff] }
 0x14e   : > { %1580 = vst.msk [vmem:[#allocation2 + $0x40] sm:$0xff] %vm1571_vm4, %v1475_v47  ;;  %v1478_v51 = vsel %vm1270_vm14, %v888_v38, %v1374_v45  ;;  %2518 = vrot.lane.b32.xlu0 %v2414_v46, %s8187_s13  ;;  %v2313_v56 = vld [vmem:[#allocation2 + $0x1a] sm:$0xff]  ;;  %v1998_v59 = vpack.c.bf16 %v1896_v50, %v1895_v54  ;;  %v2316_v18 = vld [vmem:[#allocation2 + $0x32] sm:$0xff] }
 0x14f   : > { %1583 = vst.msk [vmem:[#allocation2 + $0x58] sm:$0xff] %vm1571_vm4, %v1478_v51  ;;  %v1476_v52 = vsel %vm1268_vm15, %v880_v43, %v1372_v48  ;;  %v7721_v53 = vpop.f32.mrb[12].mxu0  ;;  %v1897_v60 = vld [vmem:[#allocation2 + $0x21] sm:$0xff]  ;;  %v1898_v61 = vld [vmem:[#allocation2 + $0x29] sm:$0xff]  ;;  %v2415_v8 = vpack.c.bf16 %v2313_v56, %v2312_v55  ;;  %v1692_v15 = vld [vmem:[#allocation2 + $0x38] sm:$0xff] }
 0x150   : > { %1581 = vst.msk [vmem:[#allocation2 + $0x48] sm:$0xff] %vm1571_vm4, %v1476_v52  ;;  %v901_v57 = vadd.f32 %v7721_v53, %v8406_v41  ;;  %v892_v58 = vpop.f32.mrb[13].mxu0  ;;  %v8479_v1 = vpack.c.bf16 %v1898_v61, %v1897_v60  ;;  %v1689_v4 = vld [vmem:[#allocation2 + $0x20] sm:$0xff]  ;;  %v1690_v10 = vld [vmem:[#allocation2 + $0x28] sm:$0xff]  ;;  %v1792_v19 = vpack.c.bf16 %v1692_v15, %v1691_v14  ;;  %v2730_v24 = vld [vmem:[#allocation2 + $0x38] sm:$0xff] }
 0x151   : > { %v893_v63 = vadd.f32 %v8406_v41, %v892_v58  ;;  %v7722_v0 = vpop.f32.mrb[14].mxu0  ;;  %v1791_v13 = vpack.c.bf16 %v1690_v10, %v1689_v4  ;;  %v3352_v25 = vld [vmem:[#allocation2 + $0x22] sm:$0xff]  ;;  %v3353_v30 = vld [vmem:[#allocation2 + $0x2a] sm:$0xff]  ;;  %v2832_v38 = vpack.c.bf16 %v2730_v24, %v2729_v23  ;;  %v8051_v42 = vld [vmem:[%s10922_s3 + $0x38] sm:$0xff]  }
 0x152   : > { %vm1273_vm0 = vcmp.ge.f32.partialorder %v901_v57, 0.0  ;;  %v1377_v5 = vmul.f32 0.01, %v901_v57  ;;  %2103 = vrot.lane.b32.xlu0 %v1998_v59, %s8186_s10  ;;  %v904_v6 = vadd.f32 %v7722_v0, %v8406_v41  ;;  %v895_v7 = vpop.f32.mrb[15].mxu0  ;;  %3300 = vst.msk [vmem:[#allocation3 + $0x8] sm:$0xff] %vm1571_vm4, %v8479_v1  ;;  %1844 = vst.msk [vmem:[#allocation3 + $0x48] sm:$0xff] %vm1571_vm4, %v1792_v19  ;;  %v8521_v47 = vpack.c.bf16 %v3353_v30, %v3352_v25 }
 0x153   : > { %vm1271_vm1 = vcmp.ge.f32.partialorder %v893_v63, 0.0  ;;  %v1375_v11 = vmul.f32 0.01, %v893_v63  ;;  %v896_v12 = vadd.f32 %v8406_v41, %v895_v7  ;;  %1843 = vst.msk [vmem:[#allocation3 + $0x30] sm:$0xff] %vm1571_vm4, %v1791_v13  ;;  %v3146_v43 = vld [vmem:[#allocation2 + $0x31] sm:$0xff]  ;;  %v8052_v52 = vld [vmem:[%s8332_s23 + $0x160] sm:$0xff]   ;;  %5286 = vmatpush1.bf16.msra.mxu0 %v8051_v42  ;;  %7942 = vmatpush1.bf16.msra.mxu1 %v8051_v42 }
 0x154   : > { %v1481_v16 = vsel %vm1273_vm0, %v901_v57, %v1377_v5  ;;  %vm1274_vm3 = vcmp.ge.f32.partialorder %v904_v6, 0.0  ;;  %v1378_v17 = vmul.f32 0.01, %v904_v6  ;;  %v2733_v28 = vld [vmem:[#allocation2 + $0x50] sm:$0xff]  ;;  %v8053_v53 = vld [vmem:[%s8332_s23 + $0x168] sm:$0xff]   ;;  %7795 = vmatprep.mubr.msk.bf16.mxu0 %vm646_vm2, %v8052_v52  ;;  %5287 = vmatprep.subr.bf16.mxu0 %v8185_v49  ;;  %v8054_v0 = vld [vmem:[%s10922_s3 + $0x40] sm:$0xff]  }
 0x155   : > { %1586 = vst.msk [vmem:[#allocation2 + $0x70] sm:$0xff] %vm1571_vm4, %v1481_v16  ;;  %v1479_v20 = vsel %vm1271_vm1, %v893_v63, %v1375_v11  ;;  %vm1272_vm5 = vcmp.ge.f32.partialorder %v896_v12, 0.0  ;;  %v1376_v21 = vmul.f32 0.01, %v896_v12  ;;  %v2317_v22 = vld [vmem:[#allocation2 + $0x3a] sm:$0xff]  ;;  %v1695_v35 = vld [vmem:[#allocation2 + $0x50] sm:$0xff]  ;;  %7796 = vmatmul.mubr.msk.bf16.gmra.mrb[88].mxu0 %vm646_vm2, %v8053_v53  ;;  %7927 = vmatprep.subr.bf16.mxu1 %v8185_v49 }
 0x156   : > { %1584 = vst.msk [vmem:[#allocation2 + $0x60] sm:$0xff] %vm1571_vm4, %v1479_v20  ;;  %v1482_v26 = vsel %vm1274_vm3, %v904_v6, %v1378_v17  ;;  %2520 = vrot.lane.b32.xlu0 %v2415_v8, %s8187_s13  ;;  %v8503_v27 = vpack.c.bf16 %v2317_v22, %v2316_v18  ;;  %v2734_v29 = vld [vmem:[#allocation2 + $0x58] sm:$0xff]  ;;  %v3768_v39 = vld [vmem:[#allocation2 + $0x40] sm:$0xff]  ;;  %v2728_v10 = vld [vmem:[#allocation2 + $0x28] sm:$0xff] }
 0x157   : > { %v4600_v31 = vld [vmem:[#allocation2 + $0x42] sm:$0xff]  ;;  %v4601_v32 = vld [vmem:[#allocation2 + $0x4a] sm:$0xff]  ;;  %1587 = vst.msk [vmem:[#allocation2 + $0x78] sm:$0xff] %vm1571_vm4, %v1482_v26  ;;  %v1480_v33 = vsel %vm1272_vm5, %v896_v12, %v1376_v21  ;;  %v7725_v34 = vpop.f32.mrb[16].mxu0  ;;  %v8519_v46 = vpack.c.bf16 %v2734_v29, %v2733_v28  ;;  %v1696_v54 = vld [vmem:[#allocation2 + $0x58] sm:$0xff]  ;;  %5288 = vmatpush1.bf16.msra.mxu0 %v8054_v0  ;;  %7943 = vmatpush1.bf16.msra.mxu1 %v8054_v0 }
 0x158   : > { %1585 = vst.msk [vmem:[#allocation2 + $0x68] sm:$0xff] %vm1571_vm4, %v1480_v33  ;;  %v917_v36 = vadd.f32 %v7725_v34, %v8406_v41  ;;  %v908_v37 = vpop.f32.mrb[17].mxu0  ;;  %2524 = vrot.lane.b32.xlu1 %v8503_v27, %s8187_s13  ;;  %v3769_v40 = vld [vmem:[#allocation2 + $0x48] sm:$0xff]  ;;  %v8516_v44 = vpack.c.bf16 %v4601_v32, %v4600_v31  ;;  %v1794_v58 = vpack.c.bf16 %v1696_v54, %v1695_v35  ;;  %v3147_v59 = vld [vmem:[#allocation2 + $0x39] sm:$0xff]  ;;  %v3150_v33 = vld [vmem:[#allocation2 + $0x51] sm:$0xff] }
 0x159   : > { %v909_v45 = vadd.f32 %v8406_v41, %v908_v37  ;;  %v1901_v48 = vld [vmem:[#allocation2 + $0x41] sm:$0xff]  ;;  %v7726_v50 = vpop.f32.mrb[18].mxu0  ;;  %v8523_v51 = vpack.c.bf16 %v3769_v40, %v3768_v39  ;;  %v1902_v62 = vld [vmem:[#allocation2 + $0x49] sm:$0xff]  ;;  %v3249_v2 = vpack.c.bf16 %v3147_v59, %v3146_v43  ;;  %v4602_v7 = vld [vmem:[#allocation2 + $0x52] sm:$0xff]  ;;  %5289 = vmatprep.subr.bf16.mxu0 %v8185_v49  ;;  %7928 = vmatprep.subr.bf16.mxu1 %v8185_v49 }
 0x15a   : > { %vm1277_vm6 = vcmp.ge.f32.partialorder %v917_v36, 0.0  ;;  %v1381_v55 = vmul.f32 0.01, %v917_v36  ;;  %2937 = vrot.lane.b32.xlu0 %v2832_v38, %s8188_s25  ;;  %v920_v56 = vadd.f32 %v7726_v50, %v8406_v41  ;;  %v911_v57 = vpop.f32.mrb[19].mxu0  ;;  %v3148_v60 = vld [vmem:[#allocation2 + $0x41] sm:$0xff]  ;;  %4756 = vst.msk [vmem:[#allocation3 + $0x10] sm:$0xff] %vm1571_vm4, %v8516_v44  ;;  %v8553_v13 = vpack.c.bf16 %v1902_v62, %v1901_v48 }
 0x15b   : > { %vm1275_vm7 = vcmp.ge.f32.partialorder %v909_v45, 0.0  ;;  %v1379_v61 = vmul.f32 0.01, %v909_v45  ;;  %v912_v63 = vadd.f32 %v8406_v41, %v911_v57  ;;  %1845 = vst.msk [vmem:[#allocation3 + $0x60] sm:$0xff] %vm1571_vm4, %v8523_v51  ;;  %v3149_v3 = vld [vmem:[#allocation2 + $0x49] sm:$0xff]  ;;  %1846 = vst.msk [vmem:[#allocation3 + $0x78] sm:$0xff] %vm1571_vm4, %v1794_v58 }
 0x15c   : > { %v1485_v4 = vsel %vm1277_vm6, %v917_v36, %v1381_v55  ;;  %2941 = vrot.lane.b32.xlu1 %v8519_v46, %s8188_s25  ;;  %vm1278_vm8 = vcmp.ge.f32.partialorder %v920_v56, 0.0  ;;  %v1382_v5 = vmul.f32 0.01, %v920_v56  ;;  %v3250_v6 = vpack.c.bf16 %v3149_v3, %v3148_v60  ;;  %3301 = vst.msk [vmem:[#allocation3 + $0x20] sm:$0xff] %vm1571_vm4, %v3249_v2  ;;  %v2727_v17 = vld [vmem:[#allocation2 + $0x20] sm:$0xff]  ;;  %v8055_v23 = vld [vmem:[%s10922_s3 + $0x48] sm:$0xff]  }
 0x15d   : > { %v4603_v8 = vld [vmem:[#allocation2 + $0x5a] sm:$0xff]  ;;  %1590 = vst.msk [vmem:[#allocation2 + $0x90] sm:$0xff] %vm1571_vm4, %v1485_v4  ;;  %v1483_v9 = vsel %vm1275_vm7, %v909_v45, %v1379_v61  ;;  %vm1276_vm9 = vcmp.ge.f32.partialorder %v912_v63, 0.0  ;;  %v1380_v11 = vmul.f32 0.01, %v912_v63  ;;  %v2831_v20 = vpack.c.bf16 %v2728_v10, %v2727_v17  ;;  %v1699_v24 = vld [vmem:[#allocation2 + $0x70] sm:$0xff]  ;;  %5290 = vmatpush1.bf16.msra.mxu0 %v8055_v23  ;;  %7944 = vmatpush1.bf16.msra.mxu1 %v8055_v23 }
 0x15e   : > { %v8548_v12 = vpack.c.bf16 %v4603_v8, %v4602_v7  ;;  %1588 = vst.msk [vmem:[#allocation2 + $0x80] sm:$0xff] %vm1571_vm4, %v1483_v9  ;;  %3560 = vrot.lane.b32.xlu0 %v8521_v47, %s8186_s10  ;;  %v1486_v14 = vsel %vm1278_vm8, %v920_v56, %v1382_v5  ;;  %3302 = vst.msk [vmem:[#allocation3 + $0x38] sm:$0xff] %vm1571_vm4, %v3250_v6  ;;  %v1904_v26 = vld [vmem:[#allocation2 + $0x59] sm:$0xff]  ;;  %v8056_v43 = vld [vmem:[%s8332_s23 + $0x170] sm:$0xff]   ;;  %5291 = vmatprep.subr.bf16.mxu0 %v8185_v49 }
 0x15f   : > { %v4604_v15 = vld [vmem:[#allocation2 + $0x62] sm:$0xff]  ;;  %v4605_v16 = vld [vmem:[#allocation2 + $0x6a] sm:$0xff]  ;;  %1591 = vst.msk [vmem:[#allocation2 + $0x98] sm:$0xff] %vm1571_vm4, %v1486_v14  ;;  %v1484_v18 = vsel %vm1276_vm9, %v912_v63, %v1380_v11  ;;  %v7729_v19 = vpop.f32.mrb[20].mxu0  ;;  %v1700_v32 = vld [vmem:[#allocation2 + $0x78] sm:$0xff]  ;;  %7799 = vmatprep.mubr.msk.bf16.mxu0 %vm646_vm2, %v8056_v43  ;;  %7929 = vmatprep.subr.bf16.mxu1 %v8185_v49 }
 0x160   : > { %4757 = vst.msk [vmem:[#allocation3 + $0x28] sm:$0xff] %vm1571_vm4, %v8548_v12  ;;  %2109 = vrot.lane.b32.xlu1 %v8553_v13, %s8186_s10  ;;  %1589 = vst.msk [vmem:[#allocation2 + $0x88] sm:$0xff] %vm1571_vm4, %v1484_v18  ;;  %v933_v21 = vadd.f32 %v7729_v19, %v8406_v41  ;;  %v924_v22 = vpop.f32.mrb[21].mxu0  ;;  %v8569_v25 = vpack.c.bf16 %v4605_v16, %v4604_v15  ;;  %v1697_v30 = vld [vmem:[#allocation2 + $0x60] sm:$0xff]  ;;  %v1698_v31 = vld [vmem:[#allocation2 + $0x68] sm:$0xff]  ;;  %v1796_v50 = vpack.c.bf16 %v1700_v32, %v1699_v24 }
 0x161   : > { %v925_v28 = vadd.f32 %v8406_v41, %v924_v22  ;;  %v7730_v29 = vpop.f32.mrb[22].mxu0  ;;  %v1795_v37 = vpack.c.bf16 %v1698_v31, %v1697_v30  ;;  %v3151_v38 = vld [vmem:[#allocation2 + $0x59] sm:$0xff]  ;;  %v3152_v39 = vld [vmem:[#allocation2 + $0x61] sm:$0xff]  ;;  %v8058_v48 = vld [vmem:[%s10922_s3 + $0x50] sm:$0xff]  }
 0x162   : > { %2935 = vrot.lane.b32.xlu0 %v2831_v20, %s8188_s25  ;;  %vm1281_vm10 = vcmp.ge.f32.partialorder %v933_v21, 0.0  ;;  %v1385_v34 = vmul.f32 0.01, %v933_v21  ;;  %v936_v35 = vadd.f32 %v7730_v29, %v8406_v41  ;;  %v927_v36 = vpop.f32.mrb[23].mxu0  ;;  %4758 = vst.msk [vmem:[#allocation3 + $0x40] sm:$0xff] %vm1571_vm4, %v8569_v25  ;;  %v8057_v45 = vld [vmem:[%s8332_s23 + $0x178] sm:$0xff]   ;;  %v3251_v54 = vpack.c.bf16 %v3151_v38, %v3150_v33  ;;  %5292 = vmatpush1.bf16.msra.mxu0 %v8058_v48 }
 0x163   : > { %vm1279_vm11 = vcmp.ge.f32.partialorder %v925_v28, 0.0  ;;  %v1383_v40 = vmul.f32 0.01, %v925_v28  ;;  %v928_v42 = vadd.f32 %v8406_v41, %v927_v36  ;;  %1847 = vst.msk [vmem:[#allocation3 + $0x90] sm:$0xff] %vm1571_vm4, %v1795_v37  ;;  %v3153_v55 = vld [vmem:[#allocation2 + $0x69] sm:$0xff]  ;;  %v1903_v57 = vld [vmem:[#allocation2 + $0x51] sm:$0xff]  ;;  %7800 = vmatmul.mubr.msk.bf16.gmra.mrb[92].mxu0 %vm646_vm2, %v8057_v45  ;;  %5293 = vmatprep.subr.bf16.mxu0 %v8185_v49 }
 0x164   : > { %2526 = vrot.lane.b32.xlu1 %v8516_v44, %s8187_s13  ;;  %v1489_v52 = vsel %vm1281_vm10, %v933_v21, %v1385_v34  ;;  %vm1282_vm12 = vcmp.ge.f32.partialorder %v936_v35, 0.0  ;;  %v1386_v53 = vmul.f32 0.01, %v936_v35  ;;  %1848 = vst.msk [vmem:[#allocation3 + $0xa8] sm:$0xff] %vm1571_vm4, %v1796_v50  ;;  %v3252_v60 = vpack.c.bf16 %v3153_v55, %v3152_v39  ;;  %v4606_v61 = vld [vmem:[#allocation2 + $0x72] sm:$0xff]  ;;  %3303 = vst.msk [vmem:[#allocation3 + $0x50] sm:$0xff] %vm1571_vm4, %v3251_v54 }
 0x165   : > { %v4607_v56 = vld [vmem:[#allocation2 + $0x7a] sm:$0xff]  ;;  %1594 = vst.msk [vmem:[#allocation2 + $0xb0] sm:$0xff] %vm1571_vm4, %v1489_v52  ;;  %v1487_v58 = vsel %vm1279_vm11, %v925_v28, %v1383_v40  ;;  %vm1280_vm13 = vcmp.ge.f32.partialorder %v928_v42, 0.0  ;;  %v1384_v59 = vmul.f32 0.01, %v928_v42  ;;  %v8594_v62 = vpack.c.bf16 %v1904_v26, %v1903_v57  ;;  %v1899_v6 = vld [vmem:[#allocation2 + $0x31] sm:$0xff]  ;;  %7945 = vmatpush1.bf16.msra.mxu1 %v8058_v48 }
 0x166   : > { %2105 = vrot.lane.b32.xlu0 %v8479_v1, %s8186_s10  ;;  %1592 = vst.msk [vmem:[#allocation2 + $0xa0] sm:$0xff] %vm1571_vm4, %v1487_v58  ;;  %v1490_v63 = vsel %vm1282_vm12, %v936_v35, %v1386_v53  ;;  %v1900_v0 = vld [vmem:[#allocation2 + $0x39] sm:$0xff]  ;;  %3304 = vst.msk [vmem:[#allocation3 + $0x68] sm:$0xff] %vm1571_vm4, %v3252_v60  ;;  %v8604_v1 = vpack.c.bf16 %v4607_v56, %v4606_v61  ;;  %v1703_v10 = vld [vmem:[#allocation2 + $0x90] sm:$0xff]  ;;  %7930 = vmatprep.subr.bf16.mxu1 %v8185_v49 }
 0x167   : > { %v4608_v2 = vld [vmem:[#allocation2 + $0x82] sm:$0xff]  ;;  %v4609_v3 = vld [vmem:[#allocation2 + $0x8a] sm:$0xff]  ;;  %1595 = vst.msk [vmem:[#allocation2 + $0xb8] sm:$0xff] %vm1571_vm4, %v1490_v63  ;;  %v1488_v4 = vsel %vm1280_vm13, %v928_v42, %v1384_v59  ;;  %v7733_v5 = vpop.f32.mrb[24].mxu0  ;;  %v8059_v9 = vld [vmem:[%s10922_s3 + $0x58] sm:$0xff]   ;;  %v2000_v20 = vpack.c.bf16 %v1900_v0, %v1899_v6 }
 0x168   : > { %2111 = vrot.lane.b32.xlu1 %v8594_v62, %s8186_s10  ;;  %1593 = vst.msk [vmem:[#allocation2 + $0xa8] sm:$0xff] %vm1571_vm4, %v1488_v4  ;;  %v949_v7 = vadd.f32 %v7733_v5, %v8406_v41  ;;  %v940_v8 = vpop.f32.mrb[25].mxu0  ;;  %v3774_v11 = vld [vmem:[#allocation2 + $0x70] sm:$0xff]  ;;  %v8060_v16 = vld [vmem:[%s8332_s23 + $0x180] sm:$0xff]   ;;  %v8061_v17 = vld [vmem:[%s8332_s23 + $0x188] sm:$0xff]   ;;  %v8619_v19 = vpack.c.bf16 %v4609_v3, %v4608_v2  ;;  %5294 = vmatpush1.bf16.msra.mxu0 %v8059_v9 }
 0x169   : > { %v941_v14 = vadd.f32 %v8406_v41, %v940_v8  ;;  %v7734_v15 = vpop.f32.mrb[26].mxu0  ;;  %v1701_v18 = vld [vmem:[#allocation2 + $0x80] sm:$0xff]  ;;  %4759 = vst.msk [vmem:[#allocation3 + $0x58] sm:$0xff] %vm1571_vm4, %v8604_v1  ;;  %v1702_v24 = vld [vmem:[#allocation2 + $0x88] sm:$0xff]  ;;  %v1704_v26 = vld [vmem:[#allocation2 + $0x98] sm:$0xff]  ;;  %7803 = vmatprep.mubr.msk.bf16.mxu0 %vm646_vm2, %v8060_v16  ;;  %5295 = vmatprep.subr.bf16.mxu0 %v8185_v49 }
 0x16a   : > { %2522 = vrot.lane.b32.xlu0 %v8521_v47, %s8187_s13  ;;  %vm1285_vm14 = vcmp.ge.f32.partialorder %v949_v7, 0.0  ;;  %v1389_v21 = vmul.f32 0.01, %v949_v7  ;;  %v952_v22 = vadd.f32 %v7734_v15, %v8406_v41  ;;  %v943_v23 = vpop.f32.mrb[27].mxu0  ;;  %v3775_v28 = vld [vmem:[#allocation2 + $0x78] sm:$0xff]  ;;  %v8062_v47 = vld [vmem:[%s10922_s3 + $0x60] sm:$0xff]   ;;  %v1797_v31 = vpack.c.bf16 %v1702_v24, %v1701_v18  ;;  %7946 = vmatpush1.bf16.msra.mxu1 %v8059_v9 }
 0x16b   : > { %vm1283_vm15 = vcmp.ge.f32.partialorder %v941_v14, 0.0  ;;  %v1387_v29 = vmul.f32 0.01, %v941_v14  ;;  %v944_v30 = vadd.f32 %v8406_v41, %v943_v23  ;;  %v3155_v32 = vld [vmem:[#allocation2 + $0x79] sm:$0xff]  ;;  %4760 = vst.msk [vmem:[#allocation3 + $0x70] sm:$0xff] %vm1571_vm4, %v8619_v19  ;;  %v1798_v36 = vpack.c.bf16 %v1704_v26, %v1703_v10  ;;  %v3154_v37 = vld [vmem:[#allocation2 + $0x71] sm:$0xff]  ;;  %7804 = vmatmul.mubr.msk.bf16.gmra.mrb[96].mxu0 %vm646_vm2, %v8061_v17  ;;  %7931 = vmatprep.subr.bf16.mxu1 %v8185_v49 }
 0x16c   : > { %2528 = vrot.lane.b32.xlu1 %v8548_v12, %s8187_s13  ;;  %v4610_v33 = vld [vmem:[#allocation2 + $0x92] sm:$0xff]  ;;  %v1493_v34 = vsel %vm1285_vm14, %v949_v7, %v1389_v21  ;;  %vm1286_vm0 = vcmp.ge.f32.partialorder %v952_v22, 0.0  ;;  %v1390_v35 = vmul.f32 0.01, %v952_v22  ;;  %1849 = vst.msk [vmem:[#allocation3 + $0xc0] sm:$0xff] %vm1571_vm4, %v1797_v31  ;;  %v3253_v42 = vpack.c.bf16 %v3155_v32, %v3154_v37  ;;  %5296 = vmatpush1.bf16.msra.mxu0 %v8062_v47  ;;  %v8063_v57 = vld [vmem:[%s10922_s3 + $0x68] sm:$0xff]  }
 0x16d   : > { %v4611_v38 = vld [vmem:[#allocation2 + $0x9a] sm:$0xff]  ;;  %1598 = vst.msk [vmem:[#allocation2 + $0xd0] sm:$0xff] %vm1571_vm4, %v1493_v34  ;;  %v1491_v39 = vsel %vm1283_vm15, %v941_v14, %v1387_v29  ;;  %vm1284_vm1 = vcmp.ge.f32.partialorder %v944_v30, 0.0  ;;  %v1388_v40 = vmul.f32 0.01, %v944_v30  ;;  %v3875_v43 = vpack.c.bf16 %v3775_v28, %v3774_v11  ;;  %1850 = vst.msk [vmem:[#allocation3 + $0xd8] sm:$0xff] %vm1571_vm4, %v1798_v36  ;;  %5297 = vmatprep.subr.bf16.mxu0 %v8185_v49 }
 0x16e   : > { %2107 = vrot.lane.b32.xlu0 %v2000_v20, %s8186_s10  ;;  %1596 = vst.msk [vmem:[#allocation2 + $0xc0] sm:$0xff] %vm1571_vm4, %v1491_v39  ;;  %v1494_v45 = vsel %vm1286_vm0, %v952_v22, %v1390_v35  ;;  %3305 = vst.msk [vmem:[#allocation3 + $0x80] sm:$0xff] %vm1571_vm4, %v3253_v42  ;;  %v8647_v54 = vpack.c.bf16 %v4611_v38, %v4610_v33  ;;  %v2735_v58 = vld [vmem:[#allocation2 + $0x60] sm:$0xff]  ;;  %v2736_v59 = vld [vmem:[#allocation2 + $0x68] sm:$0xff]  ;;  %7947 = vmatpush1.bf16.msra.mxu1 %v8062_v47 }
 0x16f   : > { %v4612_v48 = vld [vmem:[#allocation2 + $0xa2] sm:$0xff]  ;;  %v4613_v50 = vld [vmem:[#allocation2 + $0xaa] sm:$0xff]  ;;  %1599 = vst.msk [vmem:[#allocation2 + $0xd8] sm:$0xff] %vm1571_vm4, %v1494_v45  ;;  %v1492_v52 = vsel %vm1284_vm1, %v944_v30, %v1388_v40  ;;  %v7737_v53 = vpop.f32.mrb[28].mxu0  ;;  %v8065_v6 = vld [vmem:[%s8332_s23 + $0x198] sm:$0xff]   ;;  %7932 = vmatprep.subr.bf16.mxu1 %v8185_v49  ;;  %v8682_v28 = vpack.c.bf16 %v2736_v59, %v2735_v58 }
 0x170   : > { %3982 = vrot.lane.b32.xlu1 %v3875_v43, %s8187_s13  ;;  %1597 = vst.msk [vmem:[#allocation2 + $0xc8] sm:$0xff] %vm1571_vm4, %v1492_v52  ;;  %v965_v55 = vadd.f32 %v7737_v53, %v8406_v41  ;;  %v956_v56 = vpop.f32.mrb[29].mxu0  ;;  %v8064_v63 = vld [vmem:[%s8332_s23 + $0x190] sm:$0xff]   ;;  %v1705_v0 = vld [vmem:[#allocation2 + $0xa0] sm:$0xff]  ;;  %4761 = vst.msk [vmem:[#allocation3 + $0x88] sm:$0xff] %vm1571_vm4, %v8647_v54  ;;  %v8660_v2 = vpack.c.bf16 %v4613_v50, %v4612_v48  ;;  %5298 = vmatpush1.bf16.msra.mxu0 %v8063_v57 }
 0x171   : > { %v957_v60 = vadd.f32 %v8406_v41, %v956_v56  ;;  %v7738_v61 = vpop.f32.mrb[30].mxu0  ;;  %v1706_v7 = vld [vmem:[#allocation2 + $0xa8] sm:$0xff]  ;;  %7807 = vmatprep.mubr.msk.bf16.mxu0 %vm646_vm2, %v8064_v63  ;;  %v4614_v15 = vld [vmem:[#allocation2 + $0xb2] sm:$0xff]  ;;  %5299 = vmatprep.subr.bf16.mxu0 %v8185_v49 }
 0x172   : > { %3562 = vrot.lane.b32.xlu0 %v8503_v27, %s8186_s10  ;;  %vm1289_vm3 = vcmp.ge.f32.partialorder %v965_v55, 0.0  ;;  %v1393_v3 = vmul.f32 0.01, %v965_v55  ;;  %v968_v4 = vadd.f32 %v7738_v61, %v8406_v41  ;;  %v959_v5 = vpop.f32.mrb[31].mxu0  ;;  %v8066_v27 = vld [vmem:[%s10922_s3 + $0x70] sm:$0xff]   ;;  %v1799_v10 = vpack.c.bf16 %v1706_v7, %v1705_v0  ;;  %v3156_v11 = vld [vmem:[#allocation2 + $0x81] sm:$0xff]  ;;  %7948 = vmatpush1.bf16.msra.mxu1 %v8063_v57 }
 0x173   : > { %vm1287_vm5 = vcmp.ge.f32.partialorder %v957_v60, 0.0  ;;  %v1391_v8 = vmul.f32 0.01, %v957_v60  ;;  %v960_v9 = vadd.f32 %v8406_v41, %v959_v5  ;;  %v3157_v14 = vld [vmem:[#allocation2 + $0x89] sm:$0xff]  ;;  %4762 = vst.msk [vmem:[#allocation3 + $0xa0] sm:$0xff] %vm1571_vm4, %v8660_v2  ;;  %v1708_v21 = vld [vmem:[#allocation2 + $0xb8] sm:$0xff]  ;;  %7808 = vmatmul.mubr.msk.bf16.gmra.mrb[100].mxu0 %vm646_vm2, %v8065_v6  ;;  %7933 = vmatprep.subr.bf16.mxu1 %v8185_v49 }
 0x174   : > { %2945 = vrot.lane.b32.xlu1 %v3875_v43, %s8188_s25  ;;  %v1497_v16 = vsel %vm1289_vm3, %v965_v55, %v1393_v3  ;;  %vm1290_vm6 = vcmp.ge.f32.partialorder %v968_v4, 0.0  ;;  %v1394_v17 = vmul.f32 0.01, %v968_v4  ;;  %v3254_v18 = vpack.c.bf16 %v3157_v14, %v3156_v11  ;;  %v1707_v20 = vld [vmem:[#allocation2 + $0xb0] sm:$0xff]  ;;  %1851 = vst.msk [vmem:[#allocation3 + $0xf0] sm:$0xff] %vm1571_vm4, %v1799_v10  ;;  %v1905_v29 = vld [vmem:[#allocation2 + $0x61] sm:$0xff]  ;;  %5300 = vmatpush1.bf16.msra.mxu0 %v8066_v27 }
 0x175   : > { %v4615_v22 = vld [vmem:[#allocation2 + $0xba] sm:$0xff]  ;;  %1602 = vst.msk [vmem:[#allocation2 + $0xf0] sm:$0xff] %vm1571_vm4, %v1497_v16  ;;  %v1495_v23 = vsel %vm1287_vm5, %v957_v60, %v1391_v8  ;;  %vm1288_vm7 = vcmp.ge.f32.partialorder %v960_v9, 0.0  ;;  %v1392_v24 = vmul.f32 0.01, %v960_v9  ;;  %v1800_v26 = vpack.c.bf16 %v1708_v21, %v1707_v20  ;;  %v1906_v47 = vld [vmem:[#allocation2 + $0x69] sm:$0xff]  ;;  %5301 = vmatprep.subr.bf16.mxu0 %v8185_v49 }
 0x176   : > { %3978 = vrot.lane.b32.xlu0 %v8519_v46, %s8187_s13  ;;  %1600 = vst.msk [vmem:[#allocation2 + $0xe0] sm:$0xff] %vm1571_vm4, %v1495_v23  ;;  %v1498_v30 = vsel %vm1290_vm6, %v968_v4, %v1394_v17  ;;  %3306 = vst.msk [vmem:[#allocation3 + $0x98] sm:$0xff] %vm1571_vm4, %v3254_v18  ;;  %v8692_v46 = vpack.c.bf16 %v4615_v22, %v4614_v15  ;;  %v8067_v38 = vld [vmem:[%s10922_s3 + $0x78] sm:$0xff]   ;;  %7949 = vmatpush1.bf16.msra.mxu1 %v8066_v27  ;;  %v1709_v58 = vld [vmem:[#allocation2 + $0xc0] sm:$0xff] }
 0x177   : > { %v4616_v31 = vld [vmem:[#allocation2 + $0xc2] sm:$0xff]  ;;  %v4617_v32 = vld [vmem:[#allocation2 + $0xca] sm:$0xff]  ;;  %1603 = vst.msk [vmem:[#allocation2 + $0xf8] sm:$0xff] %vm1571_vm4, %v1498_v30  ;;  %v1496_v33 = vsel %vm1288_vm7, %v960_v9, %v1392_v24  ;;  %v7741_v34 = vpop.f32.mrb[32].mxu0  ;;  %1852 = vst.msk [vmem:[#allocation3 + $0x108] sm:$0xff] %vm1571_vm4, %v1800_v26  ;;  %v8709_v43 = vpack.c.bf16 %v1906_v47, %v1905_v29  ;;  %7934 = vmatprep.subr.bf16.mxu1 %v8185_v49 }
 0x178   : > { %2943 = vrot.lane.b32.xlu1 %v8682_v28, %s8188_s25  ;;  %1601 = vst.msk [vmem:[#allocation2 + $0xe8] sm:$0xff] %vm1571_vm4, %v1496_v33  ;;  %v981_v35 = vadd.f32 %v7741_v34, %v8406_v41  ;;  %v972_v36 = vpop.f32.mrb[33].mxu0  ;;  %v8698_v37 = vpack.c.bf16 %v4617_v32, %v4616_v31  ;;  %v3158_v42 = vld [vmem:[#allocation2 + $0x91] sm:$0xff]  ;;  %4763 = vst.msk [vmem:[#allocation3 + $0xb8] sm:$0xff] %vm1571_vm4, %v8692_v46  ;;  %v3159_v52 = vld [vmem:[#allocation2 + $0x99] sm:$0xff]  ;;  %5302 = vmatpush1.bf16.msra.mxu0 %v8067_v38 }
 0x179   : > { %v973_v39 = vadd.f32 %v8406_v41, %v972_v36  ;;  %v7742_v40 = vpop.f32.mrb[34].mxu0  ;;  %v4618_v53 = vld [vmem:[#allocation2 + $0xd2] sm:$0xff]  ;;  %v3255_v57 = vpack.c.bf16 %v3159_v52, %v3158_v42  ;;  %v1710_v59 = vld [vmem:[#allocation2 + $0xc8] sm:$0xff] }
 0x17a   : > { %3976 = vrot.lane.b32.xlu0 %v8523_v51, %s8187_s13  ;;  %vm1293_vm2 = vcmp.ge.f32.partialorder %v981_v35, 0.0  ;;  %v1397_v45 = vmul.f32 0.01, %v981_v35  ;;  %v984_v48 = vadd.f32 %v7742_v40, %v8406_v41  ;;  %v975_v50 = vpop.f32.mrb[35].mxu0  ;;  %4764 = vst.msk [vmem:[#allocation3 + $0xd0] sm:$0xff] %vm1571_vm4, %v8698_v37  ;;  %v1801_v61 = vpack.c.bf16 %v1710_v59, %v1709_v58  ;;  %v3160_v63 = vld [vmem:[#allocation2 + $0xa1] sm:$0xff]  ;;  %7950 = vmatpush1.bf16.msra.mxu1 %v8067_v38 }
 0x17b   : > { %vm1291_vm8 = vcmp.ge.f32.partialorder %v973_v39, 0.0  ;;  %v1395_v55 = vmul.f32 0.01, %v973_v39  ;;  %v976_v56 = vadd.f32 %v8406_v41, %v975_v50  ;;  %v3161_v0 = vld [vmem:[#allocation2 + $0xa9] sm:$0xff]  ;;  %3307 = vst.msk [vmem:[#allocation3 + $0xb0] sm:$0xff] %vm1571_vm4, %v3255_v57  ;;  %v1908_v6 = vld [vmem:[#allocation2 + $0x79] sm:$0xff] }
 0x17c   : > { %2113 = vrot.lane.b32.xlu1 %v8709_v43, %s8186_s10  ;;  %v1501_v60 = vsel %vm1293_vm2, %v981_v35, %v1397_v45  ;;  %vm1294_vm9 = vcmp.ge.f32.partialorder %v984_v48, 0.0  ;;  %v1398_v49 = vmul.f32 0.01, %v984_v48  ;;  %v3256_v5 = vpack.c.bf16 %v3161_v0, %v3160_v63  ;;  %1853 = vst.msk [vmem:[#allocation3 + $0x120] sm:$0xff] %vm1571_vm4, %v1801_v61  ;;  %v8734_v14 = vld [vmem:[#allocation8] ss:$0 sm:$0xff] }
 0x17d   : > { %v4619_v3 = vld [vmem:[#allocation2 + $0xda] sm:$0xff]  ;;  %1606 = vst.msk [vmem:[#allocation2 + $0x110] sm:$0xff] %vm1571_vm4, %v1501_v60  ;;  %v1499_v41 = vsel %vm1291_vm8, %v973_v39, %v1395_v55  ;;  %vm1292_vm10 = vcmp.ge.f32.partialorder %v976_v56, 0.0  ;;  %v1396_v4 = vmul.f32 0.01, %v976_v56  ;;  %v1711_v22 = vld [vmem:[#allocation2 + $0xd0] sm:$0xff] }
 0x17e   : > { %4392 = vrot.lane.b32.xlu0 %v8553_v13, %s8188_s25  ;;  %1604 = vst.msk [vmem:[#allocation2 + $0x100] sm:$0xff] %vm1571_vm4, %v1499_v41  ;;  %v1502_v7 = vsel %vm1294_vm9, %v984_v48, %v1398_v49  ;;  %v8726_v8 = vpack.c.bf16 %v4619_v3, %v4618_v53  ;;  %3308 = vst.msk [vmem:[#allocation3 + $0xc8] sm:$0xff] %vm1571_vm4, %v3256_v5  ;;  %v1907_v13 = vld [vmem:[#allocation2 + $0x71] sm:$0xff]  ;;  %v3163_v34 = vld [vmem:[#allocation2 + $0xb9] sm:$0xff] }
 0x17f   : > { %v4620_v9 = vld [vmem:[#allocation2 + $0xe2] sm:$0xff]  ;;  %v4621_v27 = vld [vmem:[#allocation2 + $0xea] sm:$0xff]  ;;  %1607 = vst.msk [vmem:[#allocation2 + $0x118] sm:$0xff] %vm1571_vm4, %v1502_v7  ;;  %v1500_v10 = vsel %vm1292_vm10, %v976_v56, %v1396_v4  ;;  %v7745_v11 = vpop.f32.mrb[36].mxu0  ;;  %v8741_v18 = vpack.c.bf16 %v1908_v6, %v1907_v13  ;;  %v1712_v23 = vld [vmem:[#allocation2 + $0xd8] sm:$0xff] }
 0x180   : > { %2530 = vrot.lane.b32.xlu1 %v8569_v25, %s8187_s13  ;;  %1605 = vst.msk [vmem:[#allocation2 + $0x108] sm:$0xff] %vm1571_vm4, %v1500_v10  ;;  %v997_v15 = vadd.f32 %v8734_v14, %v7745_v11  ;;  %v988_v16 = vpop.f32.mrb[37].mxu0  ;;  %v8737_v17 = vpack.c.bf16 %v4621_v27, %v4620_v9  ;;  %4765 = vst.msk [vmem:[#allocation3 + $0xe8] sm:$0xff] %vm1571_vm4, %v8726_v8  ;;  %v4622_v24 = vld [vmem:[#allocation2 + $0xf2] sm:$0xff]  ;;  %v1802_v47 = vpack.c.bf16 %v1712_v23, %v1711_v22  ;;  %v1713_v35 = vld [vmem:[#allocation2 + $0xe0] sm:$0xff] }
 0x181   : > { %v989_v20 = vadd.f32 %v8734_v14, %v988_v16  ;;  %v7746_v21 = vpop.f32.mrb[38].mxu0  ;;  %v3162_v31 = vld [vmem:[#allocation2 + $0xb1] sm:$0xff]  ;;  %v1714_v36 = vld [vmem:[#allocation2 + $0xe8] sm:$0xff]  ;;  %v2739_v3 = vld [vmem:[#allocation2 + $0x80] sm:$0xff] }
 0x182   : > { %3564 = vrot.lane.b32.xlu0 %v8516_v44, %s8186_s10  ;;  %vm1297_vm11 = vcmp.ge.f32.partialorder %v997_v15, 0.0  ;;  %v1401_v26 = vmul.f32 0.01, %v997_v15  ;;  %v1000_v29 = vadd.f32 %v8734_v14, %v7746_v21  ;;  %v991_v30 = vpop.f32.mrb[39].mxu0  ;;  %4766 = vst.msk [vmem:[#allocation3 + $0x100] sm:$0xff] %vm1571_vm4, %v8737_v17  ;;  %1854 = vst.msk [vmem:[#allocation3 + $0x138] sm:$0xff] %vm1571_vm4, %v1802_v47  ;;  %v3257_v39 = vpack.c.bf16 %v3163_v34, %v3162_v31 }
 0x183   : > { %vm1295_vm12 = vcmp.ge.f32.partialorder %v989_v20, 0.0  ;;  %v1399_v32 = vmul.f32 0.01, %v989_v20  ;;  %v992_v33 = vadd.f32 %v8734_v14, %v991_v30  ;;  %v3164_v40 = vld [vmem:[#allocation2 + $0xc1] sm:$0xff]  ;;  %v3165_v42 = vld [vmem:[#allocation2 + $0xc9] sm:$0xff]  ;;  %v1803_v52 = vpack.c.bf16 %v1714_v36, %v1713_v35  ;;  %v2742_v57 = vld [vmem:[#allocation2 + $0x98] sm:$0xff] }
 0x184   : > { %2115 = vrot.lane.b32.xlu1 %v8741_v18, %s8186_s10  ;;  %v1505_v44 = vsel %vm1297_vm11, %v997_v15, %v1401_v26  ;;  %vm1298_vm13 = vcmp.ge.f32.partialorder %v1000_v29, 0.0  ;;  %v1402_v38 = vmul.f32 0.01, %v1000_v29  ;;  %v2741_v53 = vld [vmem:[#allocation2 + $0x90] sm:$0xff]  ;;  %3309 = vst.msk [vmem:[#allocation3 + $0xe0] sm:$0xff] %vm1571_vm4, %v3257_v39  ;;  %v3258_v61 = vpack.c.bf16 %v3165_v42, %v3164_v40  ;;  %v2740_v41 = vld [vmem:[#allocation2 + $0x88] sm:$0xff] }
 0x185   : > { %v4623_v45 = vld [vmem:[#allocation2 + $0xfa] sm:$0xff]  ;;  %1610 = vst.msk [vmem:[#allocation2 + $0x130] sm:$0xff] %vm1571_vm4, %v1505_v44  ;;  %v1503_v48 = vsel %vm1295_vm12, %v989_v20, %v1399_v32  ;;  %vm1296_vm14 = vcmp.ge.f32.partialorder %v992_v33, 0.0  ;;  %v1400_v50 = vmul.f32 0.01, %v992_v33  ;;  %1855 = vst.msk [vmem:[#allocation3 + $0x150] sm:$0xff] %vm1571_vm4, %v1803_v52  ;;  %v8775_v7 = vpack.c.bf16 %v2742_v57, %v2741_v53 }
 0x186   : > { %2939 = vrot.lane.b32.xlu0 %v8523_v51, %s8188_s25  ;;  %1608 = vst.msk [vmem:[#allocation2 + $0x120] sm:$0xff] %vm1571_vm4, %v1503_v48  ;;  %v1506_v55 = vsel %vm1298_vm13, %v1000_v29, %v1402_v38  ;;  %v8758_v56 = vpack.c.bf16 %v4623_v45, %v4622_v24  ;;  %v4626_v4 = vld [vmem:[#allocation2 + $0x112] sm:$0xff]  ;;  %3310 = vst.msk [vmem:[#allocation3 + $0xf8] sm:$0xff] %vm1571_vm4, %v3258_v61  ;;  %v1909_v34 = vld [vmem:[#allocation2 + $0x81] sm:$0xff] }
 0x187   : > { %v4624_v58 = vld [vmem:[#allocation2 + $0x102] sm:$0xff]  ;;  %v4625_v59 = vld [vmem:[#allocation2 + $0x10a] sm:$0xff]  ;;  %1611 = vst.msk [vmem:[#allocation2 + $0x138] sm:$0xff] %vm1571_vm4, %v1506_v55  ;;  %v1504_v60 = vsel %vm1296_vm14, %v992_v33, %v1400_v50  ;;  %v7749_v49 = vpop.f32.mrb[40].mxu0  ;;  %v1716_v13 = vld [vmem:[#allocation2 + $0xf8] sm:$0xff]  ;;  %v8787_v33 = vpack.c.bf16 %v2740_v41, %v2739_v3  ;;  %vm2257_vm14 = vcmask 523520  }
 0x188   : > { %2532 = vrot.lane.b32.xlu1 %v8604_v1, %s8187_s13  ;;  %1609 = vst.msk [vmem:[#allocation2 + $0x128] sm:$0xff] %vm1571_vm4, %v1504_v60  ;;  %v1013_v51 = vadd.f32 %v8734_v14, %v7749_v49  ;;  %v1004_v63 = vpop.f32.mrb[41].mxu0  ;;  %v8767_v0 = vpack.c.bf16 %v4625_v59, %v4624_v58  ;;  %4767 = vst.msk [vmem:[#allocation3 + $0x118] sm:$0xff] %vm1571_vm4, %v8758_v56  ;;  %v1715_v11 = vld [vmem:[#allocation2 + $0xf0] sm:$0xff]  ;;  %v3167_v22 = vld [vmem:[#allocation2 + $0xd9] sm:$0xff] }
 0x189   : > { %v1005_v5 = vadd.f32 %v8734_v14, %v1004_v63  ;;  %v7750_v6 = vpop.f32.mrb[42].mxu0  ;;  %v1804_v20 = vpack.c.bf16 %v1716_v13, %v1715_v11  ;;  %v3166_v21 = vld [vmem:[#allocation2 + $0xd1] sm:$0xff]  ;;  %v1718_v29 = vld [vmem:[#allocation2 + $0x108] sm:$0xff] }
 0x18a   : > { %3566 = vrot.lane.b32.xlu0 %v8548_v12, %s8186_s10  ;;  %vm1301_vm15 = vcmp.ge.f32.partialorder %v1013_v51, 0.0  ;;  %v1405_v9 = vmul.f32 0.01, %v1013_v51  ;;  %v1016_v27 = vadd.f32 %v8734_v14, %v7750_v6  ;;  %v1007_v10 = vpop.f32.mrb[43].mxu0  ;;  %4768 = vst.msk [vmem:[#allocation3 + $0x130] sm:$0xff] %vm1571_vm4, %v8767_v0  ;;  %v1717_v12 = vld [vmem:[#allocation2 + $0x100] sm:$0xff]  ;;  %v3259_v26 = vpack.c.bf16 %v3167_v22, %v3166_v21 }
 0x18b   : > { %vm1299_vm0 = vcmp.ge.f32.partialorder %v1005_v5, 0.0  ;;  %v1403_v15 = vmul.f32 0.01, %v1005_v5  ;;  %v1008_v16 = vadd.f32 %v8734_v14, %v1007_v10  ;;  %1856 = vst.msk [vmem:[#allocation3 + $0x168] sm:$0xff] %vm1571_vm4, %v1804_v20  ;;  %v1805_v32 = vpack.c.bf16 %v1718_v29, %v1717_v12  ;;  %v1910_v35 = vld [vmem:[#allocation2 + $0x89] sm:$0xff]  ;;  %v1720_v49 = vld [vmem:[#allocation2 + $0x118] sm:$0xff] }
 0x18c   : > { %2949 = vrot.lane.b32.xlu1 %v8775_v7, %s8188_s25  ;;  %v1509_v23 = vsel %vm1301_vm15, %v1013_v51, %v1405_v9  ;;  %vm1302_vm1 = vcmp.ge.f32.partialorder %v1016_v27, 0.0  ;;  %v1406_v24 = vmul.f32 0.01, %v1016_v27  ;;  %3311 = vst.msk [vmem:[#allocation3 + $0x110] sm:$0xff] %vm1571_vm4, %v3259_v26  ;;  %v3169_v55 = vld [vmem:[#allocation2 + $0xe9] sm:$0xff]  ;;  %v8807_v58 = vpack.c.bf16 %v1910_v35, %v1909_v34  ;;  %v3170_v61 = vld [vmem:[#allocation2 + $0xf1] sm:$0xff] }
 0x18d   : > { %v4627_v30 = vld [vmem:[#allocation2 + $0x11a] sm:$0xff]  ;;  %1614 = vst.msk [vmem:[#allocation2 + $0x150] sm:$0xff] %vm1571_vm4, %v1509_v23  ;;  %v1507_v47 = vsel %vm1299_vm0, %v1005_v5, %v1403_v15  ;;  %vm1300_vm3 = vcmp.ge.f32.partialorder %v1008_v16, 0.0  ;;  %v1404_v31 = vmul.f32 0.01, %v1008_v16  ;;  %1857 = vst.msk [vmem:[#allocation3 + $0x180] sm:$0xff] %vm1571_vm4, %v1805_v32 }
 0x18e   : > { %4394 = vrot.lane.b32.xlu0 %v8594_v62, %s8188_s25  ;;  %1612 = vst.msk [vmem:[#allocation2 + $0x140] sm:$0xff] %vm1571_vm4, %v1507_v47  ;;  %v1510_v36 = vsel %vm1302_vm1, %v1016_v27, %v1406_v24  ;;  %v8791_v44 = vpack.c.bf16 %v4627_v30, %v4626_v4  ;;  %v3168_v62 = vld [vmem:[#allocation2 + $0xe1] sm:$0xff]  ;;  %v4630_v52 = vld [vmem:[#allocation2 + $0x132] sm:$0xff]  ;;  %v3173_v27 = vld [vmem:[#allocation2 + $0x109] sm:$0xff]  ;;  %vm2674_vm15 = vcmask 785920   ;;  %vm3091_vm1 = vcmask 1048320  }
 0x18f   : > { %v4628_v38 = vld [vmem:[#allocation2 + $0x122] sm:$0xff]  ;;  %v4629_v39 = vld [vmem:[#allocation2 + $0x12a] sm:$0xff]  ;;  %1615 = vst.msk [vmem:[#allocation2 + $0x158] sm:$0xff] %vm1571_vm4, %v1510_v36  ;;  %v1508_v40 = vsel %vm1300_vm3, %v1008_v16, %v1404_v31  ;;  %v7753_v42 = vpop.f32.mrb[44].mxu0  ;;  %v3260_v60 = vpack.c.bf16 %v3169_v55, %v3168_v62  ;;  %v3171_v51 = vld [vmem:[#allocation2 + $0xf9] sm:$0xff] }
 0x190   : > { %2947 = vrot.lane.b32.xlu1 %v8787_v33, %s8188_s25  ;;  %1613 = vst.msk [vmem:[#allocation2 + $0x148] sm:$0xff] %vm1571_vm4, %v1508_v40  ;;  %v1029_v45 = vadd.f32 %v8734_v14, %v7753_v42  ;;  %v1020_v48 = vpop.f32.mrb[45].mxu0  ;;  %v8800_v50 = vpack.c.bf16 %v4629_v39, %v4628_v38  ;;  %4769 = vst.msk [vmem:[#allocation3 + $0x148] sm:$0xff] %vm1571_vm4, %v8791_v44  ;;  %v1719_v57 = vld [vmem:[#allocation2 + $0x110] sm:$0xff]  ;;  %v3261_v41 = vpack.c.bf16 %v3171_v51, %v3170_v61  ;;  %v1721_v4 = vld [vmem:[#allocation2 + $0x120] sm:$0xff] }
 0x191   : > { %v1021_v53 = vadd.f32 %v8734_v14, %v1020_v48  ;;  %v1806_v3 = vpack.c.bf16 %v1720_v49, %v1719_v57  ;;  %v1722_v5 = vld [vmem:[#allocation2 + $0x128] sm:$0xff]  ;;  %3312 = vst.msk [vmem:[#allocation3 + $0x128] sm:$0xff] %vm1571_vm4, %v3260_v60  ;;  %v1723_v10 = vld [vmem:[#allocation2 + $0x130] sm:$0xff]  ;;  %v1724_v11 = vld [vmem:[#allocation2 + $0x138] sm:$0xff]  ;;  %v7754_v20 = vpop.f32.mrb[46].mxu0 }
 0x192   : > { %3568 = vrot.lane.b32.xlu0 %v8569_v25, %s8186_s10  ;;  %vm1305_vm5 = vcmp.ge.f32.partialorder %v1029_v45, 0.0  ;;  %v1409_v59 = vmul.f32 0.01, %v1029_v45  ;;  %4770 = vst.msk [vmem:[#allocation3 + $0x160] sm:$0xff] %vm1571_vm4, %v8800_v50  ;;  %v3172_v6 = vld [vmem:[#allocation2 + $0x101] sm:$0xff]  ;;  %v1807_v9 = vpack.c.bf16 %v1722_v5, %v1721_v4  ;;  %v1911_v13 = vld [vmem:[#allocation2 + $0x91] sm:$0xff]  ;;  %v1808_v12 = vpack.c.bf16 %v1724_v11, %v1723_v10 }
 0x193   : > { %vm1303_vm6 = vcmp.ge.f32.partialorder %v1021_v53, 0.0  ;;  %v1407_v63 = vmul.f32 0.01, %v1021_v53  ;;  %v8819_v21 = vld [vmem:[%s10922_s3 + $0x80] sm:$0xff]   ;;  %1858 = vst.msk [vmem:[#allocation3 + $0x198] sm:$0xff] %vm1571_vm4, %v1806_v3  ;;  %3313 = vst.msk [vmem:[#allocation3 + $0x140] sm:$0xff] %vm1571_vm4, %v3261_v41  ;;  %v3262_v22 = vpack.c.bf16 %v3173_v27, %v3172_v6  ;;  %v1032_v24 = vadd.f32 %v8734_v14, %v7754_v20 }
 0x194   : > { %2117 = vrot.lane.b32.xlu1 %v8807_v58, %s8186_s10  ;;  %v1513_v25 = vsel %vm1305_vm5, %v1029_v45, %v1409_v59  ;;  %v1912_v23 = vld [vmem:[#allocation2 + $0x99] sm:$0xff]  ;;  %1859 = vst.msk [vmem:[#allocation3 + $0x1b0] sm:$0xff] %vm1571_vm4, %v1807_v9  ;;  %v3174_v29 = vld [vmem:[#allocation2 + $0x111] sm:$0xff]  ;;  %7811 = vmatprep.subr.bf16.mxu0 %v8819_v21  ;;  %v1023_v47 = vpop.f32.mrb[47].mxu0  ;;  %1860 = vst.msk [vmem:[#allocation3 + $0x1c8] sm:$0xff] %vm1571_vm4, %v1808_v12 }
 0x195   : > { %v4631_v15 = vld [vmem:[#allocation2 + $0x13a] sm:$0xff]  ;;  %1618 = vst.msk [vmem:[#allocation2 + $0x170] sm:$0xff] %vm1571_vm4, %v1513_v25  ;;  %v1511_v16 = vsel %vm1303_vm6, %v1021_v53, %v1407_v63  ;;  %3314 = vst.msk [vmem:[#allocation3 + $0x158] sm:$0xff] %vm1571_vm4, %v3262_v22  ;;  %vm1306_vm7 = vcmp.ge.f32.partialorder %v1032_v24, 0.0  ;;  %v1024_v32 = vadd.f32 %v8734_v14, %v1023_v47  ;;  %v3177_v36 = vld [vmem:[#allocation2 + $0x129] sm:$0xff]  ;;  %v8838_v38 = vpack.c.bf16 %v1912_v23, %v1911_v13 }
 0x196   : > { %3980 = vrot.lane.b32.xlu0 %v8682_v28, %s8187_s13  ;;  %1616 = vst.msk [vmem:[#allocation2 + $0x160] sm:$0xff] %vm1571_vm4, %v1511_v16  ;;  %v8827_v26 = vpack.c.bf16 %v4631_v15, %v4630_v52  ;;  %v3175_v30 = vld [vmem:[#allocation2 + $0x119] sm:$0xff]  ;;  %v1410_v28 = vmul.f32 0.01, %v1032_v24  ;;  %v3176_v35 = vld [vmem:[#allocation2 + $0x121] sm:$0xff]  ;;  %v1727_v61 = vld [vmem:[#allocation2 + $0x150] sm:$0xff] }
 0x197   : > { %v3263_v31 = vpack.c.bf16 %v3175_v30, %v3174_v29  ;;  %v7757_v34 = vpop.f32.mrb[48].mxu0  ;;  %v3264_v42 = vpack.c.bf16 %v3177_v36, %v3176_v35  ;;  %v4632_v62 = vld [vmem:[#allocation2 + $0x142] sm:$0xff]  ;;  %v4633_v45 = vld [vmem:[#allocation2 + $0x14a] sm:$0xff]  ;;  %vm1304_vm2 = vcmp.ge.f32.partialorder %v1024_v32, 0.0  ;;  %v1408_v52 = vmul.f32 0.01, %v1024_v32 }
 0x198   : > { %2534 = vrot.lane.b32.xlu1 %v8619_v19, %s8187_s13  ;;  %4771 = vst.msk [vmem:[#allocation3 + $0x178] sm:$0xff] %vm1571_vm4, %v8827_v26  ;;  %v1045_v39 = vadd.f32 %v8734_v14, %v7757_v34  ;;  %v1036_v40 = vpop.f32.mrb[49].mxu0  ;;  %v1514_v48 = vsel %vm1306_vm7, %v1032_v24, %v1410_v28  ;;  %v4634_v55 = vld [vmem:[#allocation2 + $0x152] sm:$0xff]  ;;  %v1725_v60 = vld [vmem:[#allocation2 + $0x140] sm:$0xff]  ;;  %v1726_v49 = vld [vmem:[#allocation2 + $0x148] sm:$0xff]  ;;  %v8850_v41 = vpack.c.bf16 %v4633_v45, %v4632_v62 }
 0x199   : > { %3315 = vst.msk [vmem:[#allocation3 + $0x170] sm:$0xff] %vm1571_vm4, %v3263_v31  ;;  %v1037_v53 = vadd.f32 %v8734_v14, %v1036_v40  ;;  %1619 = vst.msk [vmem:[#allocation2 + $0x178] sm:$0xff] %vm1571_vm4, %v1514_v48  ;;  %v1512_v59 = vsel %vm1304_vm2, %v1024_v32, %v1408_v52  ;;  %v2745_v51 = vld [vmem:[#allocation2 + $0xb0] sm:$0xff]  ;;  %v1809_v4 = vpack.c.bf16 %v1726_v49, %v1725_v60  ;;  %v1728_v5 = vld [vmem:[#allocation2 + $0x158] sm:$0xff]  ;;  %v7758_v28 = vpop.f32.mrb[50].mxu0 }
 0x19a   : > { %4396 = vrot.lane.b32.xlu0 %v8709_v43, %s8188_s25  ;;  %vm1309_vm8 = vcmp.ge.f32.partialorder %v1045_v39, 0.0  ;;  %v1413_v57 = vmul.f32 0.01, %v1045_v39  ;;  %3316 = vst.msk [vmem:[#allocation3 + $0x188] sm:$0xff] %vm1571_vm4, %v3264_v42  ;;  %1617 = vst.msk [vmem:[#allocation2 + $0x168] sm:$0xff] %vm1571_vm4, %v1512_v59  ;;  %v1810_v9 = vpack.c.bf16 %v1728_v5, %v1727_v61  ;;  %v3178_v27 = vld [vmem:[#allocation2 + $0x131] sm:$0xff]  ;;  %v1048_v34 = vadd.f32 %v8734_v14, %v7758_v28 }
 0x19b   : > { %vm1307_vm9 = vcmp.ge.f32.partialorder %v1037_v53, 0.0  ;;  %v1411_v43 = vmul.f32 0.01, %v1037_v53  ;;  %v3179_v10 = vld [vmem:[#allocation2 + $0x139] sm:$0xff]  ;;  %v3180_v11 = vld [vmem:[#allocation2 + $0x141] sm:$0xff]  ;;  %4772 = vst.msk [vmem:[#allocation3 + $0x190] sm:$0xff] %vm1571_vm4, %v8850_v41 }
 0x19c   : > { %2119 = vrot.lane.b32.xlu1 %v8838_v38, %s8186_s10  ;;  %v1517_v3 = vsel %vm1309_vm8, %v1045_v39, %v1413_v57  ;;  %v2746_v13 = vld [vmem:[#allocation2 + $0xb8] sm:$0xff]  ;;  %1861 = vst.msk [vmem:[#allocation3 + $0x1e0] sm:$0xff] %vm1571_vm4, %v1809_v4  ;;  %v3265_v15 = vpack.c.bf16 %v3179_v10, %v3178_v27  ;;  %v3181_v16 = vld [vmem:[#allocation2 + $0x149] sm:$0xff]  ;;  %1862 = vst.msk [vmem:[#allocation3 + $0x1f8] sm:$0xff] %vm1571_vm4, %v1810_v9  ;;  %v1039_v35 = vpop.f32.mrb[51].mxu0  ;;  %vm1310_vm10 = vcmp.ge.f32.partialorder %v1048_v34, 0.0 }
 0x19d   : > { %v4635_v63 = vld [vmem:[#allocation2 + $0x15a] sm:$0xff]  ;;  %1622 = vst.msk [vmem:[#allocation2 + $0x190] sm:$0xff] %vm1571_vm4, %v1517_v3  ;;  %v1515_v6 = vsel %vm1307_vm9, %v1037_v53, %v1411_v43  ;;  %v3266_v20 = vpack.c.bf16 %v3181_v16, %v3180_v11  ;;  %v8869_v23 = vpack.c.bf16 %v2746_v13, %v2745_v51  ;;  %v2744_v29 = vld [vmem:[#allocation2 + $0xa8] sm:$0xff]  ;;  %v1040_v40 = vadd.f32 %v8734_v14, %v1039_v35  ;;  %v1731_v61 = vld [vmem:[#allocation2 + $0x170] sm:$0xff] }
 0x19e   : > { %4398 = vrot.lane.b32.xlu0 %v8741_v18, %s8188_s25  ;;  %v8855_v25 = vpack.c.bf16 %v4635_v63, %v4634_v55  ;;  %1620 = vst.msk [vmem:[#allocation2 + $0x180] sm:$0xff] %vm1571_vm4, %v1515_v6  ;;  %v3182_v18 = vld [vmem:[#allocation2 + $0x151] sm:$0xff]  ;;  %v3183_v22 = vld [vmem:[#allocation2 + $0x159] sm:$0xff]  ;;  %3317 = vst.msk [vmem:[#allocation3 + $0x1a0] sm:$0xff] %vm1571_vm4, %v3265_v15 }
 0x19f   : > { %v3267_v12 = vpack.c.bf16 %v3183_v22, %v3182_v18  ;;  %3318 = vst.msk [vmem:[#allocation3 + $0x1b8] sm:$0xff] %vm1571_vm4, %v3266_v20  ;;  %v2743_v24 = vld [vmem:[#allocation2 + $0xa0] sm:$0xff]  ;;  %v1914_v31 = vld [vmem:[#allocation2 + $0xa9] sm:$0xff]  ;;  %v7761_v62 = vpop.f32.mrb[52].mxu0  ;;  %vm1308_vm11 = vcmp.ge.f32.partialorder %v1040_v40, 0.0  ;;  %v2750_v16 = vld [vmem:[#allocation2 + $0xd8] sm:$0xff] }
 0x1a0   : > { %2536 = vrot.lane.b32.xlu1 %v8647_v54, %s8187_s13  ;;  %4773 = vst.msk [vmem:[#allocation3 + $0x1a8] sm:$0xff] %vm1571_vm4, %v8855_v25  ;;  %v8877_v30 = vpack.c.bf16 %v2744_v29, %v2743_v24  ;;  %v1913_v47 = vld [vmem:[#allocation2 + $0xa1] sm:$0xff]  ;;  %v1916_v32 = vld [vmem:[#allocation2 + $0xb9] sm:$0xff]  ;;  %v1412_v52 = vmul.f32 0.01, %v1040_v40  ;;  %v1061_v53 = vadd.f32 %v8734_v14, %v7761_v62  ;;  %v1052_v55 = vpop.f32.mrb[53].mxu0 }
 0x1a1   : > { %3319 = vst.msk [vmem:[#allocation3 + $0x1d0] sm:$0xff] %vm1571_vm4, %v3267_v12  ;;  %v4636_v36 = vld [vmem:[#allocation2 + $0x162] sm:$0xff]  ;;  %v4637_v39 = vld [vmem:[#allocation2 + $0x16a] sm:$0xff]  ;;  %v1053_v57 = vadd.f32 %v8734_v14, %v1052_v55  ;;  %v1732_v3 = vld [vmem:[#allocation2 + $0x178] sm:$0xff] }
 0x1a2   : > { %3570 = vrot.lane.b32.xlu0 %v8604_v1, %s8186_s10  ;;  %v8883_v1 = vpack.c.bf16 %v1914_v31, %v1913_v47  ;;  %v8900_v59 = vpack.c.bf16 %v4637_v39, %v4636_v36  ;;  %v1516_v43 = vsel %vm1308_vm11, %v1040_v40, %v1412_v52  ;;  %vm1313_vm12 = vcmp.ge.f32.partialorder %v1061_v53, 0.0  ;;  %v1729_v60 = vld [vmem:[#allocation2 + $0x160] sm:$0xff]  ;;  %v1730_v49 = vld [vmem:[#allocation2 + $0x168] sm:$0xff]  ;;  %v3186_v11 = vld [vmem:[#allocation2 + $0x171] sm:$0xff] }
 0x1a3   : > { %1621 = vst.msk [vmem:[#allocation2 + $0x188] sm:$0xff] %vm1571_vm4, %v1516_v43  ;;  %vm1311_vm13 = vcmp.ge.f32.partialorder %v1053_v57, 0.0  ;;  %v1415_v51 = vmul.f32 0.01, %v1053_v57  ;;  %v3184_v4 = vld [vmem:[#allocation2 + $0x161] sm:$0xff]  ;;  %v3185_v5 = vld [vmem:[#allocation2 + $0x169] sm:$0xff]  ;;  %v1811_v9 = vpack.c.bf16 %v1730_v49, %v1729_v60  ;;  %v1812_v27 = vpack.c.bf16 %v1732_v3, %v1731_v61 }
 0x1a4   : > { %2953 = vrot.lane.b32.xlu1 %v8869_v23, %s8188_s25  ;;  %4774 = vst.msk [vmem:[#allocation3 + $0x1c0] sm:$0xff] %vm1571_vm4, %v8900_v59  ;;  %v3268_v10 = vpack.c.bf16 %v3185_v5, %v3184_v4  ;;  %v2749_v15 = vld [vmem:[#allocation2 + $0xd0] sm:$0xff]  ;;  %v2747_v22 = vld [vmem:[#allocation2 + $0xc0] sm:$0xff]  ;;  %v2748_v12 = vld [vmem:[#allocation2 + $0xc8] sm:$0xff] }
 0x1a5   : > { %v4639_v45 = vld [vmem:[#allocation2 + $0x17a] sm:$0xff]  ;;  %v1519_v18 = vsel %vm1311_vm13, %v1053_v57, %v1415_v51  ;;  %1863 = vst.msk [vmem:[#allocation3 + $0x210] sm:$0xff] %vm1571_vm4, %v1811_v9  ;;  %1864 = vst.msk [vmem:[#allocation3 + $0x228] sm:$0xff] %vm1571_vm4, %v1812_v27  ;;  %v8931_v29 = vpack.c.bf16 %v2748_v12, %v2747_v22  ;;  %v1918_v31 = vld [vmem:[#allocation2 + $0xc9] sm:$0xff] }
 0x1a6   : > { %3986 = vrot.lane.b32.xlu0 %v8775_v7, %s8187_s13  ;;  %v1915_v7 = vld [vmem:[#allocation2 + $0xb1] sm:$0xff]  ;;  %v3187_v13 = vld [vmem:[#allocation2 + $0x179] sm:$0xff]  ;;  %1624 = vst.msk [vmem:[#allocation2 + $0x1a0] sm:$0xff] %vm1571_vm4, %v1519_v18  ;;  %3320 = vst.msk [vmem:[#allocation3 + $0x1e8] sm:$0xff] %vm1571_vm4, %v3268_v10 }
 0x1a7   : > { %v8893_v42 = vpack.c.bf16 %v1916_v32, %v1915_v7  ;;  %v3269_v20 = vpack.c.bf16 %v3187_v13, %v3186_v11  ;;  %v1917_v47 = vld [vmem:[#allocation2 + $0xc1] sm:$0xff]  ;;  %v7762_v7 = vpop.f32.mrb[54].mxu0  ;;  %v1919_v32 = vld [vmem:[#allocation2 + $0xd1] sm:$0xff] }
 0x1a8   : > { %2951 = vrot.lane.b32.xlu1 %v8877_v30, %s8188_s25  ;;  %v8938_v28 = vpack.c.bf16 %v1918_v31, %v1917_v47  ;;  %v1064_v35 = vadd.f32 %v8734_v14, %v7762_v7  ;;  %v1055_v36 = vpop.f32.mrb[55].mxu0  ;;  %v1733_v51 = vld [vmem:[#allocation2 + $0x180] sm:$0xff]  ;;  %v1735_v27 = vld [vmem:[#allocation2 + $0x190] sm:$0xff] }
 0x1a9   : > { %3321 = vst.msk [vmem:[#allocation3 + $0x200] sm:$0xff] %vm1571_vm4, %v3269_v20  ;;  %v1056_v62 = vadd.f32 %v8734_v14, %v1055_v36  ;;  %v2753_v12 = vld [vmem:[#allocation2 + $0xf0] sm:$0xff]  ;;  %v2751_v7 = vld [vmem:[#allocation2 + $0xe0] sm:$0xff] }
 0x1aa   : > { %3984 = vrot.lane.b32.xlu0 %v8787_v33, %s8187_s13  ;;  %v1414_v33 = vmul.f32 0.01, %v1048_v34  ;;  %v4640_v39 = vld [vmem:[#allocation2 + $0x182] sm:$0xff]  ;;  %vm1314_vm0 = vcmp.ge.f32.partialorder %v1064_v35, 0.0  ;;  %v1418_v40 = vmul.f32 0.01, %v1064_v35 }
 0x1ab   : > { %vm1312_vm3 = vcmp.ge.f32.partialorder %v1056_v62, 0.0  ;;  %v1416_v55 = vmul.f32 0.01, %v1056_v62  ;;  %v1734_v3 = vld [vmem:[#allocation2 + $0x188] sm:$0xff] }
 0x1ac   : > { %2121 = vrot.lane.b32.xlu1 %v8883_v1, %s8186_s10  ;;  %v1518_v48 = vsel %vm1310_vm10, %v1048_v34, %v1414_v33  ;;  %v1920_v34 = vld [vmem:[#allocation2 + $0xd9] sm:$0xff]  ;;  %v4641_v33 = vld [vmem:[#allocation2 + $0x18a] sm:$0xff]  ;;  %v3188_v20 = vld [vmem:[#allocation2 + $0x181] sm:$0xff] }
 0x1ad   : > { %1623 = vst.msk [vmem:[#allocation2 + $0x198] sm:$0xff] %vm1571_vm4, %v1518_v48  ;;  %v8959_v60 = vpack.c.bf16 %v4641_v33, %v4640_v39  ;;  %v1520_v61 = vsel %vm1312_vm3, %v1056_v62, %v1416_v55  ;;  %v3189_v22 = vld [vmem:[#allocation2 + $0x189] sm:$0xff] }
 0x1ae   : > { %4400 = vrot.lane.b32.xlu0 %v8807_v58, %s8188_s25  ;;  %v4638_v58 = vld [vmem:[#allocation2 + $0x172] sm:$0xff]  ;;  %1625 = vst.msk [vmem:[#allocation2 + $0x1a8] sm:$0xff] %vm1571_vm4, %v1520_v61  ;;  %v3270_v31 = vpack.c.bf16 %v3189_v22, %v3188_v20 }
 0x1af   : > { %v8905_v63 = vpack.c.bf16 %v4639_v45, %v4638_v58  ;;  %v8950_v58 = vpack.c.bf16 %v1920_v34, %v1919_v32  ;;  %4776 = vst.msk [vmem:[#allocation3 + $0x1f0] sm:$0xff] %vm1571_vm4, %v8959_v60  ;;  %v2752_v32 = vld [vmem:[#allocation2 + $0xe8] sm:$0xff] }
 0x1b0   : > { %2538 = vrot.lane.b32.xlu1 %v8660_v2, %s8187_s13  ;;  %3322 = vst.msk [vmem:[#allocation3 + $0x218] sm:$0xff] %vm1571_vm4, %v3270_v31  ;;  %v8996_v36 = vpack.c.bf16 %v2752_v32, %v2751_v7  ;;  %v2756_v7 = vld [vmem:[#allocation2 + $0x108] sm:$0xff] }
 0x1b1   : > { %4775 = vst.msk [vmem:[#allocation3 + $0x1d8] sm:$0xff] %vm1571_vm4, %v8905_v63 }
 0x1b2   : > { %3572 = vrot.lane.b32.xlu0 %v8619_v19, %s8186_s10  ;;  %v1417_v19 = vmul.f32 0.01, %v1061_v53 }
 0x1b4   : > { %2123 = vrot.lane.b32.xlu1 %v8893_v42, %s8186_s10  ;;  %v1521_v6 = vsel %vm1313_vm12, %v1061_v53, %v1417_v19  ;;  %v4642_v48 = vld [vmem:[#allocation2 + $0x192] sm:$0xff]  ;;  %v4643_v52 = vld [vmem:[#allocation2 + $0x19a] sm:$0xff]  ;;  %v1522_v53 = vsel %vm1314_vm0, %v1064_v35, %v1418_v40 }
 0x1b5   : > { %1626 = vst.msk [vmem:[#allocation2 + $0x1b0] sm:$0xff] %vm1571_vm4, %v1521_v6  ;;  %1627 = vst.msk [vmem:[#allocation2 + $0x1b8] sm:$0xff] %vm1571_vm4, %v1522_v53  ;;  %v3190_v4 = vld [vmem:[#allocation2 + $0x191] sm:$0xff]  ;;  %v8965_v6 = vpack.c.bf16 %v4643_v52, %v4642_v48  ;;  %v3191_v9 = vld [vmem:[#allocation2 + $0x199] sm:$0xff] }
 0x1b6   : > { %4402 = vrot.lane.b32.xlu0 %v8838_v38, %s8188_s25  ;;  %v8924_v38 = vpack.c.bf16 %v2750_v16, %v2749_v15  ;;  %v1736_v10 = vld [vmem:[#allocation2 + $0x198] sm:$0xff]  ;;  %v1813_v15 = vpack.c.bf16 %v1734_v3, %v1733_v51  ;;  %v3271_v16 = vpack.c.bf16 %v3191_v9, %v3190_v4  ;;  %v3192_v61 = vld [vmem:[#allocation2 + $0x1a1] sm:$0xff] }
 0x1b7   : > { %v1814_v18 = vpack.c.bf16 %v1736_v10, %v1735_v27  ;;  %4777 = vst.msk [vmem:[#allocation3 + $0x208] sm:$0xff] %vm1571_vm4, %v8965_v6  ;;  %v1924_v48 = vld [vmem:[#allocation2 + $0xf9] sm:$0xff]  ;;  %v1738_v51 = vld [vmem:[#allocation2 + $0x1a8] sm:$0xff] }
 0x1b8   : > { %2540 = vrot.lane.b32.xlu1 %v8692_v46, %s8187_s13  ;;  %1865 = vst.msk [vmem:[#allocation3 + $0x240] sm:$0xff] %vm1571_vm4, %v1813_v15  ;;  %3323 = vst.msk [vmem:[#allocation3 + $0x230] sm:$0xff] %vm1571_vm4, %v3271_v16  ;;  %v2757_v15 = vld [vmem:[#allocation2 + $0x110] sm:$0xff]  ;;  %v2758_v16 = vld [vmem:[#allocation2 + $0x118] sm:$0xff] }
 0x1b9   : > { %1866 = vst.msk [vmem:[#allocation3 + $0x258] sm:$0xff] %vm1571_vm4, %v1814_v18  ;;  %v9051_v31 = vpack.c.bf16 %v2758_v16, %v2757_v15  ;;  %v3378_v15 = vld [vmem:[#allocation2 + $0xf2] sm:$0xff]  ;;  %v3379_v16 = vld [vmem:[#allocation2 + $0xfa] sm:$0xff] }
 0x1ba   : > { %3574 = vrot.lane.b32.xlu0 %v8647_v54, %s8186_s10 }
 0x1bc   : > { %2957 = vrot.lane.b32.xlu1 %v8924_v38, %s8188_s25  ;;  %v2102_v24 = vpop.permute.xlu0 %2101  ;;  %v4646_v52 = vld [vmem:[#allocation2 + $0x1b2] sm:$0xff]  ;;  %v4645_v53 = vld [vmem:[#allocation2 + $0x1aa] sm:$0xff] }
 0x1bd   : > { %2258 = vst.msk [vmem:[#allocation3] sm:$0xff] %vm2257_vm14, %v2102_v24  ;;  %v2754_v24 = vld [vmem:[#allocation2 + $0xf8] sm:$0xff]  ;;  %v1739_v27 = vld [vmem:[#allocation2 + $0x1b0] sm:$0xff] }
 0x1be   : > { %3990 = vrot.lane.b32.xlu0 %v8869_v23, %s8187_s13 }
 0x1c0   : > { %2955 = vrot.lane.b32.xlu1 %v8931_v29, %s8188_s25  ;;  %v2519_v54 = vpop.permute.xlu0 %2518 }
 0x1c1   : > { %2675 = vst.msk [vmem:[#allocation3] sm:$0xff] %vm2674_vm15, %v2519_v54 }
 0x1c2   : > { %3988 = vrot.lane.b32.xlu0 %v8877_v30, %s8187_s13 }
 0x1c4   : > { %2125 = vrot.lane.b32.xlu1 %v8938_v28, %s8186_s10  ;;  %v2104_v23 = vpop.permute.xlu0 %2103 }
 0x1c5   : > { %2259 = vst.msk [vmem:[#allocation3 + $0x18] sm:$0xff] %vm2257_vm14, %v2104_v23  ;;  %v8988_v23 = vpack.c.bf16 %v2754_v24, %v2753_v12 }
 0x1c6   : > { %4404 = vrot.lane.b32.xlu0 %v8883_v1, %s8188_s25  ;;  %v7765_v1 = vpop.f32.mrb[56].mxu0 }
 0x1c7   : > { %v1077_v57 = vadd.f32 %v8734_v14, %v7765_v1  ;;  %v1068_v43 = vpop.f32.mrb[57].mxu0  ;;  %v1923_v1 = vld [vmem:[#allocation2 + $0xf1] sm:$0xff] }
 0x1c8   : > { %2542 = vrot.lane.b32.xlu1 %v8698_v37, %s8187_s13  ;;  %v2521_v30 = vpop.permute.xlu0 %2520  ;;  %v1069_v19 = vadd.f32 %v8734_v14, %v1068_v43  ;;  %v7766_v18 = vpop.f32.mrb[58].mxu0 }
 0x1c9   : > { %2676 = vst.msk [vmem:[#allocation3 + $0x18] sm:$0xff] %vm2674_vm15, %v2521_v30  ;;  %vm1317_vm5 = vcmp.ge.f32.partialorder %v1077_v57, 0.0  ;;  %v1922_v30 = vld [vmem:[#allocation2 + $0xe9] sm:$0xff]  ;;  %v1080_v12 = vadd.f32 %v8734_v14, %v7766_v18  ;;  %v1071_v24 = vpop.f32.mrb[59].mxu0 }
 0x1ca   : > { %v8952_v45 = vpop.permute.xlu1 %2524  ;;  %3576 = vrot.lane.b32.xlu0 %v8660_v2, %s8186_s10  ;;  %v1421_v2 = vmul.f32 0.01, %v1077_v57  ;;  %vm1315_vm6 = vcmp.ge.f32.partialorder %v1069_v19, 0.0  ;;  %v1419_v5 = vmul.f32 0.01, %v1069_v19 }
 0x1cb   : > { %vm1318_vm7 = vcmp.ge.f32.partialorder %v1080_v12, 0.0 }
 0x1cc   : > { %2127 = vrot.lane.b32.xlu1 %v8950_v58, %s8186_s10  ;;  %v2938_v49 = vpop.permute.xlu0 %2937  ;;  %v1525_v13 = vsel %vm1317_vm5, %v1077_v57, %v1421_v2  ;;  %v1523_v47 = vsel %vm1315_vm6, %v1069_v19, %v1419_v5  ;;  %v3194_v5 = vld [vmem:[#allocation2 + $0x1b1] sm:$0xff] }
 0x1cd   : > { %3093 = vst.msk [vmem:[#allocation3 + $0x18] sm:$0xff] %vm3091_vm1, %v2938_v49 }
 0x1ce   : > { %v8969_v11 = vpop.permute.xlu1 %2941  ;;  %4406 = vrot.lane.b32.xlu0 %v8893_v42, %s8188_s25  ;;  %1630 = vst.msk [vmem:[#allocation2 + $0x1d0] sm:$0xff] %vm1571_vm4, %v1525_v13  ;;  %1628 = vst.msk [vmem:[#allocation2 + $0x1c0] sm:$0xff] %vm1571_vm4, %v1523_v47  ;;  %v1740_v13 = vld [vmem:[#allocation2 + $0x1b8] sm:$0xff] }
 0x1cf   : > { %v1816_v20 = vpack.c.bf16 %v1740_v13, %v1739_v27 }
 0x1d0   : > { %2544 = vrot.lane.b32.xlu1 %v8726_v8, %s8187_s13  ;;  %v3561_v42 = vpop.permute.xlu0 %3560 }
 0x1d1   : > { %3716 = vst.msk [vmem:[#allocation3 + $0x8] sm:$0xff] %vm2257_vm14, %v3561_v42  ;;  %v7769_v42 = vpop.f32.mrb[60].mxu0 }
 0x1d2   : > { %v2110_v54 = vpop.permute.xlu1 %2109  ;;  %3578 = vrot.lane.b32.xlu0 %v8692_v46, %s8186_s10  ;;  %v1921_v46 = vld [vmem:[#allocation2 + $0xe1] sm:$0xff]  ;;  %1868 = vst.msk [vmem:[#allocation3 + $0x288] sm:$0xff] %vm1571_vm4, %v1816_v20 }
 0x1d3   : > { %2262 = vst.msk [vmem:[#allocation3 + $0x60] sm:$0xff] %vm2257_vm14, %v2110_v54  ;;  %v9004_v40 = vpack.c.bf16 %v1922_v30, %v1921_v46  ;;  %v2755_v54 = vld [vmem:[#allocation2 + $0x100] sm:$0xff] }
 0x1d4   : > { %2961 = vrot.lane.b32.xlu1 %v8988_v23, %s8188_s25  ;;  %v2936_v34 = vpop.permute.xlu0 %2935 }
 0x1d5   : > { %3092 = vst.msk [vmem:[#allocation3] sm:$0xff] %vm3091_vm1, %v2936_v34  ;;  %v4647_v55 = vld [vmem:[#allocation2 + $0x1ba] sm:$0xff]  ;;  %v1093_v34 = vadd.f32 %v8734_v14, %v7769_v42 }
 0x1d6   : > { %v2527_v35 = vpop.permute.xlu1 %2526  ;;  %3994 = vrot.lane.b32.xlu0 %v8924_v38, %s8187_s13  ;;  %v9026_v49 = vpack.c.bf16 %v4647_v55, %v4646_v52  ;;  %v3195_v9 = vld [vmem:[#allocation2 + $0x1b9] sm:$0xff] }
 0x1d7   : > { %2679 = vst.msk [vmem:[#allocation3 + $0x60] sm:$0xff] %vm2674_vm15, %v2527_v35  ;;  %v1084_v35 = vpop.f32.mrb[61].mxu0  ;;  %vm1321_vm8 = vcmp.ge.f32.partialorder %v1093_v34, 0.0  ;;  %v2762_v42 = vld [vmem:[#allocation2 + $0x138] sm:$0xff] }
 0x1d8   : > { %2959 = vrot.lane.b32.xlu1 %v8996_v36, %s8188_s25  ;;  %v2106_v39 = vpop.permute.xlu0 %2105  ;;  %4779 = vst.msk [vmem:[#allocation3 + $0x238] sm:$0xff] %vm1571_vm4, %v9026_v49 }
 0x1d9   : > { %2260 = vst.msk [vmem:[#allocation3 + $0x30] sm:$0xff] %vm2257_vm14, %v2106_v39 }
 0x1da   : > { %v2112_v33 = vpop.permute.xlu1 %2111  ;;  %3992 = vrot.lane.b32.xlu0 %v8931_v29, %s8187_s13  ;;  %v4644_v29 = vld [vmem:[#allocation2 + $0x1a2] sm:$0xff] }
 0x1db   : > { %2263 = vst.msk [vmem:[#allocation3 + $0x78] sm:$0xff] %vm2257_vm14, %v2112_v33  ;;  %v9024_v19 = vpack.c.bf16 %v4645_v53, %v4644_v29  ;;  %v1425_v33 = vmul.f32 0.01, %v1093_v34 }
 0x1dc   : > { %2129 = vrot.lane.b32.xlu1 %v9004_v40, %s8186_s10  ;;  %v2523_v38 = vpop.permute.xlu0 %2522 }
 0x1dd   : > { %2677 = vst.msk [vmem:[#allocation3 + $0x30] sm:$0xff] %vm2674_vm15, %v2523_v38  ;;  %v1529_v52 = vsel %vm1321_vm8, %v1093_v34, %v1425_v33  ;;  %v2759_v33 = vld [vmem:[#allocation2 + $0x120] sm:$0xff] }
 0x1de   : > { %v2529_v62 = vpop.permute.xlu1 %2528  ;;  %4408 = vrot.lane.b32.xlu0 %v8938_v28, %s8188_s25  ;;  %v9022_v28 = vpack.c.bf16 %v1924_v48, %v1923_v1  ;;  %4778 = vst.msk [vmem:[#allocation3 + $0x220] sm:$0xff] %vm1571_vm4, %v9024_v19  ;;  %v1926_v48 = vld [vmem:[#allocation2 + $0x109] sm:$0xff]  ;;  %1634 = vst.msk [vmem:[#allocation2 + $0x1f0] sm:$0xff] %vm1571_vm4, %v1529_v52 }
 0x1df   : > { %2680 = vst.msk [vmem:[#allocation3 + $0x78] sm:$0xff] %vm2674_vm15, %v2529_v62  ;;  %v9062_v62 = vpack.c.bf16 %v2756_v7, %v2755_v54  ;;  %v3469_v54 = vpack.c.bf16 %v3379_v16, %v3378_v15  ;;  %v1931_v16 = vld [vmem:[#allocation2 + $0x131] sm:$0xff] }
 0x1e0   : > { %2546 = vrot.lane.b32.xlu1 %v8737_v17, %s8187_s13  ;;  %v2108_v57 = vpop.permute.xlu0 %2107 }
 0x1e1   : > { %2261 = vst.msk [vmem:[#allocation3 + $0x48] sm:$0xff] %vm2257_vm14, %v2108_v57 }
 0x1e2   : > { %2678 = vst.msk [vmem:[#allocation3 + $0x48] sm:$0xff] %vm2674_vm15, %v8952_v45  ;;  %v9018_v43 = vpop.permute.xlu1 %3982  ;;  %3580 = vrot.lane.b32.xlu0 %v8698_v37, %s8186_s10  ;;  %v3193_v37 = vld [vmem:[#allocation2 + $0x1a9] sm:$0xff]  ;;  %v1737_v45 = vld [vmem:[#allocation2 + $0x1a0] sm:$0xff] }
 0x1e3   : > { %3095 = vst.msk [vmem:[#allocation3 + $0x48] sm:$0xff] %vm3091_vm1, %v8969_v11  ;;  %v3272_v3 = vpack.c.bf16 %v3193_v37, %v3192_v61  ;;  %v1815_v4 = vpack.c.bf16 %v1738_v51, %v1737_v45  ;;  %v3273_v11 = vpack.c.bf16 %v3195_v9, %v3194_v5  ;;  %v1928_v37 = vld [vmem:[#allocation2 + $0x119] sm:$0xff]  ;;  %v8069_v51 = vld [vmem:[%s10922_s3 + $0x88] sm:$0xff]   ;;  %v9092_v9 = vld [vmem:[#allocation8] ss:$0 sm:$0xff] }
 0x1e4   : > { %2131 = vrot.lane.b32.xlu1 %v9022_v28, %s8186_s10  ;;  %v3563_v2 = vpop.permute.xlu0 %3562 }
 0x1e5   : > { %3717 = vst.msk [vmem:[#allocation3 + $0x20] sm:$0xff] %vm2257_vm14, %v3563_v2  ;;  %v1927_v2 = vld [vmem:[#allocation2 + $0x111] sm:$0xff] }
 0x1e6   : > { %v2946_v10 = vpop.permute.xlu1 %2945  ;;  %4410 = vrot.lane.b32.xlu0 %v8950_v58, %s8188_s25  ;;  %3324 = vst.msk [vmem:[#allocation3 + $0x248] sm:$0xff] %vm1571_vm4, %v3272_v3  ;;  %1867 = vst.msk [vmem:[#allocation3 + $0x270] sm:$0xff] %vm1571_vm4, %v1815_v4  ;;  %v1072_v58 = vadd.f32 %v8734_v14, %v1071_v24  ;;  %v4808_v3 = vld [vmem:[#allocation3] sm:$0xff]  ;;  %v7770_v4 = vpop.f32.mrb[62].mxu0 }
 0x1e7   : > { %3097 = vst.msk [vmem:[#allocation3 + $0x78] sm:$0xff] %vm3091_vm1, %v2946_v10  ;;  %v1096_v27 = vadd.f32 %v9092_v9, %v7770_v4  ;;  %v1087_v10 = vpop.f32.mrb[63].mxu0 }
 0x1e8   : > { %2548 = vrot.lane.b32.xlu1 %v8758_v56, %s8187_s13  ;;  %v3979_v22 = vpop.permute.xlu0 %3978  ;;  %3325 = vst.msk [vmem:[#allocation3 + $0x260] sm:$0xff] %vm1571_vm4, %v3273_v11  ;;  %v1422_v56 = vmul.f32 0.01, %v1080_v12  ;;  %vm1316_vm2 = vcmp.ge.f32.partialorder %v1072_v58, 0.0  ;;  %v1420_v32 = vmul.f32 0.01, %v1072_v58 }
 0x1e9   : > { %4133 = vst.msk [vmem:[#allocation3 + $0x20] sm:$0xff] %vm2674_vm15, %v3979_v22  ;;  %vm1322_vm10 = vcmp.ge.f32.partialorder %v1096_v27, 0.0  ;;  %v1426_v13 = vmul.f32 0.01, %v1096_v27  ;;  %v7773_v18 = vpop.f32.mrb[64].mxu0 }
 0x1ea   : > { %v2944_v47 = vpop.permute.xlu1 %2943  ;;  %3582 = vrot.lane.b32.xlu0 %v8726_v8, %s8186_s10  ;;  %v1526_v30 = vsel %vm1318_vm7, %v1080_v12, %v1422_v56  ;;  %v1085_v8 = vadd.f32 %v8734_v14, %v1084_v35  ;;  %v1524_v39 = vsel %vm1316_vm2, %v1072_v58, %v1420_v32  ;;  %v1925_v14 = vld [vmem:[#allocation2 + $0x101] sm:$0xff]  ;;  %v1109_v58 = vadd.f32 %v9092_v9, %v7773_v18  ;;  %v2761_v56 = vld [vmem:[#allocation2 + $0x130] sm:$0xff]  ;;  %v1932_v18 = vld [vmem:[#allocation2 + $0x139] sm:$0xff] }
 0x1eb   : > { %3096 = vst.msk [vmem:[#allocation3 + $0x60] sm:$0xff] %vm3091_vm1, %v2944_v47  ;;  %v9073_v55 = vpack.c.bf16 %v1926_v48, %v1925_v14  ;;  %v1530_v12 = vsel %vm1322_vm10, %v1096_v27, %v1426_v13  ;;  %v1100_v47 = vpop.f32.mrb[65].mxu0  ;;  %v1741_v27 = vld [vmem:[#allocation2 + $0x1c0] sm:$0xff]  ;;  %v1743_v13 = vld [vmem:[#allocation2 + $0x1d0] sm:$0xff] }
 0x1ec   : > { %2965 = vrot.lane.b32.xlu1 %v9051_v31, %s8188_s25  ;;  %v3977_v46 = vpop.permute.xlu0 %3976  ;;  %1631 = vst.msk [vmem:[#allocation2 + $0x1d8] sm:$0xff] %vm1571_vm4, %v1526_v30  ;;  %1629 = vst.msk [vmem:[#allocation2 + $0x1c8] sm:$0xff] %vm1571_vm4, %v1524_v39  ;;  %vm1319_vm9 = vcmp.ge.f32.partialorder %v1085_v8, 0.0  ;;  %v1423_v1 = vmul.f32 0.01, %v1085_v8  ;;  %vm1325_vm12 = vcmp.ge.f32.partialorder %v1109_v58, 0.0  ;;  %v9116_v39 = vpack.c.bf16 %v2762_v42, %v2761_v56 }
 0x1ed   : > { %4132 = vst.msk [vmem:[#allocation3 + $0x8] sm:$0xff] %vm2674_vm15, %v3977_v46  ;;  %v1429_v35 = vmul.f32 0.01, %v1109_v58  ;;  %v9158_v56 = vpack.c.bf16 %v1932_v18, %v1931_v16 }
 0x1ee   : > { %v2114_v38 = vpop.permute.xlu1 %2113  ;;  %3998 = vrot.lane.b32.xlu0 %v8988_v23, %s8187_s13  ;;  %v1527_v53 = vsel %vm1319_vm9, %v1085_v8, %v1423_v1  ;;  %1635 = vst.msk [vmem:[#allocation2 + $0x1f8] sm:$0xff] %vm1571_vm4, %v1530_v12 }
 0x1ef   : > { %2264 = vst.msk [vmem:[#allocation3 + $0x90] sm:$0xff] %vm2257_vm14, %v2114_v38  ;;  %v2760_v38 = vld [vmem:[#allocation2 + $0x128] sm:$0xff] }
 0x1f0   : > { %2963 = vrot.lane.b32.xlu1 %v9062_v62, %s8188_s25  ;;  %v4393_v29 = vpop.permute.xlu0 %4392  ;;  %1632 = vst.msk [vmem:[#allocation2 + $0x1e0] sm:$0xff] %vm1571_vm4, %v1527_v53  ;;  %v1929_v53 = vld [vmem:[#allocation2 + $0x121] sm:$0xff] }
 0x1f1   : > { %4548 = vst.msk [vmem:[#allocation3 + $0x8] sm:$0xff] %vm3091_vm1, %v4393_v29  ;;  %v9132_v29 = vpack.c.bf16 %v2760_v38, %v2759_v33 }
 0x1f2   : > { %v2531_v23 = vpop.permute.xlu1 %2530  ;;  %3996 = vrot.lane.b32.xlu0 %v8996_v36, %s8187_s13 }
 0x1f3   : > { %2681 = vst.msk [vmem:[#allocation3 + $0x90] sm:$0xff] %vm2674_vm15, %v2531_v23  ;;  %v4649_v22 = vld [vmem:[#allocation2 + $0x1ca] sm:$0xff]  ;;  %v4650_v7 = vld [vmem:[#allocation2 + $0x1d2] sm:$0xff] }
 0x1f4   : > { %2133 = vrot.lane.b32.xlu1 %v9073_v55, %s8186_s10  ;;  %v3565_v57 = vpop.permute.xlu0 %3564  ;;  %v1930_v23 = vld [vmem:[#allocation2 + $0x129] sm:$0xff] }
 0x1f5   : > { %3718 = vst.msk [vmem:[#allocation3 + $0x38] sm:$0xff] %vm2257_vm14, %v3565_v57  ;;  %v4654_v42 = vld [vmem:[#allocation2 + $0x1f2] sm:$0xff] }
 0x1f6   : > { %v2116_v61 = vpop.permute.xlu1 %2115  ;;  %4412 = vrot.lane.b32.xlu0 %v9004_v40, %s8188_s25  ;;  %v9090_v40 = vpack.c.bf16 %v1928_v37, %v1927_v2  ;;  %v4811_v2 = vld [vmem:[#allocation3 + $0x18] sm:$0xff] }
 0x1f7   : > { %2265 = vst.msk [vmem:[#allocation3 + $0xa8] sm:$0xff] %vm2257_vm14, %v2116_v61  ;;  %v4651_v32 = vld [vmem:[#allocation2 + $0x1da] sm:$0xff] }
 0x1f8   : > { %2550 = vrot.lane.b32.xlu1 %v8767_v0, %s8187_s13  ;;  %v2940_v36 = vpop.permute.xlu0 %2939  ;;  %v4809_v45 = vld [vmem:[#allocation3 + $0x8] sm:$0xff]  ;;  %v9122_v14 = vpack.c.bf16 %v4651_v32, %v4650_v7  ;;  %v3196_v37 = vld [vmem:[#allocation2 + $0x1c1] sm:$0xff] }
 0x1f9   : > { %3094 = vst.msk [vmem:[#allocation3 + $0x30] sm:$0xff] %vm3091_vm1, %v2940_v36  ;;  %5303 = vmatprep.mubr.bf16.mxu0 %v4809_v45  ;;  %v3197_v36 = vld [vmem:[#allocation2 + $0x1c9] sm:$0xff] }
 0x1fa   : > { %v2533_v5 = vpop.permute.xlu1 %2532  ;;  %3584 = vrot.lane.b32.xlu0 %v8737_v17, %s8186_s10  ;;  %5304 = vmatmul.mubr.bf16.vlgmr.msra.gmra.mrb[104].mxu0 %v4808_v3  ;;  %v1088_v17 = vadd.f32 %v9092_v9, %v1087_v10  ;;  %4781 = vst.msk [vmem:[#allocation3 + $0x268] sm:$0xff] %vm1571_vm4, %v9122_v14  ;;  %v3198_v3 = vld [vmem:[#allocation2 + $0x1d1] sm:$0xff]  ;;  %v7774_v10 = vpop.f32.mrb[66].mxu0 }
 0x1fb   : > { %2682 = vst.msk [vmem:[#allocation3 + $0xa8] sm:$0xff] %vm2674_vm15, %v2533_v5  ;;  %7812 = vmatpush3.bf16.msra.mxu0 %v8819_v21  ;;  %v4648_v21 = vld [vmem:[#allocation2 + $0x1c2] sm:$0xff]  ;;  %v3199_v5 = vld [vmem:[#allocation2 + $0x1d9] sm:$0xff]  ;;  %v1103_v12 = vpop.f32.mrb[67].mxu0 }
 0x1fc   : > { %2135 = vrot.lane.b32.xlu1 %v9090_v40, %s8186_s10  ;;  %v3567_v11 = vpop.permute.xlu0 %3566  ;;  %7813 = vmatprep.subr.bf16.mxu0 %v8069_v51  ;;  %vm1320_vm11 = vcmp.ge.f32.partialorder %v1088_v17, 0.0  ;;  %v1424_v24 = vmul.f32 0.01, %v1088_v17  ;;  %v9113_v30 = vpack.c.bf16 %v4649_v22, %v4648_v21 }
 0x1fd   : > { %3719 = vst.msk [vmem:[#allocation3 + $0x50] sm:$0xff] %vm2257_vm14, %v3567_v11  ;;  %v3275_v11 = vpack.c.bf16 %v3199_v5, %v3198_v3  ;;  %v8072_v3 = vld [vmem:[#allocation2 + $0x11a] sm:$0xff]  ;;  %v4817_v5 = vld [vmem:[#allocation3 + $0x48] sm:$0xff] }
 0x1fe   : > { %4135 = vst.msk [vmem:[#allocation3 + $0x50] sm:$0xff] %vm2674_vm15, %v9018_v43  ;;  %v2950_v20 = vpop.permute.xlu1 %2949  ;;  %4414 = vrot.lane.b32.xlu0 %v9022_v28, %s8188_s25  ;;  %v1101_v43 = vadd.f32 %v9092_v9, %v1100_v47  ;;  %v1528_v34 = vsel %vm1320_vm11, %v1088_v17, %v1424_v24  ;;  %v1744_v17 = vld [vmem:[#allocation2 + $0x1d8] sm:$0xff]  ;;  %v1104_v47 = vadd.f32 %v9092_v9, %v1103_v12  ;;  %v1745_v12 = vld [vmem:[#allocation2 + $0x1e0] sm:$0xff] }
 0x1ff   : > { %3099 = vst.msk [vmem:[#allocation3 + $0xa8] sm:$0xff] %vm3091_vm1, %v2950_v20  ;;  %7814 = vmatpush3.bf16.msra.mxu0 %v8069_v51  ;;  %v3274_v51 = vpack.c.bf16 %v3197_v36, %v3196_v37  ;;  %v1112_v20 = vadd.f32 %v9092_v9, %v7774_v10  ;;  %v1818_v22 = vpack.c.bf16 %v1744_v17, %v1743_v13  ;;  %v2765_v36 = vld [vmem:[#allocation2 + $0x150] sm:$0xff] }
 0x200   : > { %2552 = vrot.lane.b32.xlu1 %v8791_v44, %s8187_s13  ;;  %v4395_v28 = vpop.permute.xlu0 %4394  ;;  %1633 = vst.msk [vmem:[#allocation2 + $0x1e8] sm:$0xff] %vm1571_vm4, %v1528_v34  ;;  %vm1323_vm13 = vcmp.ge.f32.partialorder %v1101_v43, 0.0  ;;  %v1427_v46 = vmul.f32 0.01, %v1101_v43  ;;  %v1533_v44 = vsel %vm1325_vm12, %v1109_v58, %v1429_v35  ;;  %4780 = vst.msk [vmem:[#allocation3 + $0x250] sm:$0xff] %vm1571_vm4, %v9113_v30  ;;  %vm1324_vm3 = vcmp.ge.f32.partialorder %v1104_v47, 0.0 }
 0x201   : > { %4549 = vst.msk [vmem:[#allocation3 + $0x20] sm:$0xff] %vm3091_vm1, %v4395_v28  ;;  %vm1326_vm0 = vcmp.ge.f32.partialorder %v1112_v20, 0.0  ;;  %v1430_v58 = vmul.f32 0.01, %v1112_v20 }
 0x202   : > { %v2948_v8 = vpop.permute.xlu1 %2947  ;;  %3586 = vrot.lane.b32.xlu0 %v3469_v54, %s8186_s10  ;;  %1638 = vst.msk [vmem:[#allocation2 + $0x210] sm:$0xff] %vm1571_vm4, %v1533_v44  ;;  %v1531_v1 = vsel %vm1323_vm13, %v1101_v43, %v1427_v46  ;;  %3326 = vst.msk [vmem:[#allocation3 + $0x278] sm:$0xff] %vm1571_vm4, %v3274_v51  ;;  %v1428_v46 = vmul.f32 0.01, %v1104_v47 }
 0x203   : > { %3098 = vst.msk [vmem:[#allocation3 + $0x90] sm:$0xff] %vm3091_vm1, %v2948_v8  ;;  %v1534_v35 = vsel %vm1326_vm0, %v1112_v20, %v1430_v58  ;;  %v4813_v20 = vld [vmem:[#allocation3 + $0x28] sm:$0xff] }
 0x204   : > { %2969 = vrot.lane.b32.xlu1 %v9116_v39, %s8188_s25  ;;  %v3569_v48 = vpop.permute.xlu0 %3568  ;;  %1636 = vst.msk [vmem:[#allocation2 + $0x200] sm:$0xff] %vm1571_vm4, %v1531_v1  ;;  %3327 = vst.msk [vmem:[#allocation3 + $0x290] sm:$0xff] %vm1571_vm4, %v3275_v11  ;;  %v1532_v38 = vsel %vm1324_vm3, %v1104_v47, %v1428_v46  ;;  %v2763_v11 = vld [vmem:[#allocation2 + $0x140] sm:$0xff]  ;;  %v1747_v58 = vld [vmem:[#allocation2 + $0x1f0] sm:$0xff] }
 0x205   : > { %3720 = vst.msk [vmem:[#allocation3 + $0x68] sm:$0xff] %vm2257_vm14, %v3569_v48  ;;  %v4814_v48 = vld [vmem:[#allocation3 + $0x30] sm:$0xff] }
 0x206   : > { %v2118_v52 = vpop.permute.xlu1 %2117  ;;  %4002 = vrot.lane.b32.xlu0 %v9051_v31, %s8187_s13  ;;  %v9140_v31 = vpack.c.bf16 %v1930_v23, %v1929_v53  ;;  %1870 = vst.msk [vmem:[#allocation3 + $0x2b8] sm:$0xff] %vm1571_vm4, %v1818_v22  ;;  %1639 = vst.msk [vmem:[#allocation2 + $0x218] sm:$0xff] %vm1571_vm4, %v1534_v35  ;;  %v1748_v47 = vld [vmem:[#allocation2 + $0x1f8] sm:$0xff] }
 0x207   : > { %2266 = vst.msk [vmem:[#allocation3 + $0xc0] sm:$0xff] %vm2257_vm14, %v2118_v52  ;;  %v4652_v7 = vld [vmem:[#allocation2 + $0x1e2] sm:$0xff]  ;;  %v4653_v32 = vld [vmem:[#allocation2 + $0x1ea] sm:$0xff]  ;;  %v3382_v52 = vld [vmem:[#allocation2 + $0x112] sm:$0xff] }
 0x208   : > { %2967 = vrot.lane.b32.xlu1 %v9132_v29, %s8188_s25  ;;  %v3981_v57 = vpop.permute.xlu0 %3980  ;;  %v4812_v61 = vld [vmem:[#allocation3 + $0x20] sm:$0xff]  ;;  %1637 = vst.msk [vmem:[#allocation2 + $0x208] sm:$0xff] %vm1571_vm4, %v1532_v38  ;;  %v9171_v23 = vpack.c.bf16 %v4653_v32, %v4652_v7 }
 0x209   : > { %4134 = vst.msk [vmem:[#allocation3 + $0x38] sm:$0xff] %vm2674_vm15, %v3981_v57  ;;  %5311 = vmatprep.mubr.bf16.mxu0 %v4812_v61  ;;  %v3200_v13 = vld [vmem:[#allocation2 + $0x1e1] sm:$0xff]  ;;  %v3201_v17 = vld [vmem:[#allocation2 + $0x1e9] sm:$0xff] }
 0x20a   : > { %v2535_v45 = vpop.permute.xlu1 %2534  ;;  %4000 = vrot.lane.b32.xlu0 %v9062_v62, %s8187_s13  ;;  %5312 = vmatmul.mubr.bf16.gmra.mrb[108].mxu0 %v4811_v2  ;;  %v1742_v62 = vld [vmem:[#allocation2 + $0x1c8] sm:$0xff]  ;;  %v4810_v2 = vld [vmem:[#allocation3 + $0x10] sm:$0xff]  ;;  %4782 = vst.msk [vmem:[#allocation3 + $0x280] sm:$0xff] %vm1571_vm4, %v9171_v23 }
 0x20b   : > { %2683 = vst.msk [vmem:[#allocation3 + $0xc0] sm:$0xff] %vm2674_vm15, %v2535_v45  ;;  %v1817_v21 = vpack.c.bf16 %v1742_v62, %v1741_v27  ;;  %v4655_v34 = vld [vmem:[#allocation2 + $0x1fa] sm:$0xff]  ;;  %v2764_v62 = vld [vmem:[#allocation2 + $0x148] sm:$0xff] }
 0x20c   : > { %2137 = vrot.lane.b32.xlu1 %v9140_v31, %s8186_s10  ;;  %v4397_v4 = vpop.permute.xlu0 %4396  ;;  %v9173_v57 = vpack.c.bf16 %v4655_v34, %v4654_v42  ;;  %v2766_v45 = vld [vmem:[#allocation2 + $0x158] sm:$0xff]  ;;  %v4816_v42 = vld [vmem:[#allocation3 + $0x40] sm:$0xff] }
 0x20d   : > { %4550 = vst.msk [vmem:[#allocation3 + $0x38] sm:$0xff] %vm3091_vm1, %v4397_v4  ;;  %v3471_v4 = vpack.c.bf16 %v8072_v3, %v3382_v52  ;;  %v9189_v10 = vpack.c.bf16 %v2766_v45, %v2765_v36  ;;  %v3203_v16 = vld [vmem:[#allocation2 + $0x1f9] sm:$0xff]  ;;  %v1933_v7 = vld [vmem:[#allocation2 + $0x141] sm:$0xff]  ;;  %v1934_v32 = vld [vmem:[#allocation2 + $0x149] sm:$0xff] }
 0x20e   : > { %v2120_v15 = vpop.permute.xlu1 %2119  ;;  %4416 = vrot.lane.b32.xlu0 %v9073_v55, %s8188_s25  ;;  %v7777_v55 = vpop.f32.mrb[68].mxu0  ;;  %1869 = vst.msk [vmem:[#allocation3 + $0x2a0] sm:$0xff] %vm1571_vm4, %v1817_v21  ;;  %4783 = vst.msk [vmem:[#allocation3 + $0x298] sm:$0xff] %vm1571_vm4, %v9173_v57  ;;  %v3276_v21 = vpack.c.bf16 %v3201_v17, %v3200_v13  ;;  %v9211_v35 = vpack.c.bf16 %v1934_v32, %v1933_v7  ;;  %v4658_v38 = vld [vmem:[#allocation2 + $0x212] sm:$0xff] }
 0x20f   : > { %2267 = vst.msk [vmem:[#allocation3 + $0xd8] sm:$0xff] %vm2257_vm14, %v2120_v15  ;;  %v1125_v43 = vadd.f32 %v9092_v9, %v7777_v55  ;;  %v1116_v28 = vpop.f32.mrb[69].mxu0  ;;  %v3202_v15 = vld [vmem:[#allocation2 + $0x1f1] sm:$0xff] }
 0x210   : > { %2554 = vrot.lane.b32.xlu1 %v8800_v50, %s8187_s13  ;;  %v4399_v24 = vpop.permute.xlu0 %4398  ;;  %v1117_v8 = vadd.f32 %v9092_v9, %v1116_v28  ;;  %v3277_v22 = vpack.c.bf16 %v3203_v16, %v3202_v15  ;;  %3328 = vst.msk [vmem:[#allocation3 + $0x2a8] sm:$0xff] %vm1571_vm4, %v3276_v21  ;;  %v4657_v52 = vld [vmem:[#allocation2 + $0x20a] sm:$0xff] }
 0x211   : > { %4551 = vst.msk [vmem:[#allocation3 + $0x50] sm:$0xff] %vm3091_vm1, %v4399_v24  ;;  %vm1329_vm5 = vcmp.ge.f32.partialorder %v1125_v43, 0.0  ;;  %v1433_v44 = vmul.f32 0.01, %v1125_v43  ;;  %v1746_v24 = vld [vmem:[#allocation2 + $0x1e8] sm:$0xff] }
 0x212   : > { %v2537_v54 = vpop.permute.xlu1 %2536  ;;  %3588 = vrot.lane.b32.xlu0 %v8767_v0, %s8186_s10  ;;  %vm1327_vm6 = vcmp.ge.f32.partialorder %v1117_v8, 0.0  ;;  %v1431_v1 = vmul.f32 0.01, %v1117_v8  ;;  %3329 = vst.msk [vmem:[#allocation3 + $0x2c0] sm:$0xff] %vm1571_vm4, %v3277_v22  ;;  %v1819_v28 = vpack.c.bf16 %v1746_v24, %v1745_v12  ;;  %v4828_v22 = vld [vmem:[#allocation3 + $0xa0] sm:$0xff]  ;;  %v2769_v12 = vld [vmem:[#allocation2 + $0x170] sm:$0xff] }
 0x213   : > { %2684 = vst.msk [vmem:[#allocation3 + $0xd8] sm:$0xff] %vm2674_vm15, %v2537_v54  ;;  %v1537_v53 = vsel %vm1329_vm5, %v1125_v43, %v1433_v44  ;;  %v9198_v43 = vpack.c.bf16 %v2764_v62, %v2763_v11  ;;  %v1820_v54 = vpack.c.bf16 %v1748_v47, %v1747_v58  ;;  %v4822_v44 = vld [vmem:[#allocation3 + $0x70] sm:$0xff] }
 0x214   : > { %2139 = vrot.lane.b32.xlu1 %v9158_v56, %s8186_s10  ;;  %v3571_v33 = vpop.permute.xlu0 %3570  ;;  %v4815_v0 = vld [vmem:[#allocation3 + $0x38] sm:$0xff]  ;;  %1642 = vst.msk [vmem:[#allocation2 + $0x230] sm:$0xff] %vm1571_vm4, %v1537_v53  ;;  %v1535_v37 = vsel %vm1327_vm6, %v1117_v8, %v1431_v1  ;;  %1871 = vst.msk [vmem:[#allocation3 + $0x2d0] sm:$0xff] %vm1571_vm4, %v1819_v28  ;;  %v7778_v1 = vpop.f32.mrb[70].mxu0  ;;  %v2770_v24 = vld [vmem:[#allocation2 + $0x178] sm:$0xff] }
 0x215   : > { %3721 = vst.msk [vmem:[#allocation3 + $0x80] sm:$0xff] %vm2257_vm14, %v3571_v33  ;;  %5319 = vmatprep.mubr.bf16.mxu0 %v4815_v0  ;;  %v4819_v8 = vld [vmem:[#allocation3 + $0x58] sm:$0xff]  ;;  %v1935_v33 = vld [vmem:[#allocation2 + $0x151] sm:$0xff]  ;;  %v3205_v28 = vld [vmem:[#allocation2 + $0x209] sm:$0xff] }
 0x216   : > { %v2954_v61 = vpop.permute.xlu1 %2953  ;;  %4418 = vrot.lane.b32.xlu0 %v9090_v40, %s8188_s25  ;;  %5320 = vmatmul.mubr.bf16.gmra.mrb[112].mxu0 %v4814_v48  ;;  %1640 = vst.msk [vmem:[#allocation2 + $0x220] sm:$0xff] %vm1571_vm4, %v1535_v37  ;;  %1872 = vst.msk [vmem:[#allocation3 + $0x2e8] sm:$0xff] %vm1571_vm4, %v1820_v54  ;;  %v1936_v0 = vld [vmem:[#allocation2 + $0x159] sm:$0xff]  ;;  %v3206_v54 = vld [vmem:[#allocation2 + $0x211] sm:$0xff] }
 0x217   : > { %3101 = vst.msk [vmem:[#allocation3 + $0xd8] sm:$0xff] %vm3091_vm1, %v2954_v61  ;;  %7815 = vmatprep.mubr.msk.bf16.mxu0 %vm1571_vm4, %v4810_v2  ;;  %v1128_v61 = vadd.f32 %v9092_v9, %v7778_v1  ;;  %v1119_v2 = vpop.f32.mrb[71].mxu0  ;;  %v9227_v3 = vpack.c.bf16 %v1936_v0, %v1935_v33  ;;  %v1751_v1 = vld [vmem:[#allocation2 + $0x210] sm:$0xff] }
 0x218   : > { %2556 = vrot.lane.b32.xlu1 %v8827_v26, %s8187_s13  ;;  %v3987_v40 = vpop.permute.xlu0 %3986  ;;  %v4818_v51 = vld [vmem:[#allocation3 + $0x50] sm:$0xff] }
 0x219   : > { %4137 = vst.msk [vmem:[#allocation3 + $0x80] sm:$0xff] %vm2674_vm15, %v3987_v40  ;;  %5327 = vmatprep.mubr.bf16.mxu1 %v4818_v51  ;;  %vm1330_vm7 = vcmp.ge.f32.partialorder %v1128_v61, 0.0  ;;  %v1434_v45 = vmul.f32 0.01, %v1128_v61  ;;  %v7781_v40 = vpop.f32.mrb[72].mxu0  ;;  %v4820_v51 = vld [vmem:[#allocation3 + $0x60] sm:$0xff] }
 0x21a   : > { %v2952_v27 = vpop.permute.xlu1 %2951  ;;  %3590 = vrot.lane.b32.xlu0 %v3471_v4, %s8186_s10  ;;  %5328 = vmatmul.mubr.bf16.vlgmr.msra.gmra.mrb[0].mxu1 %v4817_v5  ;;  %v1141_v4 = vadd.f32 %v9092_v9, %v7781_v40 }
 0x21b   : > { %3100 = vst.msk [vmem:[#allocation3 + $0xc0] sm:$0xff] %vm3091_vm1, %v2952_v27  ;;  %v1132_v27 = vpop.f32.mrb[73].mxu0  ;;  %v1538_v13 = vsel %vm1330_vm7, %v1128_v61, %v1434_v45  ;;  %v2768_v45 = vld [vmem:[#allocation2 + $0x168] sm:$0xff] }
 0x21c   : > { %2973 = vrot.lane.b32.xlu1 %v9189_v10, %s8188_s25  ;;  %v3985_v18 = vpop.permute.xlu0 %3984  ;;  %v1133_v15 = vadd.f32 %v9092_v9, %v1132_v27  ;;  %1643 = vst.msk [vmem:[#allocation2 + $0x238] sm:$0xff] %vm1571_vm4, %v1538_v13  ;;  %vm1333_vm8 = vcmp.ge.f32.partialorder %v1141_v4, 0.0  ;;  %v1437_v16 = vmul.f32 0.01, %v1141_v4  ;;  %v7782_v7 = vpop.f32.mrb[74].mxu0  ;;  %v1937_v27 = vld [vmem:[#allocation2 + $0x161] sm:$0xff] }
 0x21d   : > { %4136 = vst.msk [vmem:[#allocation3 + $0x68] sm:$0xff] %vm2674_vm15, %v3985_v18  ;;  %v4659_v53 = vld [vmem:[#allocation2 + $0x21a] sm:$0xff]  ;;  %v4825_v18 = vld [vmem:[#allocation3 + $0x88] sm:$0xff]  ;;  %v1135_v33 = vpop.f32.mrb[75].mxu0 }
 0x21e   : > { %v2122_v55 = vpop.permute.xlu1 %2121  ;;  %4006 = vrot.lane.b32.xlu0 %v9116_v39, %s8187_s13  ;;  %7816 = vmatmul.mubr.msk.bf16.vlgmr.msra.gmra.mrb[116].mxu0 %vm1571_vm4, %v4813_v20  ;;  %v9232_v11 = vpack.c.bf16 %v4659_v53, %v4658_v38  ;;  %vm1331_vm9 = vcmp.ge.f32.partialorder %v1133_v15, 0.0  ;;  %v1435_v21 = vmul.f32 0.01, %v1133_v15  ;;  %v1541_v58 = vsel %vm1333_vm8, %v1141_v4, %v1437_v16  ;;  %v7785_v53 = vpop.f32.mrb[76].mxu0 }
 0x21f   : > { %2268 = vst.msk [vmem:[#allocation3 + $0xf0] sm:$0xff] %vm2257_vm14, %v2122_v55  ;;  %7819 = vmatprep.mubr.msk.bf16.mxu0 %vm1571_vm4, %v4816_v42  ;;  %v3204_v42 = vld [vmem:[#allocation2 + $0x201] sm:$0xff]  ;;  %v1157_v40 = vadd.f32 %v9092_v9, %v7785_v53  ;;  %v1148_v4 = vpop.f32.mrb[77].mxu0 }
 0x220   : > { %2971 = vrot.lane.b32.xlu1 %v9198_v43, %s8188_s25  ;;  %v4401_v39 = vpop.permute.xlu0 %4400  ;;  %4785 = vst.msk [vmem:[#allocation3 + $0x2c8] sm:$0xff] %vm1571_vm4, %v9232_v11  ;;  %1646 = vst.msk [vmem:[#allocation2 + $0x250] sm:$0xff] %vm1571_vm4, %v1541_v58  ;;  %v1539_v55 = vsel %vm1331_vm9, %v1133_v15, %v1435_v21  ;;  %v3278_v32 = vpack.c.bf16 %v3205_v28, %v3204_v42  ;;  %v1149_v15 = vadd.f32 %v9092_v9, %v1148_v4  ;;  %v7786_v16 = vpop.f32.mrb[78].mxu0  ;;  %v4837_v4 = vld [vmem:[#allocation3 + $0xe8] sm:$0xff] }
 0x221   : > { %4552 = vst.msk [vmem:[#allocation3 + $0x68] sm:$0xff] %vm3091_vm1, %v4401_v39  ;;  %v3207_v39 = vld [vmem:[#allocation2 + $0x219] sm:$0xff]  ;;  %vm1337_vm12 = vcmp.ge.f32.partialorder %v1157_v40, 0.0  ;;  %v1160_v21 = vadd.f32 %v9092_v9, %v7786_v16 }
 0x222   : > { %v2539_v34 = vpop.permute.xlu1 %2538  ;;  %4004 = vrot.lane.b32.xlu0 %v9132_v29, %s8187_s13  ;;  %v4656_v29 = vld [vmem:[#allocation2 + $0x202] sm:$0xff]  ;;  %1644 = vst.msk [vmem:[#allocation2 + $0x240] sm:$0xff] %vm1571_vm4, %v1539_v55  ;;  %v3279_v0 = vpack.c.bf16 %v3207_v39, %v3206_v54  ;;  %3330 = vst.msk [vmem:[#allocation3 + $0x2d8] sm:$0xff] %vm1571_vm4, %v3278_v32  ;;  %vm1335_vm13 = vcmp.ge.f32.partialorder %v1149_v15, 0.0  ;;  %v1940_v16 = vld [vmem:[#allocation2 + $0x179] sm:$0xff] }
 0x223   : > { %2685 = vst.msk [vmem:[#allocation3 + $0xf0] sm:$0xff] %vm2674_vm15, %v2539_v34  ;;  %v9230_v5 = vpack.c.bf16 %v4657_v52, %v4656_v29  ;;  %v1749_v34 = vld [vmem:[#allocation2 + $0x200] sm:$0xff]  ;;  %v1136_v52 = vadd.f32 %v9092_v9, %v1135_v33  ;;  %vm1338_vm0 = vcmp.ge.f32.partialorder %v1160_v21, 0.0 }
 0x224   : > { %2141 = vrot.lane.b32.xlu1 %v9211_v35, %s8186_s10  ;;  %v3573_v46 = vpop.permute.xlu0 %3572  ;;  %v4823_v29 = vld [vmem:[#allocation3 + $0x78] sm:$0xff]  ;;  %3331 = vst.msk [vmem:[#allocation3 + $0x2f0] sm:$0xff] %vm1571_vm4, %v3279_v0 }
 0x225   : > { %3722 = vst.msk [vmem:[#allocation3 + $0x98] sm:$0xff] %vm2257_vm14, %v3573_v46  ;;  %v1750_v46 = vld [vmem:[#allocation2 + $0x208] sm:$0xff]  ;;  %vm1332_vm11 = vcmp.ge.f32.partialorder %v1136_v52, 0.0 }
 0x226   : > { %v2124_v48 = vpop.permute.xlu1 %2123  ;;  %4420 = vrot.lane.b32.xlu0 %v9140_v31, %s8188_s25  ;;  %7820 = vmatmul.mubr.msk.bf16.gmra.mrb[120].mxu0 %vm1571_vm4, %v4819_v8  ;;  %v1120_v31 = vadd.f32 %v9092_v9, %v1119_v2  ;;  %4784 = vst.msk [vmem:[#allocation3 + $0x2b0] sm:$0xff] %vm1571_vm4, %v9230_v5  ;;  %v1821_v38 = vpack.c.bf16 %v1750_v46, %v1749_v34 }
 0x227   : > { %2269 = vst.msk [vmem:[#allocation3 + $0x108] sm:$0xff] %vm2257_vm14, %v2124_v48  ;;  %7823 = vmatprep.mubr.msk.bf16.mxu0 %vm1571_vm4, %v4822_v44  ;;  %v1144_v44 = vadd.f32 %v9092_v9, %v7782_v7  ;;  %v1752_v48 = vld [vmem:[#allocation2 + $0x218] sm:$0xff] }
 0x228   : > { %2558 = vrot.lane.b32.xlu1 %v8850_v41, %s8187_s13  ;;  %v4403_v37 = vpop.permute.xlu0 %4402  ;;  %v4821_v36 = vld [vmem:[#allocation3 + $0x68] sm:$0xff]  ;;  %vm1328_vm2 = vcmp.ge.f32.partialorder %v1120_v31, 0.0  ;;  %v1432_v17 = vmul.f32 0.01, %v1120_v31  ;;  %v1822_v61 = vpack.c.bf16 %v1752_v48, %v1751_v1  ;;  %1873 = vst.msk [vmem:[#allocation3 + $0x300] sm:$0xff] %vm1571_vm4, %v1821_v38 }
 0x229   : > { %4553 = vst.msk [vmem:[#allocation3 + $0x80] sm:$0xff] %vm3091_vm1, %v4403_v37  ;;  %5335 = vmatprep.mubr.bf16.mxu1 %v4821_v36  ;;  %v9262_v37 = vpack.c.bf16 %v2770_v24, %v2769_v12  ;;  %v2767_v36 = vld [vmem:[#allocation2 + $0x160] sm:$0xff]  ;;  %vm1334_vm10 = vcmp.ge.f32.partialorder %v1144_v44, 0.0  ;;  %v4834_v24 = vld [vmem:[#allocation3 + $0xd0] sm:$0xff] }
 0x22a   : > { %v2541_v62 = vpop.permute.xlu1 %2540  ;;  %3592 = vrot.lane.b32.xlu0 %v8800_v50, %s8186_s10  ;;  %5336 = vmatmul.mubr.bf16.gmra.mrb[4].mxu1 %v4820_v51  ;;  %v1536_v20 = vsel %vm1328_vm2, %v1120_v31, %v1432_v17  ;;  %v1438_v31 = vmul.f32 0.01, %v1144_v44  ;;  %v1436_v51 = vmul.f32 0.01, %v1136_v52  ;;  %1874 = vst.msk [vmem:[#allocation3 + $0x318] sm:$0xff] %vm1571_vm4, %v1822_v61 }
 0x22b   : > { %2686 = vst.msk [vmem:[#allocation3 + $0x108] sm:$0xff] %vm2674_vm15, %v2541_v62  ;;  %v1938_v62 = vld [vmem:[#allocation2 + $0x169] sm:$0xff]  ;;  %v1441_v17 = vmul.f32 0.01, %v1157_v40 }
 0x22c   : > { %2143 = vrot.lane.b32.xlu1 %v9227_v3, %s8186_s10  ;;  %v3575_v50 = vpop.permute.xlu0 %3574  ;;  %1641 = vst.msk [vmem:[#allocation2 + $0x228] sm:$0xff] %vm1571_vm4, %v1536_v20  ;;  %v1542_v13 = vsel %vm1334_vm10, %v1144_v44, %v1438_v31  ;;  %v1540_v20 = vsel %vm1332_vm11, %v1136_v52, %v1436_v51  ;;  %v9286_v28 = vpack.c.bf16 %v1938_v62, %v1937_v27 }
 0x22d   : > { %3723 = vst.msk [vmem:[#allocation3 + $0xb0] sm:$0xff] %vm2257_vm14, %v3575_v50  ;;  %v4831_v50 = vld [vmem:[#allocation3 + $0xb8] sm:$0xff]  ;;  %v1545_v58 = vsel %vm1337_vm12, %v1157_v40, %v1441_v17 }
 0x22e   : > { %v2958_v47 = vpop.permute.xlu1 %2957  ;;  %4422 = vrot.lane.b32.xlu0 %v9158_v56, %s8188_s25  ;;  %7824 = vmatmul.mubr.msk.bf16.gmra.mrb[124].mxu0 %vm1571_vm4, %v4825_v18  ;;  %v9273_v18 = vpack.c.bf16 %v2768_v45, %v2767_v36  ;;  %1647 = vst.msk [vmem:[#allocation2 + $0x258] sm:$0xff] %vm1571_vm4, %v1542_v13  ;;  %1645 = vst.msk [vmem:[#allocation2 + $0x248] sm:$0xff] %vm1571_vm4, %v1540_v20 }
 0x22f   : > { %3103 = vst.msk [vmem:[#allocation3 + $0x108] sm:$0xff] %vm3091_vm1, %v2958_v47  ;;  %7827 = vmatprep.mubr.msk.bf16.mxu0 %vm1571_vm4, %v4828_v22  ;;  %v1151_v22 = vpop.f32.mrb[79].mxu0  ;;  %v1439_v47 = vmul.f32 0.01, %v1149_v15 }
 0x230   : > { %2560 = vrot.lane.b32.xlu1 %v8855_v25, %s8187_s13  ;;  %v3991_v56 = vpop.permute.xlu0 %3990  ;;  %v4824_v8 = vld [vmem:[#allocation3 + $0x80] sm:$0xff]  ;;  %v1152_v55 = vadd.f32 %v9092_v9, %v1151_v22  ;;  %v7789_v42 = vpop.f32.mrb[80].mxu0  ;;  %1650 = vst.msk [vmem:[#allocation2 + $0x270] sm:$0xff] %vm1571_vm4, %v1545_v58 }
 0x231   : > { %4139 = vst.msk [vmem:[#allocation3 + $0xb0] sm:$0xff] %vm2674_vm15, %v3991_v56  ;;  %5343 = vmatprep.mubr.bf16.mxu1 %v4824_v8  ;;  %v1173_v54 = vadd.f32 %v9092_v9, %v7789_v42  ;;  %v1164_v7 = vpop.f32.mrb[81].mxu0  ;;  %v1543_v39 = vsel %vm1335_vm13, %v1149_v15, %v1439_v47  ;;  %v1939_v15 = vld [vmem:[#allocation2 + $0x171] sm:$0xff] }
 0x232   : > { %v2956_v2 = vpop.permute.xlu1 %2955  ;;  %3594 = vrot.lane.b32.xlu0 %v8827_v26, %s8186_s10  ;;  %5344 = vmatmul.mubr.bf16.gmra.mrb[8].mxu1 %v4823_v29  ;;  %vm1336_vm3 = vcmp.ge.f32.partialorder %v1152_v55, 0.0  ;;  %v1440_v34 = vmul.f32 0.01, %v1152_v55  ;;  %v1165_v46 = vadd.f32 %v9092_v9, %v1164_v7  ;;  %v7790_v56 = vpop.f32.mrb[82].mxu0  ;;  %1648 = vst.msk [vmem:[#allocation2 + $0x260] sm:$0xff] %vm1571_vm4, %v1543_v39 }
 0x233   : > { %3102 = vst.msk [vmem:[#allocation3 + $0xf0] sm:$0xff] %vm3091_vm1, %v2956_v2  ;;  %vm1341_vm5 = vcmp.ge.f32.partialorder %v1173_v54, 0.0  ;;  %v1445_v44 = vmul.f32 0.01, %v1173_v54  ;;  %v1176_v33 = vadd.f32 %v9092_v9, %v7790_v56  ;;  %v1167_v0 = vpop.f32.mrb[83].mxu0 }
 0x234   : > { %2977 = vrot.lane.b32.xlu1 %v9262_v37, %s8188_s25  ;;  %v3989_v26 = vpop.permute.xlu0 %3988  ;;  %v1544_v1 = vsel %vm1336_vm3, %v1152_v55, %v1440_v34  ;;  %vm1339_vm6 = vcmp.ge.f32.partialorder %v1165_v46, 0.0  ;;  %v1443_v48 = vmul.f32 0.01, %v1165_v46  ;;  %v1168_v29 = vadd.f32 %v9092_v9, %v1167_v0  ;;  %v7793_v52 = vpop.f32.mrb[84].mxu0  ;;  %v4826_v34 = vld [vmem:[#allocation3 + $0x90] sm:$0xff] }
 0x235   : > { %4138 = vst.msk [vmem:[#allocation3 + $0x98] sm:$0xff] %vm2674_vm15, %v3989_v26  ;;  %v1549_v53 = vsel %vm1341_vm5, %v1173_v54, %v1445_v44  ;;  %vm1342_vm7 = vcmp.ge.f32.partialorder %v1176_v33, 0.0  ;;  %v1446_v61 = vmul.f32 0.01, %v1176_v33  ;;  %v1189_v2 = vadd.f32 %v9092_v9, %v7793_v52  ;;  %v1180_v36 = vpop.f32.mrb[85].mxu0  ;;  %v4840_v26 = vld [vmem:[#allocation3 + $0x100] sm:$0xff] }
 0x236   : > { %v2126_v12 = vpop.permute.xlu1 %2125  ;;  %4010 = vrot.lane.b32.xlu0 %v9189_v10, %s8187_s13  ;;  %7828 = vmatmul.mubr.msk.bf16.gmra.mrb[128].mxu0 %vm1571_vm4, %v4831_v50  ;;  %v1442_v10 = vmul.f32 0.01, %v1160_v21  ;;  %1649 = vst.msk [vmem:[#allocation2 + $0x268] sm:$0xff] %vm1571_vm4, %v1544_v1  ;;  %1654 = vst.msk [vmem:[#allocation2 + $0x290] sm:$0xff] %vm1571_vm4, %v1549_v53  ;;  %v1547_v45 = vsel %vm1339_vm6, %v1165_v46, %v1443_v48  ;;  %vm1340_vm2 = vcmp.ge.f32.partialorder %v1168_v29, 0.0  ;;  %v7794_v51 = vpop.f32.mrb[86].mxu0 }
 0x237   : > { %2270 = vst.msk [vmem:[#allocation3 + $0x120] sm:$0xff] %vm2257_vm14, %v2126_v12  ;;  %7831 = vmatprep.mubr.msk.bf16.mxu0 %vm1571_vm4, %v4834_v24  ;;  %v1444_v31 = vmul.f32 0.01, %v1168_v29  ;;  %v1181_v40 = vadd.f32 %v9092_v9, %v1180_v36  ;;  %v1550_v27 = vsel %vm1342_vm7, %v1176_v33, %v1446_v61  ;;  %vm1345_vm8 = vcmp.ge.f32.partialorder %v1189_v2, 0.0  ;;  %v1183_v13 = vpop.f32.mrb[87].mxu0  ;;  %v4660_v12 = vld [vmem:[#allocation2 + $0x222] sm:$0xff] }
 0x238   : > { %2975 = vrot.lane.b32.xlu1 %v9273_v18, %s8188_s25  ;;  %v4405_v32 = vpop.permute.xlu0 %4404  ;;  %v1546_v8 = vsel %vm1338_vm0, %v1160_v21, %v1442_v10  ;;  %1652 = vst.msk [vmem:[#allocation2 + $0x280] sm:$0xff] %vm1571_vm4, %v1547_v45  ;;  %v1449_v62 = vmul.f32 0.01, %v1189_v2  ;;  %1655 = vst.msk [vmem:[#allocation2 + $0x298] sm:$0xff] %vm1571_vm4, %v1550_v27  ;;  %v1192_v21 = vadd.f32 %v9092_v9, %v7794_v51  ;;  %v7797_v22 = vpop.f32.mrb[88].mxu0  ;;  %v4661_v10 = vld [vmem:[#allocation2 + $0x22a] sm:$0xff] }
 0x239   : > { %4554 = vst.msk [vmem:[#allocation3 + $0x98] sm:$0xff] %vm3091_vm1, %v4405_v32  ;;  %v1548_v50 = vsel %vm1340_vm2, %v1168_v29, %v1444_v31  ;;  %vm1343_vm9 = vcmp.ge.f32.partialorder %v1181_v40, 0.0  ;;  %v1447_v20 = vmul.f32 0.01, %v1181_v40  ;;  %v1184_v24 = vadd.f32 %v9092_v9, %v1183_v13  ;;  %v1196_v47 = vpop.f32.mrb[89].mxu0  ;;  %v4662_v33 = vld [vmem:[#allocation2 + $0x232] sm:$0xff] }
 0x23a   : > { %v2543_v38 = vpop.permute.xlu1 %2542  ;;  %4008 = vrot.lane.b32.xlu0 %v9198_v43, %s8187_s13  ;;  %1651 = vst.msk [vmem:[#allocation2 + $0x278] sm:$0xff] %vm1571_vm4, %v1546_v8  ;;  %1653 = vst.msk [vmem:[#allocation2 + $0x288] sm:$0xff] %vm1571_vm4, %v1548_v50  ;;  %v1205_v58 = vadd.f32 %v9092_v9, %v7797_v22  ;;  %vm1346_vm10 = vcmp.ge.f32.partialorder %v1192_v21, 0.0  ;;  %v1450_v7 = vmul.f32 0.01, %v1192_v21  ;;  %v1197_v32 = vadd.f32 %v9092_v9, %v1196_v47  ;;  %v7798_v39 = vpop.f32.mrb[90].mxu0 }
 0x23b   : > { %2687 = vst.msk [vmem:[#allocation3 + $0x120] sm:$0xff] %vm2674_vm15, %v2543_v38  ;;  %v1551_v54 = vsel %vm1343_vm9, %v1181_v40, %v1447_v20  ;;  %v9328_v46 = vpack.c.bf16 %v1940_v16, %v1939_v15  ;;  %vm1344_vm11 = vcmp.ge.f32.partialorder %v1184_v24, 0.0  ;;  %v1448_v56 = vmul.f32 0.01, %v1184_v24  ;;  %v1199_v8 = vpop.f32.mrb[91].mxu0  ;;  %v4663_v0 = vld [vmem:[#allocation2 + $0x23a] sm:$0xff] }
 0x23c   : > { %2145 = vrot.lane.b32.xlu1 %v9286_v28, %s8186_s10  ;;  %v3577_v43 = vpop.permute.xlu0 %3576  ;;  %1656 = vst.msk [vmem:[#allocation2 + $0x2a0] sm:$0xff] %vm1571_vm4, %v1551_v54  ;;  %vm1349_vm12 = vcmp.ge.f32.partialorder %v1205_v58, 0.0  ;;  %v1554_v38 = vsel %vm1346_vm10, %v1192_v21, %v1450_v7  ;;  %v1453_v1 = vmul.f32 0.01, %v1205_v58  ;;  %vm1347_vm13 = vcmp.ge.f32.partialorder %v1197_v32, 0.0  ;;  %v7801_v29 = vpop.f32.mrb[92].mxu0 }
 0x23d   : > { %3724 = vst.msk [vmem:[#allocation3 + $0xc8] sm:$0xff] %vm2257_vm14, %v3577_v43  ;;  %v1208_v48 = vadd.f32 %v9092_v9, %v7798_v39  ;;  %v1552_v52 = vsel %vm1344_vm11, %v1184_v24, %v1448_v56  ;;  %v1451_v53 = vmul.f32 0.01, %v1197_v32  ;;  %v1200_v61 = vadd.f32 %v9092_v9, %v1199_v8  ;;  %v2773_v43 = vld [vmem:[#allocation2 + $0x190] sm:$0xff]  ;;  %v2774_v45 = vld [vmem:[#allocation2 + $0x198] sm:$0xff] }
 0x23e   : > { %v2128_v17 = vpop.permute.xlu1 %2127  ;;  %4424 = vrot.lane.b32.xlu0 %v9211_v35, %s8188_s25  ;;  %7832 = vmatmul.mubr.msk.bf16.gmra.mrb[132].mxu0 %vm1571_vm4, %v4837_v4  ;;  %v1553_v35 = vsel %vm1345_vm8, %v1189_v2, %v1449_v62  ;;  %1659 = vst.msk [vmem:[#allocation2 + $0x2b8] sm:$0xff] %vm1571_vm4, %v1554_v38  ;;  %v1212_v2 = vpop.f32.mrb[93].mxu0  ;;  %1657 = vst.msk [vmem:[#allocation2 + $0x2a8] sm:$0xff] %vm1571_vm4, %v1552_v52  ;;  %v1557_v31 = vsel %vm1349_vm12, %v1205_v58, %v1453_v1  ;;  %v4846_v16 = vld [vmem:[#allocation3 + $0x130] sm:$0xff]  ;;  %v2771_v38 = vld [vmem:[#allocation2 + $0x180] sm:$0xff] }
 0x23f   : > { %2271 = vst.msk [vmem:[#allocation3 + $0x138] sm:$0xff] %vm2257_vm14, %v2128_v17  ;;  %7835 = vmatprep.mubr.msk.bf16.mxu0 %vm1571_vm4, %v4840_v26  ;;  %vm1350_vm0 = vcmp.ge.f32.partialorder %v1208_v48, 0.0  ;;  %v1454_v40 = vmul.f32 0.01, %v1208_v48  ;;  %v1221_v51 = vadd.f32 %v9092_v9, %v7801_v29  ;;  %v7802_v4 = vpop.f32.mrb[94].mxu0  ;;  %v4843_v26 = vld [vmem:[#allocation3 + $0x118] sm:$0xff]  ;;  %v1555_v27 = vsel %vm1347_vm13, %v1197_v32, %v1451_v53 }
 0x240   : > { %2562 = vrot.lane.b32.xlu1 %v8900_v59, %s8187_s13  ;;  %v4407_v55 = vpop.permute.xlu0 %4406  ;;  %v4827_v42 = vld [vmem:[#allocation3 + $0x98] sm:$0xff]  ;;  %1658 = vst.msk [vmem:[#allocation2 + $0x2b0] sm:$0xff] %vm1571_vm4, %v1553_v35  ;;  %1662 = vst.msk [vmem:[#allocation2 + $0x2d0] sm:$0xff] %vm1571_vm4, %v1557_v31  ;;  %vm1348_vm3 = vcmp.ge.f32.partialorder %v1200_v61, 0.0  ;;  %v1452_v62 = vmul.f32 0.01, %v1200_v61  ;;  %v9351_v13 = vpack.c.bf16 %v4663_v0, %v4662_v33  ;;  %v1213_v21 = vadd.f32 %v9092_v9, %v1212_v2 }
 0x241   : > { %4555 = vst.msk [vmem:[#allocation3 + $0xb0] sm:$0xff] %vm3091_vm1, %v4407_v55  ;;  %5351 = vmatprep.mubr.bf16.mxu1 %v4827_v42  ;;  %v1215_v17 = vpop.f32.mrb[95].mxu0  ;;  %v1558_v50 = vsel %vm1350_vm0, %v1208_v48, %v1454_v40  ;;  %vm1353_vm5 = vcmp.ge.f32.partialorder %v1221_v51, 0.0  ;;  %v1457_v20 = vmul.f32 0.01, %v1221_v51  ;;  %v1224_v35 = vadd.f32 %v9092_v9, %v7802_v4  ;;  %v4829_v42 = vld [vmem:[#allocation3 + $0xa8] sm:$0xff] }
 0x242   : > { %v2545_v44 = vpop.permute.xlu1 %2544  ;;  %3596 = vrot.lane.b32.xlu0 %v8850_v41, %s8186_s10  ;;  %5352 = vmatmul.mubr.bf16.gmra.mrb[12].mxu1 %v4826_v34  ;;  %v9339_v41 = vpack.c.bf16 %v4661_v10, %v4660_v12  ;;  %1660 = vst.msk [vmem:[#allocation2 + $0x2c0] sm:$0xff] %vm1571_vm4, %v1555_v27  ;;  %v7805_v22 = vpop.f32.mrb[96].mxu0  ;;  %v9361_v12 = vpack.c.bf16 %v2774_v45, %v2773_v43  ;;  %1663 = vst.msk [vmem:[#allocation2 + $0x2d8] sm:$0xff] %vm1571_vm4, %v1558_v50  ;;  %vm1351_vm6 = vcmp.ge.f32.partialorder %v1213_v21, 0.0  ;;  %v2772_v1 = vld [vmem:[#allocation2 + $0x188] sm:$0xff]  ;;  %v4849_v31 = vld [vmem:[#allocation3 + $0x148] sm:$0xff] }
 0x243   : > { %2688 = vst.msk [vmem:[#allocation3 + $0x138] sm:$0xff] %vm2674_vm15, %v2545_v44  ;;  %v1216_v24 = vadd.f32 %v9092_v9, %v1215_v17  ;;  %v1228_v58 = vpop.f32.mrb[97].mxu0  ;;  %v1561_v10 = vsel %vm1353_vm5, %v1221_v51, %v1457_v20  ;;  %v1455_v54 = vmul.f32 0.01, %v1213_v21  ;;  %v1237_v7 = vadd.f32 %v9092_v9, %v7805_v22  ;;  %v8073_v52 = vld [vmem:[#allocation8] ss:$0 sm:$0xff] }
 0x244   : > { %2147 = vrot.lane.b32.xlu1 %v9328_v46, %s8186_s10  ;;  %v3579_v36 = vpop.permute.xlu0 %3578  ;;  %4786 = vst.msk [vmem:[#allocation3 + $0x2e0] sm:$0xff] %vm1571_vm4, %v9339_v41  ;;  %4787 = vst.msk [vmem:[#allocation3 + $0x2f8] sm:$0xff] %vm1571_vm4, %v9351_v13  ;;  %v7806_v32 = vpop.f32.mrb[98].mxu0  ;;  %vm1354_vm7 = vcmp.ge.f32.partialorder %v1224_v35, 0.0  ;;  %v1458_v39 = vmul.f32 0.01, %v1224_v35  ;;  %v1229_v33 = vadd.f32 %v9092_v9, %v1228_v58 }
 0x245   : > { %3725 = vst.msk [vmem:[#allocation3 + $0xe0] sm:$0xff] %vm2257_vm14, %v3579_v36  ;;  %vm1352_vm2 = vcmp.ge.f32.partialorder %v1216_v24, 0.0  ;;  %v1456_v34 = vmul.f32 0.01, %v1216_v24  ;;  %v1559_v8 = vsel %vm1351_vm6, %v1213_v21, %v1455_v54  ;;  %vm1357_vm8 = vcmp.ge.f32.partialorder %v1237_v7, 0.0  ;;  %v1231_v0 = vpop.f32.mrb[99].mxu0 }
 0x246   : > { %v2962_v15 = vpop.permute.xlu1 %2961  ;;  %4426 = vrot.lane.b32.xlu0 %v9227_v3, %s8188_s25  ;;  %7836 = vmatmul.mubr.msk.bf16.gmra.mrb[136].mxu0 %vm1571_vm4, %v4843_v26  ;;  %v1556_v3 = vsel %vm1348_vm3, %v1200_v61, %v1452_v62  ;;  %1666 = vst.msk [vmem:[#allocation2 + $0x2f0] sm:$0xff] %vm1571_vm4, %v1561_v10  ;;  %v1461_v44 = vmul.f32 0.01, %v1237_v7  ;;  %1664 = vst.msk [vmem:[#allocation2 + $0x2e0] sm:$0xff] %vm1571_vm4, %v1559_v8  ;;  %v1562_v48 = vsel %vm1354_vm7, %v1224_v35, %v1458_v39  ;;  %v4852_v27 = vld [vmem:[#allocation3 + $0x160] sm:$0xff]  ;;  %v8189_v54 = vmov 0.0  }
 0x247   : > { %3105 = vst.msk [vmem:[#allocation3 + $0x138] sm:$0xff] %vm3091_vm1, %v2962_v15  ;;  %7839 = vmatprep.mubr.msk.bf16.mxu0 %vm1571_vm4, %v4846_v16  ;;  %v1560_v29 = vsel %vm1352_vm2, %v1216_v24, %v1456_v34  ;;  %v1240_v53 = vadd.f32 %v8073_v52, %v7806_v32  ;;  %v1232_v61 = vadd.f32 %v8073_v52, %v1231_v0  ;;  %vm1355_vm9 = vcmp.ge.f32.partialorder %v1229_v33, 0.0  ;;  %v1941_v16 = vld [vmem:[#allocation2 + $0x181] sm:$0xff]  ;;  %v1942_v50 = vld [vmem:[#allocation2 + $0x189] sm:$0xff]  ;;  %v3211_v32 = vld [vmem:[#allocation2 + $0x239] sm:$0xff] }
 0x248   : > { %2564 = vrot.lane.b32.xlu1 %v8905_v63, %s8187_s13  ;;  %v3995_v47 = vpop.permute.xlu0 %3994  ;;  %v4830_v55 = vld [vmem:[#allocation3 + $0xb0] sm:$0xff]  ;;  %1661 = vst.msk [vmem:[#allocation2 + $0x2c8] sm:$0xff] %vm1571_vm4, %v1556_v3  ;;  %1667 = vst.msk [vmem:[#allocation2 + $0x2f8] sm:$0xff] %vm1571_vm4, %v1562_v48  ;;  %v1565_v9 = vsel %vm1357_vm8, %v1237_v7, %v1461_v44  ;;  %v1459_v36 = vmul.f32 0.01, %v1229_v33  ;;  %v9392_v62 = vpack.c.bf16 %v2772_v1, %v2771_v38  ;;  %v1753_v44 = vld [vmem:[#allocation2 + $0x220] sm:$0xff] }
 0x249   : > { %4141 = vst.msk [vmem:[#allocation3 + $0xe0] sm:$0xff] %vm2674_vm15, %v3995_v47  ;;  %5359 = vmatprep.mubr.bf16.mxu1 %v4830_v55  ;;  %vm1358_vm10 = vcmp.ge.f32.partialorder %v1240_v53, 0.0  ;;  %v1462_v40 = vmul.f32 0.01, %v1240_v53  ;;  %vm1356_vm11 = vcmp.ge.f32.partialorder %v1232_v61, 0.0  ;;  %v3208_v47 = vld [vmem:[#allocation2 + $0x221] sm:$0xff]  ;;  %v9426_v34 = vpack.c.bf16 %v1942_v50, %v1941_v16 }
 0x24a   : > { %v2960_v56 = vpop.permute.xlu1 %2959  ;;  %3598 = vrot.lane.b32.xlu0 %v8855_v25, %s8186_s10  ;;  %5360 = vmatmul.mubr.bf16.gmra.mrb[16].mxu1 %v4829_v42  ;;  %v7809_v25 = vpop.f32.mrb[100].mxu0  ;;  %1665 = vst.msk [vmem:[#allocation2 + $0x2e8] sm:$0xff] %vm1571_vm4, %v1560_v29  ;;  %1670 = vst.msk [vmem:[#allocation2 + $0x310] sm:$0xff] %vm1571_vm4, %v1565_v9  ;;  %v1563_v17 = vsel %vm1355_vm9, %v1229_v33, %v1459_v36  ;;  %v1460_v15 = vmul.f32 0.01, %v1232_v61  ;;  %v3209_v55 = vld [vmem:[#allocation2 + $0x229] sm:$0xff] }
 0x24b   : > { %3104 = vst.msk [vmem:[#allocation3 + $0x120] sm:$0xff] %vm3091_vm1, %v2960_v56  ;;  %v1253_v43 = vadd.f32 %v8073_v52, %v7809_v25  ;;  %v1244_v45 = vpop.f32.mrb[101].mxu0  ;;  %v1566_v20 = vsel %vm1358_vm10, %v1240_v53, %v1462_v40  ;;  %v3210_v7 = vld [vmem:[#allocation2 + $0x231] sm:$0xff]  ;;  %v3280_v0 = vpack.c.bf16 %v3209_v55, %v3208_v47  ;;  %v4855_v1 = vld [vmem:[#allocation3 + $0x178] sm:$0xff]  ;;  %vm6481_vm5 = vcmask 523264  }
 0x24c   : > { %2981 = vrot.lane.b32.xlu1 %v9361_v12, %s8188_s25  ;;  %v3993_v2 = vpop.permute.xlu0 %3992  ;;  %v1245_v51 = vadd.f32 %v8073_v52, %v1244_v45  ;;  %v7810_v4 = vpop.f32.mrb[102].mxu0  ;;  %1668 = vst.msk [vmem:[#allocation2 + $0x300] sm:$0xff] %vm1571_vm4, %v1563_v17  ;;  %1671 = vst.msk [vmem:[#allocation2 + $0x318] sm:$0xff] %vm1571_vm4, %v1566_v20  ;;  %v1564_v35 = vsel %vm1356_vm11, %v1232_v61, %v1460_v15  ;;  %v3281_v38 = vpack.c.bf16 %v3211_v32, %v3210_v7  ;;  %v4858_v48 = vld [vmem:[#allocation3 + $0x190] sm:$0xff]  ;;  %v1755_v25 = vld [vmem:[#allocation2 + $0x230] sm:$0xff] }
 0x24d   : > { %4140 = vst.msk [vmem:[#allocation3 + $0xc8] sm:$0xff] %vm2674_vm15, %v3993_v2  ;;  %vm1361_vm12 = vcmp.ge.f32.partialorder %v1253_v43, 0.0  ;;  %v1256_v21 = vadd.f32 %v8073_v52, %v7810_v4  ;;  %v1247_v22 = vpop.f32.mrb[103].mxu0  ;;  %v4666_v53 = vld [vmem:[#allocation2 + $0x252] sm:$0xff]  ;;  %v4664_v36 = vld [vmem:[#allocation2 + $0x242] sm:$0xff]  ;;  %v4667_v45 = vld [vmem:[#allocation2 + $0x25a] sm:$0xff] }
 0x24e   : > { %v2130_v26 = vpop.permute.xlu1 %2129  ;;  %4014 = vrot.lane.b32.xlu0 %v9262_v37, %s8187_s13  ;;  %7840 = vmatmul.mubr.msk.bf16.gmra.mrb[140].mxu0 %vm1571_vm4, %v4849_v31  ;;  %v1465_v37 = vmul.f32 0.01, %v1253_v43  ;;  %vm1359_vm13 = vcmp.ge.f32.partialorder %v1245_v51, 0.0  ;;  %v1463_v24 = vmul.f32 0.01, %v1245_v51  ;;  %v1248_v58 = vadd.f32 %v8073_v52, %v1247_v22  ;;  %1669 = vst.msk [vmem:[#allocation2 + $0x308] sm:$0xff] %vm1571_vm4, %v1564_v35 }
 0x24f   : > { %2272 = vst.msk [vmem:[#allocation3 + $0x150] sm:$0xff] %vm2257_vm14, %v2130_v26  ;;  %7843 = vmatprep.mubr.msk.bf16.mxu0 %vm1571_vm4, %v4852_v27  ;;  %vm1362_vm0 = vcmp.ge.f32.partialorder %v1256_v21, 0.0  ;;  %v1466_v10 = vmul.f32 0.01, %v1256_v21  ;;  %v1754_v52 = vld [vmem:[#allocation2 + $0x228] sm:$0xff]  ;;  %v1756_v2 = vld [vmem:[#allocation2 + $0x238] sm:$0xff]  ;;  %v4737_v26 = vpack.c.bf16 %v4667_v45, %v4666_v53 }
 0x250   : > { %2979 = vrot.lane.b32.xlu1 %v9392_v62, %s8188_s25  ;;  %v4409_v3 = vpop.permute.xlu0 %4408  ;;  %v1569_v42 = vsel %vm1361_vm12, %v1253_v43, %v1465_v37  ;;  %1676 = vst.msk [vmem:[#allocation2 + $0x340] sm:$0xff] %vm1571_vm4, %v8189_v54  ;;  %1677 = vst.msk [vmem:[#allocation2 + $0x348] sm:$0xff] %vm1571_vm4, %v8189_v54  ;;  %v1567_v56 = vsel %vm1359_vm13, %v1245_v51, %v1463_v24  ;;  %vm1360_vm3 = vcmp.ge.f32.partialorder %v1248_v58, 0.0  ;;  %v1464_v8 = vmul.f32 0.01, %v1248_v58  ;;  %v4665_v43 = vld [vmem:[#allocation2 + $0x24a] sm:$0xff] }
 0x251   : > { %4556 = vst.msk [vmem:[#allocation3 + $0xc8] sm:$0xff] %vm3091_vm1, %v4409_v3  ;;  %v1570_v33 = vsel %vm1362_vm0, %v1256_v21, %v1466_v10  ;;  %v1823_v61 = vpack.c.bf16 %v1754_v52, %v1753_v44  ;;  %v1824_v31 = vpack.c.bf16 %v1756_v2, %v1755_v25  ;;  %v9450_v4 = vpack.c.bf16 %v4665_v43, %v4664_v36  ;;  %v1943_v17 = vld [vmem:[#allocation2 + $0x191] sm:$0xff]  ;;  %v1944_v15 = vld [vmem:[#allocation2 + $0x199] sm:$0xff]  ;;  %v3212_v22 = vld [vmem:[#allocation2 + $0x241] sm:$0xff] }
 0x252   : > { %1678 = vst.msk [vmem:[#allocation2 + $0x350] sm:$0xff] %vm1571_vm4, %v8189_v54  ;;  %1679 = vst.msk [vmem:[#allocation2 + $0x358] sm:$0xff] %vm1571_vm4, %v8189_v54  ;;  %v2547_v39 = vpop.permute.xlu1 %2546  ;;  %4012 = vrot.lane.b32.xlu0 %v9273_v18, %s8187_s13  ;;  %v1568_v29 = vsel %vm1360_vm3, %v1248_v58, %v1464_v8  ;;  %v4861_v50 = vld [vmem:[#allocation3 + $0x1a8] sm:$0xff]  ;;  %v9464_v37 = vpack.c.bf16 %v1944_v15, %v1943_v17  ;;  %v4835_v21 = vld [vmem:[#allocation3 + $0xd8] sm:$0xff] }
 0x253   : > { %1680 = vst.msk [vmem:[#allocation2 + $0x360] sm:$0xff] %vm1571_vm4, %v8189_v54  ;;  %1681 = vst.msk [vmem:[#allocation2 + $0x368] sm:$0xff] %vm1571_vm4, %v8189_v54  ;;  %v3213_v3 = vld [vmem:[#allocation2 + $0x249] sm:$0xff]  ;;  %v3214_v35 = vld [vmem:[#allocation2 + $0x251] sm:$0xff] }
 0x254   : > { %1682 = vst.msk [vmem:[#allocation2 + $0x370] sm:$0xff] %vm1571_vm4, %v8189_v54  ;;  %1683 = vst.msk [vmem:[#allocation2 + $0x378] sm:$0xff] %vm1571_vm4, %v8189_v54  ;;  %2149 = vrot.lane.b32.xlu1 %v9426_v34, %s8186_s10  ;;  %v3581_v18 = vpop.permute.xlu0 %3580  ;;  %v3282_v47 = vpack.c.bf16 %v3213_v3, %v3212_v22  ;;  %v1757_v55 = vld [vmem:[#allocation2 + $0x240] sm:$0xff]  ;;  %v1758_v10 = vld [vmem:[#allocation2 + $0x248] sm:$0xff] }
 0x255   : > { %1684 = vst.msk [vmem:[#allocation2 + $0x380] sm:$0xff] %vm1571_vm4, %v8189_v54  ;;  %1674 = vst.msk [vmem:[#allocation2 + $0x330] sm:$0xff] %vm1571_vm4, %v1569_v42  ;;  %v1759_v7 = vld [vmem:[#allocation2 + $0x250] sm:$0xff]  ;;  %v1760_v32 = vld [vmem:[#allocation2 + $0x258] sm:$0xff] }
 0x256   : > { %2689 = vst.msk [vmem:[#allocation3 + $0x150] sm:$0xff] %vm2674_vm15, %v2547_v39  ;;  %v2132_v9 = vpop.permute.xlu1 %2131  ;;  %4428 = vrot.lane.b32.xlu0 %v9286_v28, %s8188_s25  ;;  %7844 = vmatmul.mubr.msk.bf16.gmra.mrb[144].mxu0 %vm1571_vm4, %v4855_v1  ;;  %v4832_v28 = vld [vmem:[#allocation3 + $0xc0] sm:$0xff]  ;;  %v1826_v8 = vpack.c.bf16 %v1760_v32, %v1759_v7  ;;  %v3814_v44 = vld [vmem:[#allocation2 + $0x1b0] sm:$0xff]  ;;  %v4671_v53 = vld [vmem:[#allocation2 + $0x27a] sm:$0xff] }
 0x257   : > { %1672 = vst.msk [vmem:[#allocation2 + $0x320] sm:$0xff] %vm1571_vm4, %v1567_v56  ;;  %1675 = vst.msk [vmem:[#allocation2 + $0x338] sm:$0xff] %vm1571_vm4, %v1570_v33  ;;  %7847 = vmatprep.mubr.msk.bf16.mxu0 %vm1571_vm4, %v4858_v48  ;;  %v1825_v56 = vpack.c.bf16 %v1758_v10, %v1757_v55  ;;  %v3815_v33 = vld [vmem:[#allocation2 + $0x1b8] sm:$0xff]  ;;  %v4669_v52 = vld [vmem:[#allocation2 + $0x26a] sm:$0xff] }
 0x258   : > { %3726 = vst.msk [vmem:[#allocation3 + $0xf8] sm:$0xff] %vm2257_vm14, %v3581_v18  ;;  %2273 = vst.msk [vmem:[#allocation3 + $0x168] sm:$0xff] %vm2257_vm14, %v2132_v9  ;;  %2566 = vrot.lane.b32.xlu1 %v8959_v60, %s8187_s13  ;;  %v4411_v40 = vpop.permute.xlu0 %4410  ;;  %v4833_v51 = vld [vmem:[#allocation3 + $0xc8] sm:$0xff]  ;;  %v4870_v18 = vld [vmem:[#allocation3 + $0x1f0] sm:$0xff]  ;;  %v3895_v1 = vpack.c.bf16 %v3815_v33, %v3814_v44 }
 0x259   : > { %1673 = vst.msk [vmem:[#allocation2 + $0x328] sm:$0xff] %vm1571_vm4, %v1568_v29  ;;  %3332 = vst.msk [vmem:[#allocation3 + $0x308] sm:$0xff] %vm1571_vm4, %v3280_v0  ;;  %5367 = vmatprep.mubr.bf16.mxu1 %v4833_v51  ;;  %v4668_v29 = vld [vmem:[#allocation2 + $0x262] sm:$0xff]  ;;  %v4873_v25 = vld [vmem:[#allocation3 + $0x208] sm:$0xff] }
 0x25a   : > { %3333 = vst.msk [vmem:[#allocation3 + $0x320] sm:$0xff] %vm1571_vm4, %v3281_v38  ;;  %1875 = vst.msk [vmem:[#allocation3 + $0x330] sm:$0xff] %vm1571_vm4, %v1823_v61  ;;  %v2549_v27 = vpop.permute.xlu1 %2548  ;;  %3600 = vrot.lane.b32.xlu0 %v8900_v59, %s8186_s10  ;;  %5368 = vmatmul.mubr.bf16.gmra.mrb[20].mxu1 %v4832_v28  ;;  %v4864_v59 = vld [vmem:[#allocation3 + $0x1c0] sm:$0xff]  ;;  %v4738_v2 = vpack.c.bf16 %v4669_v52, %v4668_v29  ;;  %v2775_v43 = vld [vmem:[#allocation2 + $0x1a0] sm:$0xff] }
 0x25b   : > { %1876 = vst.msk [vmem:[#allocation3 + $0x348] sm:$0xff] %vm1571_vm4, %v1824_v31  ;;  %4788 = vst.msk [vmem:[#allocation3 + $0x310] sm:$0xff] %vm1571_vm4, %v9450_v4  ;;  %v2776_v45 = vld [vmem:[#allocation2 + $0x1a8] sm:$0xff]  ;;  %v4882_v17 = vld [vmem:[#allocation3 + $0x250] sm:$0xff] }
 0x25c   : > { %4557 = vst.msk [vmem:[#allocation3 + $0xe0] sm:$0xff] %vm3091_vm1, %v4411_v40  ;;  %3606 = vrot.lane.b32.xlu1 %v8965_v6, %s8186_s10  ;;  %v3583_v16 = vpop.permute.xlu0 %3582  ;;  %v2855_v28 = vpack.c.bf16 %v2776_v45, %v2775_v43  ;;  %v3216_v15 = vld [vmem:[#allocation2 + $0x261] sm:$0xff]  ;;  %v4841_v7 = vld [vmem:[#allocation3 + $0x108] sm:$0xff] }
 0x25d   : > { %2690 = vst.msk [vmem:[#allocation3 + $0x168] sm:$0xff] %vm2674_vm15, %v2549_v27  ;;  %v1946_v27 = vld [vmem:[#allocation2 + $0x1a9] sm:$0xff]  ;;  %v1761_v22 = vld [vmem:[#allocation2 + $0x260] sm:$0xff]  ;;  %v4674_v29 = vld [vmem:[#allocation2 + $0x292] sm:$0xff] }
 0x25e   : > { %4789 = vst.msk [vmem:[#allocation3 + $0x328] sm:$0xff] %vm1571_vm4, %v4737_v26  ;;  %v2966_v20 = vpop.permute.xlu1 %2965  ;;  %4430 = vrot.lane.b32.xlu0 %v9328_v46, %s8188_s25  ;;  %7848 = vmatmul.mubr.msk.bf16.gmra.mrb[148].mxu0 %vm1571_vm4, %v4861_v50  ;;  %v3215_v46 = vld [vmem:[#allocation2 + $0x259] sm:$0xff]  ;;  %3334 = vst.msk [vmem:[#allocation3 + $0x338] sm:$0xff] %vm1571_vm4, %v3282_v47  ;;  %v1945_v26 = vld [vmem:[#allocation2 + $0x1a1] sm:$0xff] }
 0x25f   : > { %3727 = vst.msk [vmem:[#allocation3 + $0x110] sm:$0xff] %vm2257_vm14, %v3583_v16  ;;  %7851 = vmatprep.mubr.msk.bf16.mxu0 %vm1571_vm4, %v4864_v59  ;;  %v3283_v42 = vpack.c.bf16 %v3215_v46, %v3214_v35  ;;  %v3217_v16 = vld [vmem:[#allocation2 + $0x269] sm:$0xff]  ;;  %v3218_v50 = vld [vmem:[#allocation2 + $0x271] sm:$0xff]  ;;  %v2023_v55 = vpack.c.bf16 %v1946_v27, %v1945_v26  ;;  %v4675_v52 = vld [vmem:[#allocation2 + $0x29a] sm:$0xff] }
 0x260   : > { %3107 = vst.msk [vmem:[#allocation3 + $0x168] sm:$0xff] %vm3091_vm1, %v2966_v20  ;;  %2151 = vrot.lane.b32.xlu1 %v9464_v37, %s8186_s10  ;;  %v3999_v24 = vpop.permute.xlu0 %3998  ;;  %v3284_v59 = vpack.c.bf16 %v3217_v16, %v3216_v15  ;;  %v1762_v3 = vld [vmem:[#allocation2 + $0x268] sm:$0xff]  ;;  %v1764_v47 = vld [vmem:[#allocation2 + $0x278] sm:$0xff] }
 0x261   : > { %4143 = vst.msk [vmem:[#allocation3 + $0x110] sm:$0xff] %vm2674_vm15, %v3999_v24  ;;  %v1827_v24 = vpack.c.bf16 %v1762_v3, %v1761_v22  ;;  %v4888_v44 = vld [vmem:[#allocation3 + $0x280] sm:$0xff] }
 0x262   : > { %v2964_v39 = vpop.permute.xlu1 %2963  ;;  %3602 = vrot.lane.b32.xlu0 %v8905_v63, %s8186_s10  ;;  %3335 = vst.msk [vmem:[#allocation3 + $0x350] sm:$0xff] %vm1571_vm4, %v3283_v42  ;;  %1877 = vst.msk [vmem:[#allocation3 + $0x360] sm:$0xff] %vm1571_vm4, %v1825_v56  ;;  %v4867_v63 = vld [vmem:[#allocation3 + $0x1d8] sm:$0xff]  ;;  %v4885_v56 = vld [vmem:[#allocation3 + $0x268] sm:$0xff] }
 0x263   : > { %v4836_v58 = vld [vmem:[#allocation3 + $0xe0] sm:$0xff]  ;;  %3106 = vst.msk [vmem:[#allocation3 + $0x150] sm:$0xff] %vm3091_vm1, %v2964_v39  ;;  %v4231_v39 = vld [vmem:[#allocation2 + $0x1b9] sm:$0xff] }
 0x264   : > { %5375 = vmatprep.mubr.bf16.mxu1 %v4836_v58  ;;  %2568 = vrot.lane.b32.xlu1 %v8965_v6, %s8187_s13  ;;  %v3997_v0 = vpop.permute.xlu0 %3996  ;;  %1878 = vst.msk [vmem:[#allocation3 + $0x378] sm:$0xff] %vm1571_vm4, %v1826_v8  ;;  %4790 = vst.msk [vmem:[#allocation3 + $0x340] sm:$0xff] %vm1571_vm4, %v4738_v2  ;;  %v1763_v58 = vld [vmem:[#allocation2 + $0x270] sm:$0xff]  ;;  %v4236_v26 = vld [vmem:[#allocation2 + $0x1e1] sm:$0xff] }
 0x265   : > { %5376 = vmatmul.mubr.bf16.gmra.mrb[24].mxu1 %v4835_v21  ;;  %4142 = vst.msk [vmem:[#allocation3 + $0xf8] sm:$0xff] %vm2674_vm15, %v3997_v0  ;;  %v3219_v21 = vld [vmem:[#allocation2 + $0x279] sm:$0xff]  ;;  %v1828_v42 = vpack.c.bf16 %v1764_v47, %v1763_v58  ;;  %v4237_v27 = vld [vmem:[#allocation2 + $0x1e9] sm:$0xff]  ;;  %v3220_v16 = vld [vmem:[#allocation2 + $0x281] sm:$0xff] }
 0x266   : > { %v2134_v38 = vpop.permute.xlu1 %2133  ;;  %4018 = vrot.lane.b32.xlu0 %v9361_v12, %s8187_s13  ;;  %7852 = vmatmul.mubr.msk.bf16.gmra.mrb[152].mxu0 %vm1571_vm4, %v4867_v63  ;;  %v4670_v12 = vld [vmem:[#allocation2 + $0x272] sm:$0xff]  ;;  %v3285_v35 = vpack.c.bf16 %v3219_v21, %v3218_v50  ;;  %3336 = vst.msk [vmem:[#allocation3 + $0x368] sm:$0xff] %vm1571_vm4, %v3284_v59  ;;  %1879 = vst.msk [vmem:[#allocation3 + $0x390] sm:$0xff] %vm1571_vm4, %v1827_v24  ;;  %v4900_v15 = vld [vmem:[#allocation3 + $0x2e0] sm:$0xff] }
 0x267   : > { %2274 = vst.msk [vmem:[#allocation3 + $0x180] sm:$0xff] %vm2257_vm14, %v2134_v38  ;;  %7855 = vmatprep.mubr.msk.bf16.mxu0 %vm1571_vm4, %v4870_v18  ;;  %v4739_v36 = vpack.c.bf16 %v4671_v53, %v4670_v12  ;;  %v3823_v18 = vld [vmem:[#allocation2 + $0x1f8] sm:$0xff]  ;;  %v1767_v24 = vld [vmem:[#allocation2 + $0x290] sm:$0xff] }
 0x268   : > { %4022 = vrot.lane.b32.xlu1 %v3895_v1, %s8187_s13  ;;  %v4413_v6 = vpop.permute.xlu0 %4412  ;;  %6586 = vst.msk [vmem:[#allocation4 + $0x340] sm:$0xff] %vm6481_vm5, %v8189_v54  ;;  %v4230_v54 = vld [vmem:[#allocation2 + $0x1b1] sm:$0xff]  ;;  %v3223_v21 = vld [vmem:[#allocation2 + $0x299] sm:$0xff] }
 0x269   : > { %4558 = vst.msk [vmem:[#allocation3 + $0xf8] sm:$0xff] %vm3091_vm1, %v4413_v6  ;;  %v4311_v0 = vpack.c.bf16 %v4231_v39, %v4230_v54  ;;  %v4673_v6 = vld [vmem:[#allocation2 + $0x28a] sm:$0xff]  ;;  %v4894_v53 = vld [vmem:[#allocation3 + $0x2b0] sm:$0xff]  ;;  %v3816_v54 = vld [vmem:[#allocation2 + $0x1c0] sm:$0xff] }
 0x26a   : > { %v2551_v48 = vpop.permute.xlu1 %2550  ;;  %4016 = vrot.lane.b32.xlu0 %v9392_v62, %s8187_s13  ;;  %v4876_v62 = vld [vmem:[#allocation3 + $0x220] sm:$0xff]  ;;  %4791 = vst.msk [vmem:[#allocation3 + $0x358] sm:$0xff] %vm1571_vm4, %v4739_v36  ;;  %3337 = vst.msk [vmem:[#allocation3 + $0x380] sm:$0xff] %vm1571_vm4, %v3285_v35  ;;  %v3222_v59 = vld [vmem:[#allocation2 + $0x291] sm:$0xff] }
 0x26b   : > { %2691 = vst.msk [vmem:[#allocation3 + $0x180] sm:$0xff] %vm2674_vm15, %v2551_v48  ;;  %v4891_v48 = vld [vmem:[#allocation3 + $0x298] sm:$0xff]  ;;  %v3821_v36 = vld [vmem:[#allocation2 + $0x1e8] sm:$0xff]  ;;  %v3287_v3 = vpack.c.bf16 %v3223_v21, %v3222_v59 }
 0x26c   : > { %2985 = vrot.lane.b32.xlu1 %v3895_v1, %s8188_s25  ;;  %v3585_v61 = vpop.permute.xlu0 %3584  ;;  %1880 = vst.msk [vmem:[#allocation3 + $0x3a8] sm:$0xff] %vm1571_vm4, %v1828_v42  ;;  %v4672_v1 = vld [vmem:[#allocation2 + $0x282] sm:$0xff] }
 0x26d   : > { %3728 = vst.msk [vmem:[#allocation3 + $0x128] sm:$0xff] %vm2257_vm14, %v3585_v61  ;;  %v4740_v61 = vpack.c.bf16 %v4673_v6, %v4672_v1  ;;  %v1766_v35 = vld [vmem:[#allocation2 + $0x288] sm:$0xff] }
 0x26e   : > { %v2136_v9 = vpop.permute.xlu1 %2135  ;;  %4432 = vrot.lane.b32.xlu0 %v9426_v34, %s8188_s25  ;;  %7856 = vmatmul.mubr.msk.bf16.gmra.mrb[156].mxu0 %vm1571_vm4, %v4873_v25  ;;  %v4838_v34 = vld [vmem:[#allocation3 + $0xf0] sm:$0xff]  ;;  %3339 = vst.msk [vmem:[#allocation3 + $0x3b0] sm:$0xff] %vm1571_vm4, %v3287_v3  ;;  %v3817_v39 = vld [vmem:[#allocation2 + $0x1c8] sm:$0xff] }
 0x26f   : > { %2275 = vst.msk [vmem:[#allocation3 + $0x198] sm:$0xff] %vm2257_vm14, %v2136_v9  ;;  %7859 = vmatprep.mubr.msk.bf16.mxu0 %vm1571_vm4, %v4876_v62  ;;  %v4741_v9 = vpack.c.bf16 %v4675_v52, %v4674_v29  ;;  %v3820_v62 = vld [vmem:[#allocation2 + $0x1e0] sm:$0xff]  ;;  %v3827_v52 = vld [vmem:[#allocation2 + $0x218] sm:$0xff]  ;;  %v3225_v3 = vld [vmem:[#allocation2 + $0x2a9] sm:$0xff] }
 0x270   : > { %3608 = vrot.lane.b32.xlu1 %v9024_v19, %s8186_s10  ;;  %v4415_v31 = vpop.permute.xlu0 %4414  ;;  %v4839_v40 = vld [vmem:[#allocation3 + $0xf8] sm:$0xff]  ;;  %4792 = vst.msk [vmem:[#allocation3 + $0x370] sm:$0xff] %vm1571_vm4, %v4740_v61  ;;  %v4678_v61 = vld [vmem:[#allocation2 + $0x2b2] sm:$0xff] }
 0x271   : > { %4559 = vst.msk [vmem:[#allocation3 + $0x110] sm:$0xff] %vm3091_vm1, %v4415_v31  ;;  %5383 = vmatprep.mubr.bf16.mxu1 %v4839_v40  ;;  %v4844_v31 = vld [vmem:[#allocation3 + $0x120] sm:$0xff] }
 0x272   : > { %v2553_v51 = vpop.permute.xlu1 %2552  ;;  %3604 = vrot.lane.b32.xlu0 %v8959_v60, %s8186_s10  ;;  %5384 = vmatmul.mubr.bf16.gmra.mrb[28].mxu1 %v4838_v34  ;;  %v4879_v60 = vld [vmem:[#allocation3 + $0x238] sm:$0xff]  ;;  %4793 = vst.msk [vmem:[#allocation3 + $0x388] sm:$0xff] %vm1571_vm4, %v4741_v9  ;;  %v9551_v34 = vpack.c.bf16 %v3821_v36, %v3820_v62  ;;  %v4909_v9 = vld [vmem:[#allocation3 + $0x328] sm:$0xff]  ;;  %v4912_v36 = vld [vmem:[#allocation3 + $0x340] sm:$0xff] }
 0x273   : > { %2692 = vst.msk [vmem:[#allocation3 + $0x198] sm:$0xff] %vm2674_vm15, %v2553_v51  ;;  %v3818_v51 = vld [vmem:[#allocation2 + $0x1d0] sm:$0xff]  ;;  %v3224_v59 = vld [vmem:[#allocation2 + $0x2a1] sm:$0xff] }
 0x274   : > { %2983 = vrot.lane.b32.xlu1 %v2855_v28, %s8188_s25  ;;  %v3587_v20 = vpop.permute.xlu0 %3586 }
 0x275   : > { %3729 = vst.msk [vmem:[#allocation3 + $0x140] sm:$0xff] %vm2257_vm14, %v3587_v20  ;;  %v3221_v20 = vld [vmem:[#allocation2 + $0x289] sm:$0xff] }
 0x276   : > { %v2970_v46 = vpop.permute.xlu1 %2969  ;;  %4434 = vrot.lane.b32.xlu0 %v9464_v37, %s8188_s25  ;;  %7860 = vmatmul.mubr.msk.bf16.gmra.mrb[160].mxu0 %vm1571_vm4, %v4879_v60  ;;  %v3286_v22 = vpack.c.bf16 %v3221_v20, %v3220_v16  ;;  %v1765_v60 = vld [vmem:[#allocation2 + $0x280] sm:$0xff]  ;;  %v4241_v16 = vld [vmem:[#allocation2 + $0x209] sm:$0xff] }
 0x277   : > { %3109 = vst.msk [vmem:[#allocation3 + $0x198] sm:$0xff] %vm3091_vm1, %v2970_v46  ;;  %7863 = vmatprep.mubr.msk.bf16.mxu0 %vm1571_vm4, %v4882_v17  ;;  %v4897_v17 = vld [vmem:[#allocation3 + $0x2c8] sm:$0xff]  ;;  %v1829_v46 = vpack.c.bf16 %v1766_v35, %v1765_v60  ;;  %v4918_v20 = vld [vmem:[#allocation3 + $0x370] sm:$0xff] }
 0x278   : > { %2153 = vrot.lane.b32.xlu1 %v2023_v55, %s8186_s10  ;;  %v4003_v37 = vpop.permute.xlu0 %4002  ;;  %v4842_v10 = vld [vmem:[#allocation3 + $0x110] sm:$0xff]  ;;  %3338 = vst.msk [vmem:[#allocation3 + $0x398] sm:$0xff] %vm1571_vm4, %v3286_v22 }
 0x279   : > { %4145 = vst.msk [vmem:[#allocation3 + $0x140] sm:$0xff] %vm2674_vm15, %v4003_v37  ;;  %5391 = vmatprep.mubr.bf16.mxu1 %v4842_v10  ;;  %v9565_v10 = vpack.c.bf16 %v4237_v27, %v4236_v26  ;;  %v3824_v26 = vld [vmem:[#allocation2 + $0x200] sm:$0xff]  ;;  %v3825_v27 = vld [vmem:[#allocation2 + $0x208] sm:$0xff]  ;;  %v3226_v60 = vld [vmem:[#allocation2 + $0x2b1] sm:$0xff] }
 0x27a   : > { %v2968_v32 = vpop.permute.xlu1 %2967  ;;  %4020 = vrot.lane.b32.xlu0 %v2855_v28, %s8187_s13  ;;  %5392 = vmatmul.mubr.bf16.gmra.mrb[32].mxu1 %v4841_v7  ;;  %v3819_v28 = vld [vmem:[#allocation2 + $0x1d8] sm:$0xff]  ;;  %1881 = vst.msk [vmem:[#allocation3 + $0x3c0] sm:$0xff] %vm1571_vm4, %v1829_v46  ;;  %v4847_v7 = vld [vmem:[#allocation3 + $0x138] sm:$0xff]  ;;  %v9604_v22 = vpack.c.bf16 %v3825_v27, %v3824_v26  ;;  %v1770_v46 = vld [vmem:[#allocation2 + $0x2a8] sm:$0xff] }
 0x27b   : > { %3108 = vst.msk [vmem:[#allocation3 + $0x180] sm:$0xff] %vm3091_vm1, %v2968_v32  ;;  %v3897_v47 = vpack.c.bf16 %v3819_v28, %v3818_v51  ;;  %v3227_v35 = vld [vmem:[#allocation2 + $0x2b9] sm:$0xff]  ;;  %v4244_v27 = vld [vmem:[#allocation2 + $0x221] sm:$0xff] }
 0x27c   : > { %2570 = vrot.lane.b32.xlu1 %v9024_v19, %s8187_s13  ;;  %v4001_v8 = vpop.permute.xlu0 %4000  ;;  %v3822_v19 = vld [vmem:[#allocation2 + $0x1f0] sm:$0xff] }
 0x27d   : > { %4144 = vst.msk [vmem:[#allocation3 + $0x128] sm:$0xff] %vm2674_vm15, %v4001_v8  ;;  %v9540_v2 = vpack.c.bf16 %v3823_v18, %v3822_v19  ;;  %v3896_v19 = vpack.c.bf16 %v3817_v39, %v3816_v54  ;;  %v4233_v18 = vld [vmem:[#allocation2 + $0x1c9] sm:$0xff] }
 0x27e   : > { %v2138_v33 = vpop.permute.xlu1 %2137  ;;  %4436 = vrot.lane.b32.xlu0 %v2023_v55, %s8188_s25  ;;  %7864 = vmatmul.mubr.msk.bf16.gmra.mrb[164].mxu0 %vm1571_vm4, %v4885_v56  ;;  %v4903_v56 = vld [vmem:[#allocation3 + $0x2f8] sm:$0xff] }
 0x27f   : > { %2276 = vst.msk [vmem:[#allocation3 + $0x1b0] sm:$0xff] %vm2257_vm14, %v2138_v33  ;;  %7867 = vmatprep.mubr.msk.bf16.mxu0 %vm1571_vm4, %v4888_v44  ;;  %v4906_v44 = vld [vmem:[#allocation3 + $0x310] sm:$0xff] }
 0x280   : > { %4438 = vrot.lane.b32.xlu1 %v4311_v0, %s8188_s25  ;;  %v4417_v63 = vpop.permute.xlu0 %4416  ;;  %v4238_v33 = vld [vmem:[#allocation2 + $0x1f1] sm:$0xff] }
 0x281   : > { %4560 = vst.msk [vmem:[#allocation3 + $0x128] sm:$0xff] %vm3091_vm1, %v4417_v63 }
 0x282   : > { %v2555_v38 = vpop.permute.xlu1 %2554  ;;  %3612 = vrot.lane.b32.xlu0 %v9113_v30, %s8186_s10 }
 0x283   : > { %2693 = vst.msk [vmem:[#allocation3 + $0x1b0] sm:$0xff] %vm2674_vm15, %v2555_v38  ;;  %v4232_v38 = vld [vmem:[#allocation2 + $0x1c1] sm:$0xff] }
 0x284   : > { %3610 = vrot.lane.b32.xlu1 %v9026_v49, %s8186_s10  ;;  %v3589_v12 = vpop.permute.xlu0 %3588 }
 0x285   : > { %3730 = vst.msk [vmem:[#allocation3 + $0x158] sm:$0xff] %vm2257_vm14, %v3589_v12  ;;  %v4676_v12 = vld [vmem:[#allocation2 + $0x2a2] sm:$0xff] }
 0x286   : > { %v2140_v25 = vpop.permute.xlu1 %2139  ;;  %3614 = vrot.lane.b32.xlu0 %v9122_v14, %s8186_s10  ;;  %7868 = vmatmul.mubr.msk.bf16.gmra.mrb[168].mxu0 %vm1571_vm4, %v4891_v48  ;;  %v3826_v48 = vld [vmem:[#allocation2 + $0x210] sm:$0xff] }
 0x287   : > { %2277 = vst.msk [vmem:[#allocation3 + $0x1c8] sm:$0xff] %vm2257_vm14, %v2140_v25  ;;  %7871 = vmatprep.mubr.msk.bf16.mxu0 %vm1571_vm4, %v4894_v53  ;;  %v4677_v53 = vld [vmem:[#allocation2 + $0x2aa] sm:$0xff]  ;;  %v4679_v25 = vld [vmem:[#allocation2 + $0x2ba] sm:$0xff] }
 0x288   : > { %2155 = vrot.lane.b32.xlu1 %v4311_v0, %s8186_s10  ;;  %v4419_v43 = vpop.permute.xlu0 %4418  ;;  %v4845_v45 = vld [vmem:[#allocation3 + $0x128] sm:$0xff]  ;;  %v4239_v0 = vld [vmem:[#allocation2 + $0x1f9] sm:$0xff] }
 0x289   : > { %4561 = vst.msk [vmem:[#allocation3 + $0x140] sm:$0xff] %vm3091_vm1, %v4419_v43  ;;  %5399 = vmatprep.mubr.bf16.mxu1 %v4845_v45  ;;  %v9581_v6 = vpack.c.bf16 %v4239_v0, %v4238_v33  ;;  %v4742_v43 = vpack.c.bf16 %v4677_v53, %v4676_v12  ;;  %v3831_v12 = vld [vmem:[#allocation2 + $0x238] sm:$0xff]  ;;  %v4681_v53 = vld [vmem:[#allocation2 + $0x2ca] sm:$0xff] }
 0x28a   : > { %v2557_v40 = vpop.permute.xlu1 %2556  ;;  %4030 = vrot.lane.b32.xlu0 %v9540_v2, %s8187_s13  ;;  %5400 = vmatmul.mubr.bf16.gmra.mrb[36].mxu1 %v4844_v31  ;;  %v9591_v31 = vpack.c.bf16 %v3827_v52, %v3826_v48 }
 0x28b   : > { %2694 = vst.msk [vmem:[#allocation3 + $0x1c8] sm:$0xff] %vm2674_vm15, %v2557_v40  ;;  %v4743_v40 = vpack.c.bf16 %v4679_v25, %v4678_v61  ;;  %v4682_v61 = vld [vmem:[#allocation2 + $0x2d2] sm:$0xff]  ;;  %v4683_v25 = vld [vmem:[#allocation2 + $0x2da] sm:$0xff] }
 0x28c   : > { %2572 = vrot.lane.b32.xlu1 %v9026_v49, %s8187_s13  ;;  %v3591_v50 = vpop.permute.xlu0 %3590  ;;  %v1768_v49 = vld [vmem:[#allocation2 + $0x298] sm:$0xff]  ;;  %4794 = vst.msk [vmem:[#allocation3 + $0x3a0] sm:$0xff] %vm1571_vm4, %v4742_v43 }
 0x28d   : > { %3731 = vst.msk [vmem:[#allocation3 + $0x170] sm:$0xff] %vm2257_vm14, %v3591_v50  ;;  %v1830_v55 = vpack.c.bf16 %v1768_v49, %v1767_v24  ;;  %v4915_v50 = vld [vmem:[#allocation3 + $0x358] sm:$0xff]  ;;  %v3288_v24 = vpack.c.bf16 %v3225_v3, %v3224_v59  ;;  %v1771_v49 = vld [vmem:[#allocation2 + $0x2b0] sm:$0xff] }
 0x28e   : > { %v2974_v58 = vpop.permute.xlu1 %2973  ;;  %4028 = vrot.lane.b32.xlu0 %v9551_v34, %s8187_s13  ;;  %7872 = vmatmul.mubr.msk.bf16.gmra.mrb[172].mxu0 %vm1571_vm4, %v4897_v17  ;;  %4795 = vst.msk [vmem:[#allocation3 + $0x3b8] sm:$0xff] %vm1571_vm4, %v4743_v40  ;;  %v4745_v40 = vpack.c.bf16 %v4683_v25, %v4682_v61  ;;  %v3231_v59 = vld [vmem:[#allocation2 + $0x2d9] sm:$0xff]  ;;  %v4249_v61 = vld [vmem:[#allocation2 + $0x249] sm:$0xff] }
 0x28f   : > { %3111 = vst.msk [vmem:[#allocation3 + $0x1c8] sm:$0xff] %vm3091_vm1, %v2974_v58  ;;  %7875 = vmatprep.mubr.msk.bf16.mxu0 %vm1571_vm4, %v4900_v15  ;;  %v4240_v15 = vld [vmem:[#allocation2 + $0x201] sm:$0xff]  ;;  %v3289_v58 = vpack.c.bf16 %v3227_v35, %v3226_v60  ;;  %v1775_v35 = vld [vmem:[#allocation2 + $0x2d0] sm:$0xff] }
 0x290   : > { %4026 = vrot.lane.b32.xlu1 %v3897_v47, %s8187_s13  ;;  %v4007_v42 = vpop.permute.xlu0 %4006  ;;  %v4848_v37 = vld [vmem:[#allocation3 + $0x140] sm:$0xff]  ;;  %1882 = vst.msk [vmem:[#allocation3 + $0x3d8] sm:$0xff] %vm1571_vm4, %v1830_v55  ;;  %3340 = vst.msk [vmem:[#allocation3 + $0x3c8] sm:$0xff] %vm1571_vm4, %v3288_v24  ;;  %v1773_v3 = vld [vmem:[#allocation2 + $0x2c0] sm:$0xff] }
 0x291   : > { %4147 = vst.msk [vmem:[#allocation3 + $0x170] sm:$0xff] %vm2674_vm15, %v4007_v42  ;;  %5407 = vmatprep.mubr.bf16.mxu1 %v4848_v37  ;;  %v1772_v37 = vld [vmem:[#allocation2 + $0x2b8] sm:$0xff]  ;;  %v1774_v60 = vld [vmem:[#allocation2 + $0x2c8] sm:$0xff] }
 0x292   : > { %v2972_v32 = vpop.permute.xlu1 %2971  ;;  %4444 = vrot.lane.b32.xlu0 %v9565_v10, %s8188_s25  ;;  %5408 = vmatmul.mubr.bf16.gmra.mrb[40].mxu1 %v4847_v7  ;;  %v4234_v7 = vld [vmem:[#allocation2 + $0x1d1] sm:$0xff]  ;;  %3341 = vst.msk [vmem:[#allocation3 + $0x3e0] sm:$0xff] %vm1571_vm4, %v3289_v58  ;;  %v1832_v54 = vpack.c.bf16 %v1772_v37, %v1771_v49  ;;  %4797 = vst.msk [vmem:[#allocation3 + $0x3e8] sm:$0xff] %vm1571_vm4, %v4745_v40  ;;  %v2370_v49 = vld [vmem:[#allocation2 + $0x1e2] sm:$0xff] }
 0x293   : > { %3110 = vst.msk [vmem:[#allocation3 + $0x1b0] sm:$0xff] %vm3091_vm1, %v2972_v32  ;;  %v4235_v32 = vld [vmem:[#allocation2 + $0x1d9] sm:$0xff] }
 0x294   : > { %2989 = vrot.lane.b32.xlu1 %v3897_v47, %s8188_s25  ;;  %v4005_v8 = vpop.permute.xlu0 %4004  ;;  %v1769_v47 = vld [vmem:[#allocation2 + $0x2a0] sm:$0xff]  ;;  %1884 = vst.msk [vmem:[#allocation3 + $0x408] sm:$0xff] %vm1571_vm4, %v1832_v54  ;;  %v4313_v0 = vpack.c.bf16 %v4235_v32, %v4234_v7 }
 0x295   : > { %4146 = vst.msk [vmem:[#allocation3 + $0x158] sm:$0xff] %vm2674_vm15, %v4005_v8  ;;  %v1831_v42 = vpack.c.bf16 %v1770_v46, %v1769_v47  ;;  %v9616_v8 = vpack.c.bf16 %v4241_v16, %v4240_v15  ;;  %v1833_v46 = vpack.c.bf16 %v1774_v60, %v1773_v3 }
 0x296   : > { %v2142_v63 = vpop.permute.xlu1 %2141  ;;  %3616 = vrot.lane.b32.xlu0 %v9171_v23, %s8186_s10  ;;  %7876 = vmatmul.mubr.msk.bf16.gmra.mrb[176].mxu0 %vm1571_vm4, %v4903_v56  ;;  %v4312_v23 = vpack.c.bf16 %v4233_v18, %v4232_v38  ;;  %v4242_v38 = vld [vmem:[#allocation2 + $0x211] sm:$0xff]  ;;  %v4243_v18 = vld [vmem:[#allocation2 + $0x219] sm:$0xff] }
 0x297   : > { %2278 = vst.msk [vmem:[#allocation3 + $0x1e0] sm:$0xff] %vm2257_vm14, %v2142_v63  ;;  %7879 = vmatprep.mubr.msk.bf16.mxu0 %vm1571_vm4, %v4906_v44  ;;  %v4853_v44 = vld [vmem:[#allocation3 + $0x168] sm:$0xff] }
 0x298   : > { %4024 = vrot.lane.b32.xlu1 %v3896_v19, %s8187_s13  ;;  %v4421_v1 = vpop.permute.xlu0 %4420  ;;  %1883 = vst.msk [vmem:[#allocation3 + $0x3f0] sm:$0xff] %vm1571_vm4, %v1831_v42  ;;  %1885 = vst.msk [vmem:[#allocation3 + $0x420] sm:$0xff] %vm1571_vm4, %v1833_v46 }
 0x299   : > { %4562 = vst.msk [vmem:[#allocation3 + $0x158] sm:$0xff] %vm3091_vm1, %v4421_v1  ;;  %v4933_v42 = vld [vmem:[#allocation3 + $0x3e8] sm:$0xff] }
 0x29a   : > { %v2559_v29 = vpop.permute.xlu1 %2558  ;;  %4446 = vrot.lane.b32.xlu0 %v9581_v6, %s8188_s25 }
 0x29b   : > { %2695 = vst.msk [vmem:[#allocation3 + $0x1e0] sm:$0xff] %vm2674_vm15, %v2559_v29  ;;  %v9632_v29 = vpack.c.bf16 %v4243_v18, %v4242_v38 }
 0x29c   : > { %4440 = vrot.lane.b32.xlu1 %v4312_v23, %s8188_s25  ;;  %v3593_v62 = vpop.permute.xlu0 %3592 }
 0x29d   : > { %3732 = vst.msk [vmem:[#allocation3 + $0x188] sm:$0xff] %vm2257_vm14, %v3593_v62 }
 0x29e   : > { %v2144_v45 = vpop.permute.xlu1 %2143  ;;  %3618 = vrot.lane.b32.xlu0 %v9173_v57, %s8186_s10  ;;  %7880 = vmatmul.mubr.msk.bf16.gmra.mrb[180].mxu0 %vm1571_vm4, %v4909_v9  ;;  %v4850_v57 = vld [vmem:[#allocation3 + $0x150] sm:$0xff]  ;;  %v4927_v9 = vld [vmem:[#allocation3 + $0x3b8] sm:$0xff] }
 0x29f   : > { %2279 = vst.msk [vmem:[#allocation3 + $0x1f8] sm:$0xff] %vm2257_vm14, %v2144_v45  ;;  %7883 = vmatprep.mubr.msk.bf16.mxu0 %vm1571_vm4, %v4912_v36 }
 0x2a0   : > { %2987 = vrot.lane.b32.xlu1 %v3896_v19, %s8188_s25  ;;  %v4423_v51 = vpop.permute.xlu0 %4422  ;;  %v4851_v28 = vld [vmem:[#allocation3 + $0x158] sm:$0xff]  ;;  %v4924_v19 = vld [vmem:[#allocation3 + $0x3a0] sm:$0xff] }
 0x2a1   : > { %4563 = vst.msk [vmem:[#allocation3 + $0x170] sm:$0xff] %vm3091_vm1, %v4423_v51  ;;  %5415 = vmatprep.mubr.bf16.mxu1 %v4851_v28  ;;  %v3828_v28 = vld [vmem:[#allocation2 + $0x220] sm:$0xff] }
 0x2a2   : > { %v2561_v17 = vpop.permute.xlu1 %2560  ;;  %4034 = vrot.lane.b32.xlu0 %v9591_v31, %s8187_s13  ;;  %5416 = vmatmul.mubr.bf16.gmra.mrb[44].mxu1 %v4850_v57  ;;  %v3829_v57 = vld [vmem:[#allocation2 + $0x228] sm:$0xff] }
 0x2a3   : > { %2696 = vst.msk [vmem:[#allocation3 + $0x1f8] sm:$0xff] %vm2674_vm15, %v2561_v17  ;;  %v4245_v17 = vld [vmem:[#allocation2 + $0x229] sm:$0xff]  ;;  %v9657_v16 = vpack.c.bf16 %v3829_v57, %v3828_v28 }
 0x2a4   : > { %2157 = vrot.lane.b32.xlu1 %v4312_v23, %s8186_s10  ;;  %v3595_v21 = vpop.permute.xlu0 %3594  ;;  %v3830_v23 = vld [vmem:[#allocation2 + $0x230] sm:$0xff]  ;;  %v9667_v54 = vpack.c.bf16 %v4245_v17, %v4244_v27 }
 0x2a5   : > { %3733 = vst.msk [vmem:[#allocation3 + $0x1a0] sm:$0xff] %vm2257_vm14, %v3595_v21  ;;  %v9643_v45 = vpack.c.bf16 %v3831_v12, %v3830_v23  ;;  %v4686_v23 = vld [vmem:[#allocation2 + $0x2f2] sm:$0xff]  ;;  %v4685_v12 = vld [vmem:[#allocation2 + $0x2ea] sm:$0xff] }
 0x2a6   : > { %v2978_v55 = vpop.permute.xlu1 %2977  ;;  %4032 = vrot.lane.b32.xlu0 %v9604_v22, %s8187_s13  ;;  %7884 = vmatmul.mubr.msk.bf16.gmra.mrb[184].mxu0 %vm1571_vm4, %v4915_v50  ;;  %v3229_v50 = vld [vmem:[#allocation2 + $0x2c9] sm:$0xff] }
 0x2a7   : > { %3113 = vst.msk [vmem:[#allocation3 + $0x1f8] sm:$0xff] %vm3091_vm1, %v2978_v55  ;;  %7887 = vmatprep.mubr.msk.bf16.mxu0 %vm1571_vm4, %v4918_v20  ;;  %v3230_v20 = vld [vmem:[#allocation2 + $0x2d1] sm:$0xff] }
 0x2a8   : > { %2574 = vrot.lane.b32.xlu1 %v9113_v30, %s8187_s13  ;;  %v4011_v39 = vpop.permute.xlu0 %4010  ;;  %v4854_v56 = vld [vmem:[#allocation3 + $0x170] sm:$0xff]  ;;  %v4921_v30 = vld [vmem:[#allocation3 + $0x388] sm:$0xff]  ;;  %v3291_v47 = vpack.c.bf16 %v3231_v59, %v3230_v20 }
 0x2a9   : > { %4149 = vst.msk [vmem:[#allocation3 + $0x1a0] sm:$0xff] %vm2674_vm15, %v4011_v39  ;;  %5423 = vmatprep.mubr.bf16.mxu1 %v4854_v56  ;;  %v2371_v55 = vld [vmem:[#allocation2 + $0x1ea] sm:$0xff]  ;;  %v4859_v39 = vld [vmem:[#allocation3 + $0x198] sm:$0xff] }
 0x2aa   : > { %v2976_v33 = vpop.permute.xlu1 %2975  ;;  %4448 = vrot.lane.b32.xlu0 %v9616_v8, %s8188_s25  ;;  %5424 = vmatmul.mubr.bf16.gmra.mrb[48].mxu1 %v4853_v44  ;;  %3343 = vst.msk [vmem:[#allocation3 + $0x410] sm:$0xff] %vm1571_vm4, %v3291_v47  ;;  %v3834_v17 = vld [vmem:[#allocation2 + $0x250] sm:$0xff] }
 0x2ab   : > { %3112 = vst.msk [vmem:[#allocation3 + $0x1e0] sm:$0xff] %vm3091_vm1, %v2976_v33  ;;  %v4246_v33 = vld [vmem:[#allocation2 + $0x231] sm:$0xff]  ;;  %v3233_v20 = vld [vmem:[#allocation2 + $0x2e9] sm:$0xff] }
 0x2ac   : > { %4442 = vrot.lane.b32.xlu1 %v4313_v0, %s8188_s25  ;;  %v4009_v63 = vpop.permute.xlu0 %4008  ;;  %v3234_v59 = vld [vmem:[#allocation2 + $0x2f1] sm:$0xff] }
 0x2ad   : > { %4148 = vst.msk [vmem:[#allocation3 + $0x188] sm:$0xff] %vm2674_vm15, %v4009_v63  ;;  %v3832_v63 = vld [vmem:[#allocation2 + $0x240] sm:$0xff] }
 0x2ae   : > { %v2146_v1 = vpop.permute.xlu1 %2145  ;;  %3620 = vrot.lane.b32.xlu0 %v9230_v5, %s8186_s10  ;;  %7888 = vmatmul.mubr.msk.bf16.gmra.mrb[188].mxu0 %vm1571_vm4, %v4921_v30  ;;  %v4680_v5 = vld [vmem:[#allocation2 + $0x2c2] sm:$0xff] }
 0x2af   : > { %2280 = vst.msk [vmem:[#allocation3 + $0x210] sm:$0xff] %vm2257_vm14, %v2146_v1  ;;  %7891 = vmatprep.mubr.msk.bf16.mxu0 %vm1571_vm4, %v4924_v19  ;;  %v4744_v36 = vpack.c.bf16 %v4681_v53, %v4680_v5  ;;  %v3833_v19 = vld [vmem:[#allocation2 + $0x248] sm:$0xff]  ;;  %v2372_v1 = vld [vmem:[#allocation2 + $0x1f2] sm:$0xff]  ;;  %v4687_v53 = vld [vmem:[#allocation2 + $0x2fa] sm:$0xff] }
 0x2b0   : > { %2159 = vrot.lane.b32.xlu1 %v4313_v0, %s8186_s10  ;;  %v4425_v48 = vpop.permute.xlu0 %4424  ;;  %v4247_v0 = vld [vmem:[#allocation2 + $0x239] sm:$0xff] }
 0x2b1   : > { %4564 = vst.msk [vmem:[#allocation3 + $0x188] sm:$0xff] %vm3091_vm1, %v4425_v48  ;;  %v9684_v18 = vpack.c.bf16 %v4247_v0, %v4246_v33  ;;  %v2373_v48 = vld [vmem:[#allocation2 + $0x1fa] sm:$0xff] }
 0x2b2   : > { %v2563_v52 = vpop.permute.xlu1 %2562  ;;  %4450 = vrot.lane.b32.xlu0 %v9632_v29, %s8188_s25  ;;  %4796 = vst.msk [vmem:[#allocation3 + $0x3d0] sm:$0xff] %vm1571_vm4, %v4744_v36  ;;  %v2445_v40 = vpack.c.bf16 %v2373_v48, %v2372_v1  ;;  %v3836_v1 = vld [vmem:[#allocation2 + $0x260] sm:$0xff]  ;;  %v3837_v48 = vld [vmem:[#allocation2 + $0x268] sm:$0xff] }
 0x2b3   : > { %2697 = vst.msk [vmem:[#allocation3 + $0x210] sm:$0xff] %vm2674_vm15, %v2563_v52  ;;  %v4684_v52 = vld [vmem:[#allocation2 + $0x2e2] sm:$0xff] }
 0x2b4   : > { %2576 = vrot.lane.b32.xlu1 %v9122_v14, %s8187_s13  ;;  %v3597_v62 = vpop.permute.xlu0 %3596 }
 0x2b5   : > { %3734 = vst.msk [vmem:[#allocation3 + $0x1b8] sm:$0xff] %vm2257_vm14, %v3597_v62  ;;  %v4746_v62 = vpack.c.bf16 %v4685_v12, %v4684_v52  ;;  %v4688_v12 = vld [vmem:[#allocation2 + $0x302] sm:$0xff] }
 0x2b6   : > { %v2148_v43 = vpop.permute.xlu1 %2147  ;;  %3622 = vrot.lane.b32.xlu0 %v9232_v11, %s8186_s10  ;;  %7892 = vmatmul.mubr.msk.bf16.gmra.mrb[192].mxu0 %vm1571_vm4, %v4927_v9  ;;  %v4856_v11 = vld [vmem:[#allocation3 + $0x180] sm:$0xff] }
 0x2b7   : > { %2281 = vst.msk [vmem:[#allocation3 + $0x228] sm:$0xff] %vm2257_vm14, %v2148_v43 }
 0x2b8   : > { %2993 = vrot.lane.b32.xlu1 %v9540_v2, %s8188_s25  ;;  %v4427_v14 = vpop.permute.xlu0 %4426  ;;  %v4857_v51 = vld [vmem:[#allocation3 + $0x188] sm:$0xff]  ;;  %v3228_v2 = vld [vmem:[#allocation2 + $0x2c1] sm:$0xff]  ;;  %4798 = vst.msk [vmem:[#allocation3 + $0x400] sm:$0xff] %vm1571_vm4, %v4746_v62 }
 0x2b9   : > { %4565 = vst.msk [vmem:[#allocation3 + $0x1a0] sm:$0xff] %vm3091_vm1, %v4427_v14  ;;  %5431 = vmatprep.mubr.bf16.mxu1 %v4857_v51  ;;  %v3290_v21 = vpack.c.bf16 %v3229_v50, %v3228_v2  ;;  %v4930_v58 = vld [vmem:[#allocation3 + $0x3d0] sm:$0xff]  ;;  %v4747_v51 = vpack.c.bf16 %v4687_v53, %v4686_v23 }
 0x2ba   : > { %v2565_v26 = vpop.permute.xlu1 %2564  ;;  %4038 = vrot.lane.b32.xlu0 %v9643_v45, %s8187_s13  ;;  %5432 = vmatmul.mubr.bf16.gmra.mrb[52].mxu1 %v4856_v11  ;;  %v3835_v2 = vld [vmem:[#allocation2 + $0x258] sm:$0xff] }
 0x2bb   : > { %2698 = vst.msk [vmem:[#allocation3 + $0x228] sm:$0xff] %vm2674_vm15, %v2565_v26  ;;  %7895 = vmatprep.mubr.msk.bf16.mxu0 %vm1571_vm4, %v4930_v58  ;;  %v4862_v26 = vld [vmem:[#allocation3 + $0x1b0] sm:$0xff]  ;;  %v1779_v58 = vld [vmem:[#allocation2 + $0x2f0] sm:$0xff] }
 0x2bc   : > { %2991 = vrot.lane.b32.xlu1 %v9551_v34, %s8188_s25  ;;  %v3599_v15 = vpop.permute.xlu0 %3598  ;;  %v1776_v34 = vld [vmem:[#allocation2 + $0x2d8] sm:$0xff]  ;;  %3342 = vst.msk [vmem:[#allocation3 + $0x3f8] sm:$0xff] %vm1571_vm4, %v3290_v21  ;;  %4799 = vst.msk [vmem:[#allocation3 + $0x418] sm:$0xff] %vm1571_vm4, %v4747_v51 }
 0x2bd   : > { %3735 = vst.msk [vmem:[#allocation3 + $0x1d0] sm:$0xff] %vm2257_vm14, %v3599_v15  ;;  %v1834_v37 = vpack.c.bf16 %v1776_v34, %v1775_v35  ;;  %v3232_v15 = vld [vmem:[#allocation2 + $0x2e1] sm:$0xff]  ;;  %v3235_v21 = vld [vmem:[#allocation2 + $0x2f9] sm:$0xff] }
 0x2be   : > { %v2982_v24 = vpop.permute.xlu1 %2981  ;;  %4036 = vrot.lane.b32.xlu0 %v9657_v16, %s8187_s13  ;;  %7896 = vmatmul.mubr.msk.bf16.gmra.mrb[196].mxu0 %vm1571_vm4, %v4933_v42  ;;  %v3292_v3 = vpack.c.bf16 %v3233_v20, %v3232_v15  ;;  %v3293_v60 = vpack.c.bf16 %v3235_v21, %v3234_v59  ;;  %v1777_v35 = vld [vmem:[#allocation2 + $0x2e0] sm:$0xff]  ;;  %v3838_v59 = vld [vmem:[#allocation2 + $0x270] sm:$0xff]  ;;  %v3839_v21 = vld [vmem:[#allocation2 + $0x278] sm:$0xff] }
 0x2bf   : > { %3115 = vst.msk [vmem:[#allocation3 + $0x228] sm:$0xff] %vm3091_vm1, %v2982_v24  ;;  %v1778_v24 = vld [vmem:[#allocation2 + $0x2e8] sm:$0xff]  ;;  %v4691_v62 = vld [vmem:[#allocation2 + $0x31a] sm:$0xff] }
 0x2c0   : > { %2161 = vrot.lane.b32.xlu1 %v9565_v10, %s8186_s10  ;;  %v4015_v7 = vpop.permute.xlu0 %4014  ;;  %v4860_v32 = vld [vmem:[#allocation3 + $0x1a0] sm:$0xff]  ;;  %1886 = vst.msk [vmem:[#allocation3 + $0x438] sm:$0xff] %vm1571_vm4, %v1834_v37  ;;  %v2444_v10 = vpack.c.bf16 %v2371_v55, %v2370_v49  ;;  %v1835_v34 = vpack.c.bf16 %v1778_v24, %v1777_v35  ;;  %v1780_v49 = vld [vmem:[#allocation2 + $0x2f8] sm:$0xff]  ;;  %3344 = vst.msk [vmem:[#allocation3 + $0x428] sm:$0xff] %vm1571_vm4, %v3292_v3 }
 0x2c1   : > { %4151 = vst.msk [vmem:[#allocation3 + $0x1d0] sm:$0xff] %vm2674_vm15, %v4015_v7  ;;  %5439 = vmatprep.mubr.bf16.mxu1 %v4860_v32  ;;  %v4936_v46 = vld [vmem:[#allocation3 + $0x400] sm:$0xff]  ;;  %v1836_v37 = vpack.c.bf16 %v1780_v49, %v1779_v58  ;;  %v9722_v32 = vpack.c.bf16 %v3835_v2, %v3834_v17  ;;  %v9764_v2 = vld [vmem:[#allocation2 + $0x252] sm:$0xff]  ;;  %v8074_v24 = vld [vmem:[#allocation2 + $0x25a] sm:$0xff] }
 0x2c2   : > { %v2980_v56 = vpop.permute.xlu1 %2979  ;;  %4452 = vrot.lane.b32.xlu0 %v9667_v54, %s8188_s25  ;;  %5440 = vmatmul.mubr.bf16.gmra.mrb[56].mxu1 %v4859_v39  ;;  %v2375_v55 = vld [vmem:[#allocation2 + $0x20a] sm:$0xff]  ;;  %3345 = vst.msk [vmem:[#allocation3 + $0x440] sm:$0xff] %vm1571_vm4, %v3293_v60  ;;  %1887 = vst.msk [vmem:[#allocation3 + $0x450] sm:$0xff] %vm1571_vm4, %v1835_v34  ;;  %v3236_v3 = vld [vmem:[#allocation2 + $0x301] sm:$0xff]  ;;  %v3491_v58 = vpack.c.bf16 %v8074_v24, %v9764_v2 }
 0x2c3   : > { %3114 = vst.msk [vmem:[#allocation3 + $0x210] sm:$0xff] %vm3091_vm1, %v2980_v56  ;;  %7899 = vmatprep.mubr.msk.bf16.mxu0 %vm1571_vm4, %v4936_v46  ;;  %v4939_v42 = vld [vmem:[#allocation3 + $0x418] sm:$0xff]  ;;  %v4865_v39 = vld [vmem:[#allocation3 + $0x1c8] sm:$0xff]  ;;  %v4868_v17 = vld [vmem:[#allocation3 + $0x1e0] sm:$0xff] }
 0x2c4   : > { %2578 = vrot.lane.b32.xlu1 %v2444_v10, %s8187_s13  ;;  %v4013_v44 = vpop.permute.xlu0 %4012  ;;  %v4250_v56 = vld [vmem:[#allocation2 + $0x251] sm:$0xff]  ;;  %v4251_v10 = vld [vmem:[#allocation2 + $0x259] sm:$0xff]  ;;  %1888 = vst.msk [vmem:[#allocation3 + $0x468] sm:$0xff] %vm1571_vm4, %v1836_v37  ;;  %v1782_v37 = vld [vmem:[#allocation2 + $0x308] sm:$0xff] }
 0x2c5   : > { %4150 = vst.msk [vmem:[#allocation3 + $0x1b8] sm:$0xff] %vm2674_vm15, %v4013_v44  ;;  %v9732_v0 = vpack.c.bf16 %v4251_v10, %v4250_v56  ;;  %v3238_v46 = vld [vmem:[#allocation2 + $0x311] sm:$0xff]  ;;  %v3239_v34 = vld [vmem:[#allocation2 + $0x319] sm:$0xff] }
 0x2c6   : > { %v2150_v30 = vpop.permute.xlu1 %2149  ;;  %3624 = vrot.lane.b32.xlu0 %v9339_v41, %s8186_s10  ;;  %v9689_v41 = vpack.c.bf16 %v3833_v19, %v3832_v63  ;;  %7900 = vmatmul.mubr.msk.bf16.gmra.mrb[200].mxu0 %vm1571_vm4, %v4939_v42  ;;  %v1781_v42 = vld [vmem:[#allocation2 + $0x300] sm:$0xff] }
 0x2c7   : > { %2282 = vst.msk [vmem:[#allocation3 + $0x240] sm:$0xff] %vm2257_vm14, %v2150_v30  ;;  %v1837_v10 = vpack.c.bf16 %v1782_v37, %v1781_v42  ;;  %v3840_v24 = vld [vmem:[#allocation2 + $0x280] sm:$0xff] }
 0x2c8   : > { %2163 = vrot.lane.b32.xlu1 %v9581_v6, %s8186_s10  ;;  %v4429_v38 = vpop.permute.xlu0 %4428  ;;  %v4248_v6 = vld [vmem:[#allocation2 + $0x241] sm:$0xff] }
 0x2c9   : > { %4566 = vst.msk [vmem:[#allocation3 + $0x1b8] sm:$0xff] %vm3091_vm1, %v4429_v38  ;;  %v9699_v14 = vpack.c.bf16 %v4249_v61, %v4248_v6  ;;  %v9747_v6 = vpack.c.bf16 %v3837_v48, %v3836_v1  ;;  %v2376_v61 = vld [vmem:[#allocation2 + $0x212] sm:$0xff] }
 0x2ca   : > { %v2567_v5 = vpop.permute.xlu1 %2566  ;;  %4454 = vrot.lane.b32.xlu0 %v9684_v18, %s8188_s25  ;;  %1889 = vst.msk [vmem:[#allocation3 + $0x480] sm:$0xff] %vm1571_vm4, %v1837_v10 }
 0x2cb   : > { %2699 = vst.msk [vmem:[#allocation3 + $0x240] sm:$0xff] %vm2674_vm15, %v2567_v5  ;;  %v4689_v5 = vld [vmem:[#allocation2 + $0x30a] sm:$0xff] }
 0x2cc   : > { %2995 = vrot.lane.b32.xlu1 %v9604_v22, %s8188_s25  ;;  %v3601_v25 = vpop.permute.xlu0 %3600  ;;  %v4748_v51 = vpack.c.bf16 %v4689_v5, %v4688_v12  ;;  %v9790_v5 = vpack.c.bf16 %v3839_v21, %v3838_v59 }
 0x2cd   : > { %3736 = vst.msk [vmem:[#allocation3 + $0x1e8] sm:$0xff] %vm2257_vm14, %v3601_v25  ;;  %v9695_v9 = vpop.f32.mrb[104].mxu0  ;;  %v4690_v25 = vld [vmem:[#allocation2 + $0x312] sm:$0xff] }
 0x2ce   : > { %v3607_v36 = vpop.permute.xlu1 %3606  ;;  %4040 = vrot.lane.b32.xlu0 %v9689_v41, %s8187_s13  ;;  %v5307_v43 = vpop.f32.mrb[105].mxu0  ;;  %4800 = vst.msk [vmem:[#allocation3 + $0x430] sm:$0xff] %vm1571_vm4, %v4748_v51 }
 0x2cf   : > { %3739 = vst.msk [vmem:[#allocation3 + $0x230] sm:$0xff] %vm2257_vm14, %v3607_v36  ;;  %v9702_v11 = vpop.f32.mrb[106].mxu0  ;;  %v2377_v36 = vld [vmem:[#allocation2 + $0x21a] sm:$0xff] }
 0x2d0   : > { %2580 = vrot.lane.b32.xlu1 %v2445_v40, %s8187_s13  ;;  %v4431_v22 = vpop.permute.xlu0 %4430  ;;  %v5310_v28 = vpop.f32.mrb[107].mxu0  ;;  %v4863_v57 = vld [vmem:[#allocation3 + $0x1b8] sm:$0xff]  ;;  %v4253_v40 = vld [vmem:[#allocation2 + $0x269] sm:$0xff] }
 0x2d1   : > { %4567 = vst.msk [vmem:[#allocation3 + $0x1d0] sm:$0xff] %vm3091_vm1, %v4431_v22  ;;  %5447 = vmatprep.mubr.bf16.mxu1 %v4863_v57  ;;  %v4252_v43 = vld [vmem:[#allocation2 + $0x261] sm:$0xff]  ;;  %v4749_v28 = vpack.c.bf16 %v4691_v62, %v4690_v25  ;;  %v4254_v25 = vld [vmem:[#allocation2 + $0x271] sm:$0xff]  ;;  %v4255_v62 = vld [vmem:[#allocation2 + $0x279] sm:$0xff] }
 0x2d2   : > { %v2152_v27 = vpop.permute.xlu1 %2151  ;;  %4456 = vrot.lane.b32.xlu0 %v9699_v14, %s8188_s25  ;;  %5448 = vmatmul.mubr.bf16.gmra.mrb[60].mxu1 %v4862_v26  ;;  %v9758_v26 = vpack.c.bf16 %v4253_v40, %v4252_v43 }
 0x2d3   : > { %2283 = vst.msk [vmem:[#allocation3 + $0x258] sm:$0xff] %vm2257_vm14, %v2152_v27 }
 0x2d4   : > { %2997 = vrot.lane.b32.xlu1 %v9591_v31, %s8188_s25  ;;  %v3603_v50 = vpop.permute.xlu0 %3602  ;;  %v2374_v31 = vld [vmem:[#allocation2 + $0x202] sm:$0xff]  ;;  %4801 = vst.msk [vmem:[#allocation3 + $0x448] sm:$0xff] %vm1571_vm4, %v4749_v28 }
 0x2d5   : > { %3737 = vst.msk [vmem:[#allocation3 + $0x200] sm:$0xff] %vm2257_vm14, %v3603_v50  ;;  %v4942_v56 = vld [vmem:[#allocation3 + $0x430] sm:$0xff] }
 0x2d6   : > { %v2569_v47 = vpop.permute.xlu1 %2568  ;;  %3626 = vrot.lane.b32.xlu0 %v9351_v13, %s8186_s10  ;;  %7903 = vmatprep.mubr.msk.bf16.mxu0 %vm1571_vm4, %v4942_v56 }
 0x2d7   : > { %2700 = vst.msk [vmem:[#allocation3 + $0x258] sm:$0xff] %vm2674_vm15, %v2569_v47  ;;  %v3237_v47 = vld [vmem:[#allocation2 + $0x309] sm:$0xff] }
 0x2d8   : > { %2165 = vrot.lane.b32.xlu1 %v9616_v8, %s8186_s10  ;;  %v4019_v7 = vpop.permute.xlu0 %4018  ;;  %v4866_v13 = vld [vmem:[#allocation3 + $0x1d0] sm:$0xff]  ;;  %v2446_v8 = vpack.c.bf16 %v2375_v55, %v2374_v31  ;;  %v3294_v31 = vpack.c.bf16 %v3237_v47, %v3236_v3  ;;  %v3295_v55 = vpack.c.bf16 %v3239_v34, %v3238_v46 }
 0x2d9   : > { %4153 = vst.msk [vmem:[#allocation3 + $0x200] sm:$0xff] %vm2674_vm15, %v4019_v7  ;;  %5455 = vmatprep.mubr.bf16.mxu1 %v4866_v13  ;;  %v1783_v7 = vld [vmem:[#allocation2 + $0x310] sm:$0xff]  ;;  %v9777_v13 = vld [vmem:[#allocation10] ss:$0 sm:$0xff] }
 0x2da   : > { %v4023_v44 = vpop.permute.xlu1 %4022  ;;  %4042 = vrot.lane.b32.xlu0 %v9722_v32, %s8187_s13  ;;  %5456 = vmatmul.mubr.bf16.gmra.mrb[64].mxu1 %v4865_v39  ;;  %3346 = vst.msk [vmem:[#allocation3 + $0x458] sm:$0xff] %vm1571_vm4, %v3294_v31  ;;  %3347 = vst.msk [vmem:[#allocation3 + $0x470] sm:$0xff] %vm1571_vm4, %v3295_v55  ;;  %v5309_v40 = vadd.f32 %v9777_v13, %v9702_v11  ;;  %v3425_v11 = vld [vmem:[#allocation2 + $0x26a] sm:$0xff] }
 0x2db   : > { %4155 = vst.msk [vmem:[#allocation3 + $0x230] sm:$0xff] %vm2674_vm15, %v4023_v44  ;;  %v1784_v44 = vld [vmem:[#allocation2 + $0x318] sm:$0xff] }
 0x2dc   : > { %2582 = vrot.lane.b32.xlu1 %v2446_v8, %s8187_s13  ;;  %v4017_v33 = vpop.permute.xlu0 %4016  ;;  %v1838_v1 = vpack.c.bf16 %v1784_v44, %v1783_v7  ;;  %v4874_v7 = vld [vmem:[#allocation3 + $0x210] sm:$0xff] }
 0x2dd   : > { %4152 = vst.msk [vmem:[#allocation3 + $0x1e8] sm:$0xff] %vm2674_vm15, %v4017_v33  ;;  %v9735_v30 = vpop.f32.mrb[108].mxu0  ;;  %v2378_v33 = vld [vmem:[#allocation2 + $0x222] sm:$0xff] }
 0x2de   : > { %v2986_v63 = vpop.permute.xlu1 %2985  ;;  %4458 = vrot.lane.b32.xlu0 %v9732_v0, %s8188_s25  ;;  %v5315_v19 = vpop.f32.mrb[109].mxu0  ;;  %v5314_v48 = vadd.f32 %v9777_v13, %v9735_v30  ;;  %v4871_v30 = vld [vmem:[#allocation3 + $0x1f8] sm:$0xff]  ;;  %1890 = vst.msk [vmem:[#allocation3 + $0x498] sm:$0xff] %vm1571_vm4, %v1838_v1  ;;  %v2380_v1 = vld [vmem:[#allocation2 + $0x232] sm:$0xff] }
 0x2df   : > { %3117 = vst.msk [vmem:[#allocation3 + $0x258] sm:$0xff] %vm3091_vm1, %v2986_v63  ;;  %v9740_v38 = vpop.f32.mrb[110].mxu0  ;;  %v2379_v63 = vld [vmem:[#allocation2 + $0x22a] sm:$0xff] }
 0x2e0   : > { %2999 = vrot.lane.b32.xlu1 %v9657_v16, %s8188_s25  ;;  %v4433_v23 = vpop.permute.xlu0 %4432  ;;  %v5318_v52 = vpop.f32.mrb[111].mxu0  ;;  %v4945_v19 = vld [vmem:[#allocation3 + $0x448] sm:$0xff] }
 0x2e1   : > { %4568 = vst.msk [vmem:[#allocation3 + $0x1e8] sm:$0xff] %vm3091_vm1, %v4433_v23  ;;  %7904 = vmatmul.mubr.msk.bf16.gmra.mrb[204].mxu0 %vm1571_vm4, %v4945_v19 }
 0x2e2   : > { %v3609_v53 = vpop.permute.xlu1 %3608  ;;  %3628 = vrot.lane.b32.xlu0 %v9450_v4, %s8186_s10  ;;  %v2447_v4 = vpack.c.bf16 %v2377_v36, %v2376_v61 }
 0x2e3   : > { %3740 = vst.msk [vmem:[#allocation3 + $0x248] sm:$0xff] %vm2257_vm14, %v3609_v53  ;;  %v5306_v53 = vadd.f32 %v9777_v13, %v9695_v9  ;;  %v2448_v9 = vpack.c.bf16 %v2379_v63, %v2378_v33 }
 0x2e4   : > { %2167 = vrot.lane.b32.xlu1 %v9632_v29, %s8186_s10  ;;  %v3605_v16 = vpop.permute.xlu0 %3604 }
 0x2e5   : > { %3738 = vst.msk [vmem:[#allocation3 + $0x218] sm:$0xff] %vm2257_vm14, %v3605_v16 }
 0x2e6   : > { %v2984_v22 = vpop.permute.xlu1 %2983  ;;  %4044 = vrot.lane.b32.xlu0 %v9747_v6, %s8187_s13 }
 0x2e7   : > { %3116 = vst.msk [vmem:[#allocation3 + $0x240] sm:$0xff] %vm3091_vm1, %v2984_v22 }
 0x2e8   : > { %2584 = vrot.lane.b32.xlu1 %v2447_v4, %s8187_s13  ;;  %v4435_v57 = vpop.permute.xlu0 %4434  ;;  %v4869_v29 = vld [vmem:[#allocation3 + $0x1e8] sm:$0xff] }
 0x2e9   : > { %4569 = vst.msk [vmem:[#allocation3 + $0x200] sm:$0xff] %vm3091_vm1, %v4435_v57  ;;  %v9762_v27 = vpop.f32.mrb[112].mxu0  ;;  %5463 = vmatprep.mubr.bf16.mxu1 %v4869_v29  ;;  %v9806_v29 = vpack.c.bf16 %v4255_v62, %v4254_v25 }
 0x2ea   : > { %v2154_v15 = vpop.permute.xlu1 %2153  ;;  %4460 = vrot.lane.b32.xlu0 %v9758_v26, %s8188_s25  ;;  %v5323_v50 = vpop.f32.mrb[113].mxu0  ;;  %5464 = vmatmul.mubr.bf16.gmra.mrb[68].mxu1 %v4868_v17  ;;  %v5322_v42 = vadd.f32 %v9777_v13, %v9762_v27 }
 0x2eb   : > { %2284 = vst.msk [vmem:[#allocation3 + $0x270] sm:$0xff] %vm2257_vm14, %v2154_v15  ;;  %v9769_v20 = vpop.f32.mrb[114].mxu0  ;;  %v3424_v50 = vld [vmem:[#allocation2 + $0x262] sm:$0xff] }
 0x2ec   : > { %3001 = vrot.lane.b32.xlu1 %v9643_v45, %s8188_s25  ;;  %v4021_v60 = vpop.permute.xlu0 %4020  ;;  %v5326_v35 = vpop.f32.mrb[115].mxu0  ;;  %v9818_v55 = vpack.c.bf16 %v3425_v11, %v3424_v50  ;;  %v5325_v63 = vadd.f32 %v9777_v13, %v9769_v20 }
 0x2ed   : > { %4154 = vst.msk [vmem:[#allocation3 + $0x218] sm:$0xff] %vm2674_vm15, %v4021_v60  ;;  %v9775_v49 = vpop.f32.mrb[0].mxu1 }
 0x2ee   : > { %v2571_v45 = vpop.permute.xlu1 %2570  ;;  %v5331_v39 = vpop.f32.mrb[1].mxu1  ;;  %3630 = vrot.lane.b32.xlu0 %v3491_v58, %s8186_s10  ;;  %v3841_v58 = vld [vmem:[#allocation2 + $0x288] sm:$0xff]  ;;  %v5330_v47 = vadd.f32 %v9777_v13, %v9775_v49 }
 0x2ef   : > { %2701 = vst.msk [vmem:[#allocation3 + $0x270] sm:$0xff] %vm2674_vm15, %v2571_v45  ;;  %v9781_v8 = vpop.f32.mrb[2].mxu1  ;;  %v4692_v45 = vld [vmem:[#allocation2 + $0x322] sm:$0xff]  ;;  %v4693_v39 = vld [vmem:[#allocation2 + $0x32a] sm:$0xff]  ;;  %v9829_v33 = vpack.c.bf16 %v3841_v58, %v3840_v24 }
 0x2f0   : > { %2169 = vrot.lane.b32.xlu1 %v9667_v54, %s8186_s10  ;;  %v5334_v23 = vpop.f32.mrb[3].mxu1  ;;  %v4437_v52 = vpop.permute.xlu0 %4436  ;;  %v4872_v12 = vld [vmem:[#allocation3 + $0x200] sm:$0xff]  ;;  %v5317_v54 = vadd.f32 %v9777_v13, %v9740_v38 }
 0x2f1   : > { %4570 = vst.msk [vmem:[#allocation3 + $0x218] sm:$0xff] %vm3091_vm1, %v4437_v52  ;;  %5471 = vmatprep.mubr.bf16.mxu1 %v4872_v12  ;;  %v7817_v61 = vpop.f32.mrb[116].mxu0  ;;  %v4694_v23 = vld [vmem:[#allocation2 + $0x332] sm:$0xff]  ;;  %v4695_v52 = vld [vmem:[#allocation2 + $0x33a] sm:$0xff] }
 0x2f2   : > { %v5763_v36 = vadd.f32 %v7817_v61, %v5314_v48  ;;  %v4439_v16 = vpop.permute.xlu1 %4438  ;;  %4046 = vrot.lane.b32.xlu0 %v9790_v5, %s8187_s13  ;;  %5472 = vmatmul.mubr.bf16.gmra.mrb[72].mxu1 %v4871_v30  ;;  %v5754_v43 = vpop.f32.mrb[117].mxu0  ;;  %v2381_v48 = vld [vmem:[#allocation2 + $0x23a] sm:$0xff] }
 0x2f3   : > { %4571 = vst.msk [vmem:[#allocation3 + $0x230] sm:$0xff] %vm3091_vm1, %v4439_v16  ;;  %v5755_v51 = vadd.f32 %v5754_v43, %v5306_v53  ;;  %v7818_v22 = vpop.f32.mrb[118].mxu0  ;;  %v4750_v16 = vpack.c.bf16 %v4693_v39, %v4692_v45 }
 0x2f4   : > { %vm6171_vm6 = vcmp.ge.f32.partialorder %v5763_v36, 0.0  ;;  %v6275_v4 = vmul.f32 0.01, %v5763_v36  ;;  %v5766_v28 = vadd.f32 %v7818_v22, %v5317_v54  ;;  %2586 = vrot.lane.b32.xlu1 %v2448_v9, %s8187_s13  ;;  %v3613_v38 = vpop.permute.xlu0 %3612  ;;  %v5757_v57 = vpop.f32.mrb[119].mxu0  ;;  %v4256_v54 = vld [vmem:[#allocation2 + $0x281] sm:$0xff] }
 0x2f5   : > { %vm6169_vm7 = vcmp.ge.f32.partialorder %v5755_v51, 0.0  ;;  %v6273_v17 = vmul.f32 0.01, %v5755_v51  ;;  %3742 = vst.msk [vmem:[#allocation3 + $0x278] sm:$0xff] %vm2257_vm14, %v3613_v38  ;;  %v5758_v15 = vadd.f32 %v5757_v57, %v5309_v40  ;;  %v4877_v38 = vld [vmem:[#allocation3 + $0x228] sm:$0xff] }
 0x2f6   : > { %v6379_v59 = vsel %vm6171_vm6, %v5763_v36, %v6275_v4  ;;  %vm6172_vm2 = vcmp.ge.f32.partialorder %v5766_v28, 0.0  ;;  %v6276_v21 = vmul.f32 0.01, %v5766_v28  ;;  %v3611_v3 = vpop.permute.xlu1 %3610  ;;  %4462 = vrot.lane.b32.xlu0 %v9806_v29, %s8188_s25  ;;  %v4257_v36 = vld [vmem:[#allocation2 + $0x289] sm:$0xff]  ;;  %v3426_v57 = vld [vmem:[#allocation2 + $0x272] sm:$0xff]  ;;  %4802 = vst.msk [vmem:[#allocation3 + $0x460] sm:$0xff] %vm1571_vm4, %v4750_v16 }
 0x2f7   : > { %6484 = vst.msk [vmem:[#allocation4 + $0x10] sm:$0xff] %vm6481_vm5, %v6379_v59  ;;  %v6377_v60 = vsel %vm6169_vm7, %v5755_v51, %v6273_v17  ;;  %vm6170_vm8 = vcmp.ge.f32.partialorder %v5758_v15, 0.0  ;;  %v6274_v35 = vmul.f32 0.01, %v5758_v15  ;;  %v3427_v17 = vld [vmem:[#allocation2 + $0x27a] sm:$0xff]  ;;  %vm7022_vm7 = vcmask 517120  }
 0x2f8   : > { %3741 = vst.msk [vmem:[#allocation3 + $0x260] sm:$0xff] %vm2257_vm14, %v3611_v3  ;;  %v6380_v46 = vsel %vm6172_vm2, %v5766_v28, %v6276_v21  ;;  %3003 = vrot.lane.b32.xlu1 %v9689_v41, %s8188_s25  ;;  %v3615_v34 = vpop.permute.xlu0 %3614  ;;  %v4875_v31 = vld [vmem:[#allocation3 + $0x218] sm:$0xff]  ;;  %v5333_v41 = vadd.f32 %v9777_v13, %v9781_v8  ;;  %vm7020_vm2 = vcmask 519168  }
 0x2f9   : > { %6482 = vst.msk [vmem:[#allocation4] sm:$0xff] %vm6481_vm5, %v6377_v60  ;;  %6485 = vst.msk [vmem:[#allocation4 + $0x18] sm:$0xff] %vm6481_vm5, %v6380_v46  ;;  %v6378_v37 = vsel %vm6170_vm8, %v5758_v15, %v6274_v35  ;;  %5479 = vmatprep.mubr.bf16.mxu1 %v4875_v31  ;;  %v7821_v49 = vpop.f32.mrb[120].mxu0  ;;  %v4751_v15 = vpack.c.bf16 %v4695_v52, %v4694_v23  ;;  %v9846_v35 = vpack.c.bf16 %v4257_v36, %v4256_v54 }
 0x2fa   : > { %3743 = vst.msk [vmem:[#allocation3 + $0x290] sm:$0xff] %vm2257_vm14, %v3615_v34  ;;  %v5779_v56 = vadd.f32 %v7821_v49, %v5330_v47  ;;  %v2156_v10 = vpop.permute.xlu1 %2155  ;;  %3632 = vrot.lane.b32.xlu0 %v9818_v55, %s8186_s10  ;;  %5480 = vmatmul.mubr.bf16.gmra.mrb[76].mxu1 %v4874_v7  ;;  %v5770_v27 = vpop.f32.mrb[121].mxu0  ;;  %v4878_v44 = vld [vmem:[#allocation3 + $0x230] sm:$0xff] }
 0x2fb   : > { %6483 = vst.msk [vmem:[#allocation4 + $0x8] sm:$0xff] %vm6481_vm5, %v6378_v37  ;;  %v5771_v19 = vadd.f32 %v5770_v27, %v5322_v42  ;;  %5487 = vmatprep.mubr.bf16.mxu1 %v4878_v44  ;;  %v7822_v8 = vpop.f32.mrb[122].mxu0  ;;  %v9865_v44 = vpack.c.bf16 %v3427_v17, %v3426_v57 }
 0x2fc   : > { %2285 = vst.msk [vmem:[#allocation3 + $0x288] sm:$0xff] %vm2257_vm14, %v2156_v10  ;;  %vm6175_vm9 = vcmp.ge.f32.partialorder %v5779_v56, 0.0  ;;  %v6279_v12 = vmul.f32 0.01, %v5779_v56  ;;  %v5782_v53 = vadd.f32 %v7822_v8, %v5333_v41  ;;  %2171 = vrot.lane.b32.xlu1 %v9684_v18, %s8186_s10  ;;  %v4031_v61 = vpop.permute.xlu0 %4030  ;;  %v5773_v30 = vpop.f32.mrb[123].mxu0  ;;  %v2449_v18 = vpack.c.bf16 %v2381_v48, %v2380_v1  ;;  %v9867_v8 = vld [vmem:[#allocation2 + $0x242] sm:$0xff] }
 0x2fd   : > { %vm6173_vm10 = vcmp.ge.f32.partialorder %v5771_v19, 0.0  ;;  %v6277_v25 = vmul.f32 0.01, %v5771_v19  ;;  %4159 = vst.msk [vmem:[#allocation3 + $0x290] sm:$0xff] %vm2674_vm15, %v4031_v61  ;;  %v5774_v20 = vadd.f32 %v5773_v30, %v5325_v63  ;;  %v5337_v62 = vpop.f32.mrb[4].mxu1  ;;  %v3842_v63 = vld [vmem:[#allocation2 + $0x290] sm:$0xff] }
 0x2fe   : > { %v6383_v43 = vsel %vm6175_vm9, %v5779_v56, %v6279_v12  ;;  %vm6176_vm11 = vcmp.ge.f32.partialorder %v5782_v53, 0.0  ;;  %v6280_v9 = vmul.f32 0.01, %v5782_v53  ;;  %v2573_v40 = vpop.permute.xlu1 %2572  ;;  %v5339_v51 = vpop.f32.mrb[5].mxu1  ;;  %4048 = vrot.lane.b32.xlu0 %v9829_v33, %s8187_s13  ;;  %v6589_v50 = vld [vmem:[#allocation4 + $0x10] sm:$0xff]  ;;  %v5338_v31 = vadd.f32 %v9777_v13, %v5337_v62  ;;  %4803 = vst.msk [vmem:[#allocation3 + $0x478] sm:$0xff] %vm1571_vm4, %v4751_v15 }
 0x2ff   : > { %6488 = vst.msk [vmem:[#allocation4 + $0x30] sm:$0xff] %vm6481_vm5, %v6383_v43  ;;  %v6381_v22 = vsel %vm6173_vm10, %v5771_v19, %v6277_v25  ;;  %vm6174_vm12 = vcmp.ge.f32.partialorder %v5774_v20, 0.0  ;;  %v6278_v4 = vmul.f32 0.01, %v5774_v20  ;;  %v5340_v28 = vpop.f32.mrb[6].mxu1  ;;  %v3843_v19 = vld [vmem:[#allocation2 + $0x298] sm:$0xff] }
 0x300   : > { %2702 = vst.msk [vmem:[#allocation3 + $0x288] sm:$0xff] %vm2674_vm15, %v2573_v40  ;;  %v6587_v11 = vld [vmem:[#allocation4] sm:$0xff]  ;;  %v6693_v59 = vld [vmem:[#allocation4 + $0x11] sm:$0xff]  ;;  %v6384_v21 = vsel %vm6176_vm11, %v5782_v53, %v6280_v9  ;;  %2588 = vrot.lane.b32.xlu1 %v2449_v18, %s8187_s13  ;;  %v5342_v3 = vpop.f32.mrb[7].mxu1  ;;  %v4029_v60 = vpop.permute.xlu0 %4028  ;;  %v5341_v39 = vadd.f32 %v9777_v13, %v5340_v28  ;;  %v4258_v43 = vld [vmem:[#allocation2 + $0x291] sm:$0xff]  ;;  %v9882_v57 = vpack.c.bf16 %v3843_v19, %v3842_v63 }
 0x301   : > { %6486 = vst.msk [vmem:[#allocation4 + $0x20] sm:$0xff] %vm6481_vm5, %v6381_v22  ;;  %v6797_v24 = vmax.f32 %v6589_v50, %v6693_v59  ;;  %6489 = vst.msk [vmem:[#allocation4 + $0x38] sm:$0xff] %vm6481_vm5, %v6384_v21  ;;  %v6382_v34 = vsel %vm6174_vm12, %v5774_v20, %v6278_v4  ;;  %v7825_v42 = vpop.f32.mrb[124].mxu0  ;;  %v9869_v1 = vld [vmem:[#allocation2 + $0x24a] sm:$0xff]  ;;  %v3240_v12 = vld [vmem:[#allocation2 + $0x321] sm:$0xff] }
 0x302   : > { %v6588_v58 = vld [vmem:[#allocation4 + $0x8] sm:$0xff]  ;;  %4158 = vst.msk [vmem:[#allocation3 + $0x278] sm:$0xff] %vm2674_vm15, %v4029_v60  ;;  %v4027_v7 = vpop.permute.xlu1 %4026  ;;  %4464 = vrot.lane.b32.xlu0 %v9846_v35, %s8188_s25  ;;  %5488 = vmatmul.mubr.bf16.gmra.mrb[80].mxu1 %v4877_v38  ;;  %v5786_v45 = vpop.f32.mrb[125].mxu0  ;;  %v4948_v20 = vld [vmem:[#allocation3 + $0x460] sm:$0xff]  ;;  %v4259_v9 = vld [vmem:[#allocation2 + $0x299] sm:$0xff] }
 0x303   : > { %v6691_v47 = vld [vmem:[#allocation4 + $0x1] sm:$0xff]  ;;  %v6692_v46 = vld [vmem:[#allocation4 + $0x9] sm:$0xff]  ;;  %6487 = vst.msk [vmem:[#allocation4 + $0x28] sm:$0xff] %vm6481_vm5, %v6382_v34  ;;  %6901 = vst.msk [vmem:[#allocation5 + $0x10] sm:$0xff] %vm6481_vm5, %v6797_v24  ;;  %v5787_v41 = vadd.f32 %v5786_v45, %v5338_v31  ;;  %v9859_v56 = vpop.f32.mrb[126].mxu0  ;;  %7907 = vmatprep.mubr.msk.bf16.mxu0 %vm1571_vm4, %v4948_v20  ;;  %v9910_v45 = vpack.c.bf16 %v4259_v9, %v4258_v43 }
 0x304   : > { %v6795_v37 = vmax.f32 %v6587_v11, %v6691_v47  ;;  %v6796_v49 = vmax.f32 %v6588_v58, %v6692_v46  ;;  %4157 = vst.msk [vmem:[#allocation3 + $0x260] sm:$0xff] %vm2674_vm15, %v4027_v7  ;;  %3005 = vrot.lane.b32.xlu1 %v9722_v32, %s8188_s25  ;;  %v4445_v10 = vpop.permute.xlu0 %4444  ;;  %v5789_v27 = vpop.f32.mrb[127].mxu0  ;;  %v3241_v53 = vld [vmem:[#allocation2 + $0x329] sm:$0xff]  ;;  %v3242_v40 = vld [vmem:[#allocation2 + $0x331] sm:$0xff]  ;;  %v3243_v31 = vld [vmem:[#allocation2 + $0x339] sm:$0xff] }
 0x305   : > { %vm6177_vm13 = vcmp.ge.f32.partialorder %v5787_v41, 0.0  ;;  %v6281_v48 = vmul.f32 0.01, %v5787_v41  ;;  %4574 = vst.msk [vmem:[#allocation3 + $0x278] sm:$0xff] %vm3091_vm1, %v4445_v10  ;;  %v5790_v23 = vadd.f32 %v5789_v27, %v5341_v39  ;;  %v5345_v52 = vpop.f32.mrb[8].mxu1  ;;  %v3296_v62 = vpack.c.bf16 %v3241_v53, %v3240_v12  ;;  %v4951_v17 = vld [vmem:[#allocation3 + $0x478] sm:$0xff] }
 0x306   : > { %6899 = vst.msk [vmem:[#allocation5] sm:$0xff] %vm6481_vm5, %v6795_v37  ;;  %6900 = vst.msk [vmem:[#allocation5 + $0x8] sm:$0xff] %vm6481_vm5, %v6796_v49  ;;  %v6593_v61 = vld [vmem:[#allocation4 + $0x30] sm:$0xff]  ;;  %v5346_v32 = vadd.f32 %v9777_v13, %v5345_v52  ;;  %v2990_v30 = vpop.permute.xlu1 %2989  ;;  %v5347_v25 = vpop.f32.mrb[9].mxu1  ;;  %3634 = vrot.lane.b32.xlu0 %v9865_v44, %s8186_s10  ;;  %7908 = vmatmul.mubr.msk.bf16.gmra.mrb[208].mxu0 %vm1571_vm4, %v4951_v17  ;;  %v3428_v39 = vld [vmem:[#allocation2 + $0x282] sm:$0xff] }
 0x307   : > { %v6385_v54 = vsel %vm6177_vm13, %v5787_v41, %v6281_v48  ;;  %vm6178_vm0 = vcmp.ge.f32.partialorder %v5790_v23, 0.0  ;;  %v6282_v36 = vmul.f32 0.01, %v5790_v23  ;;  %3119 = vst.msk [vmem:[#allocation3 + $0x288] sm:$0xff] %vm3091_vm1, %v2990_v30  ;;  %v5348_v16 = vpop.f32.mrb[10].mxu1  ;;  %v3297_v41 = vpack.c.bf16 %v3243_v31, %v3242_v40  ;;  %v1787_v10 = vld [vmem:[#allocation2 + $0x330] sm:$0xff] }
 0x308   : > { %v6591_v51 = vld [vmem:[#allocation4 + $0x20] sm:$0xff]  ;;  %v6697_v18 = vld [vmem:[#allocation4 + $0x31] sm:$0xff]  ;;  %6490 = vst.msk [vmem:[#allocation4 + $0x40] sm:$0xff] %vm6481_vm5, %v6385_v54  ;;  %v5795_v22 = vadd.f32 %v7825_v42, %v5346_v32  ;;  %v5349_v4 = vadd.f32 %v9777_v13, %v5348_v16  ;;  %2173 = vrot.lane.b32.xlu1 %v9699_v14, %s8186_s10  ;;  %v5350_v28 = vpop.f32.mrb[11].mxu1  ;;  %v3617_v38 = vpop.permute.xlu0 %3616  ;;  %v2450_v14 = vpack.c.bf16 %v9869_v1, %v9867_v8 }
 0x309   : > { %3348 = vst.msk [vmem:[#allocation3 + $0x488] sm:$0xff] %vm1571_vm4, %v3296_v62  ;;  %v6801_v15 = vmax.f32 %v6593_v61, %v6697_v18  ;;  %v6386_v21 = vsel %vm6178_vm0, %v5790_v23, %v6282_v36  ;;  %v9887_v3 = vpop.f32.mrb[128].mxu0  ;;  %v1785_v42 = vld [vmem:[#allocation2 + $0x320] sm:$0xff]  ;;  %v3429_v19 = vld [vmem:[#allocation2 + $0x28a] sm:$0xff]  ;;  %v1788_v1 = vld [vmem:[#allocation2 + $0x338] sm:$0xff]  ;;  %vm7040_vm0 = vcmask 1041408  }
 0x30a   : > { %v6592_v50 = vld [vmem:[#allocation4 + $0x28] sm:$0xff]  ;;  %3744 = vst.msk [vmem:[#allocation3 + $0x2a8] sm:$0xff] %vm2257_vm14, %v3617_v38  ;;  %vm6179_vm3 = vcmp.ge.f32.partialorder %v5795_v22, 0.0  ;;  %v6283_v58 = vmul.f32 0.01, %v5795_v22  ;;  %v4025_v47 = vpop.permute.xlu1 %4024  ;;  %4050 = vrot.lane.b32.xlu0 %v9882_v57, %s8187_s13  ;;  %v5798_v46 = vadd.f32 %v9859_v56, %v5349_v4  ;;  %v9898_v34 = vpop.f32.mrb[129].mxu0  ;;  %v1840_v52 = vpack.c.bf16 %v1788_v1, %v1787_v10 }
 0x30b   : > { %v6695_v11 = vld [vmem:[#allocation4 + $0x21] sm:$0xff]  ;;  %v6696_v59 = vld [vmem:[#allocation4 + $0x29] sm:$0xff]  ;;  %6491 = vst.msk [vmem:[#allocation4 + $0x48] sm:$0xff] %vm6481_vm5, %v6386_v21  ;;  %6905 = vst.msk [vmem:[#allocation5 + $0x30] sm:$0xff] %vm6481_vm5, %v6801_v15  ;;  %v9907_v49 = vpop.f32.mrb[130].mxu0  ;;  %v9925_v32 = vpack.c.bf16 %v3429_v19, %v3428_v39 }
 0x30c   : > { %v6799_v60 = vmax.f32 %v6591_v51, %v6695_v11  ;;  %v6800_v24 = vmax.f32 %v6592_v50, %v6696_v59  ;;  %4156 = vst.msk [vmem:[#allocation3 + $0x248] sm:$0xff] %vm2674_vm15, %v4025_v47  ;;  %v6387_v37 = vsel %vm6179_vm3, %v5795_v22, %v6283_v58  ;;  %2590 = vrot.lane.b32.xlu1 %v2450_v14, %s8187_s13  ;;  %v4447_v7 = vpop.permute.xlu0 %4446  ;;  %v1786_v56 = vld [vmem:[#allocation2 + $0x328] sm:$0xff]  ;;  %vm6180_vm6 = vcmp.ge.f32.partialorder %v5798_v46, 0.0  ;;  %v9914_v63 = vpop.f32.mrb[131].mxu0  ;;  %v3844_v23 = vld [vmem:[#allocation2 + $0x2a0] sm:$0xff] }
 0x30d   : > { %6492 = vst.msk [vmem:[#allocation4 + $0x50] sm:$0xff] %vm6481_vm5, %v6387_v37  ;;  %v6284_v27 = vmul.f32 0.01, %v5798_v46  ;;  %v1839_v8 = vpack.c.bf16 %v1786_v56, %v1785_v42  ;;  %v3845_v53 = vld [vmem:[#allocation2 + $0x2a8] sm:$0xff]  ;;  %v2385_v9 = vld [vmem:[#allocation2 + $0x25a] sm:$0xff]  ;;  %vm7041_vm3 = vcmask 1045508  }
 0x30e   : > { %6903 = vst.msk [vmem:[#allocation5 + $0x20] sm:$0xff] %vm6481_vm5, %v6799_v60  ;;  %6904 = vst.msk [vmem:[#allocation5 + $0x28] sm:$0xff] %vm6481_vm5, %v6800_v24  ;;  %v4441_v48 = vpop.permute.xlu1 %4440  ;;  %4466 = vrot.lane.b32.xlu0 %v9910_v45, %s8188_s25  ;;  %v7005_v30 = vld [vmem:[#allocation5 + $0x10] ss:$2 sm:$0xf]  ;;  %v4261_v11 = vld [vmem:[#allocation2 + $0x2a9] sm:$0xff] }
 0x30f   : > { %4575 = vst.msk [vmem:[#allocation3 + $0x290] sm:$0xff] %vm3091_vm1, %v4447_v7  ;;  %v6388_v12 = vsel %vm6180_vm6, %v5798_v46, %v6284_v27  ;;  %4572 = vst.msk [vmem:[#allocation3 + $0x248] sm:$0xff] %vm3091_vm1, %v4441_v48  ;;  %v6595_v25 = vld [vmem:[#allocation4 + $0x40] sm:$0xff]  ;;  %v7003_v40 = vld [vmem:[#allocation5] ss:$2 sm:$0xff]  ;;  %v2451_v46 = vpack.c.bf16 %v2385_v9, %v9764_v2  ;;  %vm7049_vm6 = vcmask 519170  }
 0x310   : > { %3349 = vst.msk [vmem:[#allocation3 + $0x4a0] sm:$0xff] %vm1571_vm4, %v3297_v41  ;;  %1891 = vst.msk [vmem:[#allocation3 + $0x4b0] sm:$0xff] %vm1571_vm4, %v1839_v8  ;;  %3007 = vrot.lane.b32.xlu1 %v9747_v6, %s8188_s25  ;;  %v3619_v61 = vpop.permute.xlu0 %3618  ;;  %v9935_v6 = vpack.c.bf16 %v3845_v53, %v3844_v23  ;;  %v4260_v4 = vld [vmem:[#allocation2 + $0x2a1] sm:$0xff]  ;;  %v3430_v8 = vld [vmem:[#allocation2 + $0x292] sm:$0xff] }
 0x311   : > { %6493 = vst.msk [vmem:[#allocation4 + $0x58] sm:$0xff] %vm6481_vm5, %v6388_v12  ;;  %v9929_v62 = vpop.f32.mrb[132].mxu0  ;;  %v4880_v7 = vld [vmem:[#allocation3 + $0x240] sm:$0xff]  ;;  %v9959_v39 = vpack.c.bf16 %v4261_v11, %v4260_v4  ;;  %v3431_v1 = vld [vmem:[#allocation2 + $0x29a] sm:$0xff]  ;;  %v4262_v11 = vld [vmem:[#allocation2 + $0x2b1] sm:$0xff] }
 0x312   : > { %1892 = vst.msk [vmem:[#allocation3 + $0x4c8] sm:$0xff] %vm1571_vm4, %v1840_v52  ;;  %v6699_v20 = vld [vmem:[#allocation4 + $0x41] sm:$0xff]  ;;  %v7009_v54 = vld [vmem:[#allocation5 + $0x30] ss:$2 sm:$0xf]  ;;  %v2988_v16 = vpop.permute.xlu1 %2987  ;;  %3636 = vrot.lane.b32.xlu0 %v9925_v32, %s8186_s10  ;;  %v9933_v43 = vpop.f32.mrb[133].mxu0 }
 0x313   : > { %3745 = vst.msk [vmem:[#allocation3 + $0x2c0] sm:$0xff] %vm2257_vm14, %v3619_v61  ;;  %v6803_v36 = vmax.f32 %v6595_v25, %v6699_v20  ;;  %v7011_v51 = vmax.f32 %v7005_v30, %v7009_v54  ;;  %v9938_v22 = vpop.f32.mrb[134].mxu0  ;;  %v6596_v38 = vld [vmem:[#allocation4 + $0x48] sm:$0xff] }
 0x314   : > { %3118 = vst.msk [vmem:[#allocation3 + $0x270] sm:$0xff] %vm3091_vm1, %v2988_v16  ;;  %v6700_v17 = vld [vmem:[#allocation4 + $0x49] sm:$0xff]  ;;  %2175 = vrot.lane.b32.xlu1 %v9732_v0, %s8186_s10  ;;  %v4035_v15 = vpop.permute.xlu0 %4034  ;;  %v9948_v50 = vpop.f32.mrb[135].mxu0 }
 0x315   : > { %v7007_v18 = vld [vmem:[#allocation5 + $0x20] ss:$2 sm:$0xff]  ;;  %6907 = vst.msk [vmem:[#allocation5 + $0x40] sm:$0xff] %vm6481_vm5, %v6803_v36  ;;  %v7575_v59 = vpack.c.bf16 %v7011_v51, %v7011_v51  ;;  %v6804_v21 = vmax.f32 %v6596_v38, %v6700_v17  ;;  %v5353_v14 = vpop.f32.mrb[12].mxu1 }
 0x316   : > { %v7010_v28 = vmax.f32 %v7003_v40, %v7007_v18  ;;  %4161 = vst.msk [vmem:[#allocation3 + $0x2c0] sm:$0xff] %vm2674_vm15, %v4035_v15  ;;  %v5354_v24 = vadd.f32 %v9777_v13, %v5353_v14  ;;  %v2158_v58 = vpop.permute.xlu1 %2157  ;;  %v5355_v47 = vpop.f32.mrb[13].mxu1  ;;  %4052 = vrot.lane.b32.xlu0 %v9935_v6, %s8187_s13  ;;  %v4881_v0 = vld [vmem:[#allocation3 + $0x248] sm:$0xff]  ;;  %v6597_v31 = vld [vmem:[#allocation4 + $0x50] sm:$0xff] }
 0x317   : > { %7023 = vst.msk [vmem:[%s9943_s8 + $0x4] sm:$0x3] %vm7022_vm7, %v7575_v59  ;;  %v5356_v37 = vpop.f32.mrb[14].mxu1  ;;  %5495 = vmatprep.mubr.bf16.mxu1 %v4881_v0  ;;  %v3846_v54 = vld [vmem:[#allocation2 + $0x2b0] sm:$0xff]  ;;  %v3847_v36 = vld [vmem:[#allocation2 + $0x2b8] sm:$0xff] }
 0x318   : > { %v7574_v60 = vpack.c.bf16 %v7010_v28, %v7010_v28  ;;  %6908 = vst.msk [vmem:[#allocation5 + $0x48] sm:$0xff] %vm6481_vm5, %v6804_v21  ;;  %v6701_v42 = vld [vmem:[#allocation4 + $0x51] sm:$0xff]  ;;  %v5803_v56 = vadd.f32 %v9898_v34, %v5354_v24  ;;  %v5357_v2 = vadd.f32 %v9777_v13, %v5356_v37  ;;  %2592 = vrot.lane.b32.xlu1 %v2451_v46, %s8187_s13  ;;  %v5358_v10 = vpop.f32.mrb[15].mxu1  ;;  %v4033_v27 = vpop.permute.xlu0 %4032  ;;  %v3432_v46 = vld [vmem:[#allocation2 + $0x2a2] sm:$0xff] }
 0x319   : > { %2286 = vst.msk [vmem:[#allocation3 + $0x2a0] sm:$0xff] %vm2257_vm14, %v2158_v58  ;;  %v6805_v41 = vmax.f32 %v6597_v31, %v6701_v42  ;;  %5496 = vmatmul.mubr.bf16.gmra.mrb[84].mxu1 %v4880_v7  ;;  %v9967_v19 = vpop.f32.mrb[136].mxu0  ;;  %v9995_v17 = vpack.c.bf16 %v3847_v36, %v3846_v54  ;;  %v4263_v59 = vld [vmem:[#allocation2 + $0x2b9] sm:$0xff]  ;;  %v3433_v31 = vld [vmem:[#allocation2 + $0x2aa] sm:$0xff] }
 0x31a   : > { %7021 = vst.msk [vmem:[%s9943_s8] sm:$0xf] %vm7020_vm2, %v7574_v60  ;;  %vm6181_vm8 = vcmp.ge.f32.partialorder %v5803_v56, 0.0  ;;  %v6285_v48 = vmul.f32 0.01, %v5803_v56  ;;  %v5806_v23 = vadd.f32 %v9914_v63, %v5357_v2  ;;  %v2575_v34 = vpop.permute.xlu1 %2574  ;;  %4468 = vrot.lane.b32.xlu0 %v9959_v39, %s8188_s25  ;;  %v9973_v52 = vpop.f32.mrb[137].mxu0  ;;  %v9982_v63 = vpack.c.bf16 %v3431_v1, %v3430_v8 }
 0x31b   : > { %4160 = vst.msk [vmem:[#allocation3 + $0x2a8] sm:$0xff] %vm2674_vm15, %v4033_v27  ;;  %2703 = vst.msk [vmem:[#allocation3 + $0x2a0] sm:$0xff] %vm2674_vm15, %v2575_v34  ;;  %v9976_v12 = vpop.f32.mrb[138].mxu0  ;;  %v4883_v2 = vld [vmem:[#allocation3 + $0x258] sm:$0xff]  ;;  %v3849_v27 = vld [vmem:[#allocation2 + $0x2c8] sm:$0xff] }
 0x31c   : > { %6909 = vst.msk [vmem:[#allocation5 + $0x50] sm:$0xff] %vm6481_vm5, %v6805_v41  ;;  %v6389_v53 = vsel %vm6181_vm8, %v5803_v56, %v6285_v48  ;;  %vm6182_vm9 = vcmp.ge.f32.partialorder %v5806_v23, 0.0  ;;  %v6286_v61 = vmul.f32 0.01, %v5806_v23  ;;  %3009 = vrot.lane.b32.xlu1 %v9790_v5, %s8188_s25  ;;  %v4449_v30 = vpop.permute.xlu0 %4448  ;;  %v9980_v25 = vpop.f32.mrb[139].mxu0  ;;  %v3848_v10 = vld [vmem:[#allocation2 + $0x2c0] sm:$0xff]  ;;  %v10022_v48 = vpack.c.bf16 %v3433_v31, %v3432_v46 }
 0x31d   : > { %6494 = vst.msk [vmem:[#allocation4 + $0x60] sm:$0xff] %vm6481_vm5, %v6389_v53  ;;  %v5361_v20 = vpop.f32.mrb[16].mxu1  ;;  %v4887_v1 = vld [vmem:[#allocation3 + $0x278] sm:$0xff]  ;;  %v3434_v31 = vld [vmem:[#allocation2 + $0x2b2] sm:$0xff] }
 0x31e   : > { %4576 = vst.msk [vmem:[#allocation3 + $0x2a8] sm:$0xff] %vm3091_vm1, %v4449_v30  ;;  %v6390_v16 = vsel %vm6182_vm9, %v5806_v23, %v6286_v61  ;;  %v5362_v9 = vadd.f32 %v9777_v13, %v5361_v20  ;;  %v4443_v40 = vpop.permute.xlu1 %4442  ;;  %v5363_v51 = vpop.f32.mrb[17].mxu1  ;;  %3638 = vrot.lane.b32.xlu0 %v9982_v63, %s8186_s10  ;;  %v10032_v61 = vpack.c.bf16 %v3849_v27, %v3848_v10  ;;  %vm10097_vm9 = vmor %vm7040_vm0, %vm7041_vm3 }
 0x31f   : > { %6495 = vst.msk [vmem:[#allocation4 + $0x68] sm:$0xff] %vm6481_vm5, %v6390_v16  ;;  %v5364_v5 = vpop.f32.mrb[18].mxu1  ;;  %v4265_v51 = vld [vmem:[#allocation2 + $0x2c9] sm:$0xff] }
 0x320   : > { %4573 = vst.msk [vmem:[#allocation3 + $0x260] sm:$0xff] %vm3091_vm1, %v4443_v40  ;;  %v5811_v18 = vadd.f32 %v9887_v3, %v5362_v9  ;;  %v5365_v4 = vadd.f32 %v9777_v13, %v5364_v5  ;;  %2177 = vrot.lane.b32.xlu1 %v9758_v26, %s8186_s10  ;;  %v5366_v28 = vpop.f32.mrb[19].mxu1  ;;  %v3621_v38 = vpop.permute.xlu0 %3620  ;;  %v4264_v40 = vld [vmem:[#allocation2 + $0x2c1] sm:$0xff] }
 0x321   : > { %3746 = vst.msk [vmem:[#allocation3 + $0x2d8] sm:$0xff] %vm2257_vm14, %v3621_v38  ;;  %v9998_v15 = vpop.f32.mrb[140].mxu0 }
 0x322   : > { %vm6183_vm10 = vcmp.ge.f32.partialorder %v5811_v18, 0.0  ;;  %v6287_v21 = vmul.f32 0.01, %v5811_v18  ;;  %v5814_v14 = vadd.f32 %v9907_v49, %v5365_v4  ;;  %v2160_v3 = vpop.permute.xlu1 %2159  ;;  %4054 = vrot.lane.b32.xlu0 %v9995_v17, %s8187_s13  ;;  %v10003_v60 = vpop.f32.mrb[141].mxu0  ;;  %v10012_v49 = vpack.c.bf16 %v4263_v59, %v4262_v11  ;;  %v4886_v59 = vld [vmem:[#allocation3 + $0x270] sm:$0xff] }
 0x323   : > { %2287 = vst.msk [vmem:[#allocation3 + $0x2b8] sm:$0xff] %vm2257_vm14, %v2160_v3  ;;  %v10006_v26 = vpop.f32.mrb[142].mxu0 }
 0x324   : > { %v6391_v24 = vsel %vm6183_vm10, %v5811_v18, %v6287_v21  ;;  %vm6184_vm11 = vcmp.ge.f32.partialorder %v5814_v14, 0.0  ;;  %v6288_v58 = vmul.f32 0.01, %v5814_v14  ;;  %2594 = vrot.lane.b32.xlu1 %v9818_v55, %s8187_s13  ;;  %v4451_v47 = vpop.permute.xlu0 %4450  ;;  %v10010_v0 = vpop.f32.mrb[143].mxu0  ;;  %v6599_v42 = vld [vmem:[#allocation4 + $0x60] sm:$0xff] }
 0x325   : > { %6496 = vst.msk [vmem:[#allocation4 + $0x70] sm:$0xff] %vm6481_vm5, %v6391_v24 }
 0x326   : > { %4577 = vst.msk [vmem:[#allocation3 + $0x2c0] sm:$0xff] %vm3091_vm1, %v4451_v47  ;;  %v6703_v37 = vld [vmem:[#allocation4 + $0x61] sm:$0xff]  ;;  %v6392_v7 = vsel %vm6184_vm11, %v5814_v14, %v6288_v58  ;;  %v2577_v41 = vpop.permute.xlu1 %2576  ;;  %4470 = vrot.lane.b32.xlu0 %v10012_v49, %s8188_s25  ;;  %v4890_v58 = vld [vmem:[#allocation3 + $0x290] sm:$0xff]  ;;  %v10051_v47 = vpack.c.bf16 %v4265_v51, %v4264_v40 }
 0x327   : > { %v4884_v56 = vld [vmem:[#allocation3 + $0x260] sm:$0xff]  ;;  %v6807_v55 = vmax.f32 %v6599_v42, %v6703_v37  ;;  %6497 = vst.msk [vmem:[#allocation4 + $0x78] sm:$0xff] %vm6481_vm5, %v6392_v7  ;;  %v6600_v30 = vld [vmem:[#allocation4 + $0x68] sm:$0xff] }
 0x328   : > { %2704 = vst.msk [vmem:[#allocation3 + $0x2b8] sm:$0xff] %vm2674_vm15, %v2577_v41  ;;  %5503 = vmatprep.mubr.bf16.mxu1 %v4884_v56  ;;  %3011 = vrot.lane.b32.xlu1 %v9829_v33, %s8188_s25  ;;  %v3623_v8 = vpop.permute.xlu0 %3622 }
 0x329   : > { %5504 = vmatmul.mubr.bf16.gmra.mrb[88].mxu1 %v4883_v2  ;;  %6911 = vst.msk [vmem:[#allocation5 + $0x60] sm:$0xff] %vm6481_vm5, %v6807_v55  ;;  %v10026_v23 = vpop.f32.mrb[144].mxu0 }
 0x32a   : > { %3747 = vst.msk [vmem:[#allocation3 + $0x2f0] sm:$0xff] %vm2257_vm14, %v3623_v8  ;;  %5511 = vmatprep.mubr.bf16.mxu1 %v4887_v1  ;;  %v2994_v34 = vpop.permute.xlu1 %2993  ;;  %3640 = vrot.lane.b32.xlu0 %v10022_v48, %s8186_s10  ;;  %v10030_v53 = vpop.f32.mrb[145].mxu0  ;;  %v3850_v8 = vld [vmem:[#allocation2 + $0x2d0] sm:$0xff]  ;;  %v3851_v1 = vld [vmem:[#allocation2 + $0x2d8] sm:$0xff] }
 0x32b   : > { %3121 = vst.msk [vmem:[#allocation3 + $0x2b8] sm:$0xff] %vm3091_vm1, %v2994_v34  ;;  %v10035_v33 = vpop.f32.mrb[146].mxu0  ;;  %v7025_v34 = vld [vmem:[#allocation5 + $0x40] ss:$2 sm:$0xff] }
 0x32c   : > { %v6704_v20 = vld [vmem:[#allocation4 + $0x69] sm:$0xff]  ;;  %2179 = vrot.lane.b32.xlu1 %v9806_v29, %s8186_s10  ;;  %v4039_v54 = vpop.permute.xlu0 %4038  ;;  %v10039_v36 = vpop.f32.mrb[147].mxu0 }
 0x32d   : > { %v6808_v16 = vmax.f32 %v6600_v30, %v6704_v20  ;;  %4163 = vst.msk [vmem:[#allocation3 + $0x2f0] sm:$0xff] %vm2674_vm15, %v4039_v54  ;;  %v5369_v9 = vpop.f32.mrb[20].mxu1  ;;  %v6601_v5 = vld [vmem:[#allocation4 + $0x70] sm:$0xff] }
 0x32e   : > { %v6705_v18 = vld [vmem:[#allocation4 + $0x71] sm:$0xff]  ;;  %v5370_v4 = vadd.f32 %v9777_v13, %v5369_v9  ;;  %v2992_v28 = vpop.permute.xlu1 %2991  ;;  %v5371_v38 = vpop.f32.mrb[21].mxu1  ;;  %4056 = vrot.lane.b32.xlu0 %v10032_v61, %s8187_s13 }
 0x32f   : > { %6912 = vst.msk [vmem:[#allocation5 + $0x68] sm:$0xff] %vm6481_vm5, %v6808_v16  ;;  %v6809_v29 = vmax.f32 %v6601_v5, %v6705_v18  ;;  %v5372_v11 = vpop.f32.mrb[22].mxu1  ;;  %v4889_v5 = vld [vmem:[#allocation3 + $0x288] sm:$0xff] }
 0x330   : > { %3120 = vst.msk [vmem:[#allocation3 + $0x2a0] sm:$0xff] %vm3091_vm1, %v2992_v28  ;;  %v5819_v21 = vadd.f32 %v9933_v43, %v5370_v4  ;;  %v5373_v14 = vadd.f32 %v9777_v13, %v5372_v11  ;;  %2596 = vrot.lane.b32.xlu1 %v9865_v44, %s8187_s13  ;;  %v5374_v3 = vpop.f32.mrb[23].mxu1  ;;  %v4037_v24 = vpop.permute.xlu0 %4036  ;;  %v3435_v43 = vld [vmem:[#allocation2 + $0x2ba] sm:$0xff]  ;;  %v4893_v11 = vld [vmem:[#allocation3 + $0x2a8] sm:$0xff] }
 0x331   : > { %5512 = vmatmul.mubr.bf16.gmra.mrb[92].mxu1 %v4886_v59  ;;  %6913 = vst.msk [vmem:[#allocation5 + $0x70] sm:$0xff] %vm6481_vm5, %v6809_v29  ;;  %v10055_v46 = vpop.f32.mrb[148].mxu0  ;;  %v10082_v59 = vpack.c.bf16 %v3851_v1, %v3850_v8 }
 0x332   : > { %4162 = vst.msk [vmem:[#allocation3 + $0x2d8] sm:$0xff] %vm2674_vm15, %v4037_v24  ;;  %5519 = vmatprep.mubr.bf16.mxu1 %v4890_v58  ;;  %vm6185_vm12 = vcmp.ge.f32.partialorder %v5819_v21, 0.0  ;;  %v6289_v42 = vmul.f32 0.01, %v5819_v21  ;;  %v5822_v37 = vadd.f32 %v9948_v50, %v5373_v14  ;;  %v2162_v44 = vpop.permute.xlu1 %2161  ;;  %4472 = vrot.lane.b32.xlu0 %v10051_v47, %s8188_s25  ;;  %v10060_v7 = vpop.f32.mrb[149].mxu0  ;;  %v10069_v50 = vpack.c.bf16 %v3435_v43, %v3434_v31 }
 0x333   : > { %2288 = vst.msk [vmem:[#allocation3 + $0x2d0] sm:$0xff] %vm2257_vm14, %v2162_v44  ;;  %v10063_v41 = vpop.f32.mrb[150].mxu0 }
 0x334   : > { %v6393_v56 = vsel %vm6185_vm12, %v5819_v21, %v6289_v42  ;;  %vm6186_vm13 = vcmp.ge.f32.partialorder %v5822_v37, 0.0  ;;  %v6290_v55 = vmul.f32 0.01, %v5822_v37  ;;  %3013 = vrot.lane.b32.xlu1 %v9882_v57, %s8188_s25  ;;  %v4453_v2 = vpop.permute.xlu0 %4452  ;;  %v10067_v10 = vpop.f32.mrb[151].mxu0 }
 0x335   : > { %6498 = vst.msk [vmem:[#allocation4 + $0x80] sm:$0xff] %vm6481_vm5, %v6393_v56  ;;  %v7027_v57 = vld [vmem:[#allocation5 + $0x50] ss:$2 sm:$0xf] }
 0x336   : > { %4578 = vst.msk [vmem:[#allocation3 + $0x2d8] sm:$0xff] %vm3091_vm1, %v4453_v2  ;;  %v7029_v30 = vld [vmem:[#allocation5 + $0x60] ss:$2 sm:$0xff]  ;;  %v6394_v20 = vsel %vm6186_vm13, %v5822_v37, %v6290_v55  ;;  %v2579_v16 = vpop.permute.xlu1 %2578  ;;  %3642 = vrot.lane.b32.xlu0 %v10069_v50, %s8186_s10 }
 0x337   : > { %v7032_v40 = vmax.f32 %v7025_v34, %v7029_v30  ;;  %6499 = vst.msk [vmem:[#allocation4 + $0x88] sm:$0xff] %vm6481_vm5, %v6394_v20  ;;  %v3436_v34 = vld [vmem:[#allocation2 + $0x2c2] sm:$0xff]  ;;  %v3437_v30 = vld [vmem:[#allocation2 + $0x2ca] sm:$0xff] }
 0x338   : > { %v5377_v27 = vpop.f32.mrb[24].mxu1  ;;  %2705 = vst.msk [vmem:[#allocation3 + $0x2d0] sm:$0xff] %vm2674_vm15, %v2579_v16  ;;  %v7031_v18 = vld [vmem:[#allocation5 + $0x70] ss:$2 sm:$0xf]  ;;  %2181 = vrot.lane.b32.xlu1 %v9846_v35, %s8186_s10  ;;  %v3625_v29 = vpop.permute.xlu0 %3624 }
 0x339   : > { %v5378_v54 = vadd.f32 %v9777_v13, %v5377_v27  ;;  %v5379_v9 = vpop.f32.mrb[25].mxu1  ;;  %5520 = vmatmul.mubr.bf16.gmra.mrb[96].mxu1 %v4889_v5  ;;  %v7576_v21 = vpack.c.bf16 %v7032_v40, %v7032_v40  ;;  %v7033_v14 = vmax.f32 %v7027_v57, %v7031_v18  ;;  %3748 = vst.msk [vmem:[#allocation3 + $0x308] sm:$0xff] %vm2257_vm14, %v3625_v29  ;;  %v10085_v3 = vpop.f32.mrb[152].mxu0  ;;  %v4892_v40 = vld [vmem:[#allocation3 + $0x2a0] sm:$0xff] }
 0x33a   : > { %v5380_v51 = vpop.f32.mrb[26].mxu1  ;;  %5527 = vmatprep.mubr.bf16.mxu1 %v4893_v11  ;;  %v2164_v58 = vpop.permute.xlu1 %2163  ;;  %4058 = vrot.lane.b32.xlu0 %v10082_v59, %s8187_s13  ;;  %v3853_v5 = vld [vmem:[#allocation2 + $0x2e8] sm:$0xff] }
 0x33b   : > { %v5827_v4 = vadd.f32 %v9929_v62, %v5378_v54  ;;  %v5381_v28 = vadd.f32 %v9777_v13, %v5380_v51  ;;  %v5382_v38 = vpop.f32.mrb[27].mxu1  ;;  %v4266_v62 = vld [vmem:[#allocation2 + $0x2d1] sm:$0xff]  ;;  %v4267_v13 = vld [vmem:[#allocation2 + $0x2d9] sm:$0xff]  ;;  %v10090_v31 = vpop.f32.mrb[153].mxu0  ;;  %v7043_v43 = vrot.slane %v7576_v21, 6  ;;  %v7577_v42 = vpack.c.bf16 %v7033_v14, %v7033_v14  ;;  %2289 = vst.msk [vmem:[#allocation3 + $0x2e8] sm:$0xff] %vm2257_vm14, %v2164_v58 }
 0x33c   : > { %v10093_v37 = vpop.f32.mrb[154].mxu0  ;;  %2598 = vrot.lane.b32.xlu1 %v9925_v32, %s8187_s13  ;;  %v4455_v55 = vpop.permute.xlu0 %4454  ;;  %v10105_v27 = vpack.c.bf16 %v4267_v13, %v4266_v62  ;;  %v6603_v20 = vld [vmem:[#allocation4 + $0x80] sm:$0xff]  ;;  %v3852_v51 = vld [vmem:[#allocation2 + $0x2e0] sm:$0xff]  ;;  %v3454_v14 = vld [vmem:[#allocation2 + $0x352] sm:$0xff] }
 0x33d   : > { %vm6187_vm8 = vcmp.ge.f32.partialorder %v5827_v4, 0.0  ;;  %v6291_v35 = vmul.f32 0.01, %v5827_v4  ;;  %v5830_v24 = vadd.f32 %v9938_v22, %v5381_v28  ;;  %v10103_v2 = vpop.f32.mrb[155].mxu0  ;;  %v7044_v8 = vrot.slane %v7043_v43, 4  ;;  %4579 = vst.msk [vmem:[#allocation3 + $0x2f0] sm:$0xff] %vm3091_vm1, %v4455_v55 }
 0x33e   : > { %7050 = vst.msk [vmem:[%s9943_s8 + $0x4] sm:$0xc] %vm7049_vm6, %v7043_v43  ;;  %v7045_v1 = vrot.slane %v7577_v42, 6  ;;  %v6707_v54 = vld [vmem:[#allocation4 + $0x81] sm:$0xff]  ;;  %v2996_v32 = vpop.permute.xlu1 %2995  ;;  %4474 = vrot.lane.b32.xlu0 %v10105_v27, %s8188_s25  ;;  %v10121_v28 = vpack.c.bf16 %v3437_v30, %v3436_v34  ;;  %v10131_v21 = vpack.c.bf16 %v3853_v5, %v3852_v51  ;;  %v3455_v62 = vld [vmem:[#allocation2 + $0x35a] sm:$0xff] }
 0x33f   : > { %v6395_v22 = vsel %vm6187_vm8, %v5827_v4, %v6291_v35  ;;  %vm6188_vm10 = vcmp.ge.f32.partialorder %v5830_v24, 0.0  ;;  %v6292_v56 = vmul.f32 0.01, %v5830_v24  ;;  %v6811_v57 = vmax.f32 %v6603_v20, %v6707_v54  ;;  %3122 = vst.msk [vmem:[#allocation3 + $0x2d0] sm:$0xff] %vm3091_vm1, %v2996_v32  ;;  %v4896_v4 = vld [vmem:[#allocation3 + $0x2c0] sm:$0xff]  ;;  %v6604_v13 = vld [vmem:[#allocation4 + $0x88] sm:$0xff] }
 0x340   : > { %6500 = vst.msk [vmem:[#allocation4 + $0x90] sm:$0xff] %vm6481_vm5, %v6395_v22  ;;  %v7046_v9 = vsel %vm10097_vm9, %v7044_v8, %v7045_v1  ;;  %3015 = vrot.lane.b32.xlu1 %v9935_v6, %s8188_s25  ;;  %v4041_v18 = vpop.permute.xlu0 %4040  ;;  %v10140_v43 = vpack.c.bf16 %v3455_v62, %v3454_v14  ;;  %v4269_v55 = vld [vmem:[#allocation2 + $0x2e9] sm:$0xff]  ;;  %v10143_v34 = vld [vmem:[#allocation10] ss:$0 sm:$0xff]  ;;  %v4895_v32 = vld [vmem:[#allocation3 + $0x2b8] sm:$0xff] }
 0x341   : > { %v6396_v16 = vsel %vm6188_vm10, %v5830_v24, %v6292_v56  ;;  %7051 = vst.msk [vmem:[%s9943_s8 + $0x8] sm:$0xf] %vm7020_vm2, %v7046_v9  ;;  %5528 = vmatmul.mubr.bf16.gmra.mrb[100].mxu1 %v4892_v40  ;;  %v10125_v38 = vpop.f32.mrb[156].mxu0  ;;  %v4268_v56 = vld [vmem:[#allocation2 + $0x2e1] sm:$0xff] }
 0x342   : > { %6501 = vst.msk [vmem:[#allocation4 + $0x98] sm:$0xff] %vm6481_vm5, %v6396_v16  ;;  %6915 = vst.msk [vmem:[#allocation5 + $0x80] sm:$0xff] %vm6481_vm5, %v6811_v57  ;;  %5535 = vmatprep.mubr.bf16.mxu1 %v4896_v4  ;;  %v2581_v29 = vpop.permute.xlu1 %2580  ;;  %3644 = vrot.lane.b32.xlu0 %v10121_v28, %s8186_s10  ;;  %v10129_v11 = vpop.f32.mrb[157].mxu0  ;;  %v4899_v5 = vld [vmem:[#allocation3 + $0x2d8] sm:$0xff] }
 0x343   : > { %4164 = vst.msk [vmem:[#allocation3 + $0x308] sm:$0xff] %vm2674_vm15, %v4041_v18  ;;  %2706 = vst.msk [vmem:[#allocation3 + $0x2e8] sm:$0xff] %vm2674_vm15, %v2581_v29  ;;  %v10134_v6 = vpop.f32.mrb[158].mxu0  ;;  %v10156_v18 = vpack.c.bf16 %v4269_v55, %v4268_v56  ;;  %v3438_v29 = vld [vmem:[#allocation2 + $0x2d2] sm:$0xff] }
 0x344   : > { %2183 = vrot.lane.b32.xlu1 %v9910_v45, %s8186_s10  ;;  %v4457_v24 = vpop.permute.xlu0 %4456  ;;  %v10138_v58 = vpop.f32.mrb[159].mxu0  ;;  %4805 = vst.msk [vmem:[#allocation3 + $0x4a8] sm:$0xff] %vm1571_vm4, %v10140_v43 }
 0x345   : > { %4580 = vst.msk [vmem:[#allocation3 + $0x308] sm:$0xff] %vm3091_vm1, %v4457_v24  ;;  %v5385_v22 = vpop.f32.mrb[28].mxu1 }
 0x346   : > { %v5386_v30 = vadd.f32 %v10143_v34, %v5385_v22  ;;  %v2998_v20 = vpop.permute.xlu1 %2997  ;;  %v5387_v54 = vpop.f32.mrb[29].mxu1  ;;  %4060 = vrot.lane.b32.xlu0 %v10131_v21, %s8187_s13 }
 0x347   : > { %v6708_v35 = vld [vmem:[#allocation4 + $0x89] sm:$0xff]  ;;  %3123 = vst.msk [vmem:[#allocation3 + $0x2e8] sm:$0xff] %vm3091_vm1, %v2998_v20  ;;  %v5388_v16 = vpop.f32.mrb[30].mxu1 }
 0x348   : > { %v6812_v42 = vmax.f32 %v6604_v13, %v6708_v35  ;;  %v6605_v8 = vld [vmem:[#allocation4 + $0x90] sm:$0xff]  ;;  %v5835_v9 = vadd.f32 %v9973_v52, %v5386_v30  ;;  %v5389_v57 = vadd.f32 %v10143_v34, %v5388_v16  ;;  %2600 = vrot.lane.b32.xlu1 %v9982_v63, %s8187_s13  ;;  %v5390_v40 = vpop.f32.mrb[31].mxu1  ;;  %v3627_v51 = vpop.permute.xlu0 %3626 }
 0x349   : > { %v6709_v1 = vld [vmem:[#allocation4 + $0x91] sm:$0xff]  ;;  %5536 = vmatmul.mubr.bf16.gmra.mrb[104].mxu1 %v4895_v32  ;;  %3749 = vst.msk [vmem:[#allocation3 + $0x320] sm:$0xff] %vm2257_vm14, %v3627_v51  ;;  %v10160_v4 = vpop.f32.mrb[160].mxu0 }
 0x34a   : > { %6916 = vst.msk [vmem:[#allocation5 + $0x88] sm:$0xff] %vm6481_vm5, %v6812_v42  ;;  %v6813_v45 = vmax.f32 %v6605_v8, %v6709_v1  ;;  %5543 = vmatprep.mubr.bf16.mxu1 %v4899_v5  ;;  %v3439_v52 = vld [vmem:[#allocation2 + $0x2da] sm:$0xff]  ;;  %vm6189_vm11 = vcmp.ge.f32.partialorder %v5835_v9, 0.0  ;;  %v6293_v14 = vmul.f32 0.01, %v5835_v9  ;;  %v5838_v62 = vadd.f32 %v9980_v25, %v5389_v57  ;;  %v2166_v63 = vpop.permute.xlu1 %2165  ;;  %4476 = vrot.lane.b32.xlu0 %v10156_v18, %s8188_s25  ;;  %v10165_v13 = vpop.f32.mrb[161].mxu0 }
 0x34b   : > { %2290 = vst.msk [vmem:[#allocation3 + $0x300] sm:$0xff] %vm2257_vm14, %v2166_v63  ;;  %v10168_v35 = vpop.f32.mrb[162].mxu0  ;;  %v10174_v25 = vpack.c.bf16 %v3439_v52, %v3438_v29  ;;  %v3854_v8 = vld [vmem:[#allocation2 + $0x2f0] sm:$0xff]  ;;  %v3855_v1 = vld [vmem:[#allocation2 + $0x2f8] sm:$0xff] }
 0x34c   : > { %6917 = vst.msk [vmem:[#allocation5 + $0x90] sm:$0xff] %vm6481_vm5, %v6813_v45  ;;  %v6397_v24 = vsel %vm6189_vm11, %v5835_v9, %v6293_v14  ;;  %vm6190_vm12 = vcmp.ge.f32.partialorder %v5838_v62, 0.0  ;;  %v6294_v42 = vmul.f32 0.01, %v5838_v62  ;;  %3017 = vrot.lane.b32.xlu1 %v9995_v17, %s8188_s25  ;;  %v4043_v22 = vpop.permute.xlu0 %4042  ;;  %v10172_v56 = vpop.f32.mrb[163].mxu0  ;;  %v4898_v16 = vld [vmem:[#allocation3 + $0x2d0] sm:$0xff]  ;;  %v10187_v5 = vpack.c.bf16 %v3855_v1, %v3854_v8 }
 0x34d   : > { %6502 = vst.msk [vmem:[#allocation4 + $0xa0] sm:$0xff] %vm6481_vm5, %v6397_v24  ;;  %v5393_v55 = vpop.f32.mrb[32].mxu1  ;;  %v4902_v51 = vld [vmem:[#allocation3 + $0x2f0] sm:$0xff]  ;;  %v3440_v1 = vld [vmem:[#allocation2 + $0x2e2] sm:$0xff] }
 0x34e   : > { %4165 = vst.msk [vmem:[#allocation3 + $0x320] sm:$0xff] %vm2674_vm15, %v4043_v22  ;;  %v6398_v30 = vsel %vm6190_vm12, %v5838_v62, %v6294_v42  ;;  %v5394_v20 = vadd.f32 %v10143_v34, %v5393_v55  ;;  %v2583_v54 = vpop.permute.xlu1 %2582  ;;  %v5395_v45 = vpop.f32.mrb[33].mxu1  ;;  %3646 = vrot.lane.b32.xlu0 %v10174_v25, %s8186_s10  ;;  %v4270_v52 = vld [vmem:[#allocation2 + $0x2f1] sm:$0xff]  ;;  %v4271_v14 = vld [vmem:[#allocation2 + $0x2f9] sm:$0xff] }
 0x34f   : > { %6503 = vst.msk [vmem:[#allocation4 + $0xa8] sm:$0xff] %vm6481_vm5, %v6398_v30  ;;  %v5396_v17 = vpop.f32.mrb[34].mxu1  ;;  %v10202_v8 = vpack.c.bf16 %v4271_v14, %v4270_v52  ;;  %v3441_v30 = vld [vmem:[#allocation2 + $0x2ea] sm:$0xff] }
 0x350   : > { %2707 = vst.msk [vmem:[#allocation3 + $0x300] sm:$0xff] %vm2674_vm15, %v2583_v54  ;;  %v5843_v32 = vadd.f32 %v9967_v19, %v5394_v20  ;;  %v5397_v9 = vadd.f32 %v10143_v34, %v5396_v17  ;;  %2185 = vrot.lane.b32.xlu1 %v9959_v39, %s8186_s10  ;;  %v5398_v57 = vpop.f32.mrb[35].mxu1  ;;  %v4459_v40 = vpop.permute.xlu0 %4458 }
 0x351   : > { %5544 = vmatmul.mubr.bf16.gmra.mrb[108].mxu1 %v4898_v16  ;;  %4581 = vst.msk [vmem:[#allocation3 + $0x320] sm:$0xff] %vm3091_vm1, %v4459_v40  ;;  %v10190_v29 = vpop.f32.mrb[164].mxu0  ;;  %v4905_v40 = vld [vmem:[#allocation3 + $0x308] sm:$0xff] }
 0x352   : > { %5551 = vmatprep.mubr.bf16.mxu1 %v4902_v51  ;;  %vm6191_vm13 = vcmp.ge.f32.partialorder %v5843_v32, 0.0  ;;  %v6295_v19 = vmul.f32 0.01, %v5843_v32  ;;  %v5846_v62 = vadd.f32 %v9976_v12, %v5397_v9  ;;  %v3000_v63 = vpop.permute.xlu1 %2999  ;;  %4062 = vrot.lane.b32.xlu0 %v10187_v5, %s8187_s13  ;;  %v10195_v39 = vpop.f32.mrb[165].mxu0  ;;  %v3857_v9 = vld [vmem:[#allocation2 + $0x308] sm:$0xff]  ;;  %v10214_v51 = vpack.c.bf16 %v3441_v30, %v3440_v1 }
 0x353   : > { %3124 = vst.msk [vmem:[#allocation3 + $0x300] sm:$0xff] %vm3091_vm1, %v3000_v63  ;;  %v10198_v24 = vpop.f32.mrb[166].mxu0 }
 0x354   : > { %v6399_v42 = vsel %vm6191_vm13, %v5843_v32, %v6295_v19  ;;  %vm6192_vm0 = vcmp.ge.f32.partialorder %v5846_v62, 0.0  ;;  %v6296_v22 = vmul.f32 0.01, %v5846_v62  ;;  %2602 = vrot.lane.b32.xlu1 %v10022_v48, %s8187_s13  ;;  %v3629_v55 = vpop.permute.xlu0 %3628  ;;  %v10204_v12 = vpop.f32.mrb[167].mxu0  ;;  %v6607_v20 = vld [vmem:[#allocation4 + $0xa0] sm:$0xff]  ;;  %v4901_v48 = vld [vmem:[#allocation3 + $0x2e8] sm:$0xff] }
 0x355   : > { %6504 = vst.msk [vmem:[#allocation4 + $0xb0] sm:$0xff] %vm6481_vm5, %v6399_v42  ;;  %v3856_v32 = vld [vmem:[#allocation2 + $0x300] sm:$0xff] }
 0x356   : > { %3750 = vst.msk [vmem:[#allocation3 + $0x338] sm:$0xff] %vm2257_vm14, %v3629_v55  ;;  %v6711_v54 = vld [vmem:[#allocation4 + $0xa1] sm:$0xff]  ;;  %v6400_v45 = vsel %vm6192_vm0, %v5846_v62, %v6296_v22  ;;  %v2168_v17 = vpop.permute.xlu1 %2167  ;;  %4478 = vrot.lane.b32.xlu0 %v10202_v8, %s8188_s25  ;;  %v10222_v19 = vpack.c.bf16 %v3857_v9, %v3856_v32 }
 0x357   : > { %v6815_v16 = vmax.f32 %v6607_v20, %v6711_v54  ;;  %6505 = vst.msk [vmem:[#allocation4 + $0xb8] sm:$0xff] %vm6481_vm5, %v6400_v45  ;;  %v6608_v63 = vld [vmem:[#allocation4 + $0xa8] sm:$0xff]  ;;  %v4272_v20 = vld [vmem:[#allocation2 + $0x301] sm:$0xff] }
 0x358   : > { %2291 = vst.msk [vmem:[#allocation3 + $0x318] sm:$0xff] %vm2257_vm14, %v2168_v17  ;;  %3019 = vrot.lane.b32.xlu1 %v10032_v61, %s8188_s25  ;;  %v4045_v57 = vpop.permute.xlu0 %4044  ;;  %v4273_v54 = vld [vmem:[#allocation2 + $0x309] sm:$0xff] }
 0x359   : > { %5552 = vmatmul.mubr.bf16.gmra.mrb[112].mxu1 %v4901_v48  ;;  %6919 = vst.msk [vmem:[#allocation5 + $0xa0] sm:$0xff] %vm6481_vm5, %v6815_v16  ;;  %v10218_v52 = vpop.f32.mrb[168].mxu0 }
 0x35a   : > { %4166 = vst.msk [vmem:[#allocation3 + $0x338] sm:$0xff] %vm2674_vm15, %v4045_v57  ;;  %5559 = vmatprep.mubr.bf16.mxu1 %v4905_v40  ;;  %v2585_v14 = vpop.permute.xlu1 %2584  ;;  %3648 = vrot.lane.b32.xlu0 %v10214_v51, %s8186_s10  ;;  %v10224_v62 = vpop.f32.mrb[169].mxu0  ;;  %v4904_v57 = vld [vmem:[#allocation3 + $0x300] sm:$0xff] }
 0x35b   : > { %2708 = vst.msk [vmem:[#allocation3 + $0x318] sm:$0xff] %vm2674_vm15, %v2585_v14  ;;  %v10227_v61 = vpop.f32.mrb[170].mxu0 }
 0x35c   : > { %v6712_v42 = vld [vmem:[#allocation4 + $0xa9] sm:$0xff]  ;;  %2187 = vrot.lane.b32.xlu1 %v10012_v49, %s8186_s10  ;;  %v4461_v22 = vpop.permute.xlu0 %4460  ;;  %v10231_v55 = vpop.f32.mrb[171].mxu0 }
 0x35d   : > { %v6816_v1 = vmax.f32 %v6608_v63, %v6712_v42  ;;  %4582 = vst.msk [vmem:[#allocation3 + $0x338] sm:$0xff] %vm3091_vm1, %v4461_v22  ;;  %v5401_v30 = vpop.f32.mrb[36].mxu1  ;;  %v6609_v45 = vld [vmem:[#allocation4 + $0xb0] sm:$0xff]  ;;  %v4908_v22 = vld [vmem:[#allocation3 + $0x320] sm:$0xff] }
 0x35e   : > { %v6713_v17 = vld [vmem:[#allocation4 + $0xb1] sm:$0xff]  ;;  %v5402_v16 = vadd.f32 %v10143_v34, %v5401_v30  ;;  %v3002_v48 = vpop.permute.xlu1 %3001  ;;  %v5403_v32 = vpop.f32.mrb[37].mxu1  ;;  %4064 = vrot.lane.b32.xlu0 %v10222_v19, %s8187_s13  ;;  %v10243_v30 = vpack.c.bf16 %v4273_v54, %v4272_v20 }
 0x35f   : > { %6920 = vst.msk [vmem:[#allocation5 + $0xa8] sm:$0xff] %vm6481_vm5, %v6816_v1  ;;  %v6817_v49 = vmax.f32 %v6609_v45, %v6713_v17  ;;  %v5404_v9 = vpop.f32.mrb[38].mxu1  ;;  %v3442_v1 = vld [vmem:[#allocation2 + $0x2f2] sm:$0xff]  ;;  %v3443_v45 = vld [vmem:[#allocation2 + $0x2fa] sm:$0xff] }
 0x360   : > { %3125 = vst.msk [vmem:[#allocation3 + $0x318] sm:$0xff] %vm3091_vm1, %v3002_v48  ;;  %v5851_v40 = vadd.f32 %v10003_v60, %v5402_v16  ;;  %v5405_v14 = vadd.f32 %v10143_v34, %v5404_v9  ;;  %2604 = vrot.lane.b32.xlu1 %v10069_v50, %s8187_s13  ;;  %v5406_v63 = vpop.f32.mrb[39].mxu1  ;;  %v3631_v42 = vpop.permute.xlu0 %3630  ;;  %v10259_v9 = vpack.c.bf16 %v3443_v45, %v3442_v1  ;;  %v7055_v1 = vld [vmem:[#allocation5 + $0x90] ss:$2 sm:$0xf] }
 0x361   : > { %5560 = vmatmul.mubr.bf16.gmra.mrb[116].mxu1 %v4904_v57  ;;  %6921 = vst.msk [vmem:[#allocation5 + $0xb0] sm:$0xff] %vm6481_vm5, %v6817_v49  ;;  %v10247_v17 = vpop.f32.mrb[172].mxu0  ;;  %v3859_v63 = vld [vmem:[#allocation2 + $0x318] sm:$0xff] }
 0x362   : > { %3751 = vst.msk [vmem:[#allocation3 + $0x350] sm:$0xff] %vm2257_vm14, %v3631_v42  ;;  %5567 = vmatprep.mubr.bf16.mxu1 %v4908_v22  ;;  %10937 = vst [vmem:[#allocation13_spill] sm:$0xff] %v10247_v17  ;;  %vm6193_vm3 = vcmp.ge.f32.partialorder %v5851_v40, 0.0  ;;  %v6297_v60 = vmul.f32 0.01, %v5851_v40  ;;  %v5854_v16 = vadd.f32 %v10010_v0, %v5405_v14  ;;  %v2170_v50 = vpop.permute.xlu1 %2169  ;;  %4480 = vrot.lane.b32.xlu0 %v10243_v30, %s8188_s25  ;;  %v10252_v48 = vpop.f32.mrb[173].mxu0 }
 0x363   : > { %2292 = vst.msk [vmem:[#allocation3 + $0x330] sm:$0xff] %vm2257_vm14, %v2170_v50  ;;  %v10255_v20 = vpop.f32.mrb[174].mxu0  ;;  %v3858_v14 = vld [vmem:[#allocation2 + $0x310] sm:$0xff] }
 0x364   : > { %10938 = vst [vmem:[#allocation14_spill] sm:$0xff] %v10255_v20  ;;  %v6401_v54 = vsel %vm6193_vm3, %v5851_v40, %v6297_v60  ;;  %vm6194_vm8 = vcmp.ge.f32.partialorder %v5854_v16, 0.0  ;;  %v6298_v32 = vmul.f32 0.01, %v5854_v16  ;;  %3021 = vrot.lane.b32.xlu1 %v10082_v59, %s8188_s25  ;;  %v4047_v49 = vpop.permute.xlu0 %4046  ;;  %v10261_v0 = vpop.f32.mrb[175].mxu0 }
 0x365   : > { %10939 = vst [vmem:[#allocation15_spill] sm:$0xff] %v10261_v0  ;;  %6506 = vst.msk [vmem:[#allocation4 + $0xc0] sm:$0xff] %vm6481_vm5, %v6401_v54  ;;  %v5409_v57 = vpop.f32.mrb[40].mxu1  ;;  %v7053_v42 = vld [vmem:[#allocation5 + $0x80] ss:$2 sm:$0xff]  ;;  %v10274_v0 = vpack.c.bf16 %v3859_v63, %v3858_v14 }
 0x366   : > { %4167 = vst.msk [vmem:[#allocation3 + $0x350] sm:$0xff] %vm2674_vm15, %v4047_v49  ;;  %v7057_v22 = vld [vmem:[#allocation5 + $0xa0] ss:$2 sm:$0xff]  ;;  %v6402_v40 = vsel %vm6194_vm8, %v5854_v16, %v6298_v32  ;;  %v5410_v60 = vadd.f32 %v10143_v34, %v5409_v57  ;;  %v2587_v50 = vpop.permute.xlu1 %2586  ;;  %v5411_v20 = vpop.f32.mrb[41].mxu1  ;;  %3650 = vrot.lane.b32.xlu0 %v10259_v9, %s8186_s10  ;;  %v4911_v57 = vld [vmem:[#allocation3 + $0x338] sm:$0xff] }
 0x367   : > { %v4907_v59 = vld [vmem:[#allocation3 + $0x318] sm:$0xff]  ;;  %v7060_v45 = vmax.f32 %v7053_v42, %v7057_v22  ;;  %6507 = vst.msk [vmem:[#allocation4 + $0xc8] sm:$0xff] %vm6481_vm5, %v6402_v40  ;;  %v5412_v54 = vpop.f32.mrb[42].mxu1  ;;  %v4274_v40 = vld [vmem:[#allocation2 + $0x311] sm:$0xff] }
 0x368   : > { %2709 = vst.msk [vmem:[#allocation3 + $0x330] sm:$0xff] %vm2674_vm15, %v2587_v50  ;;  %v7059_v49 = vld [vmem:[#allocation5 + $0xb0] ss:$2 sm:$0xf]  ;;  %v5859_v17 = vadd.f32 %v9998_v15, %v5410_v60  ;;  %v5413_v16 = vadd.f32 %v10143_v34, %v5412_v54  ;;  %2189 = vrot.lane.b32.xlu1 %v10051_v47, %s8186_s10  ;;  %v5414_v20 = vpop.f32.mrb[43].mxu1  ;;  %v4463_v32 = vpop.permute.xlu0 %4462 }
 0x369   : > { %5568 = vmatmul.mubr.bf16.gmra.mrb[120].mxu1 %v4907_v59  ;;  %v7578_v42 = vpack.c.bf16 %v7060_v45, %v7060_v45  ;;  %v7061_v22 = vmax.f32 %v7055_v1, %v7059_v49  ;;  %4583 = vst.msk [vmem:[#allocation3 + $0x350] sm:$0xff] %vm3091_vm1, %v4463_v32  ;;  %v4275_v50 = vld [vmem:[#allocation2 + $0x319] sm:$0xff]  ;;  %v10277_v15 = vpop.f32.mrb[176].mxu0  ;;  %v3444_v20 = vld [vmem:[#allocation2 + $0x302] sm:$0xff]  ;;  %v3445_v32 = vld [vmem:[#allocation2 + $0x30a] sm:$0xff] }
 0x36a   : > { %5575 = vmatprep.mubr.bf16.mxu1 %v4911_v57  ;;  %vm6195_vm10 = vcmp.ge.f32.partialorder %v5859_v17, 0.0  ;;  %v6299_v60 = vmul.f32 0.01, %v5859_v17  ;;  %v5862_v47 = vadd.f32 %v10006_v26, %v5413_v16  ;;  %v3004_v59 = vpop.permute.xlu1 %3003  ;;  %4066 = vrot.lane.b32.xlu0 %v10274_v0, %s8187_s13  ;;  %v10282_v14 = vpop.f32.mrb[177].mxu0  ;;  %v10291_v49 = vpack.c.bf16 %v4275_v50, %v4274_v40  ;;  %v3860_v40 = vld [vmem:[#allocation2 + $0x320] sm:$0xff]  ;;  %v3861_v50 = vld [vmem:[#allocation2 + $0x328] sm:$0xff] }
 0x36b   : > { %7070 = vst.msk [vmem:[%s9943_s8 + $0xc] sm:$0xf] %vm7020_vm2, %v7578_v42  ;;  %v7579_v63 = vpack.c.bf16 %v7061_v22, %v7061_v22  ;;  %v10287_v1 = vpop.f32.mrb[178].mxu0 }
 0x36c   : > { %3126 = vst.msk [vmem:[#allocation3 + $0x330] sm:$0xff] %vm3091_vm1, %v3004_v59  ;;  %v6403_v45 = vsel %vm6195_vm10, %v5859_v17, %v6299_v60  ;;  %vm6196_vm11 = vcmp.ge.f32.partialorder %v5862_v47, 0.0  ;;  %v6300_v54 = vmul.f32 0.01, %v5862_v47  ;;  %2606 = vrot.lane.b32.xlu1 %v10121_v28, %s8187_s13  ;;  %v3633_v26 = vpop.permute.xlu0 %3632  ;;  %v10293_v16 = vpop.f32.mrb[179].mxu0  ;;  %v6611_v57 = vld [vmem:[#allocation4 + $0xc0] sm:$0xff]  ;;  %v10305_v59 = vpack.c.bf16 %v3445_v32, %v3444_v20 }
 0x36d   : > { %7071 = vst.msk [vmem:[%s9943_s8 + $0x10] sm:$0x3] %vm7022_vm7, %v7579_v63 }
 0x36e   : > { %6508 = vst.msk [vmem:[#allocation4 + $0xd0] sm:$0xff] %vm6481_vm5, %v6403_v45  ;;  %v6715_v17 = vld [vmem:[#allocation4 + $0xc1] sm:$0xff]  ;;  %v6404_v42 = vsel %vm6196_vm11, %v5862_v47, %v6300_v54  ;;  %v2172_v22 = vpop.permute.xlu1 %2171  ;;  %4482 = vrot.lane.b32.xlu0 %v10291_v49, %s8188_s25  ;;  %v10313_v54 = vpack.c.bf16 %v3861_v50, %v3860_v40  ;;  %v4276_v40 = vld [vmem:[#allocation2 + $0x321] sm:$0xff] }
 0x36f   : > { %3752 = vst.msk [vmem:[#allocation3 + $0x368] sm:$0xff] %vm2257_vm14, %v3633_v26  ;;  %v6819_v28 = vmax.f32 %v6611_v57, %v6715_v17  ;;  %2293 = vst.msk [vmem:[#allocation3 + $0x348] sm:$0xff] %vm2257_vm14, %v2172_v22  ;;  %v6612_v32 = vld [vmem:[#allocation4 + $0xc8] sm:$0xff] }
 0x370   : > { %6509 = vst.msk [vmem:[#allocation4 + $0xd8] sm:$0xff] %vm6481_vm5, %v6404_v42  ;;  %3023 = vrot.lane.b32.xlu1 %v10131_v21, %s8188_s25  ;;  %v4049_v60 = vpop.permute.xlu0 %4048  ;;  %v4914_v21 = vld [vmem:[#allocation3 + $0x350] sm:$0xff]  ;;  %v4277_v50 = vld [vmem:[#allocation2 + $0x329] sm:$0xff] }
 0x371   : > { %6923 = vst.msk [vmem:[#allocation5 + $0xc0] sm:$0xff] %vm6481_vm5, %v6819_v28  ;;  %v10309_v47 = vpop.f32.mrb[180].mxu0 }
 0x372   : > { %4168 = vst.msk [vmem:[#allocation3 + $0x368] sm:$0xff] %vm2674_vm15, %v4049_v60  ;;  %10940 = vst [vmem:[#allocation16_spill] sm:$0xff] %v10309_v47  ;;  %v2589_v63 = vpop.permute.xlu1 %2588  ;;  %3652 = vrot.lane.b32.xlu0 %v10305_v59, %s8186_s10  ;;  %v10315_v26 = vpop.f32.mrb[181].mxu0 }
 0x373   : > { %v4910_v45 = vld [vmem:[#allocation3 + $0x330] sm:$0xff]  ;;  %2710 = vst.msk [vmem:[#allocation3 + $0x348] sm:$0xff] %vm2674_vm15, %v2589_v63  ;;  %v10318_v20 = vpop.f32.mrb[182].mxu0 }
 0x374   : > { %5576 = vmatmul.mubr.bf16.gmra.mrb[124].mxu1 %v4910_v45  ;;  %10941 = vst [vmem:[#allocation17_spill] sm:$0xff] %v10318_v20  ;;  %2191 = vrot.lane.b32.xlu1 %v10105_v27, %s8186_s10  ;;  %v4465_v17 = vpop.permute.xlu0 %4464  ;;  %v10322_v42 = vpop.f32.mrb[183].mxu0 }
 0x375   : > { %v6716_v57 = vld [vmem:[#allocation4 + $0xc9] sm:$0xff]  ;;  %5583 = vmatprep.mubr.bf16.mxu1 %v4914_v21  ;;  %10942 = vst [vmem:[#allocation18_spill] sm:$0xff] %v10322_v42  ;;  %4584 = vst.msk [vmem:[#allocation3 + $0x368] sm:$0xff] %vm3091_vm1, %v4465_v17  ;;  %v5417_v28 = vpop.f32.mrb[44].mxu1  ;;  %v10334_v42 = vpack.c.bf16 %v4277_v50, %v4276_v40 }
 0x376   : > { %v6820_v22 = vmax.f32 %v6612_v32, %v6716_v57  ;;  %v6613_v60 = vld [vmem:[#allocation4 + $0xd0] sm:$0xff]  ;;  %v5418_v45 = vadd.f32 %v10143_v34, %v5417_v28  ;;  %v3006_v20 = vpop.permute.xlu1 %3005  ;;  %v5419_v47 = vpop.f32.mrb[45].mxu1  ;;  %4068 = vrot.lane.b32.xlu0 %v10313_v54, %s8187_s13 }
 0x377   : > { %v6717_v63 = vld [vmem:[#allocation4 + $0xd1] sm:$0xff]  ;;  %3127 = vst.msk [vmem:[#allocation3 + $0x348] sm:$0xff] %vm3091_vm1, %v3006_v20  ;;  %v5420_v21 = vpop.f32.mrb[46].mxu1 }
 0x378   : > { %6924 = vst.msk [vmem:[#allocation5 + $0xc8] sm:$0xff] %vm6481_vm5, %v6820_v22  ;;  %v6821_v27 = vmax.f32 %v6613_v60, %v6717_v63  ;;  %v5867_v32 = vadd.f32 %v10030_v53, %v5418_v45  ;;  %v5421_v57 = vadd.f32 %v10143_v34, %v5420_v21  ;;  %2608 = vrot.lane.b32.xlu1 %v10174_v25, %s8187_s13  ;;  %v5422_v17 = vpop.f32.mrb[47].mxu1  ;;  %v3635_v28 = vpop.permute.xlu0 %3634  ;;  %v3446_v47 = vld [vmem:[#allocation2 + $0x312] sm:$0xff]  ;;  %v3447_v22 = vld [vmem:[#allocation2 + $0x31a] sm:$0xff] }
 0x379   : > { %3753 = vst.msk [vmem:[#allocation3 + $0x380] sm:$0xff] %vm2257_vm14, %v3635_v28  ;;  %v10338_v60 = vpop.f32.mrb[184].mxu0  ;;  %v10350_v21 = vpack.c.bf16 %v3447_v22, %v3446_v47  ;;  %v3862_v17 = vld [vmem:[#allocation2 + $0x330] sm:$0xff]  ;;  %v3863_v28 = vld [vmem:[#allocation2 + $0x338] sm:$0xff] }
 0x37a   : > { %6925 = vst.msk [vmem:[#allocation5 + $0xd0] sm:$0xff] %vm6481_vm5, %v6821_v27  ;;  %vm6197_vm12 = vcmp.ge.f32.partialorder %v5867_v32, 0.0  ;;  %v6301_v20 = vmul.f32 0.01, %v5867_v32  ;;  %v5870_v53 = vadd.f32 %v10039_v36, %v5421_v57  ;;  %v2174_v63 = vpop.permute.xlu1 %2173  ;;  %4484 = vrot.lane.b32.xlu0 %v10334_v42, %s8188_s25  ;;  %v10343_v25 = vpop.f32.mrb[185].mxu0 }
 0x37b   : > { %2294 = vst.msk [vmem:[#allocation3 + $0x360] sm:$0xff] %vm2257_vm14, %v2174_v63  ;;  %v10346_v40 = vpop.f32.mrb[186].mxu0 }
 0x37c   : > { %10943 = vst [vmem:[#allocation19_spill] sm:$0xff] %v10346_v40  ;;  %v6405_v50 = vsel %vm6197_vm12, %v5867_v32, %v6301_v20  ;;  %vm6198_vm13 = vcmp.ge.f32.partialorder %v5870_v53, 0.0  ;;  %v6302_v45 = vmul.f32 0.01, %v5870_v53  ;;  %3025 = vrot.lane.b32.xlu1 %v10187_v5, %s8188_s25  ;;  %v4051_v27 = vpop.permute.xlu0 %4050  ;;  %v10352_v36 = vpop.f32.mrb[187].mxu0  ;;  %v4917_v22 = vld [vmem:[#allocation3 + $0x368] sm:$0xff] }
 0x37d   : > { %6510 = vst.msk [vmem:[#allocation4 + $0xe0] sm:$0xff] %vm6481_vm5, %v6405_v50  ;;  %v5425_v57 = vpop.f32.mrb[48].mxu1 }
 0x37e   : > { %4169 = vst.msk [vmem:[#allocation3 + $0x380] sm:$0xff] %vm2674_vm15, %v4051_v27  ;;  %v6406_v63 = vsel %vm6198_vm13, %v5870_v53, %v6302_v45  ;;  %v5426_v32 = vadd.f32 %v10143_v34, %v5425_v57  ;;  %v2591_v20 = vpop.permute.xlu1 %2590  ;;  %v5427_v40 = vpop.f32.mrb[49].mxu1  ;;  %3654 = vrot.lane.b32.xlu0 %v10350_v21, %s8186_s10  ;;  %v4913_v5 = vld [vmem:[#allocation3 + $0x348] sm:$0xff]  ;;  %v10365_v45 = vpack.c.bf16 %v3863_v28, %v3862_v17 }
 0x37f   : > { %6511 = vst.msk [vmem:[#allocation4 + $0xe8] sm:$0xff] %vm6481_vm5, %v6406_v63  ;;  %v5428_v47 = vpop.f32.mrb[50].mxu1  ;;  %5584 = vmatmul.mubr.bf16.gmra.mrb[128].mxu1 %v4913_v5  ;;  %v4278_v57 = vld [vmem:[#allocation2 + $0x331] sm:$0xff]  ;;  %v4279_v63 = vld [vmem:[#allocation2 + $0x339] sm:$0xff] }
 0x380   : > { %2711 = vst.msk [vmem:[#allocation3 + $0x360] sm:$0xff] %vm2674_vm15, %v2591_v20  ;;  %v5875_v50 = vadd.f32 %v10026_v23, %v5426_v32  ;;  %v5429_v27 = vadd.f32 %v10143_v34, %v5428_v47  ;;  %2193 = vrot.lane.b32.xlu1 %v10156_v18, %s8186_s10  ;;  %v5430_v53 = vpop.f32.mrb[51].mxu1  ;;  %5591 = vmatprep.mubr.bf16.mxu1 %v4917_v22  ;;  %v4467_v40 = vpop.permute.xlu0 %4466 }
 0x381   : > { %4585 = vst.msk [vmem:[#allocation3 + $0x380] sm:$0xff] %vm3091_vm1, %v4467_v40  ;;  %v10368_v20 = vpop.f32.mrb[188].mxu0  ;;  %v10380_v53 = vpack.c.bf16 %v4279_v63, %v4278_v57  ;;  %v3449_v40 = vld [vmem:[#allocation2 + $0x32a] sm:$0xff] }
 0x382   : > { %10944 = vst [vmem:[#allocation20_spill] sm:$0xff] %v10368_v20  ;;  %vm6199_vm0 = vcmp.ge.f32.partialorder %v5875_v50, 0.0  ;;  %v6303_v5 = vmul.f32 0.01, %v5875_v50  ;;  %v5878_v23 = vadd.f32 %v10035_v33, %v5429_v27  ;;  %v3008_v32 = vpop.permute.xlu1 %3007  ;;  %4070 = vrot.lane.b32.xlu0 %v10365_v45, %s8187_s13  ;;  %v10373_v18 = vpop.f32.mrb[189].mxu0  ;;  %v3448_v27 = vld [vmem:[#allocation2 + $0x322] sm:$0xff] }
 0x383   : > { %10945 = vst [vmem:[#allocation21_spill] sm:$0xff] %v10373_v18  ;;  %3128 = vst.msk [vmem:[#allocation3 + $0x360] sm:$0xff] %vm3091_vm1, %v3008_v32  ;;  %v10376_v17 = vpop.f32.mrb[190].mxu0  ;;  %v3865_v57 = vld [vmem:[#allocation2 + $0x348] sm:$0xff] }
 0x384   : > { %10946 = vst [vmem:[#allocation22_spill] sm:$0xff] %v10376_v17  ;;  %v6407_v28 = vsel %vm6199_vm0, %v5875_v50, %v6303_v5  ;;  %vm6200_vm3 = vcmp.ge.f32.partialorder %v5878_v23, 0.0  ;;  %v6304_v47 = vmul.f32 0.01, %v5878_v23  ;;  %2610 = vrot.lane.b32.xlu1 %v10214_v51, %s8187_s13  ;;  %v3637_v22 = vpop.permute.xlu0 %3636  ;;  %v10382_v33 = vpop.f32.mrb[191].mxu0  ;;  %v6615_v32 = vld [vmem:[#allocation4 + $0xe0] sm:$0xff] }
 0x385   : > { %10947 = vst [vmem:[#allocation23_spill] sm:$0xff] %v10382_v33  ;;  %6512 = vst.msk [vmem:[#allocation4 + $0xf0] sm:$0xff] %vm6481_vm5, %v6407_v28  ;;  %v3864_v51 = vld [vmem:[#allocation2 + $0x340] sm:$0xff]  ;;  %v10392_v28 = vpack.c.bf16 %v3449_v40, %v3448_v27  ;;  %v4281_v40 = vld [vmem:[#allocation2 + $0x349] sm:$0xff] }
 0x386   : > { %3754 = vst.msk [vmem:[#allocation3 + $0x398] sm:$0xff] %vm2257_vm14, %v3637_v22  ;;  %v6719_v20 = vld [vmem:[#allocation4 + $0xe1] sm:$0xff]  ;;  %v6408_v17 = vsel %vm6200_vm3, %v5878_v23, %v6304_v47  ;;  %v2176_v50 = vpop.permute.xlu1 %2175  ;;  %4486 = vrot.lane.b32.xlu0 %v10380_v53, %s8188_s25  ;;  %v4280_v27 = vld [vmem:[#allocation2 + $0x341] sm:$0xff] }
 0x387   : > { %v6823_v5 = vmax.f32 %v6615_v32, %v6719_v20  ;;  %6513 = vst.msk [vmem:[#allocation4 + $0xf8] sm:$0xff] %vm6481_vm5, %v6408_v17  ;;  %v10400_v17 = vpack.c.bf16 %v3865_v57, %v3864_v51 }
 0x388   : > { %2295 = vst.msk [vmem:[#allocation3 + $0x378] sm:$0xff] %vm2257_vm14, %v2176_v50  ;;  %3027 = vrot.lane.b32.xlu1 %v10222_v19, %s8188_s25  ;;  %v4053_v63 = vpop.permute.xlu0 %4052  ;;  %v4920_v19 = vld [vmem:[#allocation3 + $0x380] sm:$0xff]  ;;  %v6616_v50 = vld [vmem:[#allocation4 + $0xe8] sm:$0xff] }
 0x389   : > { %6927 = vst.msk [vmem:[#allocation5 + $0xe0] sm:$0xff] %vm6481_vm5, %v6823_v5  ;;  %v10396_v23 = vpop.f32.mrb[192].mxu0 }
 0x38a   : > { %4170 = vst.msk [vmem:[#allocation3 + $0x398] sm:$0xff] %vm2674_vm15, %v4053_v63  ;;  %10948 = vst [vmem:[#allocation24_spill] sm:$0xff] %v10396_v23  ;;  %v2593_v47 = vpop.permute.xlu1 %2592  ;;  %3656 = vrot.lane.b32.xlu0 %v10392_v28, %s8186_s10  ;;  %v4916_v20 = vld [vmem:[#allocation3 + $0x360] sm:$0xff]  ;;  %v10402_v22 = vpop.f32.mrb[193].mxu0 }
 0x38b   : > { %10949 = vst [vmem:[#allocation25_spill] sm:$0xff] %v10402_v22  ;;  %2712 = vst.msk [vmem:[#allocation3 + $0x378] sm:$0xff] %vm2674_vm15, %v2593_v47  ;;  %5592 = vmatmul.mubr.bf16.gmra.mrb[132].mxu1 %v4916_v20  ;;  %v10405_v32 = vpop.f32.mrb[194].mxu0 }
 0x38c   : > { %10950 = vst [vmem:[#allocation26_spill] sm:$0xff] %v10405_v32  ;;  %v6720_v5 = vld [vmem:[#allocation4 + $0xe9] sm:$0xff]  ;;  %2195 = vrot.lane.b32.xlu1 %v10202_v8, %s8186_s10  ;;  %5599 = vmatprep.mubr.bf16.mxu1 %v4920_v19  ;;  %v4469_v63 = vpop.permute.xlu0 %4468  ;;  %v10409_v23 = vpop.f32.mrb[195].mxu0  ;;  %v4336_v32 = vpack.c.bf16 %v4281_v40, %v4280_v27  ;;  %v3451_v27 = vld [vmem:[#allocation2 + $0x33a] sm:$0xff] }
 0x38d   : > { %10951 = vst [vmem:[#allocation27_spill] sm:$0xff] %v10409_v23  ;;  %v6824_v51 = vmax.f32 %v6616_v50, %v6720_v5  ;;  %4586 = vst.msk [vmem:[#allocation3 + $0x398] sm:$0xff] %vm3091_vm1, %v4469_v63  ;;  %v5433_v57 = vpop.f32.mrb[52].mxu1  ;;  %v6617_v47 = vld [vmem:[#allocation4 + $0xf0] sm:$0xff] }
 0x38e   : > { %v6721_v20 = vld [vmem:[#allocation4 + $0xf1] sm:$0xff]  ;;  %v5434_v22 = vadd.f32 %v10143_v34, %v5433_v57  ;;  %v3010_v33 = vpop.permute.xlu1 %3009  ;;  %v5435_v18 = vpop.f32.mrb[53].mxu1  ;;  %4072 = vrot.lane.b32.xlu0 %v10400_v17, %s8187_s13 }
 0x38f   : > { %6928 = vst.msk [vmem:[#allocation5 + $0xe8] sm:$0xff] %vm6481_vm5, %v6824_v51  ;;  %v6825_v8 = vmax.f32 %v6617_v47, %v6721_v20  ;;  %v5436_v19 = vpop.f32.mrb[54].mxu1  ;;  %v3450_v18 = vld [vmem:[#allocation2 + $0x332] sm:$0xff] }
 0x390   : > { %3129 = vst.msk [vmem:[#allocation3 + $0x378] sm:$0xff] %vm3091_vm1, %v3010_v33  ;;  %v5883_v50 = vadd.f32 %v10060_v7, %v5434_v22  ;;  %v5437_v5 = vadd.f32 %v10143_v34, %v5436_v19  ;;  %2612 = vrot.lane.b32.xlu1 %v10259_v9, %s8187_s13  ;;  %v5438_v63 = vpop.f32.mrb[55].mxu1  ;;  %v3639_v57 = vpop.permute.xlu0 %3638  ;;  %v3866_v7 = vld [vmem:[#allocation2 + $0x350] sm:$0xff]  ;;  %v3867_v22 = vld [vmem:[#allocation2 + $0x358] sm:$0xff]  ;;  %v10430_v19 = vpack.c.bf16 %v3451_v27, %v3450_v18 }
 0x391   : > { %6929 = vst.msk [vmem:[#allocation5 + $0xf0] sm:$0xff] %vm6481_vm5, %v6825_v8  ;;  %v10426_v9 = vpop.f32.mrb[196].mxu0  ;;  %v10441_v27 = vpack.c.bf16 %v3867_v22, %v3866_v7 }
 0x392   : > { %3755 = vst.msk [vmem:[#allocation3 + $0x3b0] sm:$0xff] %vm2257_vm14, %v3639_v57  ;;  %vm6201_vm8 = vcmp.ge.f32.partialorder %v5883_v50, 0.0  ;;  %v6305_v40 = vmul.f32 0.01, %v5883_v50  ;;  %v5886_v33 = vadd.f32 %v10067_v10, %v5437_v5  ;;  %v2178_v51 = vpop.permute.xlu1 %2177  ;;  %4488 = vrot.lane.b32.xlu0 %v4336_v32, %s8188_s25  ;;  %10952 = vst [vmem:[#allocation28_spill] sm:$0xff] %v10426_v9  ;;  %v10432_v63 = vpop.f32.mrb[197].mxu0 }
 0x393   : > { %2296 = vst.msk [vmem:[#allocation3 + $0x390] sm:$0xff] %vm2257_vm14, %v2178_v51  ;;  %10953 = vst [vmem:[#allocation29_spill] sm:$0xff] %v10432_v63  ;;  %v4282_v32 = vld [vmem:[#allocation2 + $0x351] sm:$0xff]  ;;  %v4283_v5 = vld [vmem:[#allocation2 + $0x359] sm:$0xff]  ;;  %v10436_v57 = vpop.f32.mrb[198].mxu0 }
 0x394   : > { %v6409_v47 = vsel %vm6201_vm8, %v5883_v50, %v6305_v40  ;;  %vm6202_vm10 = vcmp.ge.f32.partialorder %v5886_v33, 0.0  ;;  %v6306_v20 = vmul.f32 0.01, %v5886_v33  ;;  %3029 = vrot.lane.b32.xlu1 %v10274_v0, %s8188_s25  ;;  %v4055_v8 = vpop.permute.xlu0 %4054  ;;  %10954 = vst [vmem:[#allocation30_spill] sm:$0xff] %v10436_v57  ;;  %v7073_v50 = vld [vmem:[#allocation5 + $0xc0] ss:$2 sm:$0xff] }
 0x395   : > { %6514 = vst.msk [vmem:[#allocation4 + $0x100] sm:$0xff] %vm6481_vm5, %v6409_v47  ;;  %v5441_v10 = vpop.f32.mrb[56].mxu1  ;;  %v7075_v47 = vld [vmem:[#allocation5 + $0xd0] ss:$2 sm:$0xf] }
 0x396   : > { %4171 = vst.msk [vmem:[#allocation3 + $0x3b0] sm:$0xff] %vm2674_vm15, %v4055_v8  ;;  %v7077_v40 = vld [vmem:[#allocation5 + $0xe0] ss:$2 sm:$0xff]  ;;  %v6410_v51 = vsel %vm6202_vm10, %v5886_v33, %v6306_v20  ;;  %v5442_v9 = vadd.f32 %v10143_v34, %v5441_v10  ;;  %v2595_v0 = vpop.permute.xlu1 %2594  ;;  %v5443_v23 = vpop.f32.mrb[57].mxu1  ;;  %3658 = vrot.lane.b32.xlu0 %v10430_v19, %s8186_s10  ;;  %v4923_v63 = vld [vmem:[#allocation3 + $0x398] sm:$0xff] }
 0x397   : > { %v4919_v18 = vld [vmem:[#allocation3 + $0x378] sm:$0xff]  ;;  %v7080_v8 = vmax.f32 %v7073_v50, %v7077_v40  ;;  %6515 = vst.msk [vmem:[#allocation4 + $0x108] sm:$0xff] %vm6481_vm5, %v6410_v51  ;;  %v5444_v57 = vpop.f32.mrb[58].mxu1  ;;  %v10445_v33 = vpop.f32.mrb[199].mxu0 }
 0x398   : > { %2713 = vst.msk [vmem:[#allocation3 + $0x390] sm:$0xff] %vm2674_vm15, %v2595_v0  ;;  %5600 = vmatmul.mubr.bf16.gmra.mrb[136].mxu1 %v4919_v18  ;;  %v7079_v20 = vld [vmem:[#allocation5 + $0xf0] ss:$2 sm:$0xf]  ;;  %v5891_v23 = vadd.f32 %v10055_v46, %v5442_v9  ;;  %v5445_v10 = vadd.f32 %v10143_v34, %v5444_v57  ;;  %2197 = vrot.lane.b32.xlu1 %v10243_v30, %s8186_s10  ;;  %v5446_v7 = vpop.f32.mrb[59].mxu1  ;;  %v4471_v22 = vpop.permute.xlu0 %4470 }
 0x399   : > { %5607 = vmatprep.mubr.bf16.mxu1 %v4923_v63  ;;  %v7580_v50 = vpack.c.bf16 %v7080_v8, %v7080_v8  ;;  %v7081_v40 = vmax.f32 %v7075_v47, %v7079_v20  ;;  %4587 = vst.msk [vmem:[#allocation3 + $0x3b0] sm:$0xff] %vm3091_vm1, %v4471_v22  ;;  %v4337_v46 = vpack.c.bf16 %v4283_v5, %v4282_v32  ;;  %v3452_v34 = vld [vmem:[#allocation2 + $0x342] sm:$0xff]  ;;  %v3453_v63 = vld [vmem:[#allocation2 + $0x34a] sm:$0xff] }
 0x39a   : > { %vm6203_vm11 = vcmp.ge.f32.partialorder %v5891_v23, 0.0  ;;  %v6307_v51 = vmul.f32 0.01, %v5891_v23  ;;  %v5894_v0 = vadd.f32 %v10063_v41, %v5445_v10  ;;  %v3012_v18 = vpop.permute.xlu1 %3011  ;;  %4074 = vrot.lane.b32.xlu0 %v10441_v27, %s8187_s13  ;;  %v4696_v57 = vld [vmem:[#allocation2 + $0x342] sm:$0xff]  ;;  %v4697_v47 = vld [vmem:[#allocation2 + $0x34a] sm:$0xff] }
 0x39b   : > { %v7088_v9 = vrot.slane %v7580_v50, 6  ;;  %v7581_v30 = vpack.c.bf16 %v7081_v40, %v7081_v40  ;;  %3130 = vst.msk [vmem:[#allocation3 + $0x390] sm:$0xff] %vm3091_vm1, %v3012_v18  ;;  %v4752_v10 = vpack.c.bf16 %v4697_v47, %v4696_v57  ;;  %v3506_v40 = vpack.c.bf16 %v3453_v63, %v3452_v34  ;;  %v3868_v18 = vld [vmem:[#allocation2 + $0x360] sm:$0xff]  ;;  %v4285_v47 = vld [vmem:[#allocation2 + $0x369] sm:$0xff] }
 0x39c   : > { %v6411_v8 = vsel %vm6203_vm11, %v5891_v23, %v6307_v51  ;;  %vm6204_vm12 = vcmp.ge.f32.partialorder %v5894_v0, 0.0  ;;  %v6308_v20 = vmul.f32 0.01, %v5894_v0  ;;  %2614 = vrot.lane.b32.xlu1 %v10305_v59, %s8187_s13  ;;  %v3641_v41 = vpop.permute.xlu0 %3640  ;;  %v6619_v5 = vld [vmem:[#allocation4 + $0x100] sm:$0xff] }
 0x39d   : > { %v7089_v7 = vrot.slane %v7088_v9, 4  ;;  %7094 = vst.msk [vmem:[%s9943_s8 + $0x10] sm:$0xc] %vm7049_vm6, %v7088_v9  ;;  %v7090_v32 = vrot.slane %v7581_v30, 6  ;;  %v3869_v9 = vld [vmem:[#allocation2 + $0x368] sm:$0xff] }
 0x39e   : > { %6516 = vst.msk [vmem:[#allocation4 + $0x110] sm:$0xff] %vm6481_vm5, %v6411_v8  ;;  %v6723_v22 = vld [vmem:[#allocation4 + $0x101] sm:$0xff]  ;;  %v6412_v50 = vsel %vm6204_vm12, %v5894_v0, %v6308_v20  ;;  %v2180_v23 = vpop.permute.xlu1 %2179  ;;  %4490 = vrot.lane.b32.xlu0 %v4337_v46, %s8188_s25  ;;  %v3922_v30 = vpack.c.bf16 %v3869_v9, %v3868_v18  ;;  %v4284_v57 = vld [vmem:[#allocation2 + $0x361] sm:$0xff] }
 0x39f   : > { %3756 = vst.msk [vmem:[#allocation3 + $0x3c8] sm:$0xff] %vm2257_vm14, %v3641_v41  ;;  %v7091_v59 = vsel %vm10097_vm9, %v7089_v7, %v7090_v32  ;;  %v6827_v51 = vmax.f32 %v6619_v5, %v6723_v22  ;;  %2297 = vst.msk [vmem:[#allocation3 + $0x3a8] sm:$0xff] %vm2257_vm14, %v2180_v23  ;;  %v6620_v8 = vld [vmem:[#allocation4 + $0x108] sm:$0xff]  ;;  %v10479_v22 = vld [vmem:[#allocation10] ss:$0 sm:$0xff] }
 0x3a0   : > { %4804 = vst.msk [vmem:[#allocation3 + $0x490] sm:$0xff] %vm1571_vm4, %v4752_v10  ;;  %3031 = vrot.lane.b32.xlu1 %v10313_v54, %s8188_s25  ;;  %v4057_v0 = vpop.permute.xlu0 %4056  ;;  %v4926_v63 = vld [vmem:[#allocation3 + $0x3b0] sm:$0xff] }
 0x3a1   : > { %6517 = vst.msk [vmem:[#allocation4 + $0x118] sm:$0xff] %vm6481_vm5, %v6412_v50  ;;  %6931 = vst.msk [vmem:[#allocation5 + $0x100] sm:$0xff] %vm6481_vm5, %v6827_v51 }
 0x3a2   : > { %7095 = vst.msk [vmem:[%s9943_s8 + $0x14] sm:$0xf] %vm7020_vm2, %v7091_v59  ;;  %v2597_v46 = vpop.permute.xlu1 %2596  ;;  %v4922_v34 = vld [vmem:[#allocation3 + $0x390] sm:$0xff]  ;;  %3660 = vrot.lane.b32.xlu0 %v3506_v40, %s8186_s10  ;;  %v4338_v59 = vpack.c.bf16 %v4285_v47, %v4284_v57 }
 0x3a3   : > { %4172 = vst.msk [vmem:[#allocation3 + $0x3c8] sm:$0xff] %vm2674_vm15, %v4057_v0  ;;  %2714 = vst.msk [vmem:[#allocation3 + $0x3a8] sm:$0xff] %vm2674_vm15, %v2597_v46  ;;  %5608 = vmatmul.mubr.bf16.gmra.mrb[140].mxu1 %v4922_v34 }
 0x3a4   : > { %2199 = vrot.lane.b32.xlu1 %v10291_v49, %s8186_s10  ;;  %5615 = vmatprep.mubr.bf16.mxu1 %v4926_v63  ;;  %v4473_v54 = vpop.permute.xlu0 %4472  ;;  %v4957_v49 = vld [vmem:[#allocation3 + $0x4a8] sm:$0xff] }
 0x3a5   : > { %v6724_v20 = vld [vmem:[#allocation4 + $0x109] sm:$0xff]  ;;  %4588 = vst.msk [vmem:[#allocation3 + $0x3c8] sm:$0xff] %vm3091_vm1, %v4473_v54  ;;  %v5449_v10 = vpop.f32.mrb[60].mxu1  ;;  %v3245_v63 = vld [vmem:[#allocation2 + $0x349] sm:$0xff]  ;;  %v10496_v54 = vpop.f32.mrb[200].mxu0 }
 0x3a6   : > { %v6828_v41 = vmax.f32 %v6620_v8, %v6724_v20  ;;  %v6621_v32 = vld [vmem:[#allocation4 + $0x110] sm:$0xff]  ;;  %v5450_v50 = vadd.f32 %v10479_v22, %v5449_v10  ;;  %v3014_v23 = vpop.permute.xlu1 %3013  ;;  %v5451_v40 = vpop.f32.mrb[61].mxu1  ;;  %4076 = vrot.lane.b32.xlu0 %v3922_v30, %s8187_s13  ;;  %v3244_v30 = vld [vmem:[#allocation2 + $0x341] sm:$0xff]  ;;  %v3870_v20 = vld [vmem:[#allocation2 + $0x370] sm:$0xff] }
 0x3a7   : > { %v4954_v7 = vld [vmem:[#allocation3 + $0x490] sm:$0xff]  ;;  %3131 = vst.msk [vmem:[#allocation3 + $0x3a8] sm:$0xff] %vm3091_vm1, %v3014_v23  ;;  %v5452_v18 = vpop.f32.mrb[62].mxu1 }
 0x3a8   : > { %v6725_v5 = vld [vmem:[#allocation4 + $0x111] sm:$0xff]  ;;  %7911 = vmatprep.mubr.msk.bf16.mxu0 %vm1571_vm4, %v4954_v7  ;;  %6932 = vst.msk [vmem:[#allocation5 + $0x108] sm:$0xff] %vm6481_vm5, %v6828_v41  ;;  %v5899_v9 = vadd.f32 %v10090_v31, %v5450_v50  ;;  %v5453_v0 = vadd.f32 %v10479_v22, %v5452_v18  ;;  %2616 = vrot.lane.b32.xlu1 %v10350_v21, %s8187_s13  ;;  %v5454_v46 = vpop.f32.mrb[63].mxu1  ;;  %v3643_v34 = vpop.permute.xlu0 %3642 }
 0x3a9   : > { %v6829_v51 = vmax.f32 %v6621_v32, %v6725_v5  ;;  %7912 = vmatmul.mubr.msk.bf16.gmra.mrb[212].mxu0 %vm1571_vm4, %v4957_v49  ;;  %3757 = vst.msk [vmem:[#allocation3 + $0x3e0] sm:$0xff] %vm2257_vm14, %v3643_v34  ;;  %v3298_v31 = vpack.c.bf16 %v3245_v63, %v3244_v30  ;;  %v3871_v21 = vld [vmem:[#allocation2 + $0x378] sm:$0xff] }
 0x3aa   : > { %vm6205_vm13 = vcmp.ge.f32.partialorder %v5899_v9, 0.0  ;;  %v6309_v57 = vmul.f32 0.01, %v5899_v9  ;;  %v5902_v47 = vadd.f32 %v10103_v2, %v5453_v0  ;;  %v2182_v8 = vpop.permute.xlu1 %2181  ;;  %4492 = vrot.lane.b32.xlu0 %v4338_v59, %s8188_s25  ;;  %v10501_v2 = vpop.f32.mrb[201].mxu0  ;;  %v4287_v0 = vld [vmem:[#allocation2 + $0x379] sm:$0xff] }
 0x3ab   : > { %6933 = vst.msk [vmem:[#allocation5 + $0x110] sm:$0xff] %vm6481_vm5, %v6829_v51  ;;  %v10505_v5 = vpop.f32.mrb[202].mxu0 }
 0x3ac   : > { %2298 = vst.msk [vmem:[#allocation3 + $0x3c0] sm:$0xff] %vm2257_vm14, %v2182_v8  ;;  %v6413_v41 = vsel %vm6205_vm13, %v5899_v9, %v6309_v57  ;;  %vm6206_vm0 = vcmp.ge.f32.partialorder %v5902_v47, 0.0  ;;  %v6310_v10 = vmul.f32 0.01, %v5902_v47  ;;  %3033 = vrot.lane.b32.xlu1 %v10365_v45, %s8188_s25  ;;  %v4059_v7 = vpop.permute.xlu0 %4058  ;;  %v3923_v45 = vpack.c.bf16 %v3871_v21, %v3870_v20  ;;  %v4929_v18 = vld [vmem:[#allocation3 + $0x3c8] sm:$0xff]  ;;  %v10512_v46 = vpop.f32.mrb[203].mxu0 }
 0x3ad   : > { %3350 = vst.msk [vmem:[#allocation3 + $0x4b8] sm:$0xff] %vm1571_vm4, %v3298_v31  ;;  %v5457_v32 = vpop.f32.mrb[64].mxu1  ;;  %v4286_v9 = vld [vmem:[#allocation2 + $0x371] sm:$0xff] }
 0x3ae   : > { %6518 = vst.msk [vmem:[#allocation4 + $0x120] sm:$0xff] %vm6481_vm5, %v6413_v41  ;;  %v6414_v50 = vsel %vm6206_vm0, %v5902_v47, %v6310_v10  ;;  %v5458_v23 = vadd.f32 %v10479_v22, %v5457_v32  ;;  %v2599_v40 = vpop.permute.xlu1 %2598  ;;  %v5459_v59 = vpop.f32.mrb[65].mxu1  ;;  %v4925_v49 = vld [vmem:[#allocation3 + $0x3a8] sm:$0xff]  ;;  %3662 = vrot.lane.b32.xlu0 %v10140_v43, %s8186_s10  ;;  %v4339_v31 = vpack.c.bf16 %v4287_v0, %v4286_v9  ;;  %v3247_v32 = vld [vmem:[#allocation2 + $0x359] sm:$0xff] }
 0x3af   : > { %4173 = vst.msk [vmem:[#allocation3 + $0x3e0] sm:$0xff] %vm2674_vm15, %v4059_v7  ;;  %2715 = vst.msk [vmem:[#allocation3 + $0x3c0] sm:$0xff] %vm2674_vm15, %v2599_v40  ;;  %v5460_v51 = vpop.f32.mrb[66].mxu1  ;;  %5616 = vmatmul.mubr.bf16.gmra.mrb[144].mxu1 %v4925_v49  ;;  %v4701_v20 = vld [vmem:[#allocation2 + $0x36a] sm:$0xff]  ;;  %v4702_v7 = vld [vmem:[#allocation2 + $0x372] sm:$0xff] }
 0x3b0   : > { %6519 = vst.msk [vmem:[#allocation4 + $0x128] sm:$0xff] %vm6481_vm5, %v6414_v50  ;;  %v5907_v34 = vadd.f32 %v10085_v3, %v5458_v23  ;;  %v5461_v30 = vadd.f32 %v10479_v22, %v5460_v51  ;;  %2201 = vrot.lane.b32.xlu1 %v10334_v42, %s8186_s10  ;;  %v5462_v43 = vpop.f32.mrb[67].mxu1  ;;  %5623 = vmatprep.mubr.bf16.mxu1 %v4929_v18  ;;  %v4475_v63 = vpop.permute.xlu0 %4474  ;;  %v4700_v3 = vld [vmem:[#allocation2 + $0x362] sm:$0xff]  ;;  %v4703_v50 = vld [vmem:[#allocation2 + $0x37a] sm:$0xff] }
 0x3b1   : > { %4589 = vst.msk [vmem:[#allocation3 + $0x3e0] sm:$0xff] %vm3091_vm1, %v4475_v63  ;;  %v4754_v10 = vpack.c.bf16 %v4701_v20, %v4700_v3 }
 0x3b2   : > { %vm6207_vm3 = vcmp.ge.f32.partialorder %v5907_v34, 0.0  ;;  %v6311_v57 = vmul.f32 0.01, %v5907_v34  ;;  %v5910_v47 = vadd.f32 %v10093_v37, %v5461_v30  ;;  %v3016_v8 = vpop.permute.xlu1 %3015  ;;  %4078 = vrot.lane.b32.xlu0 %v3923_v45, %s8187_s13  ;;  %v3246_v37 = vld [vmem:[#allocation2 + $0x351] sm:$0xff] }
 0x3b3   : > { %3132 = vst.msk [vmem:[#allocation3 + $0x3c0] sm:$0xff] %vm3091_vm1, %v3016_v8  ;;  %v3299_v45 = vpack.c.bf16 %v3247_v32, %v3246_v37 }
 0x3b4   : > { %v6415_v21 = vsel %vm6207_vm3, %v5907_v34, %v6311_v57  ;;  %vm6208_vm8 = vcmp.ge.f32.partialorder %v5910_v47, 0.0  ;;  %v6312_v42 = vmul.f32 0.01, %v5910_v47  ;;  %2618 = vrot.lane.b32.xlu1 %v10392_v28, %s8187_s13  ;;  %v3645_v41 = vpop.permute.xlu0 %3644  ;;  %4806 = vst.msk [vmem:[#allocation3 + $0x4c0] sm:$0xff] %vm1571_vm4, %v4754_v10  ;;  %v4755_v28 = vpack.c.bf16 %v4703_v50, %v4702_v7 }
 0x3b5   : > { %6520 = vst.msk [vmem:[#allocation4 + $0x130] sm:$0xff] %vm6481_vm5, %v6415_v21  ;;  %v6623_v23 = vld [vmem:[#allocation4 + $0x120] sm:$0xff] }
 0x3b6   : > { %3758 = vst.msk [vmem:[#allocation3 + $0x3f8] sm:$0xff] %vm2257_vm14, %v3645_v41  ;;  %v6416_v59 = vsel %vm6208_vm8, %v5910_v47, %v6312_v42  ;;  %v2184_v49 = vpop.permute.xlu1 %2183  ;;  %4494 = vrot.lane.b32.xlu0 %v4339_v31, %s8188_s25 }
 0x3b7   : > { %v6727_v40 = vld [vmem:[#allocation4 + $0x121] sm:$0xff]  ;;  %6521 = vst.msk [vmem:[#allocation4 + $0x138] sm:$0xff] %vm6481_vm5, %v6416_v59 }
 0x3b8   : > { %v6831_v51 = vmax.f32 %v6623_v23, %v6727_v40  ;;  %2299 = vst.msk [vmem:[#allocation3 + $0x3d8] sm:$0xff] %vm2257_vm14, %v2184_v49  ;;  %3035 = vrot.lane.b32.xlu1 %v10400_v17, %s8188_s25  ;;  %v4061_v18 = vpop.permute.xlu0 %4060  ;;  %v4932_v34 = vld [vmem:[#allocation3 + $0x3e0] sm:$0xff]  ;;  %v6624_v30 = vld [vmem:[#allocation4 + $0x128] sm:$0xff] }
 0x3b9   : > { %3351 = vst.msk [vmem:[#allocation3 + $0x4d0] sm:$0xff] %vm1571_vm4, %v3299_v45  ;;  %4807 = vst.msk [vmem:[#allocation3 + $0x4d8] sm:$0xff] %vm1571_vm4, %v4755_v28 }
 0x3ba   : > { %6935 = vst.msk [vmem:[#allocation5 + $0x120] sm:$0xff] %vm6481_vm5, %v6831_v51  ;;  %v2601_v9 = vpop.permute.xlu1 %2600  ;;  %v4928_v0 = vld [vmem:[#allocation3 + $0x3c0] sm:$0xff]  ;;  %v7097_v51 = vld [vmem:[#allocation5 + $0x100] ss:$2 sm:$0xff] }
 0x3bb   : > { %4174 = vst.msk [vmem:[#allocation3 + $0x3f8] sm:$0xff] %vm2674_vm15, %v4061_v18  ;;  %2716 = vst.msk [vmem:[#allocation3 + $0x3d8] sm:$0xff] %vm2674_vm15, %v2601_v9  ;;  %5624 = vmatmul.mubr.bf16.gmra.mrb[148].mxu1 %v4928_v0  ;;  %v4960_v47 = vld [vmem:[#allocation3 + $0x4c0] sm:$0xff] }
 0x3bc   : > { %v6728_v43 = vld [vmem:[#allocation4 + $0x129] sm:$0xff]  ;;  %2203 = vrot.lane.b32.xlu1 %v10380_v53, %s8186_s10  ;;  %5631 = vmatprep.mubr.bf16.mxu1 %v4932_v34  ;;  %v4477_v17 = vpop.permute.xlu0 %4476 }
 0x3bd   : > { %v6832_v63 = vmax.f32 %v6624_v30, %v6728_v43  ;;  %4590 = vst.msk [vmem:[#allocation3 + $0x3f8] sm:$0xff] %vm3091_vm1, %v4477_v17  ;;  %v5465_v57 = vpop.f32.mrb[68].mxu1  ;;  %v6625_v8 = vld [vmem:[#allocation4 + $0x130] sm:$0xff]  ;;  %7915 = vmatprep.mubr.msk.bf16.mxu0 %vm1571_vm4, %v4960_v47  ;;  %v7099_v17 = vld [vmem:[#allocation5 + $0x110] ss:$2 sm:$0xf] }
 0x3be   : > { %v6729_v31 = vld [vmem:[#allocation4 + $0x131] sm:$0xff]  ;;  %v5466_v3 = vadd.f32 %v10479_v22, %v5465_v57  ;;  %v3018_v20 = vpop.permute.xlu1 %3017  ;;  %v5467_v21 = vpop.f32.mrb[69].mxu1 }
 0x3bf   : > { %6936 = vst.msk [vmem:[#allocation5 + $0x128] sm:$0xff] %vm6481_vm5, %v6832_v63  ;;  %v6833_v42 = vmax.f32 %v6625_v8, %v6729_v31  ;;  %v5468_v53 = vpop.f32.mrb[70].mxu1 }
 0x3c0   : > { %3133 = vst.msk [vmem:[#allocation3 + $0x3d8] sm:$0xff] %vm3091_vm1, %v3018_v20  ;;  %v4963_v41 = vld [vmem:[#allocation3 + $0x4d8] sm:$0xff]  ;;  %v5915_v10 = vadd.f32 %v10129_v11, %v5466_v3  ;;  %v5469_v7 = vadd.f32 %v10479_v22, %v5468_v53  ;;  %2620 = vrot.lane.b32.xlu1 %v10430_v19, %s8187_s13  ;;  %v5470_v37 = vpop.f32.mrb[71].mxu1  ;;  %v3647_v32 = vpop.permute.xlu0 %3646 }
 0x3c1   : > { %7916 = vmatmul.mubr.msk.bf16.gmra.mrb[216].mxu0 %vm1571_vm4, %v4963_v41  ;;  %6937 = vst.msk [vmem:[#allocation5 + $0x130] sm:$0xff] %vm6481_vm5, %v6833_v42  ;;  %v10553_v11 = vpop.f32.mrb[204].mxu0 }
 0x3c2   : > { %3759 = vst.msk [vmem:[#allocation3 + $0x410] sm:$0xff] %vm2257_vm14, %v3647_v32  ;;  %vm6209_vm10 = vcmp.ge.f32.partialorder %v5915_v10, 0.0  ;;  %v6313_v50 = vmul.f32 0.01, %v5915_v10  ;;  %v5918_v23 = vadd.f32 %v10138_v58, %v5469_v7  ;;  %v2186_v40 = vpop.permute.xlu1 %2185  ;;  %v10557_v45 = vpop.f32.mrb[205].mxu0 }
 0x3c3   : > { %2300 = vst.msk [vmem:[#allocation3 + $0x3f0] sm:$0xff] %vm2257_vm14, %v2186_v40  ;;  %v10561_v58 = vpop.f32.mrb[206].mxu0 }
 0x3c4   : > { %v6417_v59 = vsel %vm6209_vm10, %v5915_v10, %v6313_v50  ;;  %vm6210_vm11 = vcmp.ge.f32.partialorder %v5918_v23, 0.0  ;;  %v6314_v19 = vmul.f32 0.01, %v5918_v23  ;;  %3037 = vrot.lane.b32.xlu1 %v10441_v27, %s8188_s25  ;;  %v4063_v49 = vpop.permute.xlu0 %4062  ;;  %v4935_v57 = vld [vmem:[#allocation3 + $0x3f8] sm:$0xff]  ;;  %v10566_v47 = vpop.f32.mrb[207].mxu0 }
 0x3c5   : > { %6522 = vst.msk [vmem:[#allocation4 + $0x140] sm:$0xff] %vm6481_vm5, %v6417_v59  ;;  %v5473_v28 = vpop.f32.mrb[72].mxu1 }
 0x3c6   : > { %4175 = vst.msk [vmem:[#allocation3 + $0x410] sm:$0xff] %vm2674_vm15, %v4063_v49  ;;  %v7101_v18 = vld [vmem:[#allocation5 + $0x120] ss:$2 sm:$0xff]  ;;  %v6418_v9 = vsel %vm6210_vm11, %v5918_v23, %v6314_v19  ;;  %v5474_v0 = vadd.f32 %v10479_v22, %v5473_v28  ;;  %v2603_v34 = vpop.permute.xlu1 %2602  ;;  %v5475_v30 = vpop.f32.mrb[73].mxu1 }
 0x3c7   : > { %v4931_v43 = vld [vmem:[#allocation3 + $0x3d8] sm:$0xff]  ;;  %v7104_v27 = vmax.f32 %v7097_v51, %v7101_v18  ;;  %6523 = vst.msk [vmem:[#allocation4 + $0x148] sm:$0xff] %vm6481_vm5, %v6418_v9  ;;  %v5476_v63 = vpop.f32.mrb[74].mxu1 }
 0x3c8   : > { %2717 = vst.msk [vmem:[#allocation3 + $0x3f0] sm:$0xff] %vm2674_vm15, %v2603_v34  ;;  %5632 = vmatmul.mubr.bf16.gmra.mrb[152].mxu1 %v4931_v43  ;;  %v7103_v8 = vld [vmem:[#allocation5 + $0x130] ss:$2 sm:$0xf]  ;;  %v5923_v31 = vadd.f32 %v10125_v38, %v5474_v0  ;;  %v5477_v3 = vadd.f32 %v10479_v22, %v5476_v63  ;;  %v5478_v20 = vpop.f32.mrb[75].mxu1  ;;  %v4479_v21 = vpop.permute.xlu0 %4478 }
 0x3c9   : > { %5639 = vmatprep.mubr.bf16.mxu1 %v4935_v57  ;;  %v7582_v42 = vpack.c.bf16 %v7104_v27, %v7104_v27  ;;  %v7105_v53 = vmax.f32 %v7099_v17, %v7103_v8  ;;  %4591 = vst.msk [vmem:[#allocation3 + $0x410] sm:$0xff] %vm3091_vm1, %v4479_v21 }
 0x3ca   : > { %vm6211_vm4 = vcmp.ge.f32.partialorder %v5923_v31, 0.0  ;;  %v6315_v41 = vmul.f32 0.01, %v5923_v31  ;;  %v5926_v10 = vadd.f32 %v10134_v6, %v5477_v3  ;;  %v3020_v7 = vpop.permute.xlu1 %3019 }
 0x3cb   : > { %7114 = vst.msk [vmem:[%s9943_s8 + $0x18] sm:$0xf] %vm7020_vm2, %v7582_v42  ;;  %v7583_v37 = vpack.c.bf16 %v7105_v53, %v7105_v53 }
 0x3cc   : > { %3134 = vst.msk [vmem:[#allocation3 + $0x3f0] sm:$0xff] %vm3091_vm1, %v3020_v7  ;;  %v6419_v38 = vsel %vm6211_vm4, %v5923_v31, %v6315_v41  ;;  %vm6212_vm12 = vcmp.ge.f32.partialorder %v5926_v10, 0.0  ;;  %v6316_v32 = vmul.f32 0.01, %v5926_v10  ;;  %v3649_v50 = vpop.permute.xlu0 %3648  ;;  %v6627_v40 = vld [vmem:[#allocation4 + $0x140] sm:$0xff] }
 0x3cd   : > { %7115 = vst.msk [vmem:[%s9943_s8 + $0x1c] sm:$0x3] %vm7022_vm7, %v7583_v37  ;;  %v5481_v23 = vpop.f32.mrb[76].mxu1 }
 0x3ce   : > { %6524 = vst.msk [vmem:[#allocation4 + $0x150] sm:$0xff] %vm6481_vm5, %v6419_v38  ;;  %v6731_v59 = vld [vmem:[#allocation4 + $0x141] sm:$0xff]  ;;  %v6420_v6 = vsel %vm6212_vm12, %v5926_v10, %v6316_v32  ;;  %v5482_v19 = vadd.f32 %v10479_v22, %v5481_v23  ;;  %v2188_v49 = vpop.permute.xlu1 %2187  ;;  %v5483_v28 = vpop.f32.mrb[77].mxu1 }
 0x3cf   : > { %3760 = vst.msk [vmem:[#allocation3 + $0x428] sm:$0xff] %vm2257_vm14, %v3649_v50  ;;  %v6835_v51 = vmax.f32 %v6627_v40, %v6731_v59  ;;  %2301 = vst.msk [vmem:[#allocation3 + $0x408] sm:$0xff] %vm2257_vm14, %v2188_v49  ;;  %v5484_v18 = vpop.f32.mrb[78].mxu1  ;;  %v6628_v8 = vld [vmem:[#allocation4 + $0x148] sm:$0xff] }
 0x3d0   : > { %6525 = vst.msk [vmem:[#allocation4 + $0x158] sm:$0xff] %vm6481_vm5, %v6420_v6  ;;  %v5931_v9 = vadd.f32 %v10165_v13, %v5482_v19  ;;  %v5485_v0 = vadd.f32 %v10479_v22, %v5484_v18  ;;  %v5486_v34 = vpop.f32.mrb[79].mxu1  ;;  %v4065_v30 = vpop.permute.xlu0 %4064  ;;  %v4938_v57 = vld [vmem:[#allocation3 + $0x410] sm:$0xff] }
 0x3d1   : > { %6939 = vst.msk [vmem:[#allocation5 + $0x140] sm:$0xff] %vm6481_vm5, %v6835_v51 }
 0x3d2   : > { %4176 = vst.msk [vmem:[#allocation3 + $0x428] sm:$0xff] %vm2674_vm15, %v4065_v30  ;;  %vm6213_vm13 = vcmp.ge.f32.partialorder %v5931_v9, 0.0  ;;  %v6317_v43 = vmul.f32 0.01, %v5931_v9  ;;  %v5934_v17 = vadd.f32 %v10172_v56, %v5485_v0  ;;  %v2605_v27 = vpop.permute.xlu1 %2604 }
 0x3d3   : > { %v4934_v63 = vld [vmem:[#allocation3 + $0x3f0] sm:$0xff]  ;;  %2718 = vst.msk [vmem:[#allocation3 + $0x408] sm:$0xff] %vm2674_vm15, %v2605_v27 }
 0x3d4   : > { %5640 = vmatmul.mubr.bf16.gmra.mrb[156].mxu1 %v4934_v63  ;;  %v6421_v31 = vsel %vm6213_vm13, %v5931_v9, %v6317_v43  ;;  %vm6214_vm0 = vcmp.ge.f32.partialorder %v5934_v17, 0.0  ;;  %v6318_v3 = vmul.f32 0.01, %v5934_v17  ;;  %v4481_v20 = vpop.permute.xlu0 %4480 }
 0x3d5   : > { %v6732_v13 = vld [vmem:[#allocation4 + $0x149] sm:$0xff]  ;;  %5647 = vmatprep.mubr.bf16.mxu1 %v4938_v57  ;;  %6526 = vst.msk [vmem:[#allocation4 + $0x160] sm:$0xff] %vm6481_vm5, %v6421_v31  ;;  %v5489_v42 = vpop.f32.mrb[80].mxu1 }
 0x3d6   : > { %v6836_v21 = vmax.f32 %v6628_v8, %v6732_v13  ;;  %4592 = vst.msk [vmem:[#allocation3 + $0x428] sm:$0xff] %vm3091_vm1, %v4481_v20  ;;  %v6629_v56 = vld [vmem:[#allocation4 + $0x150] sm:$0xff]  ;;  %v6422_v41 = vsel %vm6214_vm0, %v5934_v17, %v6318_v3  ;;  %v5490_v10 = vadd.f32 %v10479_v22, %v5489_v42  ;;  %v3022_v7 = vpop.permute.xlu1 %3021  ;;  %v5491_v37 = vpop.f32.mrb[81].mxu1 }
 0x3d7   : > { %v6733_v53 = vld [vmem:[#allocation4 + $0x151] sm:$0xff]  ;;  %6527 = vst.msk [vmem:[#allocation4 + $0x168] sm:$0xff] %vm6481_vm5, %v6422_v41  ;;  %v5492_v32 = vpop.f32.mrb[82].mxu1 }
 0x3d8   : > { %6940 = vst.msk [vmem:[#allocation5 + $0x148] sm:$0xff] %vm6481_vm5, %v6836_v21  ;;  %v6837_v38 = vmax.f32 %v6629_v56, %v6733_v53  ;;  %v5939_v50 = vadd.f32 %v10160_v4, %v5490_v10  ;;  %v5493_v23 = vadd.f32 %v10479_v22, %v5492_v32  ;;  %v5494_v40 = vpop.f32.mrb[83].mxu1  ;;  %v3651_v59 = vpop.permute.xlu0 %3650 }
 0x3d9   : > { %3135 = vst.msk [vmem:[#allocation3 + $0x408] sm:$0xff] %vm3091_vm1, %v3022_v7  ;;  %v10602_v4 = vpop.f32.mrb[208].mxu0 }
 0x3da   : > { %6941 = vst.msk [vmem:[#allocation5 + $0x150] sm:$0xff] %vm6481_vm5, %v6837_v38  ;;  %vm6215_vm3 = vcmp.ge.f32.partialorder %v5939_v50, 0.0  ;;  %v6319_v6 = vmul.f32 0.01, %v5939_v50  ;;  %v5942_v19 = vadd.f32 %v10168_v35, %v5493_v23  ;;  %v2190_v49 = vpop.permute.xlu1 %2189  ;;  %v10604_v43 = vpop.f32.mrb[209].mxu0 }
 0x3db   : > { %3761 = vst.msk [vmem:[#allocation3 + $0x440] sm:$0xff] %vm2257_vm14, %v3651_v59  ;;  %2302 = vst.msk [vmem:[#allocation3 + $0x420] sm:$0xff] %vm2257_vm14, %v2190_v49  ;;  %v10608_v27 = vpop.f32.mrb[210].mxu0 }
 0x3dc   : > { %v6423_v28 = vsel %vm6215_vm3, %v5939_v50, %v6319_v6  ;;  %vm6216_vm8 = vcmp.ge.f32.partialorder %v5942_v19, 0.0  ;;  %v6320_v51 = vmul.f32 0.01, %v5942_v19  ;;  %v4067_v18 = vpop.permute.xlu0 %4066  ;;  %v6631_v9 = vld [vmem:[#allocation4 + $0x160] sm:$0xff]  ;;  %v10610_v8 = vpop.f32.mrb[211].mxu0 }
 0x3dd   : > { %6528 = vst.msk [vmem:[#allocation4 + $0x170] sm:$0xff] %vm6481_vm5, %v6423_v28  ;;  %v4941_v63 = vld [vmem:[#allocation3 + $0x428] sm:$0xff] }
 0x3de   : > { %4177 = vst.msk [vmem:[#allocation3 + $0x440] sm:$0xff] %vm2674_vm15, %v4067_v18  ;;  %v6735_v0 = vld [vmem:[#allocation4 + $0x161] sm:$0xff]  ;;  %v6424_v34 = vsel %vm6216_vm8, %v5942_v19, %v6320_v51  ;;  %v2607_v30 = vpop.permute.xlu1 %2606 }
 0x3df   : > { %v6839_v35 = vmax.f32 %v6631_v9, %v6735_v0  ;;  %6529 = vst.msk [vmem:[#allocation4 + $0x178] sm:$0xff] %vm6481_vm5, %v6424_v34  ;;  %v6632_v31 = vld [vmem:[#allocation4 + $0x168] sm:$0xff] }
 0x3e0   : > { %2719 = vst.msk [vmem:[#allocation3 + $0x420] sm:$0xff] %vm2674_vm15, %v2607_v30  ;;  %v4937_v17 = vld [vmem:[#allocation3 + $0x408] sm:$0xff]  ;;  %v4483_v57 = vpop.permute.xlu0 %4482 }
 0x3e1   : > { %5648 = vmatmul.mubr.bf16.gmra.mrb[160].mxu1 %v4937_v17  ;;  %6943 = vst.msk [vmem:[#allocation5 + $0x160] sm:$0xff] %vm6481_vm5, %v6839_v35  ;;  %v7117_v6 = vld [vmem:[#allocation5 + $0x140] ss:$2 sm:$0xff]  ;;  %v7119_v9 = vld [vmem:[#allocation5 + $0x150] ss:$2 sm:$0xf] }
 0x3e2   : > { %5655 = vmatprep.mubr.bf16.mxu1 %v4941_v63  ;;  %4593 = vst.msk [vmem:[#allocation3 + $0x440] sm:$0xff] %vm3091_vm1, %v4483_v57  ;;  %v3024_v13 = vpop.permute.xlu1 %3023 }
 0x3e3   : > { %3136 = vst.msk [vmem:[#allocation3 + $0x420] sm:$0xff] %vm3091_vm1, %v3024_v13 }
 0x3e4   : > { %v6736_v3 = vld [vmem:[#allocation4 + $0x169] sm:$0xff]  ;;  %v3653_v20 = vpop.permute.xlu0 %3652 }
 0x3e5   : > { %v6840_v21 = vmax.f32 %v6632_v31, %v6736_v3  ;;  %3762 = vst.msk [vmem:[#allocation3 + $0x458] sm:$0xff] %vm2257_vm14, %v3653_v20  ;;  %v6633_v42 = vld [vmem:[#allocation4 + $0x170] sm:$0xff] }
 0x3e6   : > { %v6737_v56 = vld [vmem:[#allocation4 + $0x171] sm:$0xff]  ;;  %v2192_v53 = vpop.permute.xlu1 %2191 }
 0x3e7   : > { %6944 = vst.msk [vmem:[#allocation5 + $0x168] sm:$0xff] %vm6481_vm5, %v6840_v21  ;;  %v6841_v41 = vmax.f32 %v6633_v42, %v6737_v56 }
 0x3e8   : > { %2303 = vst.msk [vmem:[#allocation3 + $0x438] sm:$0xff] %vm2257_vm14, %v2192_v53  ;;  %v4069_v10 = vpop.permute.xlu0 %4068 }
 0x3e9   : > { %6945 = vst.msk [vmem:[#allocation5 + $0x170] sm:$0xff] %vm6481_vm5, %v6841_v41  ;;  %v4944_v32 = vld [vmem:[#allocation3 + $0x440] sm:$0xff] }
 0x3ea   : > { %4178 = vst.msk [vmem:[#allocation3 + $0x458] sm:$0xff] %vm2674_vm15, %v4069_v10  ;;  %v2609_v7 = vpop.permute.xlu1 %2608  ;;  %v4940_v37 = vld [vmem:[#allocation3 + $0x420] sm:$0xff] }
 0x3eb   : > { %2720 = vst.msk [vmem:[#allocation3 + $0x438] sm:$0xff] %vm2674_vm15, %v2609_v7  ;;  %5656 = vmatmul.mubr.bf16.gmra.mrb[164].mxu1 %v4940_v37 }
 0x3ec   : > { %v5497_v38 = vpop.f32.mrb[84].mxu1  ;;  %5663 = vmatprep.mubr.bf16.mxu1 %v4944_v32  ;;  %v4485_v40 = vpop.permute.xlu0 %4484 }
 0x3ed   : > { %v5498_v50 = vadd.f32 %v10479_v22, %v5497_v38  ;;  %v5499_v23 = vpop.f32.mrb[85].mxu1  ;;  %4594 = vst.msk [vmem:[#allocation3 + $0x458] sm:$0xff] %vm3091_vm1, %v4485_v40 }
 0x3ee   : > { %v5500_v59 = vpop.f32.mrb[86].mxu1  ;;  %v7121_v19 = vld [vmem:[#allocation5 + $0x160] ss:$2 sm:$0xff]  ;;  %v3026_v51 = vpop.permute.xlu1 %3025 }
 0x3ef   : > { %v5947_v49 = vadd.f32 %v10195_v39, %v5498_v50  ;;  %v5501_v28 = vadd.f32 %v10479_v22, %v5500_v59  ;;  %v5502_v18 = vpop.f32.mrb[87].mxu1  ;;  %v7124_v0 = vmax.f32 %v7117_v6, %v7121_v19  ;;  %3137 = vst.msk [vmem:[#allocation3 + $0x438] sm:$0xff] %vm3091_vm1, %v3026_v51 }
 0x3f0   : > { %v7123_v34 = vld [vmem:[#allocation5 + $0x170] ss:$2 sm:$0xf]  ;;  %v3655_v17 = vpop.permute.xlu0 %3654 }
 0x3f1   : > { %vm6217_vm10 = vcmp.ge.f32.partialorder %v5947_v49, 0.0  ;;  %v6321_v30 = vmul.f32 0.01, %v5947_v49  ;;  %v5950_v35 = vadd.f32 %v10204_v12, %v5501_v28  ;;  %v7584_v63 = vpack.c.bf16 %v7124_v0, %v7124_v0  ;;  %3763 = vst.msk [vmem:[#allocation3 + $0x470] sm:$0xff] %vm2257_vm14, %v3655_v17 }
 0x3f2   : > { %v7125_v57 = vmax.f32 %v7119_v9, %v7123_v34  ;;  %v2194_v31 = vpop.permute.xlu1 %2193 }
 0x3f3   : > { %v6425_v39 = vsel %vm6217_vm10, %v5947_v49, %v6321_v30  ;;  %vm6218_vm11 = vcmp.ge.f32.partialorder %v5950_v35, 0.0  ;;  %v6322_v13 = vmul.f32 0.01, %v5950_v35  ;;  %v7132_v3 = vrot.slane %v7584_v63, 6  ;;  %2304 = vst.msk [vmem:[#allocation3 + $0x450] sm:$0xff] %vm2257_vm14, %v2194_v31 }
 0x3f4   : > { %v7585_v20 = vpack.c.bf16 %v7125_v57, %v7125_v57  ;;  %6530 = vst.msk [vmem:[#allocation4 + $0x180] sm:$0xff] %vm6481_vm5, %v6425_v39  ;;  %v4071_v42 = vpop.permute.xlu0 %4070  ;;  %v4947_v7 = vld [vmem:[#allocation3 + $0x458] sm:$0xff] }
 0x3f5   : > { %v6426_v21 = vsel %vm6218_vm11, %v5950_v35, %v6322_v13  ;;  %v7133_v12 = vrot.slane %v7132_v3, 4  ;;  %7138 = vst.msk [vmem:[%s9943_s8 + $0x1c] sm:$0xc] %vm7049_vm6, %v7132_v3 }
 0x3f6   : > { %v7134_v56 = vrot.slane %v7585_v20, 6  ;;  %6531 = vst.msk [vmem:[#allocation4 + $0x188] sm:$0xff] %vm6481_vm5, %v6426_v21  ;;  %v2611_v53 = vpop.permute.xlu1 %2610  ;;  %v4943_v41 = vld [vmem:[#allocation3 + $0x438] sm:$0xff] }
 0x3f7   : > { %4179 = vst.msk [vmem:[#allocation3 + $0x470] sm:$0xff] %vm2674_vm15, %v4071_v42  ;;  %2721 = vst.msk [vmem:[#allocation3 + $0x450] sm:$0xff] %vm2674_vm15, %v2611_v53  ;;  %5664 = vmatmul.mubr.bf16.gmra.mrb[168].mxu1 %v4943_v41 }
 0x3f8   : > { %v7135_v10 = vsel %vm10097_vm9, %v7133_v12, %v7134_v56  ;;  %5671 = vmatprep.mubr.bf16.mxu1 %v4947_v7  ;;  %v4487_v37 = vpop.permute.xlu0 %4486 }
 0x3f9   : > { %7139 = vst.msk [vmem:[%s9943_s8 + $0x20] sm:$0xf] %vm7020_vm2, %v7135_v10 }
 0x3fa   : > { %4595 = vst.msk [vmem:[#allocation3 + $0x470] sm:$0xff] %vm3091_vm1, %v4487_v37  ;;  %v3028_v38 = vpop.permute.xlu1 %3027 }
 0x3fb   : > { %3138 = vst.msk [vmem:[#allocation3 + $0x450] sm:$0xff] %vm3091_vm1, %v3028_v38  ;;  %v6635_v50 = vld [vmem:[#allocation4 + $0x180] sm:$0xff] }
 0x3fc   : > { %v5505_v32 = vpop.f32.mrb[88].mxu1  ;;  %v3657_v6 = vpop.permute.xlu0 %3656 }
 0x3fd   : > { %v6739_v23 = vld [vmem:[#allocation4 + $0x181] sm:$0xff]  ;;  %v5506_v40 = vadd.f32 %v10479_v22, %v5505_v32  ;;  %v5507_v59 = vpop.f32.mrb[89].mxu1  ;;  %3764 = vst.msk [vmem:[#allocation3 + $0x488] sm:$0xff] %vm2257_vm14, %v3657_v6 }
 0x3fe   : > { %v6843_v19 = vmax.f32 %v6635_v50, %v6739_v23  ;;  %v5508_v49 = vpop.f32.mrb[90].mxu1  ;;  %v2196_v18 = vpop.permute.xlu1 %2195  ;;  %v6636_v7 = vld [vmem:[#allocation4 + $0x188] sm:$0xff] }
 0x3ff   : > { %v5955_v28 = vadd.f32 %v10190_v29, %v5506_v40  ;;  %v5509_v51 = vadd.f32 %v10479_v22, %v5508_v49  ;;  %v5510_v9 = vpop.f32.mrb[91].mxu1  ;;  %2305 = vst.msk [vmem:[#allocation3 + $0x468] sm:$0xff] %vm2257_vm14, %v2196_v18 }
 0x400   : > { %6947 = vst.msk [vmem:[#allocation5 + $0x180] sm:$0xff] %vm6481_vm5, %v6843_v19  ;;  %v4073_v30 = vpop.permute.xlu0 %4072 }
 0x401   : > { %vm6219_vm4 = vcmp.ge.f32.partialorder %v5955_v28, 0.0  ;;  %v6323_v0 = vmul.f32 0.01, %v5955_v28  ;;  %v5958_v34 = vadd.f32 %v10198_v24, %v5509_v51  ;;  %4180 = vst.msk [vmem:[#allocation3 + $0x488] sm:$0xff] %vm2674_vm15, %v4073_v30  ;;  %v4950_v39 = vld [vmem:[#allocation3 + $0x470] sm:$0xff] }
 0x402   : > { %v2613_v63 = vpop.permute.xlu1 %2612  ;;  %v4946_v29 = vld [vmem:[#allocation3 + $0x450] sm:$0xff] }
 0x403   : > { %v6427_v35 = vsel %vm6219_vm4, %v5955_v28, %v6323_v0  ;;  %vm6220_vm12 = vcmp.ge.f32.partialorder %v5958_v34, 0.0  ;;  %v6324_v17 = vmul.f32 0.01, %v5958_v34  ;;  %2722 = vst.msk [vmem:[#allocation3 + $0x468] sm:$0xff] %vm2674_vm15, %v2613_v63  ;;  %5672 = vmatmul.mubr.bf16.gmra.mrb[172].mxu1 %v4946_v29 }
 0x404   : > { %6532 = vst.msk [vmem:[#allocation4 + $0x190] sm:$0xff] %vm6481_vm5, %v6427_v35  ;;  %v5513_v57 = vpop.f32.mrb[92].mxu1  ;;  %5679 = vmatprep.mubr.bf16.mxu1 %v4950_v39  ;;  %v4489_v24 = vpop.permute.xlu0 %4488 }
 0x405   : > { %v6428_v13 = vsel %vm6220_vm12, %v5958_v34, %v6324_v17  ;;  %v5514_v31 = vadd.f32 %v10479_v22, %v5513_v57  ;;  %v5515_v3 = vpop.f32.mrb[93].mxu1  ;;  %4596 = vst.msk [vmem:[#allocation3 + $0x488] sm:$0xff] %vm3091_vm1, %v4489_v24 }
 0x406   : > { %6533 = vst.msk [vmem:[#allocation4 + $0x198] sm:$0xff] %vm6481_vm5, %v6428_v13  ;;  %v5516_v20 = vpop.f32.mrb[94].mxu1  ;;  %v3030_v12 = vpop.permute.xlu1 %3029 }
 0x407   : > { %v5963_v21 = vadd.f32 %v10224_v62, %v5514_v31  ;;  %v5517_v42 = vadd.f32 %v10479_v22, %v5516_v20  ;;  %v5518_v56 = vpop.f32.mrb[95].mxu1  ;;  %3139 = vst.msk [vmem:[#allocation3 + $0x468] sm:$0xff] %vm3091_vm1, %v3030_v12 }
 0x408   : > { %v3659_v10 = vpop.permute.xlu0 %3658 }
 0x409   : > { %vm6221_vm13 = vcmp.ge.f32.partialorder %v5963_v21, 0.0  ;;  %v6325_v53 = vmul.f32 0.01, %v5963_v21  ;;  %v5966_v41 = vadd.f32 %v10231_v55, %v5517_v42  ;;  %3765 = vst.msk [vmem:[#allocation3 + $0x4a0] sm:$0xff] %vm2257_vm14, %v3659_v10 }
 0x40a   : > { %v2198_v50 = vpop.permute.xlu1 %2197 }
 0x40b   : > { %v6740_v37 = vld [vmem:[#allocation4 + $0x189] sm:$0xff]  ;;  %v6429_v38 = vsel %vm6221_vm13, %v5963_v21, %v6325_v53  ;;  %vm6222_vm0 = vcmp.ge.f32.partialorder %v5966_v41, 0.0  ;;  %v6326_v32 = vmul.f32 0.01, %v5966_v41  ;;  %2306 = vst.msk [vmem:[#allocation3 + $0x480] sm:$0xff] %vm2257_vm14, %v2198_v50 }
 0x40c   : > { %v6844_v62 = vmax.f32 %v6636_v7, %v6740_v37  ;;  %6534 = vst.msk [vmem:[#allocation4 + $0x1a0] sm:$0xff] %vm6481_vm5, %v6429_v38  ;;  %v5521_v23 = vpop.f32.mrb[96].mxu1  ;;  %v6637_v40 = vld [vmem:[#allocation4 + $0x190] sm:$0xff]  ;;  %v4075_v49 = vpop.permute.xlu0 %4074  ;;  %v4953_v18 = vld [vmem:[#allocation3 + $0x488] sm:$0xff] }
 0x40d   : > { %v6741_v59 = vld [vmem:[#allocation4 + $0x191] sm:$0xff]  ;;  %v6430_v6 = vsel %vm6222_vm0, %v5966_v41, %v6326_v32  ;;  %v5522_v55 = vadd.f32 %v10479_v22, %v5521_v23  ;;  %v5523_v19 = vpop.f32.mrb[97].mxu1  ;;  %4181 = vst.msk [vmem:[#allocation3 + $0x4a0] sm:$0xff] %vm2674_vm15, %v4075_v49  ;;  %v10955_v37 = vld [vmem:[#allocation15_spill] sm:$0xff] }
 0x40e   : > { %6948 = vst.msk [vmem:[#allocation5 + $0x188] sm:$0xff] %vm6481_vm5, %v6844_v62  ;;  %v6845_v28 = vmax.f32 %v6637_v40, %v6741_v59  ;;  %6535 = vst.msk [vmem:[#allocation4 + $0x1a8] sm:$0xff] %vm6481_vm5, %v6430_v6  ;;  %v5524_v51 = vpop.f32.mrb[98].mxu1  ;;  %v2615_v34 = vpop.permute.xlu1 %2614  ;;  %v4949_v35 = vld [vmem:[#allocation3 + $0x468] sm:$0xff] }
 0x40f   : > { %v5971_v9 = vadd.f32 %v10218_v52, %v5522_v55  ;;  %v5525_v0 = vadd.f32 %v10479_v22, %v5524_v51  ;;  %v5526_v30 = vpop.f32.mrb[99].mxu1  ;;  %2723 = vst.msk [vmem:[#allocation3 + $0x480] sm:$0xff] %vm2674_vm15, %v2615_v34  ;;  %5680 = vmatmul.mubr.bf16.gmra.mrb[176].mxu1 %v4949_v35  ;;  %v10956_v35 = vld [vmem:[#allocation13_spill] sm:$0xff] }
 0x410   : > { %6949 = vst.msk [vmem:[#allocation5 + $0x190] sm:$0xff] %vm6481_vm5, %v6845_v28  ;;  %5687 = vmatprep.mubr.bf16.mxu1 %v4953_v18  ;;  %v4491_v29 = vpop.permute.xlu0 %4490 }
 0x411   : > { %vm6223_vm3 = vcmp.ge.f32.partialorder %v5971_v9, 0.0  ;;  %v6327_v17 = vmul.f32 0.01, %v5971_v9  ;;  %v5974_v63 = vadd.f32 %v10227_v61, %v5525_v0  ;;  %4597 = vst.msk [vmem:[#allocation3 + $0x4a0] sm:$0xff] %vm3091_vm1, %v4491_v29 }
 0x412   : > { %v3032_v39 = vpop.permute.xlu1 %3031 }
 0x413   : > { %v6431_v57 = vsel %vm6223_vm3, %v5971_v9, %v6327_v17  ;;  %vm6224_vm8 = vcmp.ge.f32.partialorder %v5974_v63, 0.0  ;;  %v6328_v52 = vmul.f32 0.01, %v5974_v63  ;;  %3140 = vst.msk [vmem:[#allocation3 + $0x480] sm:$0xff] %vm3091_vm1, %v3032_v39  ;;  %v6639_v31 = vld [vmem:[#allocation4 + $0x1a0] sm:$0xff] }
 0x414   : > { %6536 = vst.msk [vmem:[#allocation4 + $0x1b0] sm:$0xff] %vm6481_vm5, %v6431_v57  ;;  %v5529_v13 = vpop.f32.mrb[100].mxu1  ;;  %v3661_v61 = vpop.permute.xlu0 %3660  ;;  %v10957_v39 = vld [vmem:[#allocation14_spill] sm:$0xff] }
 0x415   : > { %v6743_v3 = vld [vmem:[#allocation4 + $0x1a1] sm:$0xff]  ;;  %v6432_v24 = vsel %vm6224_vm8, %v5974_v63, %v6328_v52  ;;  %v5530_v20 = vadd.f32 %v10479_v22, %v5529_v13  ;;  %v5531_v21 = vpop.f32.mrb[101].mxu1  ;;  %3766 = vst.msk [vmem:[#allocation3 + $0x4b8] sm:$0xff] %vm2257_vm14, %v3661_v61 }
 0x416   : > { %v6847_v42 = vmax.f32 %v6639_v31, %v6743_v3  ;;  %6537 = vst.msk [vmem:[#allocation4 + $0x1b8] sm:$0xff] %vm6481_vm5, %v6432_v24  ;;  %v5532_v12 = vpop.f32.mrb[102].mxu1  ;;  %v2200_v41 = vpop.permute.xlu1 %2199  ;;  %v6640_v62 = vld [vmem:[#allocation4 + $0x1a8] sm:$0xff] }
 0x417   : > { %v5979_v56 = vadd.f32 %v10252_v48, %v5530_v20  ;;  %v5533_v53 = vadd.f32 %v10479_v22, %v5532_v12  ;;  %v5534_v10 = vpop.f32.mrb[103].mxu1  ;;  %2307 = vst.msk [vmem:[#allocation3 + $0x498] sm:$0xff] %vm2257_vm14, %v2200_v41  ;;  %v7141_v21 = vld [vmem:[#allocation5 + $0x180] ss:$2 sm:$0xff] }
 0x418   : > { %6951 = vst.msk [vmem:[#allocation5 + $0x1a0] sm:$0xff] %vm6481_vm5, %v6847_v42  ;;  %v4077_v32 = vpop.permute.xlu0 %4076  ;;  %v4956_v50 = vld [vmem:[#allocation3 + $0x4a0] sm:$0xff] }
 0x419   : > { %vm6225_vm10 = vcmp.ge.f32.partialorder %v5979_v56, 0.0  ;;  %v6329_v7 = vmul.f32 0.01, %v5979_v56  ;;  %v5982_v38 = vadd.f32 %v10955_v37, %v5533_v53  ;;  %4182 = vst.msk [vmem:[#allocation3 + $0x4b8] sm:$0xff] %vm2674_vm15, %v4077_v32  ;;  %v10696_v53 = vld [vmem:[#allocation10] ss:$0 sm:$0xff] }
 0x41a   : > { %v2617_v59 = vpop.permute.xlu1 %2616  ;;  %v4952_v6 = vld [vmem:[#allocation3 + $0x480] sm:$0xff]  ;;  %v7143_v37 = vld [vmem:[#allocation5 + $0x190] ss:$2 sm:$0xf] }
 0x41b   : > { %v6744_v23 = vld [vmem:[#allocation4 + $0x1a9] sm:$0xff]  ;;  %v6433_v40 = vsel %vm6225_vm10, %v5979_v56, %v6329_v7  ;;  %vm6226_vm11 = vcmp.ge.f32.partialorder %v5982_v38, 0.0  ;;  %v6330_v48 = vmul.f32 0.01, %v5982_v38  ;;  %2724 = vst.msk [vmem:[#allocation3 + $0x498] sm:$0xff] %vm2674_vm15, %v2617_v59  ;;  %5688 = vmatmul.mubr.bf16.gmra.mrb[180].mxu1 %v4952_v6 }
 0x41c   : > { %v6848_v55 = vmax.f32 %v6640_v62, %v6744_v23  ;;  %6538 = vst.msk [vmem:[#allocation4 + $0x1c0] sm:$0xff] %vm6481_vm5, %v6433_v40  ;;  %v5537_v19 = vpop.f32.mrb[104].mxu1  ;;  %v6641_v49 = vld [vmem:[#allocation4 + $0x1b0] sm:$0xff]  ;;  %5695 = vmatprep.mubr.bf16.mxu1 %v4956_v50  ;;  %v4493_v0 = vpop.permute.xlu0 %4492 }
 0x41d   : > { %v6745_v28 = vld [vmem:[#allocation4 + $0x1b1] sm:$0xff]  ;;  %v6434_v51 = vsel %vm6226_vm11, %v5982_v38, %v6330_v48  ;;  %v5538_v18 = vadd.f32 %v10479_v22, %v5537_v19  ;;  %v5539_v9 = vpop.f32.mrb[105].mxu1  ;;  %4598 = vst.msk [vmem:[#allocation3 + $0x4b8] sm:$0xff] %vm3091_vm1, %v4493_v0 }
 0x41e   : > { %6952 = vst.msk [vmem:[#allocation5 + $0x1a8] sm:$0xff] %vm6481_vm5, %v6848_v55  ;;  %v6849_v34 = vmax.f32 %v6641_v49, %v6745_v28  ;;  %6539 = vst.msk [vmem:[#allocation4 + $0x1c8] sm:$0xff] %vm6481_vm5, %v6434_v51  ;;  %v5540_v30 = vpop.f32.mrb[106].mxu1  ;;  %v3034_v29 = vpop.permute.xlu1 %3033 }
 0x41f   : > { %v5987_v17 = vadd.f32 %v10956_v35, %v5538_v18  ;;  %v5541_v63 = vadd.f32 %v10479_v22, %v5540_v30  ;;  %v5542_v57 = vpop.f32.mrb[107].mxu1  ;;  %3141 = vst.msk [vmem:[#allocation3 + $0x498] sm:$0xff] %vm3091_vm1, %v3034_v29 }
 0x420   : > { %6953 = vst.msk [vmem:[#allocation5 + $0x1b0] sm:$0xff] %vm6481_vm5, %v6849_v34  ;;  %v3663_v31 = vpop.permute.xlu0 %3662 }
 0x421   : > { %vm6227_vm4 = vcmp.ge.f32.partialorder %v5987_v17, 0.0  ;;  %v6331_v52 = vmul.f32 0.01, %v5987_v17  ;;  %v5990_v13 = vadd.f32 %v10957_v39, %v5541_v63  ;;  %3767 = vst.msk [vmem:[#allocation3 + $0x4d0] sm:$0xff] %vm2257_vm14, %v3663_v31 }
 0x422   : > { %v2202_v20 = vpop.permute.xlu1 %2201 }
 0x423   : > { %v6435_v3 = vsel %vm6227_vm4, %v5987_v17, %v6331_v52  ;;  %vm6228_vm12 = vcmp.ge.f32.partialorder %v5990_v13, 0.0  ;;  %v6332_v24 = vmul.f32 0.01, %v5990_v13  ;;  %2308 = vst.msk [vmem:[#allocation3 + $0x4b0] sm:$0xff] %vm2257_vm14, %v2202_v20  ;;  %v6643_v42 = vld [vmem:[#allocation4 + $0x1c0] sm:$0xff] }
 0x424   : > { %6540 = vst.msk [vmem:[#allocation4 + $0x1d0] sm:$0xff] %vm6481_vm5, %v6435_v3  ;;  %v5545_v22 = vpop.f32.mrb[108].mxu1  ;;  %v4079_v7 = vpop.permute.xlu0 %4078  ;;  %v4959_v62 = vld [vmem:[#allocation3 + $0x4b8] sm:$0xff] }
 0x425   : > { %v7145_v61 = vld [vmem:[#allocation5 + $0x1a0] ss:$2 sm:$0xff]  ;;  %v6436_v56 = vsel %vm6228_vm12, %v5990_v13, %v6332_v24  ;;  %v5546_v41 = vadd.f32 %v10696_v53, %v5545_v22  ;;  %v5547_v10 = vpop.f32.mrb[109].mxu1  ;;  %4183 = vst.msk [vmem:[#allocation3 + $0x4d0] sm:$0xff] %vm2674_vm15, %v4079_v7 }
 0x426   : > { %v6747_v12 = vld [vmem:[#allocation4 + $0x1c1] sm:$0xff]  ;;  %v7148_v38 = vmax.f32 %v7141_v21, %v7145_v61  ;;  %6541 = vst.msk [vmem:[#allocation4 + $0x1d8] sm:$0xff] %vm6481_vm5, %v6436_v56  ;;  %v5548_v50 = vpop.f32.mrb[110].mxu1  ;;  %v2619_v59 = vpop.permute.xlu1 %2618  ;;  %v4955_v55 = vld [vmem:[#allocation3 + $0x498] sm:$0xff] }
 0x427   : > { %v6851_v32 = vmax.f32 %v6643_v42, %v6747_v12  ;;  %v7147_v23 = vld [vmem:[#allocation5 + $0x1b0] ss:$2 sm:$0xf]  ;;  %v5995_v40 = vadd.f32 %v10282_v14, %v5546_v41  ;;  %v5549_v48 = vadd.f32 %v10696_v53, %v5548_v50  ;;  %v5550_v6 = vpop.f32.mrb[111].mxu1  ;;  %2725 = vst.msk [vmem:[#allocation3 + $0x4b0] sm:$0xff] %vm2674_vm15, %v2619_v59  ;;  %5696 = vmatmul.mubr.bf16.gmra.mrb[184].mxu1 %v4955_v55  ;;  %v6644_v9 = vld [vmem:[#allocation4 + $0x1c8] sm:$0xff] }
 0x428   : > { %v7586_v19 = vpack.c.bf16 %v7148_v38, %v7148_v38  ;;  %v7149_v49 = vmax.f32 %v7143_v37, %v7147_v23  ;;  %5703 = vmatprep.mubr.bf16.mxu1 %v4959_v62  ;;  %v4495_v18 = vpop.permute.xlu0 %4494  ;;  %v10958_v55 = vld [vmem:[#allocation18_spill] sm:$0xff] }
 0x429   : > { %6955 = vst.msk [vmem:[#allocation5 + $0x1c0] sm:$0xff] %vm6481_vm5, %v6851_v32  ;;  %vm6229_vm13 = vcmp.ge.f32.partialorder %v5995_v40, 0.0  ;;  %v6333_v28 = vmul.f32 0.01, %v5995_v40  ;;  %v5998_v51 = vadd.f32 %v10293_v16, %v5549_v48 }
 0x42a   : > { %7158 = vst.msk [vmem:[%s9943_s8 + $0x24] sm:$0xf] %vm7020_vm2, %v7586_v19  ;;  %v7587_v14 = vpack.c.bf16 %v7149_v49, %v7149_v49  ;;  %v3036_v35 = vpop.permute.xlu1 %3035 }
 0x42b   : > { %4599 = vst.msk [vmem:[#allocation3 + $0x4d0] sm:$0xff] %vm3091_vm1, %v4495_v18  ;;  %v6748_v0 = vld [vmem:[#allocation4 + $0x1c9] sm:$0xff]  ;;  %v6437_v34 = vsel %vm6229_vm13, %v5995_v40, %v6333_v28  ;;  %vm6230_vm0 = vcmp.ge.f32.partialorder %v5998_v51, 0.0  ;;  %v6334_v30 = vmul.f32 0.01, %v5998_v51  ;;  %3142 = vst.msk [vmem:[#allocation3 + $0x4b0] sm:$0xff] %vm3091_vm1, %v3036_v35 }
 0x42c   : > { %7159 = vst.msk [vmem:[%s9943_s8 + $0x28] sm:$0x3] %vm7022_vm7, %v7587_v14  ;;  %v6852_v17 = vmax.f32 %v6644_v9, %v6748_v0  ;;  %v5553_v16 = vpop.f32.mrb[112].mxu1  ;;  %v6645_v63 = vld [vmem:[#allocation4 + $0x1d0] sm:$0xff] }
 0x42d   : > { %6542 = vst.msk [vmem:[#allocation4 + $0x1e0] sm:$0xff] %vm6481_vm5, %v6437_v34  ;;  %v6749_v29 = vld [vmem:[#allocation4 + $0x1d1] sm:$0xff]  ;;  %v6438_v57 = vsel %vm6230_vm0, %v5998_v51, %v6334_v30  ;;  %v5554_v52 = vadd.f32 %v10696_v53, %v5553_v16  ;;  %v5555_v39 = vpop.f32.mrb[113].mxu1 }
 0x42e   : > { %6956 = vst.msk [vmem:[#allocation5 + $0x1c8] sm:$0xff] %vm6481_vm5, %v6852_v17  ;;  %v6853_v13 = vmax.f32 %v6645_v63, %v6749_v29  ;;  %6543 = vst.msk [vmem:[#allocation4 + $0x1e8] sm:$0xff] %vm6481_vm5, %v6438_v57  ;;  %v5556_v31 = vpop.f32.mrb[114].mxu1  ;;  %v2204_v20 = vpop.permute.xlu1 %2203  ;;  %v10959_v63 = vld [vmem:[#allocation16_spill] sm:$0xff] }
 0x42f   : > { %v6003_v3 = vadd.f32 %v10277_v15, %v5554_v52  ;;  %v5557_v24 = vadd.f32 %v10696_v53, %v5556_v31  ;;  %v5558_v21 = vpop.f32.mrb[115].mxu1  ;;  %2309 = vst.msk [vmem:[#allocation3 + $0x4c8] sm:$0xff] %vm2257_vm14, %v2204_v20  ;;  %v10960_v31 = vld [vmem:[#allocation17_spill] sm:$0xff] }
 0x430   : > { %6957 = vst.msk [vmem:[#allocation5 + $0x1d0] sm:$0xff] %vm6481_vm5, %v6853_v13 }
 0x431   : > { %vm6231_vm3 = vcmp.ge.f32.partialorder %v6003_v3, 0.0  ;;  %v6335_v22 = vmul.f32 0.01, %v6003_v3  ;;  %v6006_v61 = vadd.f32 %v10287_v1, %v5557_v24 }
 0x432   : > { %v4962_v42 = vld [vmem:[#allocation3 + $0x4d0] sm:$0xff]  ;;  %v2621_v41 = vpop.permute.xlu1 %2620 }
 0x433   : > { %v6439_v12 = vsel %vm6231_vm3, %v6003_v3, %v6335_v22  ;;  %vm6232_vm8 = vcmp.ge.f32.partialorder %v6006_v61, 0.0  ;;  %v6336_v56 = vmul.f32 0.01, %v6006_v61  ;;  %v4958_v10 = vld [vmem:[#allocation3 + $0x4b0] sm:$0xff]  ;;  %2726 = vst.msk [vmem:[#allocation3 + $0x4c8] sm:$0xff] %vm2674_vm15, %v2621_v41 }
 0x434   : > { %6544 = vst.msk [vmem:[#allocation4 + $0x1f0] sm:$0xff] %vm6481_vm5, %v6439_v12  ;;  %v5561_v15 = vpop.f32.mrb[116].mxu1  ;;  %5704 = vmatmul.mubr.bf16.gmra.mrb[188].mxu1 %v4958_v10  ;;  %v6647_v7 = vld [vmem:[#allocation4 + $0x1e0] sm:$0xff] }
 0x435   : > { %v6751_v37 = vld [vmem:[#allocation4 + $0x1e1] sm:$0xff]  ;;  %v6440_v38 = vsel %vm6232_vm8, %v6006_v61, %v6336_v56  ;;  %v5562_v32 = vadd.f32 %v10696_v53, %v5561_v15  ;;  %v5563_v50 = vpop.f32.mrb[117].mxu1  ;;  %5711 = vmatprep.mubr.bf16.mxu1 %v4962_v42 }
 0x436   : > { %v6855_v1 = vmax.f32 %v6647_v7, %v6751_v37  ;;  %6545 = vst.msk [vmem:[#allocation4 + $0x1f8] sm:$0xff] %vm6481_vm5, %v6440_v38  ;;  %v5564_v62 = vpop.f32.mrb[118].mxu1  ;;  %v3038_v48 = vpop.permute.xlu1 %3037  ;;  %v6648_v49 = vld [vmem:[#allocation4 + $0x1e8] sm:$0xff] }
 0x437   : > { %v6011_v23 = vadd.f32 %v10315_v26, %v5562_v32  ;;  %v5565_v40 = vadd.f32 %v10696_v53, %v5564_v62  ;;  %v5566_v59 = vpop.f32.mrb[119].mxu1  ;;  %3143 = vst.msk [vmem:[#allocation3 + $0x4c8] sm:$0xff] %vm3091_vm1, %v3038_v48  ;;  %v7161_v21 = vld [vmem:[#allocation5 + $0x1c0] ss:$2 sm:$0xff] }
 0x438   : > { %6959 = vst.msk [vmem:[#allocation5 + $0x1e0] sm:$0xff] %vm6481_vm5, %v6855_v1  ;;  %v7163_v56 = vld [vmem:[#allocation5 + $0x1d0] ss:$2 sm:$0xf] }
 0x439   : > { %vm6233_vm14 = vcmp.ge.f32.partialorder %v6011_v23, 0.0  ;;  %v6337_v6 = vmul.f32 0.01, %v6011_v23  ;;  %v6014_v19 = vadd.f32 %v10958_v55, %v5565_v40 }
 0x43b   : > { %v6752_v28 = vld [vmem:[#allocation4 + $0x1e9] sm:$0xff]  ;;  %v6441_v51 = vsel %vm6233_vm14, %v6011_v23, %v6337_v6  ;;  %vm6234_vm15 = vcmp.ge.f32.partialorder %v6014_v19, 0.0  ;;  %v6338_v18 = vmul.f32 0.01, %v6014_v19 }
 0x43c   : > { %v6856_v14 = vmax.f32 %v6648_v49, %v6752_v28  ;;  %6546 = vst.msk [vmem:[#allocation4 + $0x200] sm:$0xff] %vm6481_vm5, %v6441_v51  ;;  %v5569_v26 = vpop.f32.mrb[120].mxu1  ;;  %v6649_v9 = vld [vmem:[#allocation4 + $0x1f0] sm:$0xff] }
 0x43d   : > { %v6753_v0 = vld [vmem:[#allocation4 + $0x1f1] sm:$0xff]  ;;  %v6442_v34 = vsel %vm6234_vm15, %v6014_v19, %v6338_v18  ;;  %v5570_v30 = vadd.f32 %v10696_v53, %v5569_v26  ;;  %v5571_v35 = vpop.f32.mrb[121].mxu1 }
 0x43e   : > { %6960 = vst.msk [vmem:[#allocation5 + $0x1e8] sm:$0xff] %vm6481_vm5, %v6856_v14  ;;  %v6857_v17 = vmax.f32 %v6649_v9, %v6753_v0  ;;  %6547 = vst.msk [vmem:[#allocation4 + $0x208] sm:$0xff] %vm6481_vm5, %v6442_v34  ;;  %v5572_v16 = vpop.f32.mrb[122].mxu1  ;;  %v4961_v39 = vld [vmem:[#allocation3 + $0x4c8] sm:$0xff] }
 0x43f   : > { %v6019_v29 = vadd.f32 %v10959_v63, %v5570_v30  ;;  %v5573_v57 = vadd.f32 %v10696_v53, %v5572_v16  ;;  %v5574_v52 = vpop.f32.mrb[123].mxu1  ;;  %5712 = vmatmul.mubr.bf16.gmra.mrb[192].mxu1 %v4961_v39  ;;  %v10961_v39 = vld [vmem:[#allocation19_spill] sm:$0xff] }
 0x440   : > { %6961 = vst.msk [vmem:[#allocation5 + $0x1f0] sm:$0xff] %vm6481_vm5, %v6857_v17 }
 0x441   : > { %vm6235_vm1 = vcmp.ge.f32.partialorder %v6019_v29, 0.0  ;;  %v6339_v13 = vmul.f32 0.01, %v6019_v29  ;;  %v6022_v3 = vadd.f32 %v10960_v31, %v5573_v57 }
 0x443   : > { %v6443_v24 = vsel %vm6235_vm1, %v6019_v29, %v6339_v13  ;;  %vm6236_vm10 = vcmp.ge.f32.partialorder %v6022_v3, 0.0  ;;  %v6340_v20 = vmul.f32 0.01, %v6022_v3  ;;  %v6651_v61 = vld [vmem:[#allocation4 + $0x200] sm:$0xff] }
 0x444   : > { %6548 = vst.msk [vmem:[#allocation4 + $0x210] sm:$0xff] %vm6481_vm5, %v6443_v24 }
 0x445   : > { %v7165_v22 = vld [vmem:[#allocation5 + $0x1e0] ss:$2 sm:$0xff]  ;;  %v6444_v12 = vsel %vm6236_vm10, %v6022_v3, %v6340_v20 }
 0x446   : > { %v6755_v42 = vld [vmem:[#allocation4 + $0x201] sm:$0xff]  ;;  %v7168_v41 = vmax.f32 %v7161_v21, %v7165_v22  ;;  %6549 = vst.msk [vmem:[#allocation4 + $0x218] sm:$0xff] %vm6481_vm5, %v6444_v12 }
 0x447   : > { %v6859_v10 = vmax.f32 %v6651_v61, %v6755_v42  ;;  %v7167_v15 = vld [vmem:[#allocation5 + $0x1f0] ss:$2 sm:$0xf]  ;;  %v5577_v7 = vpop.f32.mrb[124].mxu1  ;;  %v6652_v6 = vld [vmem:[#allocation4 + $0x208] sm:$0xff] }
 0x448   : > { %v7588_v37 = vpack.c.bf16 %v7168_v41, %v7168_v41  ;;  %v7169_v38 = vmax.f32 %v7163_v56, %v7167_v15  ;;  %v5578_v32 = vadd.f32 %v10696_v53, %v5577_v7  ;;  %v5579_v50 = vpop.f32.mrb[125].mxu1 }
 0x449   : > { %6963 = vst.msk [vmem:[#allocation5 + $0x200] sm:$0xff] %vm6481_vm5, %v6859_v10  ;;  %v5580_v1 = vpop.f32.mrb[126].mxu1  ;;  %v10962_v10 = vld [vmem:[#allocation21_spill] sm:$0xff] }
 0x44a   : > { %v7176_v62 = vrot.slane %v7588_v37, 6  ;;  %v7589_v23 = vpack.c.bf16 %v7169_v38, %v7169_v38  ;;  %v6027_v40 = vadd.f32 %v10343_v25, %v5578_v32  ;;  %v5581_v48 = vadd.f32 %v10696_v53, %v5580_v1  ;;  %v5582_v59 = vpop.f32.mrb[127].mxu1 }
 0x44b   : > { %v6756_v55 = vld [vmem:[#allocation4 + $0x209] sm:$0xff] }
 0x44c   : > { %v7177_v19 = vrot.slane %v7176_v62, 4  ;;  %7182 = vst.msk [vmem:[%s9943_s8 + $0x28] sm:$0xc] %vm7049_vm6, %v7176_v62  ;;  %v7178_v49 = vrot.slane %v7589_v23, 6  ;;  %v6860_v28 = vmax.f32 %v6652_v6, %v6756_v55  ;;  %vm6237_vm11 = vcmp.ge.f32.partialorder %v6027_v40, 0.0  ;;  %v6653_v51 = vld [vmem:[#allocation4 + $0x210] sm:$0xff] }
 0x44d   : > { %v6757_v18 = vld [vmem:[#allocation4 + $0x211] sm:$0xff]  ;;  %v6341_v14 = vmul.f32 0.01, %v6027_v40  ;;  %v6030_v26 = vadd.f32 %v10352_v36, %v5581_v48  ;;  %v10963_v62 = vld [vmem:[#allocation23_spill] sm:$0xff] }
 0x44e   : > { %v7179_v25 = vsel %vm10097_vm9, %v7177_v19, %v7178_v49  ;;  %6964 = vst.msk [vmem:[#allocation5 + $0x208] sm:$0xff] %vm6481_vm5, %v6860_v28  ;;  %v6861_v9 = vmax.f32 %v6653_v51, %v6757_v18 }
 0x44f   : > { %7183 = vst.msk [vmem:[%s9943_s8 + $0x2c] sm:$0xf] %vm7020_vm2, %v7179_v25  ;;  %v6445_v0 = vsel %vm6237_vm11, %v6027_v40, %v6341_v14  ;;  %vm6238_vm4 = vcmp.ge.f32.partialorder %v6030_v26, 0.0  ;;  %v6342_v34 = vmul.f32 0.01, %v6030_v26 }
 0x450   : > { %6965 = vst.msk [vmem:[#allocation5 + $0x210] sm:$0xff] %vm6481_vm5, %v6861_v9  ;;  %6550 = vst.msk [vmem:[#allocation4 + $0x220] sm:$0xff] %vm6481_vm5, %v6445_v0  ;;  %v10964_v9 = vld [vmem:[#allocation20_spill] sm:$0xff] }
 0x451   : > { %v6446_v30 = vsel %vm6238_vm4, %v6030_v26, %v6342_v34 }
 0x452   : > { %6551 = vst.msk [vmem:[#allocation4 + $0x228] sm:$0xff] %vm6481_vm5, %v6446_v30  ;;  %v5585_v35 = vpop.f32.mrb[128].mxu1 }
 0x453   : > { %v5586_v36 = vadd.f32 %v10696_v53, %v5585_v35  ;;  %v5587_v17 = vpop.f32.mrb[129].mxu1 }
 0x454   : > { %v5588_v16 = vpop.f32.mrb[130].mxu1 }
 0x455   : > { %v6035_v63 = vadd.f32 %v10338_v60, %v5586_v36  ;;  %v5589_v29 = vadd.f32 %v10696_v53, %v5588_v16  ;;  %v5590_v57 = vpop.f32.mrb[131].mxu1  ;;  %v7185_v19 = vld [vmem:[#allocation5 + $0x200] ss:$2 sm:$0xff] }
 0x457   : > { %vm6239_vm12 = vcmp.ge.f32.partialorder %v6035_v63, 0.0  ;;  %v6343_v52 = vmul.f32 0.01, %v6035_v63  ;;  %v6038_v13 = vadd.f32 %v10961_v39, %v5589_v29  ;;  %v6655_v31 = vld [vmem:[#allocation4 + $0x220] sm:$0xff] }
 0x458   : > { %v7187_v18 = vld [vmem:[#allocation5 + $0x210] ss:$2 sm:$0xf] }
 0x459   : > { %v6759_v3 = vld [vmem:[#allocation4 + $0x221] sm:$0xff]  ;;  %v6447_v20 = vsel %vm6239_vm12, %v6035_v63, %v6343_v52  ;;  %vm6240_vm13 = vcmp.ge.f32.partialorder %v6038_v13, 0.0  ;;  %v6344_v21 = vmul.f32 0.01, %v6038_v13 }
 0x45a   : > { %v6863_v24 = vmax.f32 %v6655_v31, %v6759_v3  ;;  %6552 = vst.msk [vmem:[#allocation4 + $0x230] sm:$0xff] %vm6481_vm5, %v6447_v20  ;;  %v6656_v56 = vld [vmem:[#allocation4 + $0x228] sm:$0xff]  ;;  %v10965_v29 = vld [vmem:[#allocation22_spill] sm:$0xff] }
 0x45b   : > { %v6448_v22 = vsel %vm6240_vm13, %v6038_v13, %v6344_v21 }
 0x45c   : > { %6967 = vst.msk [vmem:[#allocation5 + $0x220] sm:$0xff] %vm6481_vm5, %v6863_v24  ;;  %6553 = vst.msk [vmem:[#allocation4 + $0x238] sm:$0xff] %vm6481_vm5, %v6448_v22 }
 0x45e   : > { %v5593_v60 = vpop.f32.mrb[132].mxu1 }
 0x45f   : > { %v5594_v61 = vadd.f32 %v10696_v53, %v5593_v60  ;;  %v5595_v42 = vpop.f32.mrb[133].mxu1 }
 0x460   : > { %v5596_v12 = vpop.f32.mrb[134].mxu1  ;;  %v10966_v42 = vld [vmem:[#allocation25_spill] sm:$0xff] }
 0x461   : > { %v6760_v41 = vld [vmem:[#allocation4 + $0x229] sm:$0xff]  ;;  %v6043_v15 = vadd.f32 %v10962_v10, %v5594_v61  ;;  %v5597_v7 = vadd.f32 %v10696_v53, %v5596_v12  ;;  %v5598_v37 = vpop.f32.mrb[135].mxu1 }
 0x462   : > { %v6864_v38 = vmax.f32 %v6656_v56, %v6760_v41  ;;  %v6657_v32 = vld [vmem:[#allocation4 + $0x230] sm:$0xff] }
 0x463   : > { %v6761_v50 = vld [vmem:[#allocation4 + $0x231] sm:$0xff]  ;;  %vm6241_vm0 = vcmp.ge.f32.partialorder %v6043_v15, 0.0  ;;  %v6345_v1 = vmul.f32 0.01, %v6043_v15  ;;  %v6046_v23 = vadd.f32 %v10963_v62, %v5597_v7 }
 0x464   : > { %6968 = vst.msk [vmem:[#allocation5 + $0x228] sm:$0xff] %vm6481_vm5, %v6864_v38  ;;  %v6865_v40 = vmax.f32 %v6657_v32, %v6761_v50  ;;  %v10967_v32 = vld [vmem:[#allocation27_spill] sm:$0xff] }
 0x465   : > { %v6449_v48 = vsel %vm6241_vm0, %v6043_v15, %v6345_v1  ;;  %vm6242_vm3 = vcmp.ge.f32.partialorder %v6046_v23, 0.0  ;;  %v6346_v59 = vmul.f32 0.01, %v6046_v23 }
 0x466   : > { %6969 = vst.msk [vmem:[#allocation5 + $0x230] sm:$0xff] %vm6481_vm5, %v6865_v40  ;;  %6554 = vst.msk [vmem:[#allocation4 + $0x240] sm:$0xff] %vm6481_vm5, %v6449_v48 }
 0x467   : > { %v6450_v6 = vsel %vm6242_vm3, %v6046_v23, %v6346_v59 }
 0x468   : > { %6555 = vst.msk [vmem:[#allocation4 + $0x248] sm:$0xff] %vm6481_vm5, %v6450_v6 }
 0x46b   : > { %v5601_v55 = vpop.f32.mrb[136].mxu1  ;;  %v7189_v49 = vld [vmem:[#allocation5 + $0x220] ss:$2 sm:$0xff] }
 0x46c   : > { %v5602_v28 = vadd.f32 %v10696_v53, %v5601_v55  ;;  %v5603_v51 = vpop.f32.mrb[137].mxu1  ;;  %v7192_v14 = vmax.f32 %v7185_v19, %v7189_v49 }
 0x46d   : > { %v5604_v26 = vpop.f32.mrb[138].mxu1  ;;  %v7191_v25 = vld [vmem:[#allocation5 + $0x230] ss:$2 sm:$0xf]  ;;  %v6659_v17 = vld [vmem:[#allocation4 + $0x240] sm:$0xff]  ;;  %v10968_v51 = vld [vmem:[#allocation24_spill] sm:$0xff] }
 0x46e   : > { %v6051_v0 = vadd.f32 %v10964_v9, %v5602_v28  ;;  %v5605_v34 = vadd.f32 %v10696_v53, %v5604_v26  ;;  %v5606_v30 = vpop.f32.mrb[139].mxu1  ;;  %v7590_v35 = vpack.c.bf16 %v7192_v14, %v7192_v14  ;;  %v7193_v36 = vmax.f32 %v7187_v18, %v7191_v25 }
 0x46f   : > { %v6763_v16 = vld [vmem:[#allocation4 + $0x241] sm:$0xff] }
 0x470   : > { %vm6243_vm8 = vcmp.ge.f32.partialorder %v6051_v0, 0.0  ;;  %v6347_v63 = vmul.f32 0.01, %v6051_v0  ;;  %v6054_v57 = vadd.f32 %v10965_v29, %v5605_v34  ;;  %7202 = vst.msk [vmem:[%s9943_s8 + $0x30] sm:$0xf] %vm7020_vm2, %v7590_v35  ;;  %v7591_v52 = vpack.c.bf16 %v7193_v36, %v7193_v36  ;;  %v6660_v60 = vld [vmem:[#allocation4 + $0x248] sm:$0xff] }
 0x471   : > { %v6867_v39 = vmax.f32 %v6659_v17, %v6763_v16  ;;  %v10969_v34 = vld [vmem:[#allocation26_spill] sm:$0xff] }
 0x472   : > { %v6451_v13 = vsel %vm6243_vm8, %v6051_v0, %v6347_v63  ;;  %vm6244_vm14 = vcmp.ge.f32.partialorder %v6054_v57, 0.0  ;;  %v6348_v31 = vmul.f32 0.01, %v6054_v57  ;;  %7203 = vst.msk [vmem:[%s9943_s8 + $0x34] sm:$0x3] %vm7022_vm7, %v7591_v52 }
 0x473   : > { %6971 = vst.msk [vmem:[#allocation5 + $0x240] sm:$0xff] %vm6481_vm5, %v6867_v39  ;;  %6556 = vst.msk [vmem:[#allocation4 + $0x250] sm:$0xff] %vm6481_vm5, %v6451_v13 }
 0x474   : > { %v6452_v3 = vsel %vm6244_vm14, %v6054_v57, %v6348_v31  ;;  %v10970_v31 = vld [vmem:[#allocation29_spill] sm:$0xff] }
 0x475   : > { %6557 = vst.msk [vmem:[#allocation4 + $0x258] sm:$0xff] %vm6481_vm5, %v6452_v3 }
 0x476   : > { %v5609_v24 = vpop.f32.mrb[140].mxu1 }
 0x477   : > { %v5610_v20 = vadd.f32 %v10696_v53, %v5609_v24  ;;  %v5611_v21 = vpop.f32.mrb[141].mxu1 }
 0x478   : > { %v5612_v22 = vpop.f32.mrb[142].mxu1 }
 0x479   : > { %v6059_v12 = vadd.f32 %v10966_v42, %v5610_v20  ;;  %v5613_v56 = vadd.f32 %v10696_v53, %v5612_v22  ;;  %v5614_v41 = vpop.f32.mrb[143].mxu1 }
 0x47a   : > { %v6764_v61 = vld [vmem:[#allocation4 + $0x249] sm:$0xff] }
 0x47b   : > { %v6868_v10 = vmax.f32 %v6660_v60, %v6764_v61  ;;  %v6661_v7 = vld [vmem:[#allocation4 + $0x250] sm:$0xff]  ;;  %vm6245_vm15 = vcmp.ge.f32.partialorder %v6059_v12, 0.0  ;;  %v6349_v38 = vmul.f32 0.01, %v6059_v12  ;;  %v6062_v50 = vadd.f32 %v10967_v32, %v5613_v56 }
 0x47c   : > { %v10784_v15 = vpop.f32.mrb[212].mxu0  ;;  %v6765_v37 = vld [vmem:[#allocation4 + $0x251] sm:$0xff] }
 0x47d   : > { %v10787_v1 = vpop.f32.mrb[213].mxu0  ;;  %6972 = vst.msk [vmem:[#allocation5 + $0x248] sm:$0xff] %vm6481_vm5, %v6868_v10  ;;  %v6869_v62 = vmax.f32 %v6661_v7, %v6765_v37  ;;  %v6453_v40 = vsel %vm6245_vm15, %v6059_v12, %v6349_v38  ;;  %vm6246_vm1 = vcmp.ge.f32.partialorder %v6062_v50, 0.0  ;;  %v6350_v48 = vmul.f32 0.01, %v6062_v50 }
 0x47e   : > { %v10790_v23 = vpop.f32.mrb[214].mxu0  ;;  %6558 = vst.msk [vmem:[#allocation4 + $0x260] sm:$0xff] %vm6481_vm5, %v6453_v40 }
 0x47f   : > { %v10792_v59 = vpop.f32.mrb[215].mxu0  ;;  %6973 = vst.msk [vmem:[#allocation5 + $0x250] sm:$0xff] %vm6481_vm5, %v6869_v62  ;;  %v6454_v6 = vsel %vm6246_vm1, %v6062_v50, %v6350_v48 }
 0x480   : > { %6559 = vst.msk [vmem:[#allocation4 + $0x268] sm:$0xff] %vm6481_vm5, %v6454_v6 }
 0x482   : > { %v5617_v55 = vpop.f32.mrb[144].mxu1 }
 0x483   : > { %v5618_v19 = vadd.f32 %v10696_v53, %v5617_v55  ;;  %v5619_v49 = vpop.f32.mrb[145].mxu1 }
 0x484   : > { %v5620_v28 = vpop.f32.mrb[146].mxu1  ;;  %v7205_v50 = vld [vmem:[#allocation5 + $0x240] ss:$2 sm:$0xff] }
 0x485   : > { %v6067_v18 = vadd.f32 %v10968_v51, %v5618_v19  ;;  %v5621_v14 = vadd.f32 %v10696_v53, %v5620_v28  ;;  %v5622_v26 = vpop.f32.mrb[147].mxu1  ;;  %v6663_v25 = vld [vmem:[#allocation4 + $0x260] sm:$0xff]  ;;  %v10971_v28 = vld [vmem:[#allocation28_spill] sm:$0xff] }
 0x486   : > { %v7207_v6 = vld [vmem:[#allocation5 + $0x250] ss:$2 sm:$0xf] }
 0x487   : > { %v6767_v9 = vld [vmem:[#allocation4 + $0x261] sm:$0xff]  ;;  %vm6247_vm10 = vcmp.ge.f32.partialorder %v6067_v18, 0.0  ;;  %v6351_v0 = vmul.f32 0.01, %v6067_v18  ;;  %v6070_v30 = vadd.f32 %v10969_v34, %v5621_v14 }
 0x488   : > { %v6871_v35 = vmax.f32 %v6663_v25, %v6767_v9  ;;  %v6664_v39 = vld [vmem:[#allocation4 + $0x268] sm:$0xff] }
 0x489   : > { %v6455_v36 = vsel %vm6247_vm10, %v6067_v18, %v6351_v0  ;;  %vm6248_vm11 = vcmp.ge.f32.partialorder %v6070_v30, 0.0  ;;  %v6352_v17 = vmul.f32 0.01, %v6070_v30 }
 0x48a   : > { %6975 = vst.msk [vmem:[#allocation5 + $0x260] sm:$0xff] %vm6481_vm5, %v6871_v35  ;;  %6560 = vst.msk [vmem:[#allocation4 + $0x270] sm:$0xff] %vm6481_vm5, %v6455_v36 }
 0x48b   : > { %v6456_v16 = vsel %vm6248_vm11, %v6070_v30, %v6352_v17  ;;  %v10972_v30 = vld [vmem:[#allocation30_spill] sm:$0xff] }
 0x48c   : > { %6561 = vst.msk [vmem:[#allocation4 + $0x278] sm:$0xff] %vm6481_vm5, %v6456_v16 }
 0x48e   : > { %v5625_v63 = vpop.f32.mrb[148].mxu1 }
 0x48f   : > { %v5626_v29 = vadd.f32 %v10696_v53, %v5625_v63  ;;  %v5627_v57 = vpop.f32.mrb[149].mxu1 }
 0x490   : > { %v5628_v52 = vpop.f32.mrb[150].mxu1 }
 0x491   : > { %v6768_v13 = vld [vmem:[#allocation4 + $0x269] sm:$0xff]  ;;  %v6075_v3 = vadd.f32 %v10970_v31, %v5626_v29  ;;  %v5629_v24 = vadd.f32 %v10696_v53, %v5628_v52  ;;  %v5630_v20 = vpop.f32.mrb[151].mxu1 }
 0x492   : > { %v6872_v21 = vmax.f32 %v6664_v39, %v6768_v13  ;;  %v6665_v22 = vld [vmem:[#allocation4 + $0x270] sm:$0xff] }
 0x493   : > { %v6769_v60 = vld [vmem:[#allocation4 + $0x271] sm:$0xff]  ;;  %vm6249_vm4 = vcmp.ge.f32.partialorder %v6075_v3, 0.0  ;;  %v6353_v61 = vmul.f32 0.01, %v6075_v3  ;;  %v6078_v42 = vadd.f32 %v10445_v33, %v5629_v24 }
 0x494   : > { %v10808_v12 = vpop.f32.mrb[216].mxu0  ;;  %6976 = vst.msk [vmem:[#allocation5 + $0x268] sm:$0xff] %vm6481_vm5, %v6872_v21  ;;  %v6873_v56 = vmax.f32 %v6665_v22, %v6769_v60 }
 0x495   : > { %v10811_v41 = vpop.f32.mrb[217].mxu0  ;;  %v6457_v10 = vsel %vm6249_vm4, %v6075_v3, %v6353_v61  ;;  %vm6250_vm12 = vcmp.ge.f32.partialorder %v6078_v42, 0.0  ;;  %v6354_v7 = vmul.f32 0.01, %v6078_v42 }
 0x496   : > { %v10813_v37 = vpop.f32.mrb[218].mxu0  ;;  %6977 = vst.msk [vmem:[#allocation5 + $0x270] sm:$0xff] %vm6481_vm5, %v6873_v56  ;;  %6562 = vst.msk [vmem:[#allocation4 + $0x280] sm:$0xff] %vm6481_vm5, %v6457_v10 }
 0x497   : > { %v10817_v38 = vpop.f32.mrb[219].mxu0  ;;  %v6458_v32 = vsel %vm6250_vm12, %v6078_v42, %v6354_v7 }
 0x498   : > { %6563 = vst.msk [vmem:[#allocation4 + $0x288] sm:$0xff] %vm6481_vm5, %v6458_v32 }
 0x49b   : > { %v5633_v33 = vpop.f32.mrb[152].mxu1  ;;  %v7209_v62 = vld [vmem:[#allocation5 + $0x260] ss:$2 sm:$0xff] }
 0x49c   : > { %v5634_v40 = vadd.f32 %v10696_v53, %v5633_v33  ;;  %v5635_v48 = vpop.f32.mrb[153].mxu1  ;;  %v7212_v55 = vmax.f32 %v7205_v50, %v7209_v62 }
 0x49d   : > { %v5636_v19 = vpop.f32.mrb[154].mxu1  ;;  %v7211_v49 = vld [vmem:[#allocation5 + $0x270] ss:$2 sm:$0xf]  ;;  %v6667_v9 = vld [vmem:[#allocation4 + $0x280] sm:$0xff] }
 0x49e   : > { %v6083_v51 = vadd.f32 %v10971_v28, %v5634_v40  ;;  %v5637_v18 = vadd.f32 %v10696_v53, %v5636_v19  ;;  %v5638_v14 = vpop.f32.mrb[155].mxu1  ;;  %v7592_v26 = vpack.c.bf16 %v7212_v55, %v7212_v55  ;;  %v7213_v25 = vmax.f32 %v7207_v6, %v7211_v49 }
 0x49f   : > { %v6771_v0 = vld [vmem:[#allocation4 + $0x281] sm:$0xff] }
 0x4a0   : > { %vm6251_vm13 = vcmp.ge.f32.partialorder %v6083_v51, 0.0  ;;  %v6355_v34 = vmul.f32 0.01, %v6083_v51  ;;  %v6086_v35 = vadd.f32 %v10972_v30, %v5637_v18  ;;  %v7220_v36 = vrot.slane %v7592_v26, 6  ;;  %v6668_v21 = vld [vmem:[#allocation4 + $0x288] sm:$0xff] }
 0x4a1   : > { %v7593_v17 = vpack.c.bf16 %v7213_v25, %v7213_v25  ;;  %v6875_v16 = vmax.f32 %v6667_v9, %v6771_v0 }
 0x4a2   : > { %v6459_v63 = vsel %vm6251_vm13, %v6083_v51, %v6355_v34  ;;  %vm6252_vm0 = vcmp.ge.f32.partialorder %v6086_v35, 0.0  ;;  %v6356_v29 = vmul.f32 0.01, %v6086_v35  ;;  %v7221_v57 = vrot.slane %v7220_v36, 4  ;;  %7226 = vst.msk [vmem:[%s9943_s8 + $0x34] sm:$0xc] %vm7049_vm6, %v7220_v36 }
 0x4a3   : > { %v7222_v52 = vrot.slane %v7593_v17, 6  ;;  %6979 = vst.msk [vmem:[#allocation5 + $0x280] sm:$0xff] %vm6481_vm5, %v6875_v16  ;;  %6564 = vst.msk [vmem:[#allocation4 + $0x290] sm:$0xff] %vm6481_vm5, %v6459_v63 }
 0x4a4   : > { %v6460_v39 = vsel %vm6252_vm0, %v6086_v35, %v6356_v29 }
 0x4a5   : > { %v7223_v13 = vsel %vm10097_vm9, %v7221_v57, %v7222_v52  ;;  %6565 = vst.msk [vmem:[#allocation4 + $0x298] sm:$0xff] %vm6481_vm5, %v6460_v39 }
 0x4a6   : > { %7227 = vst.msk [vmem:[%s9943_s8 + $0x38] sm:$0xf] %vm7020_vm2, %v7223_v13 }
 0x4a7   : > { %v5641_v31 = vpop.f32.mrb[156].mxu1 }
 0x4a8   : > { %v5642_v3 = vadd.f32 %v10696_v53, %v5641_v31  ;;  %v5643_v24 = vpop.f32.mrb[157].mxu1 }
 0x4a9   : > { %v5644_v20 = vpop.f32.mrb[158].mxu1 }
 0x4aa   : > { %v6772_v22 = vld [vmem:[#allocation4 + $0x289] sm:$0xff]  ;;  %v6091_v60 = vadd.f32 %v10501_v2, %v5642_v3  ;;  %v5645_v61 = vadd.f32 %v10696_v53, %v5644_v20  ;;  %v5646_v42 = vpop.f32.mrb[159].mxu1 }
 0x4ab   : > { %v6876_v56 = vmax.f32 %v6668_v21, %v6772_v22  ;;  %v6669_v10 = vld [vmem:[#allocation4 + $0x290] sm:$0xff] }
 0x4ac   : > { %v6773_v7 = vld [vmem:[#allocation4 + $0x291] sm:$0xff]  ;;  %vm6253_vm3 = vcmp.ge.f32.partialorder %v6091_v60, 0.0  ;;  %v6357_v32 = vmul.f32 0.01, %v6091_v60  ;;  %v6094_v33 = vadd.f32 %v10512_v46, %v5645_v61 }
 0x4ad   : > { %6980 = vst.msk [vmem:[#allocation5 + $0x288] sm:$0xff] %vm6481_vm5, %v6876_v56  ;;  %v6877_v50 = vmax.f32 %v6669_v10, %v6773_v7 }
 0x4ae   : > { %v6461_v62 = vsel %vm6253_vm3, %v6091_v60, %v6357_v32  ;;  %vm6254_vm8 = vcmp.ge.f32.partialorder %v6094_v33, 0.0  ;;  %v6358_v40 = vmul.f32 0.01, %v6094_v33 }
 0x4af   : > { %6981 = vst.msk [vmem:[#allocation5 + $0x290] sm:$0xff] %vm6481_vm5, %v6877_v50  ;;  %6566 = vst.msk [vmem:[#allocation4 + $0x2a0] sm:$0xff] %vm6481_vm5, %v6461_v62 }
 0x4b0   : > { %v6462_v2 = vsel %vm6254_vm8, %v6094_v33, %v6358_v40 }
 0x4b1   : > { %6567 = vst.msk [vmem:[#allocation4 + $0x2a8] sm:$0xff] %vm6481_vm5, %v6462_v2 }
 0x4b4   : > { %v5649_v48 = vpop.f32.mrb[160].mxu1 }
 0x4b5   : > { %v5650_v6 = vadd.f32 %v10696_v53, %v5649_v48  ;;  %v5651_v55 = vpop.f32.mrb[161].mxu1 }
 0x4b6   : > { %v5652_v19 = vpop.f32.mrb[162].mxu1  ;;  %v6671_v51 = vld [vmem:[#allocation4 + $0x2a0] sm:$0xff]  ;;  %v7231_v33 = vld [vmem:[#allocation5 + $0x290] ss:$2 sm:$0xf] }
 0x4b7   : > { %v6099_v46 = vadd.f32 %v10496_v54, %v5650_v6  ;;  %v5653_v49 = vadd.f32 %v10696_v53, %v5652_v19  ;;  %v5654_v28 = vpop.f32.mrb[163].mxu1 }
 0x4b8   : > { %v6775_v18 = vld [vmem:[#allocation4 + $0x2a1] sm:$0xff] }
 0x4b9   : > { %v6879_v14 = vmax.f32 %v6671_v51, %v6775_v18  ;;  %vm6255_vm14 = vcmp.ge.f32.partialorder %v6099_v46, 0.0  ;;  %v6359_v26 = vmul.f32 0.01, %v6099_v46  ;;  %v6102_v25 = vadd.f32 %v10505_v5, %v5653_v49  ;;  %v6672_v63 = vld [vmem:[#allocation4 + $0x2a8] sm:$0xff] }
 0x4bb   : > { %6983 = vst.msk [vmem:[#allocation5 + $0x2a0] sm:$0xff] %vm6481_vm5, %v6879_v14  ;;  %v6463_v9 = vsel %vm6255_vm14, %v6099_v46, %v6359_v26  ;;  %vm6256_vm15 = vcmp.ge.f32.partialorder %v6102_v25, 0.0  ;;  %v6360_v0 = vmul.f32 0.01, %v6102_v25 }
 0x4bc   : > { %6568 = vst.msk [vmem:[#allocation4 + $0x2b0] sm:$0xff] %vm6481_vm5, %v6463_v9 }
 0x4bd   : > { %v6464_v34 = vsel %vm6256_vm15, %v6102_v25, %v6360_v0 }
 0x4be   : > { %6569 = vst.msk [vmem:[#allocation4 + $0x2b8] sm:$0xff] %vm6481_vm5, %v6464_v34  ;;  %v5657_v54 = vpop.f32.mrb[164].mxu1 }
 0x4bf   : > { %v5658_v30 = vadd.f32 %v10696_v53, %v5657_v54  ;;  %v5659_v35 = vpop.f32.mrb[165].mxu1 }
 0x4c0   : > { %v5660_v36 = vpop.f32.mrb[166].mxu1 }
 0x4c1   : > { %v6107_v17 = vadd.f32 %v10557_v45, %v5658_v30  ;;  %v5661_v16 = vadd.f32 %v10696_v53, %v5660_v36  ;;  %v5662_v5 = vpop.f32.mrb[167].mxu1 }
 0x4c3   : > { %v6776_v29 = vld [vmem:[#allocation4 + $0x2a9] sm:$0xff]  ;;  %vm6257_vm1 = vcmp.ge.f32.partialorder %v6107_v17, 0.0  ;;  %v6361_v52 = vmul.f32 0.01, %v6107_v17  ;;  %v6110_v39 = vadd.f32 %v10566_v47, %v5661_v16 }
 0x4c4   : > { %v6880_v57 = vmax.f32 %v6672_v63, %v6776_v29  ;;  %v6673_v13 = vld [vmem:[#allocation4 + $0x2b0] sm:$0xff] }
 0x4c5   : > { %v6777_v31 = vld [vmem:[#allocation4 + $0x2b1] sm:$0xff]  ;;  %v6465_v24 = vsel %vm6257_vm1, %v6107_v17, %v6361_v52  ;;  %vm6258_vm10 = vcmp.ge.f32.partialorder %v6110_v39, 0.0  ;;  %v6362_v20 = vmul.f32 0.01, %v6110_v39 }
 0x4c6   : > { %6984 = vst.msk [vmem:[#allocation5 + $0x2a8] sm:$0xff] %vm6481_vm5, %v6880_v57  ;;  %v6881_v3 = vmax.f32 %v6673_v13, %v6777_v31  ;;  %6570 = vst.msk [vmem:[#allocation4 + $0x2c0] sm:$0xff] %vm6481_vm5, %v6465_v24  ;;  %v7229_v47 = vld [vmem:[#allocation5 + $0x280] ss:$2 sm:$0xff] }
 0x4c7   : > { %v6466_v45 = vsel %vm6258_vm10, %v6110_v39, %v6362_v20 }
 0x4c8   : > { %6985 = vst.msk [vmem:[#allocation5 + $0x2b0] sm:$0xff] %vm6481_vm5, %v6881_v3  ;;  %6571 = vst.msk [vmem:[#allocation4 + $0x2c8] sm:$0xff] %vm6481_vm5, %v6466_v45 }
 0x4ca   : > { %v5665_v21 = vpop.f32.mrb[168].mxu1 }
 0x4cb   : > { %v5666_v22 = vadd.f32 %v10696_v53, %v5665_v21  ;;  %v5667_v60 = vpop.f32.mrb[169].mxu1 }
 0x4cc   : > { %v5668_v42 = vpop.f32.mrb[170].mxu1 }
 0x4cd   : > { %v7233_v61 = vld [vmem:[#allocation5 + $0x2a0] ss:$2 sm:$0xff]  ;;  %v6115_v10 = vadd.f32 %v10553_v11, %v5666_v22  ;;  %v5669_v7 = vadd.f32 %v10696_v53, %v5668_v42  ;;  %v5670_v32 = vpop.f32.mrb[171].mxu1  ;;  %v6675_v2 = vld [vmem:[#allocation4 + $0x2c0] sm:$0xff] }
 0x4ce   : > { %v7236_v56 = vmax.f32 %v7229_v47, %v7233_v61 }
 0x4cf   : > { %v7235_v50 = vld [vmem:[#allocation5 + $0x2b0] ss:$2 sm:$0xf]  ;;  %v6779_v48 = vld [vmem:[#allocation4 + $0x2c1] sm:$0xff]  ;;  %vm6259_vm11 = vcmp.ge.f32.partialorder %v6115_v10, 0.0  ;;  %v6118_v19 = vadd.f32 %v10561_v58, %v5669_v7 }
 0x4d0   : > { %v7594_v62 = vpack.c.bf16 %v7236_v56, %v7236_v56  ;;  %v7237_v40 = vmax.f32 %v7231_v33, %v7235_v50  ;;  %v6363_v6 = vmul.f32 0.01, %v6115_v10  ;;  %v6883_v55 = vmax.f32 %v6675_v2, %v6779_v48  ;;  %v6676_v26 = vld [vmem:[#allocation4 + $0x2c8] sm:$0xff] }
 0x4d1   : > { %vm6260_vm4 = vcmp.ge.f32.partialorder %v6118_v19, 0.0  ;;  %v6364_v11 = vmul.f32 0.01, %v6118_v19 }
 0x4d2   : > { %7246 = vst.msk [vmem:[%s9943_s8 + $0x3c] sm:$0xf] %vm7020_vm2, %v7594_v62  ;;  %v7595_v46 = vpack.c.bf16 %v7237_v40, %v7237_v40  ;;  %v6467_v49 = vsel %vm6259_vm11, %v6115_v10, %v6363_v6 }
 0x4d3   : > { %6987 = vst.msk [vmem:[#allocation5 + $0x2c0] sm:$0xff] %vm6481_vm5, %v6883_v55  ;;  %6572 = vst.msk [vmem:[#allocation4 + $0x2d0] sm:$0xff] %vm6481_vm5, %v6467_v49  ;;  %v6468_v28 = vsel %vm6260_vm4, %v6118_v19, %v6364_v11 }
 0x4d4   : > { %7247 = vst.msk [vmem:[%s9943_s8 + $0x40] sm:$0x3] %vm7022_vm7, %v7595_v46 }
 0x4d5   : > { %6573 = vst.msk [vmem:[#allocation4 + $0x2d8] sm:$0xff] %vm6481_vm5, %v6468_v28 }
 0x4d6   : > { %v5673_v51 = vpop.f32.mrb[172].mxu1 }
 0x4d7   : > { %v5674_v18 = vadd.f32 %v10696_v53, %v5673_v51  ;;  %v5675_v14 = vpop.f32.mrb[173].mxu1 }
 0x4d8   : > { %v5676_v58 = vpop.f32.mrb[174].mxu1 }
 0x4d9   : > { %v6123_v9 = vadd.f32 %v10604_v43, %v5674_v18  ;;  %v5677_v0 = vadd.f32 %v10696_v53, %v5676_v58  ;;  %v5678_v34 = vpop.f32.mrb[175].mxu1 }
 0x4da   : > { %v6780_v25 = vld [vmem:[#allocation4 + $0x2c9] sm:$0xff] }
 0x4db   : > { %v6884_v54 = vmax.f32 %v6676_v26, %v6780_v25  ;;  %vm6261_vm12 = vcmp.ge.f32.partialorder %v6123_v9, 0.0  ;;  %v6365_v30 = vmul.f32 0.01, %v6123_v9  ;;  %v6126_v35 = vadd.f32 %v10610_v8, %v5677_v0  ;;  %v6677_v36 = vld [vmem:[#allocation4 + $0x2d0] sm:$0xff] }
 0x4dc   : > { %v6781_v17 = vld [vmem:[#allocation4 + $0x2d1] sm:$0xff] }
 0x4dd   : > { %6988 = vst.msk [vmem:[#allocation5 + $0x2c8] sm:$0xff] %vm6481_vm5, %v6884_v54  ;;  %v6885_v16 = vmax.f32 %v6677_v36, %v6781_v17  ;;  %v6469_v5 = vsel %vm6261_vm12, %v6123_v9, %v6365_v30  ;;  %vm6262_vm7 = vcmp.ge.f32.partialorder %v6126_v35, 0.0  ;;  %v6366_v63 = vmul.f32 0.01, %v6126_v35 }
 0x4de   : > { %6574 = vst.msk [vmem:[#allocation4 + $0x2e0] sm:$0xff] %vm6481_vm5, %v6469_v5 }
 0x4df   : > { %6989 = vst.msk [vmem:[#allocation5 + $0x2d0] sm:$0xff] %vm6481_vm5, %v6885_v16  ;;  %v6470_v43 = vsel %vm6262_vm7, %v6126_v35, %v6366_v63 }
 0x4e0   : > { %6575 = vst.msk [vmem:[#allocation4 + $0x2e8] sm:$0xff] %vm6481_vm5, %v6470_v43 }
 0x4e2   : > { %v5681_v29 = vpop.f32.mrb[176].mxu1 }
 0x4e3   : > { %v5682_v57 = vadd.f32 %v10696_v53, %v5681_v29  ;;  %v5683_v52 = vpop.f32.mrb[177].mxu1 }
 0x4e4   : > { %v5684_v8 = vpop.f32.mrb[178].mxu1  ;;  %v7249_v49 = vld [vmem:[#allocation5 + $0x2c0] ss:$2 sm:$0xff] }
 0x4e5   : > { %v6131_v39 = vadd.f32 %v10602_v4, %v5682_v57  ;;  %v5685_v13 = vadd.f32 %v10696_v53, %v5684_v8  ;;  %v5686_v31 = vpop.f32.mrb[179].mxu1  ;;  %v6679_v3 = vld [vmem:[#allocation4 + $0x2e0] sm:$0xff]  ;;  %v10882_v53 = vld [vmem:[#allocation10] ss:$0 sm:$0xff] }
 0x4e7   : > { %v6783_v24 = vld [vmem:[#allocation4 + $0x2e1] sm:$0xff]  ;;  %vm6263_vm13 = vcmp.ge.f32.partialorder %v6131_v39, 0.0  ;;  %v6367_v20 = vmul.f32 0.01, %v6131_v39  ;;  %v6134_v45 = vadd.f32 %v10608_v27, %v5685_v13 }
 0x4e8   : > { %v6887_v21 = vmax.f32 %v6679_v3, %v6783_v24  ;;  %v6680_v10 = vld [vmem:[#allocation4 + $0x2e8] sm:$0xff] }
 0x4e9   : > { %v6471_v22 = vsel %vm6263_vm13, %v6131_v39, %v6367_v20  ;;  %vm6264_vm0 = vcmp.ge.f32.partialorder %v6134_v45, 0.0  ;;  %v6368_v60 = vmul.f32 0.01, %v6134_v45 }
 0x4ea   : > { %6991 = vst.msk [vmem:[#allocation5 + $0x2e0] sm:$0xff] %vm6481_vm5, %v6887_v21  ;;  %6576 = vst.msk [vmem:[#allocation4 + $0x2f0] sm:$0xff] %vm6481_vm5, %v6471_v22 }
 0x4eb   : > { %v6472_v47 = vsel %vm6264_vm0, %v6134_v45, %v6368_v60 }
 0x4ec   : > { %6577 = vst.msk [vmem:[#allocation4 + $0x2f8] sm:$0xff] %vm6481_vm5, %v6472_v47 }
 0x4ee   : > { %v5689_v4 = vpop.f32.mrb[180].mxu1 }
 0x4ef   : > { %v5690_v61 = vadd.f32 %v10882_v53, %v5689_v4  ;;  %v5691_v42 = vpop.f32.mrb[181].mxu1 }
 0x4f0   : > { %v5692_v56 = vpop.f32.mrb[182].mxu1 }
 0x4f1   : > { %v6784_v27 = vld [vmem:[#allocation4 + $0x2e9] sm:$0xff]  ;;  %v5693_v7 = vadd.f32 %v10882_v53, %v5692_v56  ;;  %v6139_v32 = vadd.f32 %v10787_v1, %v5690_v61  ;;  %v5694_v33 = vpop.f32.mrb[183].mxu1 }
 0x4f2   : > { %v6888_v50 = vmax.f32 %v6680_v10, %v6784_v27  ;;  %v6681_v62 = vld [vmem:[#allocation4 + $0x2f0] sm:$0xff] }
 0x4f3   : > { %v6785_v40 = vld [vmem:[#allocation4 + $0x2f1] sm:$0xff]  ;;  %vm6265_vm3 = vcmp.ge.f32.partialorder %v6139_v32, 0.0  ;;  %v6369_v2 = vmul.f32 0.01, %v6139_v32  ;;  %v6142_v48 = vadd.f32 %v10792_v59, %v5693_v7 }
 0x4f4   : > { %6992 = vst.msk [vmem:[#allocation5 + $0x2e8] sm:$0xff] %vm6481_vm5, %v6888_v50  ;;  %v6889_v6 = vmax.f32 %v6681_v62, %v6785_v40  ;;  %v7251_v59 = vld [vmem:[#allocation5 + $0x2d0] ss:$2 sm:$0xf] }
 0x4f5   : > { %v6473_v55 = vsel %vm6265_vm3, %v6139_v32, %v6369_v2  ;;  %vm6266_vm8 = vcmp.ge.f32.partialorder %v6142_v48, 0.0  ;;  %v6370_v19 = vmul.f32 0.01, %v6142_v48 }
 0x4f6   : > { %6993 = vst.msk [vmem:[#allocation5 + $0x2f0] sm:$0xff] %vm6481_vm5, %v6889_v6  ;;  %6578 = vst.msk [vmem:[#allocation4 + $0x300] sm:$0xff] %vm6481_vm5, %v6473_v55 }
 0x4f7   : > { %v6474_v46 = vsel %vm6266_vm8, %v6142_v48, %v6370_v19 }
 0x4f8   : > { %6579 = vst.msk [vmem:[#allocation4 + $0x308] sm:$0xff] %vm6481_vm5, %v6474_v46 }
 0x4fa   : > { %v5697_v1 = vpop.f32.mrb[184].mxu1 }
 0x4fb   : > { %v7253_v11 = vld [vmem:[#allocation5 + $0x2e0] ss:$2 sm:$0xff]  ;;  %v5698_v28 = vadd.f32 %v10882_v53, %v5697_v1  ;;  %v5699_v51 = vpop.f32.mrb[185].mxu1 }
 0x4fc   : > { %v7256_v18 = vmax.f32 %v7249_v49, %v7253_v11  ;;  %v5700_v14 = vpop.f32.mrb[186].mxu1 }
 0x4fd   : > { %v7255_v58 = vld [vmem:[#allocation5 + $0x2f0] ss:$2 sm:$0xf]  ;;  %v6147_v26 = vadd.f32 %v10784_v15, %v5698_v28  ;;  %v5701_v25 = vadd.f32 %v10882_v53, %v5700_v14  ;;  %v5702_v9 = vpop.f32.mrb[187].mxu1 }
 0x4fe   : > { %v7596_v0 = vpack.c.bf16 %v7256_v18, %v7256_v18  ;;  %v7257_v34 = vmax.f32 %v7251_v59, %v7255_v58 }
 0x4ff   : > { %vm6267_vm14 = vcmp.ge.f32.partialorder %v6147_v26, 0.0  ;;  %v6371_v54 = vmul.f32 0.01, %v6147_v26  ;;  %v6150_v30 = vadd.f32 %v10790_v23, %v5701_v25 }
 0x500   : > { %v7264_v35 = vrot.slane %v7596_v0, 6  ;;  %v7597_v36 = vpack.c.bf16 %v7257_v34, %v7257_v34 }
 0x501   : > { %v6475_v17 = vsel %vm6267_vm14, %v6147_v26, %v6371_v54  ;;  %vm6268_vm15 = vcmp.ge.f32.partialorder %v6150_v30, 0.0  ;;  %v6372_v16 = vmul.f32 0.01, %v6150_v30 }
 0x502   : > { %v7265_v5 = vrot.slane %v7264_v35, 4  ;;  %7270 = vst.msk [vmem:[%s9943_s8 + $0x40] sm:$0xc] %vm7049_vm6, %v7264_v35  ;;  %v7266_v63 = vrot.slane %v7597_v36, 6 }
 0x503   : > { %6580 = vst.msk [vmem:[#allocation4 + $0x310] sm:$0xff] %vm6481_vm5, %v6475_v17  ;;  %v6476_v15 = vsel %vm6268_vm15, %v6150_v30, %v6372_v16 }
 0x504   : > { %v7267_v43 = vsel %vm10097_vm9, %v7265_v5, %v7266_v63  ;;  %6581 = vst.msk [vmem:[#allocation4 + $0x318] sm:$0xff] %vm6481_vm5, %v6476_v15 }
 0x505   : > { %7271 = vst.msk [vmem:[%s9943_s8 + $0x44] sm:$0xf] %vm7020_vm2, %v7267_v43 }
 0x507   : > { %v5705_v23 = vpop.f32.mrb[188].mxu1 }
 0x508   : > { %v5706_v29 = vadd.f32 %v10882_v53, %v5705_v23  ;;  %v5707_v57 = vpop.f32.mrb[189].mxu1 }
 0x509   : > { %v5708_v52 = vpop.f32.mrb[190].mxu1 }
 0x50a   : > { %v5709_v8 = vadd.f32 %v10882_v53, %v5708_v52  ;;  %v6155_v39 = vadd.f32 %v10811_v41, %v5706_v29  ;;  %v5710_v13 = vpop.f32.mrb[191].mxu1 }
 0x50c   : > { %vm6269_vm6 = vcmp.ge.f32.partialorder %v6155_v39, 0.0  ;;  %v6373_v31 = vmul.f32 0.01, %v6155_v39  ;;  %v6158_v3 = vadd.f32 %v10817_v38, %v5709_v8 }
 0x50e   : > { %v6477_v44 = vsel %vm6269_vm6, %v6155_v39, %v6373_v31  ;;  %vm6270_vm9 = vcmp.ge.f32.partialorder %v6158_v3, 0.0  ;;  %v6374_v24 = vmul.f32 0.01, %v6158_v3 }
 0x50f   : > { %6582 = vst.msk [vmem:[#allocation4 + $0x320] sm:$0xff] %vm6481_vm5, %v6477_v44 }
 0x510   : > { %v6478_v20 = vsel %vm6270_vm9, %v6158_v3, %v6374_v24 }
 0x511   : > { %6583 = vst.msk [vmem:[#allocation4 + $0x328] sm:$0xff] %vm6481_vm5, %v6478_v20 }
 0x512   : > { %v5713_v45 = vpop.f32.mrb[192].mxu1 }
 0x513   : > { %v5714_v21 = vadd.f32 %v10882_v53, %v5713_v45  ;;  %v5715_v22 = vpop.f32.mrb[193].mxu1 }
 0x514   : > { %v5716_v60 = vpop.f32.mrb[194].mxu1 }
 0x515   : > { %v6163_v41 = vadd.f32 %v10808_v12, %v5714_v21  ;;  %v5717_v47 = vadd.f32 %v10882_v53, %v5716_v60  ;;  %v5718_v4 = vpop.f32.mrb[195].mxu1 }
 0x517   : > { %vm6271_vm2 = vcmp.ge.f32.partialorder %v6163_v41, 0.0  ;;  %v6375_v38 = vmul.f32 0.01, %v6163_v41  ;;  %v6166_v61 = vadd.f32 %v10813_v37, %v5717_v47 }
 0x519   : > { %v6479_v42 = vsel %vm6271_vm2, %v6163_v41, %v6375_v38  ;;  %vm6272_vm1 = vcmp.ge.f32.partialorder %v6166_v61, 0.0  ;;  %v6376_v56 = vmul.f32 0.01, %v6166_v61 }
 0x51a   : > { %6584 = vst.msk [vmem:[#allocation4 + $0x330] sm:$0xff] %vm6481_vm5, %v6479_v42 }
 0x51b   : > { %v6480_v10 = vsel %vm6272_vm1, %v6166_v61, %v6376_v56 }
 0x51c   : > { %6585 = vst.msk [vmem:[#allocation4 + $0x338] sm:$0xff] %vm6481_vm5, %v6480_v10 }
 0x51d PF: > { %s17_s18 = sadd.s32 1, %s8177_s18  }
 0x51e   : > { %p14_p10 = scmp.ge.s32.totalorder %s17_s18, 4  }
 0x520   :  { %16 = sbr.rel (!%p14_p10) target bundleno = 2 (0x2), region = 130 }
 0x527   :  { %7293 = vsyncpa [#allocation7], 1 }
 0x528   :  { %7295 = vsyncpa [#allocation7 + $0x1], 1 }
 0x529   :  { %7296 = vsyncpa [#allocation9], 1 }

</bundles_post_ra>
